<compile_context>
chip_gen: v7x
topology: tpu7x:2x2x1
jax: 0.10.0
libtpu: 0.0.40
codegen_flags: <defaults>
</compile_context>

<pallas_src>
import jax
import jax.numpy as jnp
from jax.experimental import pallas as pl
from jax.experimental.pallas import tpu as pltpu

LANE = 128
SUB = 16  # bf16-friendly row padding -> full (16,128) sublane tiles


def _rup(n, m):
    return ((n + m - 1) // m) * m


def _fullspec(shape):
    # Single block covering the full array (block dims == array dims, so the
    # (8,128) divisibility rule is satisfied even for odd sizes like (1, n_out)).
    return pl.BlockSpec(shape, lambda i: (0,) * len(shape))


# ----------------------------------------------------------------------------
# Fused Pallas kernel: mol GCN branch -> pro GCN branch -> combined head
# ----------------------------------------------------------------------------
def _gnn_kernel(
        # mol graph inputs
        adj_m_ref, x_m_ref, bat_m_ref,
        # protein graph inputs
        adj_p_ref, x_p_ref, bat_p_ref,
        # mol branch weights
        mw1, mb1, mw2, mb2, mw3, mb3, mwg1, mbg1, mwg2, mbg2,
        # protein branch weights
        pw1, pb1, pw2, pb2, pw3, pb3, pwg1, pbg1, pwg2, pbg2,
        # head weights
        hw1a, hw1b, hb1, hw2, hb2, hwo, hbo,
        # output
        o_ref):
    f32 = jnp.float32
    bf16 = jnp.bfloat16
    b_pad = o_ref.shape[0]

    def gcn_branch(adj_ref, x_ref, bat_ref,
                   w1, b1, w2, b2, w3, b3, wg1, bg1, wg2, bg2):
        adj = adj_ref[...]                      # bf16 binary (A + I); padded rows/cols are zero
        n_pad = adj.shape[0]
        # Symmetric GCN normalization folded in-kernel (VPU/EUP work is free):
        #   D^-1/2 (A+I) D^-1/2 X  ==  dinv * ((A+I) @ (dinv * X))
        deg = jnp.sum(adj.astype(f32), axis=1, keepdims=True)     # (N, 1)
        dinv = jnp.where(deg > 0.0, jax.lax.rsqrt(deg), 0.0)      # (N, 1) f32

        def gcn(x_bf, w_ref, b_ref):
            xs = (dinv * x_bf.astype(f32)).astype(bf16)
            agg = dinv * jnp.dot(adj, xs, preferred_element_type=f32)
            h = jnp.dot(agg.astype(bf16), w_ref[...],
                        preferred_element_type=f32)
            return jnp.maximum(h + b_ref[...], 0.0).astype(bf16)

        x = gcn(x_ref[...], w1, b1)
        x = gcn(x, w2, b2)
        x = gcn(x, w3, b3)

        # Global mean pool built in-kernel from the batch-assignment vector.
        bat = bat_ref[...]                                          # (1, N_pad) int32, -1 = padding
        gids = jax.lax.broadcasted_iota(jnp.int32, (b_pad, n_pad), 0)
        onehot = (bat == gids).astype(f32)                          # (B_pad, N_pad)
        counts = jnp.maximum(jnp.sum(onehot, axis=1, keepdims=True), 1.0)
        pool = (onehot / counts).astype(bf16)
        pooled = jnp.dot(pool, x, preferred_element_type=f32)       # (B_pad, F3)

        # fc_g1 + ReLU, fc_g2 (dropout = identity at inference)
        h = jnp.dot(pooled.astype(bf16), wg1[...],
                    preferred_element_type=f32) + bg1[...]
        h = jnp.maximum(h, 0.0)
        emb = jnp.dot(h.astype(bf16), wg2[...],
                      preferred_element_type=f32) + bg2[...]
        return emb                                                  # (B_pad, 128) f32

    # NOTE: padded graph rows (>= num_graphs) carry relu(bias) values through
    # the FC layers; they never contaminate real rows and are sliced off by the
    # wrapper ([:num_graphs]).  Keep that slice if refactoring.
    xm = gcn_branch(adj_m_ref, x_m_ref, bat_m_ref,
                    mw1, mb1, mw2, mb2, mw3, mb3, mwg1, mbg1, mwg2, mbg2)
    xp = gcn_branch(adj_p_ref, x_p_ref, bat_p_ref,
                    pw1, pb1, pw2, pb2, pw3, pb3, pwg1, pbg1, pwg2, pbg2)

    # Concat-free head: fc1(concat(xm, xp)) == xm @ W1a + xp @ W1b + b1
    h = (jnp.dot(xm.astype(bf16), hw1a[...], preferred_element_type=f32)
         + jnp.dot(xp.astype(bf16), hw1b[...], preferred_element_type=f32)
         + hb1[...])
    h = jnp.maximum(h, 0.0)
    h = jnp.dot(h.astype(bf16), hw2[...], preferred_element_type=f32) + hb2[...]
    h = jnp.maximum(h, 0.0)

    # Final 512 -> n_output projection on the VPU (mul + lane reduce) using the
    # unpadded (n_out, 512) weight -- avoids 127 dead MXU weight columns.
    wo = hwo[...]                               # (n_out, 512) f32
    bo = hbo[...]                               # (1, n_out) f32
    n_out = o_ref.shape[1]
    cols = [jnp.sum(h * wo[j:j + 1, :], axis=1, keepdims=True)
            for j in range(n_out)]
    o = cols[0] if n_out == 1 else jnp.concatenate(cols, axis=1)
    o_ref[...] = (o + bo).astype(o_ref.dtype)


def gnn_fused_call(pp, adj_m, x_m, bat_m, adj_p, x_p, bat_p, b_pad, n_output):
    args = (adj_m, x_m, bat_m, adj_p, x_p, bat_p,
            pp["mol_conv1_w"], pp["mol_conv1_b"],
            pp["mol_conv2_w"], pp["mol_conv2_b"],
            pp["mol_conv3_w"], pp["mol_conv3_b"],
            pp["mol_fc_g1_w"], pp["mol_fc_g1_b"],
            pp["mol_fc_g2_w"], pp["mol_fc_g2_b"],
            pp["pro_conv1_w"], pp["pro_conv1_b"],
            pp["pro_conv2_w"], pp["pro_conv2_b"],
            pp["pro_conv3_w"], pp["pro_conv3_b"],
            pp["pro_fc_g1_w"], pp["pro_fc_g1_b"],
            pp["pro_fc_g2_w"], pp["pro_fc_g2_b"],
            pp["fc1_wa"], pp["fc1_wb"], pp["fc1_b"],
            pp["fc2_w"], pp["fc2_b"],
            pp["out_wt"], pp["out_b"])
    return pl.pallas_call(
        _gnn_kernel,
        out_shape=jax.ShapeDtypeStruct((b_pad, n_output), jnp.float32),
        grid=(1,),
        in_specs=[_fullspec(a.shape) for a in args],
        out_specs=_fullspec((b_pad, n_output)),
        compiler_params=pltpu.CompilerParams(
            dimension_semantics=("arbitrary",),
            vmem_limit_bytes=32 * 1024 * 1024),
    )(*args)


# ----------------------------------------------------------------------------
# Minimal graph glue (plain JAX): binary adjacency scatter, padding, bf16 cast.
# Normalization and pooling weights are computed inside the kernel.
# ----------------------------------------------------------------------------
def binary_adj_with_self_loops(edge_index, num_nodes, num_nodes_pad):
    src, dst = edge_index[0], edge_index[1]
    A = jnp.zeros((num_nodes, num_nodes), jnp.float32)
    A = A.at[dst, src].set(1.0)                          # message src -> dst
    A = jnp.maximum(A, jnp.eye(num_nodes, dtype=jnp.float32))  # add self-loops
    pad = num_nodes_pad - num_nodes
    return jnp.pad(A, ((0, pad), (0, pad))).astype(jnp.bfloat16)


def pad_nodes(x, n_pad, f_pad):
    n, f = x.shape
    return jnp.pad(x, ((0, n_pad - n), (0, f_pad - f))).astype(jnp.bfloat16)


def pad_batch_vec(batch, n_pad):
    b = jnp.pad(batch.astype(jnp.int32), (0, n_pad - batch.shape[0]),
                constant_values=-1)                      # -1 = padded node
    return b.reshape(1, n_pad)


def batched_ring_edges(nodes_per_graph, num_graphs):
    """Disjoint per-graph undirected rings (PyG-style disjoint-union batch)."""
    src, dst = [], []
    for g in range(num_graphs):
        base = g * nodes_per_graph
        for i in range(nodes_per_graph):
            j = (i + 1) % nodes_per_graph
            src += [base + i, base + j]
            dst += [base + j, base + i]
    return jnp.array([src, dst], dtype=jnp.int32)


# ----------------------------------------------------------------------------
# Parameters: true-shape init, then zero-pad feature dims to 128-lane multiples
# ----------------------------------------------------------------------------
def glorot(key, shape):
    fan_in, fan_out = shape
    limit = jnp.sqrt(6.0 / (fan_in + fan_out))
    return jax.random.uniform(key, shape, jnp.float32, -limit, limit)


def build_params(key, num_features_pro=54, num_features_mol=78,
                 output_dim=128, n_output=1):
    keys = jax.random.split(key, 32)
    k = iter(keys)
    p = {}

    def lin(name, fin, fout):
        p[name + "_w"] = glorot(next(k), (fin, fout))
        p[name + "_b"] = jax.random.uniform(
            next(k), (fout,), jnp.float32, -0.01, 0.01)

    lin("mol_conv1", num_features_mol, num_features_mol)
    lin("mol_conv2", num_features_mol, num_features_mol * 2)
    lin("mol_conv3", num_features_mol * 2, num_features_mol * 4)
    lin("mol_fc_g1", num_features_mol * 4, 1024)
    lin("mol_fc_g2", 1024, output_dim)
    lin("pro_conv1", num_features_pro, num_features_pro)
    lin("pro_conv2", num_features_pro, num_features_pro * 2)
    lin("pro_conv3", num_features_pro * 2, num_features_pro * 4)
    lin("pro_fc_g1", num_features_pro * 4, 1024)
    lin("pro_fc_g2", 1024, output_dim)
    lin("fc1", 2 * output_dim, 1024)
    lin("fc2", 1024, 512)
    lin("out", 512, n_output)
    return p


def prepare_params(p, output_dim=128):
    """Zero-pad feature dims to 128 multiples, split fc1 (concat-free head),
    store MXU weights in bf16, biases as (1, F) f32; final projection kept
    unpadded/transposed for the in-kernel VPU reduction."""
    pp = {}

    def wlin(name):
        w = p[name + "_w"]
        fin_p = _rup(w.shape[0], LANE)
        fout_p = _rup(w.shape[1], LANE)
        pp[name + "_w"] = jnp.pad(
            w, ((0, fin_p - w.shape[0]), (0, fout_p - w.shape[1]))
        ).astype(jnp.bfloat16)
        b = p[name + "_b"]
        pp[name + "_b"] = jnp.pad(b, (0, fout_p - b.shape[0])).reshape(
            1, fout_p).astype(jnp.float32)

    for name in ("mol_conv1", "mol_conv2", "mol_conv3", "mol_fc_g1", "mol_fc_g2",
                 "pro_conv1", "pro_conv2", "pro_conv3", "pro_fc_g1", "pro_fc_g2",
                 "fc2"):
        wlin(name)

    # Split fc1 rows: top half multiplies the mol embedding, bottom half the
    # protein embedding (exactly equivalent to concat + fc1).
    w1 = p["fc1_w"]                                      # (2*output_dim, 1024)
    pp["fc1_wa"] = w1[:output_dim].astype(jnp.bfloat16)
    pp["fc1_wb"] = w1[output_dim:].astype(jnp.bfloat16)
    pp["fc1_b"] = p["fc1_b"].reshape(1, -1).astype(jnp.float32)

    # Final projection: transposed, unpadded, f32 (used on the VPU in-kernel).
    pp["out_wt"] = p["out_w"].T.astype(jnp.float32)      # (n_out, 512)
    pp["out_b"] = p["out_b"].reshape(1, -1).astype(jnp.float32)   # (1, n_out)
    return pp


# ----------------------------------------------------------------------------
# Forward pass
# ----------------------------------------------------------------------------
def gnn_net_forward(pp, mol_x, mol_edge_index, mol_batch,
                    pro_x, pro_edge_index, pro_batch, num_graphs, n_output=1):
    # TODO(synk): nn.Dropout is a no-op at inference; training-mode dropout
    # (random masking) is intentionally not implemented.
    b_pad = _rup(num_graphs, SUB)
    n_mol, n_pro = mol_x.shape[0], pro_x.shape[0]
    nm_pad, np_pad = _rup(n_mol, SUB), _rup(n_pro, SUB)

    adj_m = binary_adj_with_self_loops(mol_edge_index, n_mol, nm_pad)
    adj_p = binary_adj_with_self_loops(pro_edge_index, n_pro, np_pad)
    x_m = pad_nodes(mol_x, nm_pad, pp["mol_conv1_w"].shape[0])
    x_p = pad_nodes(pro_x, np_pad, pp["pro_conv1_w"].shape[0])
    bat_m = pad_batch_vec(mol_batch, nm_pad)
    bat_p = pad_batch_vec(pro_batch, np_pad)

    out_pad = gnn_fused_call(pp, adj_m, x_m, bat_m, adj_p, x_p, bat_p,
                             b_pad, n_output)            # [B_pad, n_output]
    return out_pad[:num_graphs]


# ----------------------------------------------------------------------------
# Main
# ----------------------------------------------------------------------------
if __name__ == "__main__":
    key = jax.random.PRNGKey(0)
    k_param, k_mol, k_pro = jax.random.split(key, 3)

    NUM_FEATURES_MOL = 78
    NUM_FEATURES_PRO = 54
    NUM_GRAPHS = 2            # batch of 2 (mol, protein) pairs
    N_MOL_PER_GRAPH = 10
    N_PRO_PER_GRAPH = 12
    N_MOL = NUM_GRAPHS * N_MOL_PER_GRAPH
    N_PRO = NUM_GRAPHS * N_PRO_PER_GRAPH

    params = build_params(k_param)
    pp = prepare_params(params)

    mol_x = jax.random.normal(k_mol, (N_MOL, NUM_FEATURES_MOL), jnp.float32)
    pro_x = jax.random.normal(k_pro, (N_PRO, NUM_FEATURES_PRO), jnp.float32)

    mol_edge_index = batched_ring_edges(N_MOL_PER_GRAPH, NUM_GRAPHS)
    pro_edge_index = batched_ring_edges(N_PRO_PER_GRAPH, NUM_GRAPHS)

    mol_batch = jnp.repeat(jnp.arange(NUM_GRAPHS, dtype=jnp.int32), N_MOL_PER_GRAPH)
    pro_batch = jnp.repeat(jnp.arange(NUM_GRAPHS, dtype=jnp.int32), N_PRO_PER_GRAPH)

    fwd = jax.jit(gnn_net_forward, static_argnames=("num_graphs", "n_output"))
    out = fwd(pp, mol_x, mol_edge_index, mol_batch,
              pro_x, pro_edge_index, pro_batch, num_graphs=NUM_GRAPHS)
    out = jax.block_until_ready(out)
    assert out.shape == (NUM_GRAPHS, 1), out.shape
    assert bool(jnp.all(jnp.isfinite(out)))
    print("KERNEL_OK")
</pallas_src>

<mosaic_0001>
module attributes {stable_mosaic.version = 11 : i64} {
  func.func @_gnn_kernel(%arg0: i32, %arg1: memref<32x32xbf16, #tpu.memory_space<vmem>>, %arg2: memref<32x128xbf16, #tpu.memory_space<vmem>>, %arg3: memref<1x32xi32, #tpu.memory_space<vmem>>, %arg4: memref<32x32xbf16, #tpu.memory_space<vmem>>, %arg5: memref<32x128xbf16, #tpu.memory_space<vmem>>, %arg6: memref<1x32xi32, #tpu.memory_space<vmem>>, %arg7: memref<128x128xbf16, #tpu.memory_space<vmem>>, %arg8: memref<1x128xf32, #tpu.memory_space<vmem>>, %arg9: memref<128x256xbf16, #tpu.memory_space<vmem>>, %arg10: memref<1x256xf32, #tpu.memory_space<vmem>>, %arg11: memref<256x384xbf16, #tpu.memory_space<vmem>>, %arg12: memref<1x384xf32, #tpu.memory_space<vmem>>, %arg13: memref<384x1024xbf16, #tpu.memory_space<vmem>>, %arg14: memref<1x1024xf32, #tpu.memory_space<vmem>>, %arg15: memref<1024x128xbf16, #tpu.memory_space<vmem>>, %arg16: memref<1x128xf32, #tpu.memory_space<vmem>>, %arg17: memref<128x128xbf16, #tpu.memory_space<vmem>>, %arg18: memref<1x128xf32, #tpu.memory_space<vmem>>, %arg19: memref<128x128xbf16, #tpu.memory_space<vmem>>, %arg20: memref<1x128xf32, #tpu.memory_space<vmem>>, %arg21: memref<128x256xbf16, #tpu.memory_space<vmem>>, %arg22: memref<1x256xf32, #tpu.memory_space<vmem>>, %arg23: memref<256x1024xbf16, #tpu.memory_space<vmem>>, %arg24: memref<1x1024xf32, #tpu.memory_space<vmem>>, %arg25: memref<1024x128xbf16, #tpu.memory_space<vmem>>, %arg26: memref<1x128xf32, #tpu.memory_space<vmem>>, %arg27: memref<128x1024xbf16, #tpu.memory_space<vmem>>, %arg28: memref<128x1024xbf16, #tpu.memory_space<vmem>>, %arg29: memref<1x1024xf32, #tpu.memory_space<vmem>>, %arg30: memref<1024x512xbf16, #tpu.memory_space<vmem>>, %arg31: memref<1x512xf32, #tpu.memory_space<vmem>>, %arg32: memref<1x512xf32, #tpu.memory_space<vmem>>, %arg33: memref<1x1xf32, #tpu.memory_space<vmem>>, %arg34: memref<16x1xf32, #tpu.memory_space<vmem>>) attributes {dimension_semantics = [#tpu.dimension_semantics<arbitrary>], iteration_bounds = array<i64: 1>, scalar_prefetch = 0 : i64, scratch_operands = 0 : i64, tpu.core_type = #tpu.core_type<tc>, window_params = [{pipeline_mode = #tpu.pipeline_mode<synchronous>, transform_indices = @transform_0, window_bounds = array<i64: 32, 32>}, {pipeline_mode = #tpu.pipeline_mode<synchronous>, transform_indices = @transform_1, window_bounds = array<i64: 32, 128>}, {pipeline_mode = #tpu.pipeline_mode<synchronous>, transform_indices = @transform_2, window_bounds = array<i64: 1, 32>}, {pipeline_mode = #tpu.pipeline_mode<synchronous>, transform_indices = @transform_3, window_bounds = array<i64: 32, 32>}, {pipeline_mode = #tpu.pipeline_mode<synchronous>, transform_indices = @transform_4, window_bounds = array<i64: 32, 128>}, {pipeline_mode = #tpu.pipeline_mode<synchronous>, transform_indices = @transform_5, window_bounds = array<i64: 1, 32>}, {pipeline_mode = #tpu.pipeline_mode<synchronous>, transform_indices = @transform_6, window_bounds = array<i64: 128, 128>}, {pipeline_mode = #tpu.pipeline_mode<synchronous>, transform_indices = @transform_7, window_bounds = array<i64: 1, 128>}, {pipeline_mode = #tpu.pipeline_mode<synchronous>, transform_indices = @transform_8, window_bounds = array<i64: 128, 256>}, {pipeline_mode = #tpu.pipeline_mode<synchronous>, transform_indices = @transform_9, window_bounds = array<i64: 1, 256>}, {pipeline_mode = #tpu.pipeline_mode<synchronous>, transform_indices = @transform_10, window_bounds = array<i64: 256, 384>}, {pipeline_mode = #tpu.pipeline_mode<synchronous>, transform_indices = @transform_11, window_bounds = array<i64: 1, 384>}, {pipeline_mode = #tpu.pipeline_mode<synchronous>, transform_indices = @transform_12, window_bounds = array<i64: 384, 1024>}, {pipeline_mode = #tpu.pipeline_mode<synchronous>, transform_indices = @transform_13, window_bounds = array<i64: 1, 1024>}, {pipeline_mode = #tpu.pipeline_mode<synchronous>, transform_indices = @transform_14, window_bounds = array<i64: 1024, 128>}, {pipeline_mode = #tpu.pipeline_mode<synchronous>, transform_indices = @transform_15, window_bounds = array<i64: 1, 128>}, {pipeline_mode = #tpu.pipeline_mode<synchronous>, transform_indices = @transform_16, window_bounds = array<i64: 128, 128>}, {pipeline_mode = #tpu.pipeline_mode<synchronous>, transform_indices = @transform_17, window_bounds = array<i64: 1, 128>}, {pipeline_mode = #tpu.pipeline_mode<synchronous>, transform_indices = @transform_18, window_bounds = array<i64: 128, 128>}, {pipeline_mode = #tpu.pipeline_mode<synchronous>, transform_indices = @transform_19, window_bounds = array<i64: 1, 128>}, {pipeline_mode = #tpu.pipeline_mode<synchronous>, transform_indices = @transform_20, window_bounds = array<i64: 128, 256>}, {pipeline_mode = #tpu.pipeline_mode<synchronous>, transform_indices = @transform_21, window_bounds = array<i64: 1, 256>}, {pipeline_mode = #tpu.pipeline_mode<synchronous>, transform_indices = @transform_22, window_bounds = array<i64: 256, 1024>}, {pipeline_mode = #tpu.pipeline_mode<synchronous>, transform_indices = @transform_23, window_bounds = array<i64: 1, 1024>}, {pipeline_mode = #tpu.pipeline_mode<synchronous>, transform_indices = @transform_24, window_bounds = array<i64: 1024, 128>}, {pipeline_mode = #tpu.pipeline_mode<synchronous>, transform_indices = @transform_25, window_bounds = array<i64: 1, 128>}, {pipeline_mode = #tpu.pipeline_mode<synchronous>, transform_indices = @transform_26, window_bounds = array<i64: 128, 1024>}, {pipeline_mode = #tpu.pipeline_mode<synchronous>, transform_indices = @transform_27, window_bounds = array<i64: 128, 1024>}, {pipeline_mode = #tpu.pipeline_mode<synchronous>, transform_indices = @transform_28, window_bounds = array<i64: 1, 1024>}, {pipeline_mode = #tpu.pipeline_mode<synchronous>, transform_indices = @transform_29, window_bounds = array<i64: 1024, 512>}, {pipeline_mode = #tpu.pipeline_mode<synchronous>, transform_indices = @transform_30, window_bounds = array<i64: 1, 512>}, {pipeline_mode = #tpu.pipeline_mode<synchronous>, transform_indices = @transform_31, window_bounds = array<i64: 1, 512>}, {pipeline_mode = #tpu.pipeline_mode<synchronous>, transform_indices = @transform_32, window_bounds = array<i64: 1, 1>}, {pipeline_mode = #tpu.pipeline_mode<synchronous>, transform_indices = @transform_33, window_bounds = array<i64: 16, 1>}]} {
    %c0 = arith.constant 0 : index
    %c0_0 = arith.constant 0 : index
    %0 = vector.load %arg1[%c0, %c0_0] : memref<32x32xbf16, #tpu.memory_space<vmem>>, vector<32x32xbf16>
    %1 = arith.extf %0 : vector<32x32xbf16> to vector<32x32xf32>
    %cst = arith.constant dense<0.000000e+00> : vector<32xf32>
    %2 = vector.multi_reduction <add>, %1, %cst [1] : vector<32x32xf32> to vector<32xf32>
    %3 = vector.shape_cast %2 : vector<32xf32> to vector<32x1xf32>
    %cst_1 = arith.constant 0.000000e+00 : f32
    %4 = vector.broadcast %cst_1 : f32 to vector<32x1xf32>
    %5 = arith.cmpf ogt, %3, %4 : vector<32x1xf32>
    %6 = math.rsqrt %3 : vector<32x1xf32>
    %cst_2 = arith.constant 0.000000e+00 : f32
    %7 = vector.broadcast %cst_2 : f32 to vector<32x1xf32>
    %8 = arith.select %5, %6, %7 : vector<32x1xi1>, vector<32x1xf32>
    %c0_3 = arith.constant 0 : index
    %c0_4 = arith.constant 0 : index
    %9 = vector.load %arg2[%c0_3, %c0_4] : memref<32x128xbf16, #tpu.memory_space<vmem>>, vector<32x128xbf16>
    %10 = arith.extf %9 : vector<32x128xbf16> to vector<32x128xf32>
    %11 = vector.broadcast %8 : vector<32x1xf32> to vector<32x128xf32>
    %12 = arith.mulf %11, %10 : vector<32x128xf32>
    %13 = arith.truncf %12 : vector<32x128xf32> to vector<32x128xbf16>
    %cst_5 = arith.constant dense<0.000000e+00> : vector<32x128xf32>
    %14 = tpu.matmul %0, %13, %cst_5 {dimension_numbers = #tpu.dot_dimension_numbers<[1], [0], [0], [1], [0, 0, 1, 1], [], []>} : vector<32x32xbf16>, vector<32x128xbf16>, vector<32x128xf32> -> vector<32x128xf32>
    %15 = vector.broadcast %8 : vector<32x1xf32> to vector<32x128xf32>
    %16 = arith.mulf %15, %14 : vector<32x128xf32>
    %17 = arith.truncf %16 : vector<32x128xf32> to vector<32x128xbf16>
    %c0_6 = arith.constant 0 : index
    %c0_7 = arith.constant 0 : index
    %18 = vector.load %arg7[%c0_6, %c0_7] : memref<128x128xbf16, #tpu.memory_space<vmem>>, vector<128x128xbf16>
    %cst_8 = arith.constant dense<0.000000e+00> : vector<32x128xf32>
    %19 = tpu.matmul %17, %18, %cst_8 {dimension_numbers = #tpu.dot_dimension_numbers<[1], [0], [0], [1], [0, 0, 1, 1], [], []>} : vector<32x128xbf16>, vector<128x128xbf16>, vector<32x128xf32> -> vector<32x128xf32>
    %c0_9 = arith.constant 0 : index
    %c0_10 = arith.constant 0 : index
    %20 = vector.load %arg8[%c0_9, %c0_10] : memref<1x128xf32, #tpu.memory_space<vmem>>, vector<1x128xf32>
    %21 = vector.broadcast %20 : vector<1x128xf32> to vector<32x128xf32>
    %22 = arith.addf %19, %21 : vector<32x128xf32>
    %cst_11 = arith.constant 0.000000e+00 : f32
    %23 = vector.broadcast %cst_11 : f32 to vector<32x128xf32>
    %24 = arith.maximumf %22, %23 : vector<32x128xf32>
    %25 = arith.truncf %24 : vector<32x128xf32> to vector<32x128xbf16>
    %26 = arith.extf %25 : vector<32x128xbf16> to vector<32x128xf32>
    %27 = vector.broadcast %8 : vector<32x1xf32> to vector<32x128xf32>
    %28 = arith.mulf %27, %26 : vector<32x128xf32>
    %29 = arith.truncf %28 : vector<32x128xf32> to vector<32x128xbf16>
    %cst_12 = arith.constant dense<0.000000e+00> : vector<32x128xf32>
    %30 = tpu.matmul %0, %29, %cst_12 {dimension_numbers = #tpu.dot_dimension_numbers<[1], [0], [0], [1], [0, 0, 1, 1], [], []>} : vector<32x32xbf16>, vector<32x128xbf16>, vector<32x128xf32> -> vector<32x128xf32>
    %31 = vector.broadcast %8 : vector<32x1xf32> to vector<32x128xf32>
    %32 = arith.mulf %31, %30 : vector<32x128xf32>
    %33 = arith.truncf %32 : vector<32x128xf32> to vector<32x128xbf16>
    %c0_13 = arith.constant 0 : index
    %c0_14 = arith.constant 0 : index
    %34 = vector.load %arg9[%c0_13, %c0_14] : memref<128x256xbf16, #tpu.memory_space<vmem>>, vector<128x256xbf16>
    %cst_15 = arith.constant dense<0.000000e+00> : vector<32x256xf32>
    %35 = tpu.matmul %33, %34, %cst_15 {dimension_numbers = #tpu.dot_dimension_numbers<[1], [0], [0], [1], [0, 0, 1, 1], [], []>} : vector<32x128xbf16>, vector<128x256xbf16>, vector<32x256xf32> -> vector<32x256xf32>
    %c0_16 = arith.constant 0 : index
    %c0_17 = arith.constant 0 : index
    %36 = vector.load %arg10[%c0_16, %c0_17] : memref<1x256xf32, #tpu.memory_space<vmem>>, vector<1x256xf32>
    %37 = vector.broadcast %36 : vector<1x256xf32> to vector<32x256xf32>
    %38 = arith.addf %35, %37 : vector<32x256xf32>
    %cst_18 = arith.constant 0.000000e+00 : f32
    %39 = vector.broadcast %cst_18 : f32 to vector<32x256xf32>
    %40 = arith.maximumf %38, %39 : vector<32x256xf32>
    %41 = arith.truncf %40 : vector<32x256xf32> to vector<32x256xbf16>
    %42 = arith.extf %41 : vector<32x256xbf16> to vector<32x256xf32>
    %43 = vector.broadcast %8 : vector<32x1xf32> to vector<32x256xf32>
    %44 = arith.mulf %43, %42 : vector<32x256xf32>
    %45 = arith.truncf %44 : vector<32x256xf32> to vector<32x256xbf16>
    %cst_19 = arith.constant dense<0.000000e+00> : vector<32x256xf32>
    %46 = tpu.matmul %0, %45, %cst_19 {dimension_numbers = #tpu.dot_dimension_numbers<[1], [0], [0], [1], [0, 0, 1, 1], [], []>} : vector<32x32xbf16>, vector<32x256xbf16>, vector<32x256xf32> -> vector<32x256xf32>
    %47 = vector.broadcast %8 : vector<32x1xf32> to vector<32x256xf32>
    %48 = arith.mulf %47, %46 : vector<32x256xf32>
    %49 = arith.truncf %48 : vector<32x256xf32> to vector<32x256xbf16>
    %c0_20 = arith.constant 0 : index
    %c0_21 = arith.constant 0 : index
    %50 = vector.load %arg11[%c0_20, %c0_21] : memref<256x384xbf16, #tpu.memory_space<vmem>>, vector<256x384xbf16>
    %cst_22 = arith.constant dense<0.000000e+00> : vector<32x384xf32>
    %51 = tpu.matmul %49, %50, %cst_22 {dimension_numbers = #tpu.dot_dimension_numbers<[1], [0], [0], [1], [0, 0, 1, 1], [], []>} : vector<32x256xbf16>, vector<256x384xbf16>, vector<32x384xf32> -> vector<32x384xf32>
    %c0_23 = arith.constant 0 : index
    %c0_24 = arith.constant 0 : index
    %52 = vector.load %arg12[%c0_23, %c0_24] : memref<1x384xf32, #tpu.memory_space<vmem>>, vector<1x384xf32>
    %53 = vector.broadcast %52 : vector<1x384xf32> to vector<32x384xf32>
    %54 = arith.addf %51, %53 : vector<32x384xf32>
    %cst_25 = arith.constant 0.000000e+00 : f32
    %55 = vector.broadcast %cst_25 : f32 to vector<32x384xf32>
    %56 = arith.maximumf %54, %55 : vector<32x384xf32>
    %57 = arith.truncf %56 : vector<32x384xf32> to vector<32x384xbf16>
    %c0_26 = arith.constant 0 : index
    %c0_27 = arith.constant 0 : index
    %58 = vector.load %arg3[%c0_26, %c0_27] : memref<1x32xi32, #tpu.memory_space<vmem>>, vector<1x32xi32>
    %59 = tpu.iota {dimensions = array<i32: 0>} : vector<16x32xi32>
    %60 = vector.broadcast %58 : vector<1x32xi32> to vector<16x32xi32>
    %61 = arith.cmpi eq, %60, %59 : vector<16x32xi32>
    %62 = arith.extui %61 : vector<16x32xi1> to vector<16x32xi32>
    %63 = arith.sitofp %62 : vector<16x32xi32> to vector<16x32xf32>
    %cst_28 = arith.constant dense<0.000000e+00> : vector<16xf32>
    %64 = vector.multi_reduction <add>, %63, %cst_28 [1] : vector<16x32xf32> to vector<16xf32>
    %65 = vector.shape_cast %64 : vector<16xf32> to vector<16x1xf32>
    %cst_29 = arith.constant 1.000000e+00 : f32
    %66 = vector.broadcast %cst_29 : f32 to vector<16x1xf32>
    %67 = arith.maximumf %65, %66 : vector<16x1xf32>
    %68 = vector.broadcast %67 : vector<16x1xf32> to vector<16x32xf32>
    %69 = arith.divf %63, %68 : vector<16x32xf32>
    %70 = arith.truncf %69 : vector<16x32xf32> to vector<16x32xbf16>
    %cst_30 = arith.constant dense<0.000000e+00> : vector<16x384xf32>
    %71 = tpu.matmul %70, %57, %cst_30 {dimension_numbers = #tpu.dot_dimension_numbers<[1], [0], [0], [1], [0, 0, 1, 1], [], []>} : vector<16x32xbf16>, vector<32x384xbf16>, vector<16x384xf32> -> vector<16x384xf32>
    %72 = arith.truncf %71 : vector<16x384xf32> to vector<16x384xbf16>
    %c0_31 = arith.constant 0 : index
    %c0_32 = arith.constant 0 : index
    %73 = vector.load %arg13[%c0_31, %c0_32] : memref<384x1024xbf16, #tpu.memory_space<vmem>>, vector<384x1024xbf16>
    %cst_33 = arith.constant dense<0.000000e+00> : vector<16x1024xf32>
    %74 = tpu.matmul %72, %73, %cst_33 {dimension_numbers = #tpu.dot_dimension_numbers<[1], [0], [0], [1], [0, 0, 1, 1], [], []>} : vector<16x384xbf16>, vector<384x1024xbf16>, vector<16x1024xf32> -> vector<16x1024xf32>
    %c0_34 = arith.constant 0 : index
    %c0_35 = arith.constant 0 : index
    %75 = vector.load %arg14[%c0_34, %c0_35] : memref<1x1024xf32, #tpu.memory_space<vmem>>, vector<1x1024xf32>
    %76 = vector.broadcast %75 : vector<1x1024xf32> to vector<16x1024xf32>
    %77 = arith.addf %74, %76 : vector<16x1024xf32>
    %cst_36 = arith.constant 0.000000e+00 : f32
    %78 = vector.broadcast %cst_36 : f32 to vector<16x1024xf32>
    %79 = arith.maximumf %77, %78 : vector<16x1024xf32>
    %80 = arith.truncf %79 : vector<16x1024xf32> to vector<16x1024xbf16>
    %c0_37 = arith.constant 0 : index
    %c0_38 = arith.constant 0 : index
    %81 = vector.load %arg15[%c0_37, %c0_38] : memref<1024x128xbf16, #tpu.memory_space<vmem>>, vector<1024x128xbf16>
    %cst_39 = arith.constant dense<0.000000e+00> : vector<16x128xf32>
    %82 = tpu.matmul %80, %81, %cst_39 {dimension_numbers = #tpu.dot_dimension_numbers<[1], [0], [0], [1], [0, 0, 1, 1], [], []>} : vector<16x1024xbf16>, vector<1024x128xbf16>, vector<16x128xf32> -> vector<16x128xf32>
    %c0_40 = arith.constant 0 : index
    %c0_41 = arith.constant 0 : index
    %83 = vector.load %arg16[%c0_40, %c0_41] : memref<1x128xf32, #tpu.memory_space<vmem>>, vector<1x128xf32>
    %84 = vector.broadcast %83 : vector<1x128xf32> to vector<16x128xf32>
    %85 = arith.addf %82, %84 : vector<16x128xf32>
    %c0_42 = arith.constant 0 : index
    %c0_43 = arith.constant 0 : index
    %86 = vector.load %arg4[%c0_42, %c0_43] : memref<32x32xbf16, #tpu.memory_space<vmem>>, vector<32x32xbf16>
    %87 = arith.extf %86 : vector<32x32xbf16> to vector<32x32xf32>
    %cst_44 = arith.constant dense<0.000000e+00> : vector<32xf32>
    %88 = vector.multi_reduction <add>, %87, %cst_44 [1] : vector<32x32xf32> to vector<32xf32>
    %89 = vector.shape_cast %88 : vector<32xf32> to vector<32x1xf32>
    %cst_45 = arith.constant 0.000000e+00 : f32
    %90 = vector.broadcast %cst_45 : f32 to vector<32x1xf32>
    %91 = arith.cmpf ogt, %89, %90 : vector<32x1xf32>
    %92 = math.rsqrt %89 : vector<32x1xf32>
    %cst_46 = arith.constant 0.000000e+00 : f32
    %93 = vector.broadcast %cst_46 : f32 to vector<32x1xf32>
    %94 = arith.select %91, %92, %93 : vector<32x1xi1>, vector<32x1xf32>
    %c0_47 = arith.constant 0 : index
    %c0_48 = arith.constant 0 : index
    %95 = vector.load %arg5[%c0_47, %c0_48] : memref<32x128xbf16, #tpu.memory_space<vmem>>, vector<32x128xbf16>
    %96 = arith.extf %95 : vector<32x128xbf16> to vector<32x128xf32>
    %97 = vector.broadcast %94 : vector<32x1xf32> to vector<32x128xf32>
    %98 = arith.mulf %97, %96 : vector<32x128xf32>
    %99 = arith.truncf %98 : vector<32x128xf32> to vector<32x128xbf16>
    %cst_49 = arith.constant dense<0.000000e+00> : vector<32x128xf32>
    %100 = tpu.matmul %86, %99, %cst_49 {dimension_numbers = #tpu.dot_dimension_numbers<[1], [0], [0], [1], [0, 0, 1, 1], [], []>} : vector<32x32xbf16>, vector<32x128xbf16>, vector<32x128xf32> -> vector<32x128xf32>
    %101 = vector.broadcast %94 : vector<32x1xf32> to vector<32x128xf32>
    %102 = arith.mulf %101, %100 : vector<32x128xf32>
    %103 = arith.truncf %102 : vector<32x128xf32> to vector<32x128xbf16>
    %c0_50 = arith.constant 0 : index
    %c0_51 = arith.constant 0 : index
    %104 = vector.load %arg17[%c0_50, %c0_51] : memref<128x128xbf16, #tpu.memory_space<vmem>>, vector<128x128xbf16>
    %cst_52 = arith.constant dense<0.000000e+00> : vector<32x128xf32>
    %105 = tpu.matmul %103, %104, %cst_52 {dimension_numbers = #tpu.dot_dimension_numbers<[1], [0], [0], [1], [0, 0, 1, 1], [], []>} : vector<32x128xbf16>, vector<128x128xbf16>, vector<32x128xf32> -> vector<32x128xf32>
    %c0_53 = arith.constant 0 : index
    %c0_54 = arith.constant 0 : index
    %106 = vector.load %arg18[%c0_53, %c0_54] : memref<1x128xf32, #tpu.memory_space<vmem>>, vector<1x128xf32>
    %107 = vector.broadcast %106 : vector<1x128xf32> to vector<32x128xf32>
    %108 = arith.addf %105, %107 : vector<32x128xf32>
    %cst_55 = arith.constant 0.000000e+00 : f32
    %109 = vector.broadcast %cst_55 : f32 to vector<32x128xf32>
    %110 = arith.maximumf %108, %109 : vector<32x128xf32>
    %111 = arith.truncf %110 : vector<32x128xf32> to vector<32x128xbf16>
    %112 = arith.extf %111 : vector<32x128xbf16> to vector<32x128xf32>
    %113 = vector.broadcast %94 : vector<32x1xf32> to vector<32x128xf32>
    %114 = arith.mulf %113, %112 : vector<32x128xf32>
    %115 = arith.truncf %114 : vector<32x128xf32> to vector<32x128xbf16>
    %cst_56 = arith.constant dense<0.000000e+00> : vector<32x128xf32>
    %116 = tpu.matmul %86, %115, %cst_56 {dimension_numbers = #tpu.dot_dimension_numbers<[1], [0], [0], [1], [0, 0, 1, 1], [], []>} : vector<32x32xbf16>, vector<32x128xbf16>, vector<32x128xf32> -> vector<32x128xf32>
    %117 = vector.broadcast %94 : vector<32x1xf32> to vector<32x128xf32>
    %118 = arith.mulf %117, %116 : vector<32x128xf32>
    %119 = arith.truncf %118 : vector<32x128xf32> to vector<32x128xbf16>
    %c0_57 = arith.constant 0 : index
    %c0_58 = arith.constant 0 : index
    %120 = vector.load %arg19[%c0_57, %c0_58] : memref<128x128xbf16, #tpu.memory_space<vmem>>, vector<128x128xbf16>
    %cst_59 = arith.constant dense<0.000000e+00> : vector<32x128xf32>
    %121 = tpu.matmul %119, %120, %cst_59 {dimension_numbers = #tpu.dot_dimension_numbers<[1], [0], [0], [1], [0, 0, 1, 1], [], []>} : vector<32x128xbf16>, vector<128x128xbf16>, vector<32x128xf32> -> vector<32x128xf32>
    %c0_60 = arith.constant 0 : index
    %c0_61 = arith.constant 0 : index
    %122 = vector.load %arg20[%c0_60, %c0_61] : memref<1x128xf32, #tpu.memory_space<vmem>>, vector<1x128xf32>
    %123 = vector.broadcast %122 : vector<1x128xf32> to vector<32x128xf32>
    %124 = arith.addf %121, %123 : vector<32x128xf32>
    %cst_62 = arith.constant 0.000000e+00 : f32
    %125 = vector.broadcast %cst_62 : f32 to vector<32x128xf32>
    %126 = arith.maximumf %124, %125 : vector<32x128xf32>
    %127 = arith.truncf %126 : vector<32x128xf32> to vector<32x128xbf16>
    %128 = arith.extf %127 : vector<32x128xbf16> to vector<32x128xf32>
    %129 = vector.broadcast %94 : vector<32x1xf32> to vector<32x128xf32>
    %130 = arith.mulf %129, %128 : vector<32x128xf32>
    %131 = arith.truncf %130 : vector<32x128xf32> to vector<32x128xbf16>
    %cst_63 = arith.constant dense<0.000000e+00> : vector<32x128xf32>
    %132 = tpu.matmul %86, %131, %cst_63 {dimension_numbers = #tpu.dot_dimension_numbers<[1], [0], [0], [1], [0, 0, 1, 1], [], []>} : vector<32x32xbf16>, vector<32x128xbf16>, vector<32x128xf32> -> vector<32x128xf32>
    %133 = vector.broadcast %94 : vector<32x1xf32> to vector<32x128xf32>
    %134 = arith.mulf %133, %132 : vector<32x128xf32>
    %135 = arith.truncf %134 : vector<32x128xf32> to vector<32x128xbf16>
    %c0_64 = arith.constant 0 : index
    %c0_65 = arith.constant 0 : index
    %136 = vector.load %arg21[%c0_64, %c0_65] : memref<128x256xbf16, #tpu.memory_space<vmem>>, vector<128x256xbf16>
    %cst_66 = arith.constant dense<0.000000e+00> : vector<32x256xf32>
    %137 = tpu.matmul %135, %136, %cst_66 {dimension_numbers = #tpu.dot_dimension_numbers<[1], [0], [0], [1], [0, 0, 1, 1], [], []>} : vector<32x128xbf16>, vector<128x256xbf16>, vector<32x256xf32> -> vector<32x256xf32>
    %c0_67 = arith.constant 0 : index
    %c0_68 = arith.constant 0 : index
    %138 = vector.load %arg22[%c0_67, %c0_68] : memref<1x256xf32, #tpu.memory_space<vmem>>, vector<1x256xf32>
    %139 = vector.broadcast %138 : vector<1x256xf32> to vector<32x256xf32>
    %140 = arith.addf %137, %139 : vector<32x256xf32>
    %cst_69 = arith.constant 0.000000e+00 : f32
    %141 = vector.broadcast %cst_69 : f32 to vector<32x256xf32>
    %142 = arith.maximumf %140, %141 : vector<32x256xf32>
    %143 = arith.truncf %142 : vector<32x256xf32> to vector<32x256xbf16>
    %c0_70 = arith.constant 0 : index
    %c0_71 = arith.constant 0 : index
    %144 = vector.load %arg6[%c0_70, %c0_71] : memref<1x32xi32, #tpu.memory_space<vmem>>, vector<1x32xi32>
    %145 = tpu.iota {dimensions = array<i32: 0>} : vector<16x32xi32>
    %146 = vector.broadcast %144 : vector<1x32xi32> to vector<16x32xi32>
    %147 = arith.cmpi eq, %146, %145 : vector<16x32xi32>
    %148 = arith.extui %147 : vector<16x32xi1> to vector<16x32xi32>
    %149 = arith.sitofp %148 : vector<16x32xi32> to vector<16x32xf32>
    %cst_72 = arith.constant dense<0.000000e+00> : vector<16xf32>
    %150 = vector.multi_reduction <add>, %149, %cst_72 [1] : vector<16x32xf32> to vector<16xf32>
    %151 = vector.shape_cast %150 : vector<16xf32> to vector<16x1xf32>
    %cst_73 = arith.constant 1.000000e+00 : f32
    %152 = vector.broadcast %cst_73 : f32 to vector<16x1xf32>
    %153 = arith.maximumf %151, %152 : vector<16x1xf32>
    %154 = vector.broadcast %153 : vector<16x1xf32> to vector<16x32xf32>
    %155 = arith.divf %149, %154 : vector<16x32xf32>
    %156 = arith.truncf %155 : vector<16x32xf32> to vector<16x32xbf16>
    %cst_74 = arith.constant dense<0.000000e+00> : vector<16x256xf32>
    %157 = tpu.matmul %156, %143, %cst_74 {dimension_numbers = #tpu.dot_dimension_numbers<[1], [0], [0], [1], [0, 0, 1, 1], [], []>} : vector<16x32xbf16>, vector<32x256xbf16>, vector<16x256xf32> -> vector<16x256xf32>
    %158 = arith.truncf %157 : vector<16x256xf32> to vector<16x256xbf16>
    %c0_75 = arith.constant 0 : index
    %c0_76 = arith.constant 0 : index
    %159 = vector.load %arg23[%c0_75, %c0_76] : memref<256x1024xbf16, #tpu.memory_space<vmem>>, vector<256x1024xbf16>
    %cst_77 = arith.constant dense<0.000000e+00> : vector<16x1024xf32>
    %160 = tpu.matmul %158, %159, %cst_77 {dimension_numbers = #tpu.dot_dimension_numbers<[1], [0], [0], [1], [0, 0, 1, 1], [], []>} : vector<16x256xbf16>, vector<256x1024xbf16>, vector<16x1024xf32> -> vector<16x1024xf32>
    %c0_78 = arith.constant 0 : index
    %c0_79 = arith.constant 0 : index
    %161 = vector.load %arg24[%c0_78, %c0_79] : memref<1x1024xf32, #tpu.memory_space<vmem>>, vector<1x1024xf32>
    %162 = vector.broadcast %161 : vector<1x1024xf32> to vector<16x1024xf32>
    %163 = arith.addf %160, %162 : vector<16x1024xf32>
    %cst_80 = arith.constant 0.000000e+00 : f32
    %164 = vector.broadcast %cst_80 : f32 to vector<16x1024xf32>
    %165 = arith.maximumf %163, %164 : vector<16x1024xf32>
    %166 = arith.truncf %165 : vector<16x1024xf32> to vector<16x1024xbf16>
    %c0_81 = arith.constant 0 : index
    %c0_82 = arith.constant 0 : index
    %167 = vector.load %arg25[%c0_81, %c0_82] : memref<1024x128xbf16, #tpu.memory_space<vmem>>, vector<1024x128xbf16>
    %cst_83 = arith.constant dense<0.000000e+00> : vector<16x128xf32>
    %168 = tpu.matmul %166, %167, %cst_83 {dimension_numbers = #tpu.dot_dimension_numbers<[1], [0], [0], [1], [0, 0, 1, 1], [], []>} : vector<16x1024xbf16>, vector<1024x128xbf16>, vector<16x128xf32> -> vector<16x128xf32>
    %c0_84 = arith.constant 0 : index
    %c0_85 = arith.constant 0 : index
    %169 = vector.load %arg26[%c0_84, %c0_85] : memref<1x128xf32, #tpu.memory_space<vmem>>, vector<1x128xf32>
    %170 = vector.broadcast %169 : vector<1x128xf32> to vector<16x128xf32>
    %171 = arith.addf %168, %170 : vector<16x128xf32>
    %172 = arith.truncf %85 : vector<16x128xf32> to vector<16x128xbf16>
    %c0_86 = arith.constant 0 : index
    %c0_87 = arith.constant 0 : index
    %173 = vector.load %arg27[%c0_86, %c0_87] : memref<128x1024xbf16, #tpu.memory_space<vmem>>, vector<128x1024xbf16>
    %cst_88 = arith.constant dense<0.000000e+00> : vector<16x1024xf32>
    %174 = tpu.matmul %172, %173, %cst_88 {dimension_numbers = #tpu.dot_dimension_numbers<[1], [0], [0], [1], [0, 0, 1, 1], [], []>} : vector<16x128xbf16>, vector<128x1024xbf16>, vector<16x1024xf32> -> vector<16x1024xf32>
    %175 = arith.truncf %171 : vector<16x128xf32> to vector<16x128xbf16>
    %c0_89 = arith.constant 0 : index
    %c0_90 = arith.constant 0 : index
    %176 = vector.load %arg28[%c0_89, %c0_90] : memref<128x1024xbf16, #tpu.memory_space<vmem>>, vector<128x1024xbf16>
    %cst_91 = arith.constant dense<0.000000e+00> : vector<16x1024xf32>
    %177 = tpu.matmul %175, %176, %cst_91 {dimension_numbers = #tpu.dot_dimension_numbers<[1], [0], [0], [1], [0, 0, 1, 1], [], []>} : vector<16x128xbf16>, vector<128x1024xbf16>, vector<16x1024xf32> -> vector<16x1024xf32>
    %178 = arith.addf %174, %177 : vector<16x1024xf32>
    %c0_92 = arith.constant 0 : index
    %c0_93 = arith.constant 0 : index
    %179 = vector.load %arg29[%c0_92, %c0_93] : memref<1x1024xf32, #tpu.memory_space<vmem>>, vector<1x1024xf32>
    %180 = vector.broadcast %179 : vector<1x1024xf32> to vector<16x1024xf32>
    %181 = arith.addf %178, %180 : vector<16x1024xf32>
    %cst_94 = arith.constant 0.000000e+00 : f32
    %182 = vector.broadcast %cst_94 : f32 to vector<16x1024xf32>
    %183 = arith.maximumf %181, %182 : vector<16x1024xf32>
    %184 = arith.truncf %183 : vector<16x1024xf32> to vector<16x1024xbf16>
    %c0_95 = arith.constant 0 : index
    %c0_96 = arith.constant 0 : index
    %185 = vector.load %arg30[%c0_95, %c0_96] : memref<1024x512xbf16, #tpu.memory_space<vmem>>, vector<1024x512xbf16>
    %cst_97 = arith.constant dense<0.000000e+00> : vector<16x512xf32>
    %186 = tpu.matmul %184, %185, %cst_97 {dimension_numbers = #tpu.dot_dimension_numbers<[1], [0], [0], [1], [0, 0, 1, 1], [], []>} : vector<16x1024xbf16>, vector<1024x512xbf16>, vector<16x512xf32> -> vector<16x512xf32>
    %c0_98 = arith.constant 0 : index
    %c0_99 = arith.constant 0 : index
    %187 = vector.load %arg31[%c0_98, %c0_99] : memref<1x512xf32, #tpu.memory_space<vmem>>, vector<1x512xf32>
    %188 = vector.broadcast %187 : vector<1x512xf32> to vector<16x512xf32>
    %189 = arith.addf %186, %188 : vector<16x512xf32>
    %cst_100 = arith.constant 0.000000e+00 : f32
    %190 = vector.broadcast %cst_100 : f32 to vector<16x512xf32>
    %191 = arith.maximumf %189, %190 : vector<16x512xf32>
    %c0_101 = arith.constant 0 : index
    %c0_102 = arith.constant 0 : index
    %192 = vector.load %arg32[%c0_101, %c0_102] : memref<1x512xf32, #tpu.memory_space<vmem>>, vector<1x512xf32>
    %c0_103 = arith.constant 0 : index
    %c0_104 = arith.constant 0 : index
    %193 = vector.load %arg33[%c0_103, %c0_104] : memref<1x1xf32, #tpu.memory_space<vmem>>, vector<1x1xf32>
    %194 = vector.broadcast %192 : vector<1x512xf32> to vector<16x512xf32>
    %195 = arith.mulf %191, %194 : vector<16x512xf32>
    %cst_105 = arith.constant dense<0.000000e+00> : vector<16xf32>
    %196 = vector.multi_reduction <add>, %195, %cst_105 [1] : vector<16x512xf32> to vector<16xf32>
    %197 = vector.shape_cast %196 : vector<16xf32> to vector<16x1xf32>
    %198 = vector.broadcast %193 : vector<1x1xf32> to vector<16x1xf32>
    %199 = arith.addf %197, %198 : vector<16x1xf32>
    %c0_106 = arith.constant 0 : index
    %c0_107 = arith.constant 0 : index
    %200 = vector.load %arg34[%c0_106, %c0_107] : memref<16x1xf32, #tpu.memory_space<vmem>>, vector<16x1xf32>
    tpu.vector_store %arg34[%c0_106, %c0_107], %199 {strides = array<i32>} : memref<16x1xf32, #tpu.memory_space<vmem>>, vector<16x1xf32>,
    return
  }
  func.func @transform_0(%arg0: i32) -> (i32, i32) {
    %c0_i32 = arith.constant 0 : i32
    %c0_i32_0 = arith.constant 0 : i32
    %c0_i32_1 = arith.constant 0 : i32
    return %c0_i32, %c0_i32_0 : i32, i32
  }
  func.func @transform_1(%arg0: i32) -> (i32, i32) {
    %c0_i32 = arith.constant 0 : i32
    %c0_i32_0 = arith.constant 0 : i32
    %c0_i32_1 = arith.constant 0 : i32
    return %c0_i32, %c0_i32_0 : i32, i32
  }
  func.func @transform_2(%arg0: i32) -> (i32, i32) {
    %c0_i32 = arith.constant 0 : i32
    %c0_i32_0 = arith.constant 0 : i32
    %c0_i32_1 = arith.constant 0 : i32
    return %c0_i32, %c0_i32_0 : i32, i32
  }
  func.func @transform_3(%arg0: i32) -> (i32, i32) {
    %c0_i32 = arith.constant 0 : i32
    %c0_i32_0 = arith.constant 0 : i32
    %c0_i32_1 = arith.constant 0 : i32
    return %c0_i32, %c0_i32_0 : i32, i32
  }
  func.func @transform_4(%arg0: i32) -> (i32, i32) {
    %c0_i32 = arith.constant 0 : i32
    %c0_i32_0 = arith.constant 0 : i32
    %c0_i32_1 = arith.constant 0 : i32
    return %c0_i32, %c0_i32_0 : i32, i32
  }
  func.func @transform_5(%arg0: i32) -> (i32, i32) {
    %c0_i32 = arith.constant 0 : i32
    %c0_i32_0 = arith.constant 0 : i32
    %c0_i32_1 = arith.constant 0 : i32
    return %c0_i32, %c0_i32_0 : i32, i32
  }
  func.func @transform_6(%arg0: i32) -> (i32, i32) {
    %c0_i32 = arith.constant 0 : i32
    %c0_i32_0 = arith.constant 0 : i32
    %c0_i32_1 = arith.constant 0 : i32
    return %c0_i32, %c0_i32_0 : i32, i32
  }
  func.func @transform_7(%arg0: i32) -> (i32, i32) {
    %c0_i32 = arith.constant 0 : i32
    %c0_i32_0 = arith.constant 0 : i32
    %c0_i32_1 = arith.constant 0 : i32
    return %c0_i32, %c0_i32_0 : i32, i32
  }
  func.func @transform_8(%arg0: i32) -> (i32, i32) {
    %c0_i32 = arith.constant 0 : i32
    %c0_i32_0 = arith.constant 0 : i32
    %c0_i32_1 = arith.constant 0 : i32
    return %c0_i32, %c0_i32_0 : i32, i32
  }
  func.func @transform_9(%arg0: i32) -> (i32, i32) {
    %c0_i32 = arith.constant 0 : i32
    %c0_i32_0 = arith.constant 0 : i32
    %c0_i32_1 = arith.constant 0 : i32
    return %c0_i32, %c0_i32_0 : i32, i32
  }
  func.func @transform_10(%arg0: i32) -> (i32, i32) {
    %c0_i32 = arith.constant 0 : i32
    %c0_i32_0 = arith.constant 0 : i32
    %c0_i32_1 = arith.constant 0 : i32
    return %c0_i32, %c0_i32_0 : i32, i32
  }
  func.func @transform_11(%arg0: i32) -> (i32, i32) {
    %c0_i32 = arith.constant 0 : i32
    %c0_i32_0 = arith.constant 0 : i32
    %c0_i32_1 = arith.constant 0 : i32
    return %c0_i32, %c0_i32_0 : i32, i32
  }
  func.func @transform_12(%arg0: i32) -> (i32, i32) {
    %c0_i32 = arith.constant 0 : i32
    %c0_i32_0 = arith.constant 0 : i32
    %c0_i32_1 = arith.constant 0 : i32
    return %c0_i32, %c0_i32_0 : i32, i32
  }
  func.func @transform_13(%arg0: i32) -> (i32, i32) {
    %c0_i32 = arith.constant 0 : i32
    %c0_i32_0 = arith.constant 0 : i32
    %c0_i32_1 = arith.constant 0 : i32
    return %c0_i32, %c0_i32_0 : i32, i32
  }
  func.func @transform_14(%arg0: i32) -> (i32, i32) {
    %c0_i32 = arith.constant 0 : i32
    %c0_i32_0 = arith.constant 0 : i32
    %c0_i32_1 = arith.constant 0 : i32
    return %c0_i32, %c0_i32_0 : i32, i32
  }
  func.func @transform_15(%arg0: i32) -> (i32, i32) {
    %c0_i32 = arith.constant 0 : i32
    %c0_i32_0 = arith.constant 0 : i32
    %c0_i32_1 = arith.constant 0 : i32
    return %c0_i32, %c0_i32_0 : i32, i32
  }
  func.func @transform_16(%arg0: i32) -> (i32, i32) {
    %c0_i32 = arith.constant 0 : i32
    %c0_i32_0 = arith.constant 0 : i32
    %c0_i32_1 = arith.constant 0 : i32
    return %c0_i32, %c0_i32_0 : i32, i32
  }
  func.func @transform_17(%arg0: i32) -> (i32, i32) {
    %c0_i32 = arith.constant 0 : i32
    %c0_i32_0 = arith.constant 0 : i32
    %c0_i32_1 = arith.constant 0 : i32
    return %c0_i32, %c0_i32_0 : i32, i32
  }
  func.func @transform_18(%arg0: i32) -> (i32, i32) {
    %c0_i32 = arith.constant 0 : i32
    %c0_i32_0 = arith.constant 0 : i32
    %c0_i32_1 = arith.constant 0 : i32
    return %c0_i32, %c0_i32_0 : i32, i32
  }
  func.func @transform_19(%arg0: i32) -> (i32, i32) {
    %c0_i32 = arith.constant 0 : i32
    %c0_i32_0 = arith.constant 0 : i32
    %c0_i32_1 = arith.constant 0 : i32
    return %c0_i32, %c0_i32_0 : i32, i32
  }
  func.func @transform_20(%arg0: i32) -> (i32, i32) {
    %c0_i32 = arith.constant 0 : i32
    %c0_i32_0 = arith.constant 0 : i32
    %c0_i32_1 = arith.constant 0 : i32
    return %c0_i32, %c0_i32_0 : i32, i32
  }
  func.func @transform_21(%arg0: i32) -> (i32, i32) {
    %c0_i32 = arith.constant 0 : i32
    %c0_i32_0 = arith.constant 0 : i32
    %c0_i32_1 = arith.constant 0 : i32
    return %c0_i32, %c0_i32_0 : i32, i32
  }
  func.func @transform_22(%arg0: i32) -> (i32, i32) {
    %c0_i32 = arith.constant 0 : i32
    %c0_i32_0 = arith.constant 0 : i32
    %c0_i32_1 = arith.constant 0 : i32
    return %c0_i32, %c0_i32_0 : i32, i32
  }
  func.func @transform_23(%arg0: i32) -> (i32, i32) {
    %c0_i32 = arith.constant 0 : i32
    %c0_i32_0 = arith.constant 0 : i32
    %c0_i32_1 = arith.constant 0 : i32
    return %c0_i32, %c0_i32_0 : i32, i32
  }
  func.func @transform_24(%arg0: i32) -> (i32, i32) {
    %c0_i32 = arith.constant 0 : i32
    %c0_i32_0 = arith.constant 0 : i32
    %c0_i32_1 = arith.constant 0 : i32
    return %c0_i32, %c0_i32_0 : i32, i32
  }
  func.func @transform_25(%arg0: i32) -> (i32, i32) {
    %c0_i32 = arith.constant 0 : i32
    %c0_i32_0 = arith.constant 0 : i32
    %c0_i32_1 = arith.constant 0 : i32
    return %c0_i32, %c0_i32_0 : i32, i32
  }
  func.func @transform_26(%arg0: i32) -> (i32, i32) {
    %c0_i32 = arith.constant 0 : i32
    %c0_i32_0 = arith.constant 0 : i32
    %c0_i32_1 = arith.constant 0 : i32
    return %c0_i32, %c0_i32_0 : i32, i32
  }
  func.func @transform_27(%arg0: i32) -> (i32, i32) {
    %c0_i32 = arith.constant 0 : i32
    %c0_i32_0 = arith.constant 0 : i32
    %c0_i32_1 = arith.constant 0 : i32
    return %c0_i32, %c0_i32_0 : i32, i32
  }
  func.func @transform_28(%arg0: i32) -> (i32, i32) {
    %c0_i32 = arith.constant 0 : i32
    %c0_i32_0 = arith.constant 0 : i32
    %c0_i32_1 = arith.constant 0 : i32
    return %c0_i32, %c0_i32_0 : i32, i32
  }
  func.func @transform_29(%arg0: i32) -> (i32, i32) {
    %c0_i32 = arith.constant 0 : i32
    %c0_i32_0 = arith.constant 0 : i32
    %c0_i32_1 = arith.constant 0 : i32
    return %c0_i32, %c0_i32_0 : i32, i32
  }
  func.func @transform_30(%arg0: i32) -> (i32, i32) {
    %c0_i32 = arith.constant 0 : i32
    %c0_i32_0 = arith.constant 0 : i32
    %c0_i32_1 = arith.constant 0 : i32
    return %c0_i32, %c0_i32_0 : i32, i32
  }
  func.func @transform_31(%arg0: i32) -> (i32, i32) {
    %c0_i32 = arith.constant 0 : i32
    %c0_i32_0 = arith.constant 0 : i32
    %c0_i32_1 = arith.constant 0 : i32
    return %c0_i32, %c0_i32_0 : i32, i32
  }
  func.func @transform_32(%arg0: i32) -> (i32, i32) {
    %c0_i32 = arith.constant 0 : i32
    %c0_i32_0 = arith.constant 0 : i32
    %c0_i32_1 = arith.constant 0 : i32
    return %c0_i32, %c0_i32_0 : i32, i32
  }
  func.func @transform_33(%arg0: i32) -> (i32, i32) {
    %c0_i32 = arith.constant 0 : i32
    %c0_i32_0 = arith.constant 0 : i32
    %c0_i32_1 = arith.constant 0 : i32
    return %c0_i32, %c0_i32_0 : i32, i32
  }
}

</mosaic_0001>

<bundles_post_ra>
// kernel: gnn_net_forward.1
= control target key start
LH: loop header
LB: loop body
LE: loop exit
PB: predicated region body
PF: predicated region fallthrough
CT: control target
= control target key end

     0   :  { %s12012_s6 = smov 1   ;;  %s12013_s10 = smov 2   ;;  %s13271_s0 = inlined_call_operand.smem [shape: u32[34], index: -1, kind: input, shape index: {}] }
   0x1   :  { %s12081_s5 = sld [smem:[%s13271_s0]]   ;;  %s12014_s14 = smov 3  }
   0x2   :  { %s12086_s9 = sld [smem:[%s13271_s0 + %s12012_s6]]   ;;  %s12015_s18 = smov 4  }
   0x3   :  { %s12091_s13 = sld [smem:[%s13271_s0 + %s12013_s10]]   ;;  %s12016_s22 = smov 5  }
   0x4   :  { %s12096_s17 = sld [smem:[%s13271_s0 + %s12014_s14]]   ;;  %s12017_s26 = smov 6  }
   0x5   :  { %s12101_s21 = sld [smem:[%s13271_s0 + %s12015_s18]]   ;;  %s12018_s30 = smov 7  }
   0x6   :  { %s12106_s25 = sld [smem:[%s13271_s0 + %s12016_s22]]   ;;  %s12019_s4 = smov 8  }
   0x7   :  { %13284 = sst [smem:[#allocation42_spill]] %s12081_s5  ;;  %s12020_s10 = smov 9  }
   0x8   :  { %13285 = sst [smem:[#allocation43_spill]] %s12086_s9  ;;  %s12021_s15 = smov 10  }
   0x9   :  { %13286 = sst [smem:[#allocation44_spill]] %s12091_s13  ;;  %s12022_s20 = smov 11  }
   0xa   :  { %13287 = sst [smem:[#allocation45_spill]] %s12096_s17  ;;  %s12024_s1 = smov 13  }
   0xb   :  { %13288 = sst [smem:[#allocation46_spill]] %s12101_s21  ;;  %s12025_s7 = smov 14  }
   0xc   :  { %13289 = sst [smem:[#allocation47_spill]] %s12106_s25  ;;  %s12027_s22 = smov 16  }
   0xd   :  { %s12111_s29 = sld [smem:[%s13271_s0 + %s12017_s26]]   ;;  %s12023_s26 = smov 12  }
   0xe   :  { %s12116_s3 = sld [smem:[%s13271_s0 + %s12018_s30]]   ;;  %s12028_s28 = smov 17  }
   0xf   :  { %s12121_s8 = sld [smem:[%s13271_s0 + %s12019_s4]]  }
  0x10   :  { %s12126_s14 = sld [smem:[%s13271_s0 + %s12020_s10]]  }
  0x11   :  { %s12131_s19 = sld [smem:[%s13271_s0 + %s12021_s15]]   ;;  %s12026_s15 = smov 15  }
  0x12   :  { %s12136_s24 = sld [smem:[%s13271_s0 + %s12022_s20]]  }
  0x13   :  { %13290 = sst [smem:[#allocation48_spill]] %s12111_s29 }
  0x14   :  { %s12141_s30 = sld [smem:[%s13271_s0 + %s12023_s26]]  }
  0x15   :  { %s12146_s6 = sld [smem:[%s13271_s0 + %s12024_s1]]   ;;  %s12044_s1 = smov 33  }
  0x16   :  { %s12151_s12 = sld [smem:[%s13271_s0 + %s12025_s7]]   ;;  %s12029_s7 = smov 18  }
  0x17   :  { %13291 = sst [smem:[#allocation49_spill]] %s12131_s19 }
  0x18   :  { %13292 = sst [smem:[#allocation50_spill]] %s12136_s24 }
  0x19   :  { %s12156_s20 = sld [smem:[%s13271_s0 + %s12026_s15]]   ;;  %s12030_s15 = smov 19  }
  0x1a   :  { %13293 = sst [smem:[#allocation51_spill]] %s12141_s30 }
  0x1b   :  { %13294 = sst [smem:[#allocation52_spill]] %s12146_s6 }
  0x1c   :  { %13295 = sst [smem:[#allocation53_spill]] %s12151_s12 }
  0x1d   :  { %s12161_s27 = sld [smem:[%s13271_s0 + %s12027_s22]]   ;;  %s12031_s22 = smov 20  }
  0x1e   :  { %s12166_s4 = sld [smem:[%s13271_s0 + %s12028_s28]]   ;;  %s12032_s28 = smov 21  }
  0x1f   :  { %s12171_s25 = sld [smem:[%s13271_s0 + %s12029_s7]]   ;;  %s12033_s7 = smov 22  }
  0x20   :  { %s12176_s21 = sld [smem:[%s13271_s0 + %s12030_s15]]   ;;  %s12034_s15 = smov 23  }
  0x21   :  { %s12181_s6 = sld [smem:[%s13271_s0 + %s12031_s22]]   ;;  %s12035_s22 = smov 24  }
  0x22   :  { %s12186_s12 = sld [smem:[%s13271_s0 + %s12032_s28]]   ;;  %s12036_s28 = smov 25  }
  0x23   :  { %s12191_s17 = sld [smem:[%s13271_s0 + %s12033_s7]]   ;;  %s12037_s7 = smov 26  }
  0x24   :  { %s12196_s24 = sld [smem:[%s13271_s0 + %s12034_s15]]   ;;  %s12038_s15 = smov 27  }
  0x25   :  { %s12201_s30 = sld [smem:[%s13271_s0 + %s12035_s22]]   ;;  %s12039_s22 = smov 28  }
  0x26   :  { %s12206_s13 = sld [smem:[%s13271_s0 + %s12036_s28]]   ;;  %s12040_s28 = smov 29  }
  0x27   :  { %s12211_s19 = sld [smem:[%s13271_s0 + %s12037_s7]]   ;;  %s12041_s7 = smov 30  }
  0x28   :  { %s12216_s9 = sld [smem:[%s13271_s0 + %s12038_s15]]   ;;  %s12042_s15 = smov 31  }
  0x29   :  { %s12221_s29 = sld [smem:[%s13271_s0 + %s12039_s22]]   ;;  %s12043_s22 = smov 32  }
  0x2a   :  { %s12226_s5 = sld [smem:[%s13271_s0 + %s12040_s28]]  }
  0x2b   :  { %13296 = sst [smem:[#allocation54_spill]] %s12201_s30 }
  0x2c   :  { %s12236_s30 = sld [smem:[%s13271_s0 + %s12042_s15]]  }
  0x2d   :  { %13297 = sst [smem:[#allocation55_spill]] %s12211_s19 }
  0x2e   :  { %s12231_s19 = sld [smem:[%s13271_s0 + %s12041_s7]]  }
  0x2f   :  { %13298 = sst [smem:[#allocation56_spill]] %s12221_s29 }
  0x30   :  { %13299 = sst [smem:[#allocation57_spill]] %s12226_s5 }
  0x31   :  { %s9398_s29 = sld [smem:[%s13271_s0 + %s12043_s22]]  }
  0x32   :  { %s12244_s5 = sld [smem:[%s13271_s0 + %s12044_s1]]  }
  0x37   :  { %v72_v0 = vstv %s9398_s29 }
  0x38   :  { %73 = vst [vmem:[#allocation2] sm:$0x1] %v72_v0 }
  0x39   :  { %74 = vsyncpa [#allocation4], 0 }
  0x3a   :  { %75 = vsyncpa [#allocation6], 0 }
  0x3b   :  { %76 = vsyncpa [#allocation9], 0 }
  0x3c   :  { %77 = vsyncpa [#allocation12], 0 }
  0x3d   :  { %78 = vsyncpa [#allocation15], 0 }
  0x3e   :  { %79 = vsyncpa [#allocation18], 0 }
  0x3f   :  { %80 = vsyncpa [#allocation21], 0 }
  0x40   :  { %81 = vsyncpa [#allocation24], 0 }
  0x41   :  { %82 = vsyncpa [#allocation27], 0 }
  0x42   :  { %83 = vsyncpa [#allocation30], 0  ;;  %s12045_s7 = smov [#allocation5]   ;;  %s11574_s0 = scalar_lea.hbm %s12121_s8, 2048 }
  0x43   :  { %s113_s10 = sshll.u32 %s12045_s7, 4  ;;  %p11575_p0 = scmp.ne.s32.totalorder %s12121_s8, %s11574_s0  ;;  %s114_s10 = int_to_ptr.vmem [resolvable:$true] %s113_s10 }
  0x44   :  { %p11578_p1 = scmp.lt.u32.totalorder %s11574_s0, %s12121_s8 }
  0x46   :  { %p11580_p2 = pnand %p11578_p1, %p11575_p0 }
  0x48   :  { %11583 = shalt.err (!%p11580_p2)
}
  0x49   :  { %s11584_s29 = scalar_lea.vmem %s114_s10, 2048  ;;  %p11589_p4 = scmp.lt.s32.totalorder %s114_s10, %s114_s10 }
  0x4a   :  { %p11585_p3 = scmp.ne.s32.totalorder %s114_s10, %s11584_s29  ;;  %p11590_p5 = scmp.lt.s32.totalorder %s11584_s29, %s11584_s29 }
  0x4c   :  { %p11591_p6 = por %p11590_p5, %p11589_p4 }
  0x4e   :  { %p11592_p7 = pnand %p11591_p6, %p11585_p3 }
  0x50   :  { %11595 = shalt.err (!%p11592_p7)
}
  0x51   :  { %s12046_s11 = smov 128   ;;  %s12047_s15 = smov 8  }
  0x52   :  { %119 = dma.hbm_to_vmem [thread:$0]  %s12121_s8, 2048, %s114_s10, [#allocation6], %s12046_s11, %s12046_s11, %s12047_s15  }
  0x53   :  { %s12048_s16 = smov [#allocation8]   ;;  %s12049_s22 = smov [#allocation11]  }
  0x54   :  { %s146_s18 = sshll.u32 %s12048_s16, 4  ;;  %s168_s23 = sshll.u32 %s12049_s22, 4  ;;  %s147_s18 = int_to_ptr.vmem [resolvable:$true] %s146_s18  ;;  %s169_s23 = int_to_ptr.vmem [resolvable:$true] %s168_s23 }
  0x55   :  { %s11596_s26 = scalar_lea.hbm %s12156_s20, 16 }
  0x56   :  { %p11597_p8 = scmp.ne.s32.totalorder %s12156_s20, %s11596_s26  ;;  %p11600_p9 = scmp.lt.u32.totalorder %s11596_s26, %s12156_s20 }
  0x58   :  { %p11602_p10 = pnand %p11600_p9, %p11597_p8 }
  0x5a   :  { %11605 = shalt.err (!%p11602_p10)
}
  0x5b   :  { %s11606_s1 = scalar_lea.vmem %s147_s18, 16  ;;  %s11610_s28 = scalar_lea.vmem %s147_s18, 32 }
  0x5c   :  { %p11607_p11 = scmp.ne.s32.totalorder %s147_s18, %s11606_s1  ;;  %p11611_p12 = scmp.lt.s32.totalorder %s147_s18, %s147_s18 }
  0x5d   :  { %p11612_p13 = scmp.lt.s32.totalorder %s11610_s28, %s11606_s1 }
  0x5f   :  { %p11613_p0 = por %p11612_p13, %p11611_p12 }
  0x61   :  { %p11614_p1 = pnand %p11613_p0, %p11607_p11 }
  0x63   :  { %11617 = shalt.err (!%p11614_p1)
}
  0x64   :  { %149 = dma.hbm_to_vmem [thread:$0]  %s12156_s20, 16, %s147_s18, [#allocation9]  }
  0x65   :  { %s11618_s8 = scalar_lea.hbm %s12166_s4, 16 }
  0x66   :  { %p11619_p2 = scmp.ne.s32.totalorder %s12166_s4, %s11618_s8  ;;  %p11622_p3 = scmp.lt.u32.totalorder %s11618_s8, %s12166_s4 }
  0x68   :  { %p11624_p4 = pnand %p11622_p3, %p11619_p2 }
  0x6a   :  { %11627 = shalt.err (!%p11624_p4)
}
  0x6b   :  { %s11628_s2 = scalar_lea.vmem %s169_s23, 16  ;;  %s11632_s7 = scalar_lea.vmem %s169_s23, 32 }
  0x6c   :  { %p11629_p5 = scmp.ne.s32.totalorder %s169_s23, %s11628_s2  ;;  %p11633_p6 = scmp.lt.s32.totalorder %s169_s23, %s169_s23 }
  0x6d   :  { %p11634_p7 = scmp.lt.s32.totalorder %s11632_s7, %s11628_s2 }
  0x6f   :  { %p11635_p8 = por %p11634_p7, %p11633_p6 }
  0x71   :  { %p11636_p9 = pnand %p11635_p8, %p11629_p5 }
  0x73   :  { %11639 = shalt.err (!%p11636_p9)
}
  0x74   :  { %171 = dma.hbm_to_vmem [thread:$0]  %s12166_s4, 16, %s169_s23, [#allocation12]  }
  0x75   :  { %s12050_s20 = smov [#allocation14]   ;;  %s12051_s0 = smov [#allocation17]  }
  0x76   :  { %s190_s10 = sshll.u32 %s12050_s20, 4  ;;  %s212_s29 = sshll.u32 %s12051_s0, 4  ;;  %s191_s10 = int_to_ptr.vmem [resolvable:$true] %s190_s10  ;;  %s213_s29 = int_to_ptr.vmem [resolvable:$true] %s212_s29 }
  0x77   :  { %s11640_s16 = scalar_lea.hbm %s12176_s21, 16 }
  0x78   :  { %p11641_p10 = scmp.ne.s32.totalorder %s12176_s21, %s11640_s16  ;;  %p11644_p11 = scmp.lt.u32.totalorder %s11640_s16, %s12176_s21 }
  0x7a   :  { %p11646_p12 = pnand %p11644_p11, %p11641_p10 }
  0x7c   :  { %11649 = shalt.err (!%p11646_p12)
}
  0x7d   :  { %s11650_s18 = scalar_lea.vmem %s191_s10, 16  ;;  %s11654_s22 = scalar_lea.vmem %s191_s10, 32 }
  0x7e   :  { %p11651_p13 = scmp.ne.s32.totalorder %s191_s10, %s11650_s18  ;;  %p11655_p0 = scmp.lt.s32.totalorder %s191_s10, %s191_s10 }
  0x7f   :  { %p11656_p1 = scmp.lt.s32.totalorder %s11654_s22, %s11650_s18 }
  0x81   :  { %p11657_p2 = por %p11656_p1, %p11655_p0 }
  0x83   :  { %p11658_p3 = pnand %p11657_p2, %p11651_p13 }
  0x85   :  { %11661 = shalt.err (!%p11658_p3)
}
  0x86   :  { %193 = dma.hbm_to_vmem [thread:$0]  %s12176_s21, 16, %s191_s10, [#allocation15]  }
  0x87   :  { %s11662_s4 = scalar_lea.hbm %s12186_s12, 32 }
  0x88   :  { %p11663_p4 = scmp.ne.s32.totalorder %s12186_s12, %s11662_s4  ;;  %p11666_p5 = scmp.lt.u32.totalorder %s11662_s4, %s12186_s12 }
  0x8a   :  { %p11668_p6 = pnand %p11666_p5, %p11663_p4 }
  0x8c   :  { %11671 = shalt.err (!%p11668_p6)
}
  0x8d   :  { %s11672_s23 = scalar_lea.vmem %s213_s29, 32  ;;  %p11677_p8 = scmp.lt.s32.totalorder %s213_s29, %s213_s29 }
  0x8e   :  { %p11673_p7 = scmp.ne.s32.totalorder %s213_s29, %s11672_s23  ;;  %p11678_p9 = scmp.lt.s32.totalorder %s11672_s23, %s11672_s23 }
  0x90   :  { %p11679_p10 = por %p11678_p9, %p11677_p8 }
  0x92   :  { %p11680_p11 = pnand %p11679_p10, %p11673_p7 }
  0x94   :  { %11683 = shalt.err (!%p11680_p11)
}
  0x95   :  { %215 = dma.hbm_to_vmem [thread:$0]  %s12186_s12, 32, %s213_s29, [#allocation18]  }
  0x96   :  { %s12052_s26 = smov [#allocation20]   ;;  %s12053_s1 = smov [#allocation23]  }
  0x97   :  { %s234_s21 = sshll.u32 %s12052_s26, 4  ;;  %s256_s28 = sshll.u32 %s12053_s1, 4  ;;  %s235_s21 = int_to_ptr.vmem [resolvable:$true] %s234_s21  ;;  %s257_s28 = int_to_ptr.vmem [resolvable:$true] %s256_s28 }
  0x98   :  { %s11684_s8 = scalar_lea.hbm %s12196_s24, 128 }
  0x99   :  { %p11685_p12 = scmp.ne.s32.totalorder %s12196_s24, %s11684_s8  ;;  %p11688_p13 = scmp.lt.u32.totalorder %s11684_s8, %s12196_s24 }
  0x9b   :  { %p11690_p0 = pnand %p11688_p13, %p11685_p12 }
  0x9d   :  { %11693 = shalt.err (!%p11690_p0)
}
  0x9e   :  { %s11694_s2 = scalar_lea.vmem %s235_s21, 128  ;;  %p11699_p2 = scmp.lt.s32.totalorder %s235_s21, %s235_s21 }
  0x9f   :  { %p11695_p1 = scmp.ne.s32.totalorder %s235_s21, %s11694_s2  ;;  %p11700_p3 = scmp.lt.s32.totalorder %s11694_s2, %s11694_s2 }
  0xa1   :  { %p11701_p4 = por %p11700_p3, %p11699_p2 }
  0xa3   :  { %p11702_p5 = pnand %p11701_p4, %p11695_p1 }
  0xa5   :  { %11705 = shalt.err (!%p11702_p5)
}
  0xa6   :  { %237 = dma.hbm_to_vmem [thread:$0]  %s12196_s24, 128, %s235_s21, [#allocation21]  }
  0xa7   :  { %s11706_s12 = scalar_lea.hbm %s12206_s13, 16 }
  0xa8   :  { %p11707_p6 = scmp.ne.s32.totalorder %s12206_s13, %s11706_s12  ;;  %p11710_p7 = scmp.lt.u32.totalorder %s11706_s12, %s12206_s13 }
  0xaa   :  { %p11712_p8 = pnand %p11710_p7, %p11707_p6 }
  0xac   :  { %11715 = shalt.err (!%p11712_p8)
}
  0xad   :  { %s11716_s7 = scalar_lea.vmem %s257_s28, 16  ;;  %s11720_s20 = scalar_lea.vmem %s257_s28, 32 }
  0xae   :  { %p11717_p9 = scmp.ne.s32.totalorder %s257_s28, %s11716_s7  ;;  %p11721_p10 = scmp.lt.s32.totalorder %s257_s28, %s257_s28 }
  0xaf   :  { %p11722_p11 = scmp.lt.s32.totalorder %s11720_s20, %s11716_s7 }
  0xb1   :  { %p11723_p12 = por %p11722_p11, %p11721_p10 }
  0xb3   :  { %p11724_p13 = pnand %p11723_p12, %p11717_p9 }
  0xb5   :  { %11727 = shalt.err (!%p11724_p13)
}
  0xb6   :  { %259 = dma.hbm_to_vmem [thread:$0]  %s12206_s13, 16, %s257_s28, [#allocation24]  }
  0xb7   :  { %s12054_s24 = smov [#allocation26]   ;;  %s12055_s0 = smov [#allocation29]  }
  0xb8   :  { %s277_s10 = sshll.u32 %s12054_s24, 4  ;;  %s302_s29 = sshll.u32 %s12055_s0, 4  ;;  %s278_s10 = int_to_ptr.vmem [resolvable:$true] %s277_s10  ;;  %s303_s29 = int_to_ptr.vmem [resolvable:$true] %s302_s29 }
  0xb9   :  { %s11728_s16 = scalar_lea.hbm %s12216_s9, 8192 }
  0xba   :  { %p11729_p0 = scmp.ne.s32.totalorder %s12216_s9, %s11728_s16  ;;  %p11732_p1 = scmp.lt.u32.totalorder %s11728_s16, %s12216_s9 }
  0xbc   :  { %p11734_p2 = pnand %p11732_p1, %p11729_p0 }
  0xbe   :  { %11737 = shalt.err (!%p11734_p2)
}
  0xbf   :  { %s11738_s18 = scalar_lea.vmem %s278_s10, 8192  ;;  %p11743_p4 = scmp.lt.s32.totalorder %s278_s10, %s278_s10 }
  0xc0   :  { %p11739_p3 = scmp.ne.s32.totalorder %s278_s10, %s11738_s18  ;;  %p11744_p5 = scmp.lt.s32.totalorder %s11738_s18, %s11738_s18 }
  0xc2   :  { %p11745_p6 = por %p11744_p5, %p11743_p4 }
  0xc4   :  { %p11746_p7 = pnand %p11745_p6, %p11739_p3 }
  0xc6   :  { %11749 = shalt.err (!%p11746_p7)
}
  0xc7   :  { %s12056_s22 = smov 512   ;;  %s12057_s13 = smov 32  }
  0xc8   :  { %283 = dma.hbm_to_vmem [thread:$0]  %s12216_s9, 8192, %s278_s10, [#allocation27], %s12056_s22, %s12056_s22, %s12057_s13  }
  0xc9   :  { %s11750_s4 = scalar_lea.hbm %s12231_s19, 64 }
  0xca   :  { %p11751_p8 = scmp.ne.s32.totalorder %s12231_s19, %s11750_s4  ;;  %p11754_p9 = scmp.lt.u32.totalorder %s11750_s4, %s12231_s19 }
  0xcc   :  { %p11756_p10 = pnand %p11754_p9, %p11751_p8 }
  0xce   :  { %11759 = shalt.err (!%p11756_p10)
}
  0xcf   :  { %s11760_s23 = scalar_lea.vmem %s303_s29, 64  ;;  %p11765_p12 = scmp.lt.s32.totalorder %s303_s29, %s303_s29 }
  0xd0   :  { %p11761_p11 = scmp.ne.s32.totalorder %s303_s29, %s11760_s23  ;;  %p11766_p13 = scmp.lt.s32.totalorder %s11760_s23, %s11760_s23 }
  0xd2   :  { %p11767_p0 = por %p11766_p13, %p11765_p12 }
  0xd4   :  { %p11768_p1 = pnand %p11767_p0, %p11761_p11 }
  0xd6   :  { %11771 = shalt.err (!%p11768_p1)
}
  0xd7   :  { %305 = dma.hbm_to_vmem [thread:$0]  %s12231_s19, 64, %s303_s29, [#allocation30]  }
  0xd8   :  { %s12058_s26 = smov [#allocation3]   ;;  %s12059_s21 = smov [#allocation7]  }
  0xd9   :  { %s104_s9 = sshll.u32 %s12058_s26, 4  ;;  %s126_s1 = sshll.u32 %s12059_s21, 4  ;;  %s105_s9 = int_to_ptr.vmem [resolvable:$true] %s104_s9  ;;  %s127_s1 = int_to_ptr.vmem [resolvable:$true] %s126_s1 }
  0xda   :  { %s11772_s28 = scalar_lea.hbm %s12116_s3, 16 }
  0xdb   :  { %p11773_p2 = scmp.ne.s32.totalorder %s12116_s3, %s11772_s28  ;;  %p11776_p3 = scmp.lt.u32.totalorder %s11772_s28, %s12116_s3 }
  0xdd   :  { %p11778_p4 = pnand %p11776_p3, %p11773_p2 }
  0xdf   :  { %11781 = shalt.err (!%p11778_p4)
}
  0xe0   :  { %s11782_s8 = scalar_lea.vmem %s105_s9, 16  ;;  %s11786_s2 = scalar_lea.vmem %s105_s9, 32 }
  0xe1   :  { %p11783_p5 = scmp.ne.s32.totalorder %s105_s9, %s11782_s8  ;;  %p11787_p6 = scmp.lt.s32.totalorder %s105_s9, %s105_s9 }
  0xe2   :  { %p11788_p7 = scmp.lt.s32.totalorder %s11786_s2, %s11782_s8 }
  0xe4   :  { %p11789_p8 = por %p11788_p7, %p11787_p6 }
  0xe6   :  { %p11790_p9 = pnand %p11789_p8, %p11783_p5 }
  0xe8   :  { %11793 = shalt.err (!%p11790_p9)
}
  0xe9   :  { %107 = dma.hbm_to_vmem [thread:$0]  %s12116_s3, 16, %s105_s9, [#allocation4]  }
  0xea   :  { %s11794_s19 = scalar_lea.hbm %s12126_s14, 32 }
  0xeb   :  { %p11795_p10 = scmp.ne.s32.totalorder %s12126_s14, %s11794_s19  ;;  %p11798_p11 = scmp.lt.u32.totalorder %s11794_s19, %s12126_s14 }
  0xed   :  { %p11800_p12 = pnand %p11798_p11, %p11795_p10 }
  0xef   :  { %11803 = shalt.err (!%p11800_p12)
}
  0xf0   :  { %s11804_s12 = scalar_lea.vmem %s127_s1, 32  ;;  %p11809_p0 = scmp.lt.s32.totalorder %s127_s1, %s127_s1 }
  0xf1   :  { %p11805_p13 = scmp.ne.s32.totalorder %s127_s1, %s11804_s12  ;;  %p11810_p1 = scmp.lt.s32.totalorder %s11804_s12, %s11804_s12 }
  0xf3   :  { %p11811_p2 = por %p11810_p1, %p11809_p0 }
  0xf5   :  { %p11812_p3 = pnand %p11811_p2, %p11805_p13 }
  0xf7   :  { %11815 = shalt.err (!%p11812_p3)
}
  0xf8   :  { %129 = dma.hbm_to_vmem [thread:$0]  %s12126_s14, 32, %s127_s1, [#allocation6]  }
  0xf9   :  { %s12060_s7 = smov [#allocation10]   ;;  %s11816_s20 = scalar_lea.hbm %s12161_s27, 1024 }
  0xfa   :  { %s155_s3 = sshll.u32 %s12060_s7, 4  ;;  %p11817_p4 = scmp.ne.s32.totalorder %s12161_s27, %s11816_s20  ;;  %s156_s3 = int_to_ptr.vmem [resolvable:$true] %s155_s3 }
  0xfb   :  { %p11820_p5 = scmp.lt.u32.totalorder %s11816_s20, %s12161_s27 }
  0xfd   :  { %p11822_p6 = pnand %p11820_p5, %p11817_p4 }
  0xff   :  { %11825 = shalt.err (!%p11822_p6)
}
 0x100   :  { %s11826_s24 = scalar_lea.vmem %s156_s3, 1024  ;;  %p11831_p8 = scmp.lt.s32.totalorder %s156_s3, %s156_s3 }
 0x101   :  { %p11827_p7 = scmp.ne.s32.totalorder %s156_s3, %s11826_s24  ;;  %p11832_p9 = scmp.lt.s32.totalorder %s11826_s24, %s11826_s24 }
 0x103   :  { %p11833_p10 = por %p11832_p9, %p11831_p8 }
 0x105   :  { %p11834_p11 = pnand %p11833_p10, %p11827_p7 }
 0x107   :  { %11837 = shalt.err (!%p11834_p11)
}
 0x108   :  { %s12061_s10 = smov 64   ;;  %s12062_s14 = smov 4  }
 0x109   :  { %161 = dma.hbm_to_vmem [thread:$0]  %s12161_s27, 1024, %s156_s3, [#allocation9], %s12061_s10, %s12061_s10, %s12062_s14  }
 0x10a   :  { %s12063_s0 = smov [#allocation13]   ;;  %s12064_s16 = smov [#allocation16]  }
 0x10b   :  { %s177_s29 = sshll.u32 %s12063_s0, 4  ;;  %s199_s18 = sshll.u32 %s12064_s16, 4  ;;  %s178_s29 = int_to_ptr.vmem [resolvable:$true] %s177_s29  ;;  %s12303_s18 = int_to_ptr.vmem [resolvable:$true] %s199_s18 }
 0x10c   :  { %s11838_s4 = scalar_lea.hbm %s12171_s25, 1024 }
 0x10d   :  { %p11839_p12 = scmp.ne.s32.totalorder %s12171_s25, %s11838_s4  ;;  %p11842_p13 = scmp.lt.u32.totalorder %s11838_s4, %s12171_s25 }
 0x10f   :  { %p11844_p0 = pnand %p11842_p13, %p11839_p12 }
 0x111   :  { %11847 = shalt.err (!%p11844_p0)
}
 0x112   :  { %s11848_s23 = scalar_lea.vmem %s178_s29, 1024  ;;  %p11853_p2 = scmp.lt.s32.totalorder %s178_s29, %s178_s29 }
 0x113   :  { %p11849_p1 = scmp.ne.s32.totalorder %s178_s29, %s11848_s23  ;;  %p11854_p3 = scmp.lt.s32.totalorder %s11848_s23, %s11848_s23 }
 0x115   :  { %p11855_p4 = por %p11854_p3, %p11853_p2 }
 0x117   :  { %p11856_p5 = pnand %p11855_p4, %p11849_p1 }
 0x119   :  { %11859 = shalt.err (!%p11856_p5)
}
 0x11a   :  { %183 = dma.hbm_to_vmem [thread:$0]  %s12171_s25, 1024, %s178_s29, [#allocation12], %s12061_s10, %s12061_s10, %s12062_s14  }
 0x11b   :  { %s11860_s27 = scalar_lea.hbm %s12181_s6, 2048 }
 0x11c   :  { %p11861_p6 = scmp.ne.s32.totalorder %s12181_s6, %s11860_s27  ;;  %p11864_p7 = scmp.lt.u32.totalorder %s11860_s27, %s12181_s6 }
 0x11e   :  { %p11866_p8 = pnand %p11864_p7, %p11861_p6 }
 0x120   :  { %11869 = shalt.err (!%p11866_p8)
}
 0x121   :  { %s11870_s26 = scalar_lea.vmem %s12303_s18, 2048  ;;  %p11875_p10 = scmp.lt.s32.totalorder %s12303_s18, %s12303_s18 }
 0x122   :  { %p11871_p9 = scmp.ne.s32.totalorder %s12303_s18, %s11870_s26  ;;  %p11876_p11 = scmp.lt.s32.totalorder %s11870_s26, %s11870_s26 }
 0x124   :  { %p11877_p12 = por %p11876_p11, %p11875_p10 }
 0x126   :  { %p11878_p13 = pnand %p11877_p12, %p11871_p9 }
 0x128   :  { %11881 = shalt.err (!%p11878_p13)
}
 0x129   :  { %205 = dma.hbm_to_vmem [thread:$0]  %s12181_s6, 2048, %s12303_s18, [#allocation15], %s12046_s11, %s12046_s11, %s12047_s15  }
 0x12a   :  { %s12065_s25 = smov [#allocation19]   ;;  %s12066_s21 = smov [#allocation22]  }
 0x12b   :  { %s221_s9 = sshll.u32 %s12065_s25, 4  ;;  %s243_s1 = sshll.u32 %s12066_s21, 4  ;;  %s222_s9 = int_to_ptr.vmem [resolvable:$true] %s221_s9  ;;  %s12324_s1 = int_to_ptr.vmem [resolvable:$true] %s243_s1 }
 0x12c   :  { %s11882_s28 = scalar_lea.hbm %s12191_s17, 16384 }
 0x12d   :  { %p11883_p0 = scmp.ne.s32.totalorder %s12191_s17, %s11882_s28  ;;  %p11886_p1 = scmp.lt.u32.totalorder %s11882_s28, %s12191_s17 }
 0x12f   :  { %p11888_p2 = pnand %p11886_p1, %p11883_p0 }
 0x131   :  { %11891 = shalt.err (!%p11888_p2)
}
 0x132   :  { %s11892_s8 = scalar_lea.vmem %s222_s9, 16384  ;;  %p11897_p4 = scmp.lt.s32.totalorder %s222_s9, %s222_s9 }
 0x133   :  { %p11893_p3 = scmp.ne.s32.totalorder %s222_s9, %s11892_s8  ;;  %p11898_p5 = scmp.lt.s32.totalorder %s11892_s8, %s11892_s8 }
 0x135   :  { %p11899_p6 = por %p11898_p5, %p11897_p4 }
 0x137   :  { %p11900_p7 = pnand %p11899_p6, %p11893_p3 }
 0x139   :  { %11903 = shalt.err (!%p11900_p7)
}
 0x13a   :  { %s13300_s6 = sld [smem:[#allocation54_spill]] }
 0x13b   :  { %227 = dma.hbm_to_vmem [thread:$0]  %s12191_s17, 16384, %s222_s9, [#allocation18], %s12056_s22, %s12056_s22, %s12057_s13  }
 0x140   :  { %s11904_s11 = scalar_lea.hbm %s13300_s6, 8192 }
 0x141   :  { %p11905_p8 = scmp.ne.s32.totalorder %s13300_s6, %s11904_s11  ;;  %p11908_p9 = scmp.lt.u32.totalorder %s11904_s11, %s13300_s6 }
 0x143   :  { %p11910_p10 = pnand %p11908_p9, %p11905_p8 }
 0x145   :  { %11913 = shalt.err (!%p11910_p10)
}
 0x146   :  { %s11914_s15 = scalar_lea.vmem %s12324_s1, 8192  ;;  %p11919_p12 = scmp.lt.s32.totalorder %s12324_s1, %s12324_s1 }
 0x147   :  { %p11915_p11 = scmp.ne.s32.totalorder %s12324_s1, %s11914_s15  ;;  %p11920_p13 = scmp.lt.s32.totalorder %s11914_s15, %s11914_s15 }
 0x149   :  { %p11921_p0 = por %p11920_p13, %p11919_p12 }
 0x14b   :  { %p11922_p1 = pnand %p11921_p0, %p11915_p11 }
 0x14d   :  { %11925 = shalt.err (!%p11922_p1)
}
 0x14e   :  { %s13301_s17 = sld [smem:[#allocation55_spill]]  ;;  %s12067_s2 = smov [#allocation25]  }
 0x14f   :  { %249 = dma.hbm_to_vmem [thread:$0]  %s13300_s6, 8192, %s12324_s1, [#allocation21], %s12061_s10, %s12061_s10, %s12062_s14  }
 0x150   :  { %s265_s19 = sshll.u32 %s12067_s2, 4  ;;  %s12068_s12 = smov [#allocation28]   ;;  %s266_s19 = int_to_ptr.vmem [resolvable:$true] %s265_s19 }
 0x151   :  { %s290_s7 = sshll.u32 %s12068_s12, 4  ;;  %s291_s7 = int_to_ptr.vmem [resolvable:$true] %s290_s7 }
 0x154   :  { %s11926_s3 = scalar_lea.hbm %s13301_s17, 8192 }
 0x155   :  { %p11927_p2 = scmp.ne.s32.totalorder %s13301_s17, %s11926_s3  ;;  %p11930_p3 = scmp.lt.u32.totalorder %s11926_s3, %s13301_s17 }
 0x157   :  { %p11932_p4 = pnand %p11930_p3, %p11927_p2 }
 0x159   :  { %11935 = shalt.err (!%p11932_p4)
}
 0x15a   :  { %s11936_s20 = scalar_lea.vmem %s266_s19, 8192  ;;  %p11941_p6 = scmp.lt.s32.totalorder %s266_s19, %s266_s19 }
 0x15b   :  { %p11937_p5 = scmp.ne.s32.totalorder %s266_s19, %s11936_s20  ;;  %p11942_p7 = scmp.lt.s32.totalorder %s11936_s20, %s11936_s20 }
 0x15d   :  { %p11943_p8 = por %p11942_p7, %p11941_p6 }
 0x15f   :  { %p11944_p9 = pnand %p11943_p8, %p11937_p5 }
 0x161   :  { %11947 = shalt.err (!%p11944_p9)
}
 0x162   :  { %s13302_s24 = sld [smem:[#allocation56_spill]] }
 0x163   :  { %271 = dma.hbm_to_vmem [thread:$0]  %s13301_s17, 8192, %s266_s19, [#allocation24], %s12056_s22, %s12056_s22, %s12057_s13  }
 0x168   :  { %s11948_s10 = scalar_lea.hbm %s13302_s24, 128 }
 0x169   :  { %p11949_p10 = scmp.ne.s32.totalorder %s13302_s24, %s11948_s10  ;;  %p11952_p11 = scmp.lt.u32.totalorder %s11948_s10, %s13302_s24 }
 0x16b   :  { %p11954_p12 = pnand %p11952_p11, %p11949_p10 }
 0x16d   :  { %11957 = shalt.err (!%p11954_p12)
}
 0x16e   :  { %s11958_s14 = scalar_lea.vmem %s291_s7, 128  ;;  %p11963_p0 = scmp.lt.s32.totalorder %s291_s7, %s291_s7 }
 0x16f   :  { %p11959_p13 = scmp.ne.s32.totalorder %s291_s7, %s11958_s14  ;;  %p11964_p1 = scmp.lt.s32.totalorder %s11958_s14, %s11958_s14 }
 0x171   :  { %p11965_p2 = por %p11964_p1, %p11963_p0 }
 0x173   :  { %p11966_p3 = pnand %p11965_p2, %p11959_p13 }
 0x175   :  { %11969 = shalt.err (!%p11966_p3)
}
 0x176   :  { %293 = dma.hbm_to_vmem [thread:$0]  %s13302_s24, 128, %s291_s7, [#allocation27]  }
 0x177   :  { %s12069_s0 = smov [#allocation31]   ;;  %s11970_s22 = scalar_lea.hbm %s12236_s30, 64 }
 0x178   :  { %s312_s29 = sshll.u32 %s12069_s0, 4  ;;  %p11971_p4 = scmp.ne.s32.totalorder %s12236_s30, %s11970_s22  ;;  %s313_s29 = int_to_ptr.vmem [resolvable:$true] %s312_s29 }
 0x179   :  { %p11974_p5 = scmp.lt.u32.totalorder %s11970_s22, %s12236_s30 }
 0x17b   :  { %p11976_p6 = pnand %p11974_p5, %p11971_p4 }
 0x17d   :  { %11979 = shalt.err (!%p11976_p6)
}
 0x17e   :  { %s11980_s13 = scalar_lea.vmem %s313_s29, 64  ;;  %p11985_p8 = scmp.lt.s32.totalorder %s313_s29, %s313_s29 }
 0x17f   :  { %p11981_p7 = scmp.ne.s32.totalorder %s313_s29, %s11980_s13  ;;  %p11986_p9 = scmp.lt.s32.totalorder %s11980_s13, %s11980_s13 }
 0x181   :  { %p11987_p10 = por %p11986_p9, %p11985_p8 }
 0x183   :  { %p11988_p11 = pnand %p11987_p10, %p11981_p7 }
 0x185   :  { %11991 = shalt.err (!%p11988_p11)
}
 0x186   :  { %315 = dma.hbm_to_vmem [thread:$0]  %s12236_s30, 64, %s313_s29, [#allocation30]  }
 0x187   :  { %11992 = dma.done.wait [#allocation4], 16  }
 0x188   :  { %11993 = vsyncadd [#allocation4], 4294967280 }
 0x189   :  { %11994 = dma.done.wait [#allocation6], 2080  }
 0x18a   :  { %11995 = vsyncadd [#allocation6], 4294965216 }
 0x18b   :  { %11996 = dma.done.wait [#allocation9], 1040  }
 0x18c   :  { %11997 = vsyncadd [#allocation9], 4294966256 }
 0x18d   :  { %11998 = dma.done.wait [#allocation12], 1040  }
 0x18e   :  { %11999 = vsyncadd [#allocation12], 4294966256 }
 0x18f   :  { %12000 = dma.done.wait [#allocation15], 2064  }
 0x190   :  { %12001 = vsyncadd [#allocation15], 4294965232 }
 0x191   :  { %12002 = dma.done.wait [#allocation18], 16416  }
 0x192   :  { %12003 = vsyncadd [#allocation18], 4294950880 }
 0x193   :  { %12004 = dma.done.wait [#allocation21], 8320  }
 0x194   :  { %12005 = vsyncadd [#allocation21], 4294958976 }
 0x195   :  { %12006 = dma.done.wait [#allocation24], 8208  }
 0x196   :  { %12007 = vsyncadd [#allocation24], 4294959088 }
 0x197   :  { %12008 = dma.done.wait [#allocation27], 8320  }
 0x198   :  { %12009 = vsyncadd [#allocation27], 4294958976 }
 0x199   :  { %12010 = dma.done.wait [#allocation30], 128  }
 0x19a   :  { %12011 = vsyncadd [#allocation30], 4294967168  ;;  %s13303_s30 = sld [smem:[#allocation42_spill]]  ;;  %s13304_s16 = sld [smem:[#allocation48_spill]]  ;;  %vm384_vm0 = vcmask 261120   ;;  %vm12072_vm7 = vmmov 0  }
 0x19b   :  { %s13305_s18 = sld [smem:[#allocation43_spill]]  ;;  %v9404_v54 = vld [vmem:[#allocation3] ss:$0 sm:$0xff]  ;;  %s13306_s4 = sld [smem:[#allocation49_spill]]  ;;  %vm9350_vm14 = vcmask 7168  }
 0x19c   :  { %s13307_s23 = sld [smem:[#allocation44_spill]]  ;;  %s13308_s27 = sld [smem:[#allocation51_spill]] }
 0x19d   :  { %s13309_s26 = sld [smem:[#allocation50_spill]]  ;;  %s13310_s25 = sld [smem:[#allocation45_spill]] }
 0x19e   :  { %s13311_s9 = sld [smem:[#allocation53_spill]]  ;;  %s13312_s21 = sld [smem:[#allocation52_spill]] }
 0x19f   :  { %s13313_s1 = sld [smem:[#allocation46_spill]]  ;;  %s13314_s28 = sld [smem:[#allocation47_spill]] }
 0x1a0   :  { %v378_v1 = vld [vmem:[%s13303_s30 + $0x8] sm:$0xff]   ;;  %v12362_v2 = vld [vmem:[%s13303_s30] sm:$0xff]   ;;  %v10895_v13 = vld [vmem:[%s13304_s16 + $0x10] sm:$0xff]   ;;  %s13315_s8 = sld [smem:[#allocation57_spill]] }
 0x1a1   :  { %v382_v3 = vunpack.c.l.bf16 %v378_v1  ;;  %v380_v4 = vunpack.c.l.bf16 %v12362_v2  ;;  %v383_v5 = vunpack.c.h.bf16 %v378_v1  ;;  %v381_v6 = vunpack.c.h.bf16 %v12362_v2  ;;  %10646 = vmatprep.mubr.msk.bf16.mxu0 %vm384_vm0, %v12362_v2  ;;  %v10893_v11 = vld [vmem:[%s13304_s16] sm:$0xff]   ;;  %v10894_v12 = vld [vmem:[%s13304_s16 + $0x8] sm:$0xff]   ;;  %v10896_v14 = vld [vmem:[%s13304_s16 + $0x18] sm:$0xff]  }
 0x1a2   :  { %10650 = vmatprep.subr.bf16.mxu1 %v10893_v11  ;;  %v10897_v15 = vld [vmem:[%s13304_s16 + $0x20] sm:$0xff]   ;;  %v10898_v16 = vld [vmem:[%s13304_s16 + $0x28] sm:$0xff]   ;;  %v10899_v42 = vld [vmem:[%s13304_s16 + $0x30] sm:$0xff]  }
 0x1a3   :  { %v391_v7 = vsel %vm384_vm0, %v382_v3, 0.0  ;;  %v385_v8 = vsel %vm384_vm0, %v380_v4, 0.0  ;;  %v394_v9 = vsel %vm384_vm0, %v383_v5, 0.0  ;;  %v388_v10 = vsel %vm384_vm0, %v381_v6, 0.0  ;;  %10651 = vmatpush3.bf16.msra.mxu1 %v10893_v11  ;;  %v10368_v21 = vld [vmem:[%s13305_s18] sm:$0xff]   ;;  %v10383_v22 = vld [vmem:[%s13305_s18 + $0x8] sm:$0xff]  }
 0x1a4   :  { %392 = vadd.xlane.f32.xlu1 %v391_v7  ;;  %386 = vadd.xlane.f32.xlu0 %v385_v8  ;;  %v10369_v25 = vunpack.c.l.bf16 %v10368_v21  ;;  %v10370_v26 = vunpack.c.h.bf16 %v10368_v21  ;;  %v10374_v27 = vunpack.c.h.bf16 %v10383_v22  ;;  %v10373_v32 = vunpack.c.l.bf16 %v10383_v22  ;;  %v12393_v41 = vld [vmem:[%s13303_s30 + $0x8] sm:$0xff]   ;;  %v10900_v43 = vld [vmem:[%s13304_s16 + $0x38] sm:$0xff]  }
 0x1a5   :  { %10652 = vmatprep.subr.bf16.mxu1 %v10894_v12  ;;  %v10907_v21 = vld [vmem:[#allocation5 + $0x20] ss:$8 sps:$4 sm:$0xff]   ;;  %v10912_v22 = vld [vmem:[#allocation5 + $0x34] ss:$8 sps:$4 sm:$0xff]  }
 0x1a7   :  { %10653 = vmatpush3.bf16.msra.mxu1 %v10894_v12 }
 0x1a8   :  { %395 = vadd.xlane.f32.xlu1 %v394_v9  ;;  %389 = vadd.xlane.f32.xlu0 %v388_v10 }
 0x1a9   :  { %10654 = vmatprep.subr.bf16.mxu1 %v10895_v13 }
 0x1ab   :  { %10655 = vmatpush3.bf16.msra.mxu1 %v10895_v13 }
 0x1ac   :  { %10656 = vmatprep.subr.bf16.mxu1 %v10896_v14 }
 0x1af   :  { %10657 = vmatpush3.bf16.msra.mxu1 %v10896_v14 }
 0x1b0   :  { %10658 = vmatprep.subr.bf16.mxu1 %v10897_v15 }
 0x1b3   :  { %10659 = vmatpush3.bf16.msra.mxu1 %v10897_v15 }
 0x1b4   :  { %10660 = vmatprep.subr.bf16.mxu1 %v10898_v16 }
 0x1b7   :  { %10661 = vmatpush3.bf16.msra.mxu1 %v10898_v16  ;;  %v10903_v16 = vld [vmem:[#allocation5 + $0x4] ss:$8 sps:$4 sm:$0xff]  }
 0x1b8   :  { %10662 = vmatprep.subr.bf16.mxu1 %v10899_v42 }
 0x1bb   :  { %10663 = vmatpush3.bf16.msra.mxu1 %v10899_v42 }
 0x1bc   :  { %10664 = vmatprep.subr.bf16.mxu1 %v10900_v43 }
 0x1bf   :  { %10665 = vmatpush3.bf16.msra.mxu1 %v10900_v43 }
 0x231   :  { %v393_v17 = vpop.xlane.xlu1 %392  ;;  %v387_v18 = vpop.xlane.xlu0 %386 }
 0x232   :  { %11547 = vrsqrt.f32 %v387_v18  ;;  %vm397_vm1 = vcmp.gt.f32.partialorder %v387_v18, 0.0  ;;  %vm399_vm3 = vcmp.gt.f32.partialorder %v393_v17, 0.0  ;;  %v10906_v18 = vld [vmem:[#allocation5 + $0x14] ss:$8 sps:$4 sm:$0xff]  }
 0x233   :  { %11549 = vrsqrt.f32 %v393_v17  ;;  %v10901_v17 = vld [vmem:[#allocation5] ss:$8 sps:$4 sm:$0xff]  }
 0x235   :  { %v396_v19 = vpop.xlane.xlu1 %395  ;;  %v390_v20 = vpop.xlane.xlu0 %389 }
 0x236   :  { %11551 = vrsqrt.f32 %v396_v19  ;;  %vm400_vm2 = vcmp.gt.f32.partialorder %v396_v19, 0.0  ;;  %vm398_vm4 = vcmp.gt.f32.partialorder %v390_v20, 0.0  ;;  %v10904_v19 = vld [vmem:[#allocation5 + $0x10] ss:$8 sps:$4 sm:$0xff]  }
 0x237   :  { %11553 = vrsqrt.f32 %v390_v20  ;;  %v10909_v20 = vld [vmem:[#allocation5 + $0x24] ss:$8 sps:$4 sm:$0xff]  }
 0x23c   :  { %v11548_v23 = vpop.eup %11547 }
 0x23d   :  { %v11550_v24 = vpop.eup %11549  ;;  %v12380_v29 = vsel %vm397_vm1, %v11548_v23, 0.0  ;;  %v10910_v23 = vld [vmem:[#allocation5 + $0x30] ss:$8 sps:$4 sm:$0xff]  }
 0x23e   :  { %v12384_v33 = vsel %vm399_vm3, %v11550_v24, 0.0  ;;  %v417_v35 = vmul.f32 %v10369_v25, %v12380_v29  ;;  %v10915_v24 = vld [vmem:[#allocation5 + $0x44] ss:$8 sps:$4 sm:$0xff]   ;;  %v10913_v25 = vld [vmem:[#allocation5 + $0x40] ss:$8 sps:$4 sm:$0xff]  }
 0x23f   :  { %v419_v39 = vmul.f32 %v10373_v32, %v12384_v33  ;;  %v10924_v32 = vld [vmem:[#allocation5 + $0x74] ss:$8 sps:$4 sm:$0xff]  }
 0x240   :  { %v11552_v28 = vpop.eup %11551 }
 0x241   :  { %v11554_v30 = vpop.eup %11553  ;;  %v12382_v31 = vsel %vm400_vm2, %v11552_v28, 0.0  ;;  %v10921_v28 = vld [vmem:[#allocation5 + $0x64] ss:$8 sps:$4 sm:$0xff]  }
 0x242   :  { %v12386_v34 = vsel %vm398_vm4, %v11554_v30, 0.0  ;;  %v420_v37 = vmul.f32 %v10374_v27, %v12382_v31  ;;  %v10916_v27 = vld [vmem:[#allocation5 + $0x50] ss:$8 sps:$4 sm:$0xff]   ;;  %v10919_v30 = vld [vmem:[#allocation5 + $0x60] ss:$8 sps:$4 sm:$0xff]  }
 0x243   :  { %v418_v36 = vmul.f32 %v10370_v26, %v12386_v34  ;;  %v10918_v26 = vld [vmem:[#allocation5 + $0x54] ss:$8 sps:$4 sm:$0xff]  }
 0x244   :  { %v422_v40 = vpack.c.bf16 %v420_v37, %v419_v39 }
 0x245   :  { %v421_v38 = vpack.c.bf16 %v418_v36, %v417_v35  ;;  %v10922_v35 = vld [vmem:[#allocation5 + $0x70] ss:$8 sps:$4 sm:$0xff]   ;;  %v12070_v36 = vmov 0  }
 0x247   :  { %10642 = vmatprep.subr.bf16.mxu0 %v421_v38 }
 0x248   :  { %10643 = vmatpush3.bf16.msra.mxu0 %v421_v38 }
 0x249   :  { %10644 = vmatprep.subr.bf16.mxu0 %v422_v40 }
 0x24c   :  { %10645 = vmatpush3.bf16.msra.mxu0 %v422_v40 }
 0x24f   :  { %10647 = vmatmul.mubr.msk.bf16.vlgmr.msra.gmra.mrb[0].mxu0 %vm384_vm0, %v12393_v41 }
 0x250   :  { %10674 = vmatprep.mubr.msk.bf16.mxu0 %vm384_vm0, %v12362_v2 }
 0x322   :  { %v10648_v44 = vpop.f32.mrb[0].mxu0 }
 0x323   :  { %v473_v45 = vpop.f32.mrb[1].mxu0  ;;  %v490_v47 = vmul.f32 %v10648_v44, %v12384_v33 }
 0x324   :  { %v10649_v46 = vpop.f32.mrb[2].mxu0  ;;  %v488_v50 = vmul.f32 %v473_v45, %v12380_v29 }
 0x325   :  { %v491_v48 = vmul.f32 %v10649_v46, %v12382_v31  ;;  %v476_v49 = vpop.f32.mrb[3].mxu0 }
 0x326   :  { %v489_v51 = vmul.f32 %v476_v49, %v12386_v34  ;;  %v10953_v49 = vld [vmem:[%s13306_s4 + $0x8] ss:$12 sps:$4 sm:$0xff]  }
 0x327   :  { %v493_v52 = vpack.c.bf16 %v491_v48, %v490_v47  ;;  %v10952_v48 = vld [vmem:[%s13306_s4 + $0xc8] ss:$12 sps:$4 sm:$0xff]  }
 0x328   :  { %v492_v53 = vpack.c.bf16 %v489_v51, %v488_v50  ;;  %v10957_v50 = vld [vmem:[%s13306_s4 + $0xe0] ss:$12 sps:$4 sm:$0xff]  }
 0x329   :  { %v10958_v51 = vld [vmem:[%s13306_s4 + $0x20] ss:$12 sps:$4 sm:$0xff]  }
 0x32a   :  { %10666 = vmatprep.mubr.bf16.mxu1 %v492_v53  ;;  %v10963_v53 = vld [vmem:[%s13306_s4 + $0x38] ss:$12 sps:$4 sm:$0xff]  }
 0x32b   :  { %10667 = vmatmul.mubr.bf16.vlgmr.msra.gmra.mrb[0].mxu1 %v493_v52  ;;  %v10962_v52 = vld [vmem:[%s13306_s4 + $0xf8] ss:$12 sps:$4 sm:$0xff]  }
 0x32c   :  { %910 = vmatprep.mubr.bf16.mxu1 %v12070_v36 }
 0x3fe   :  { %v10668_v55 = vpop.f32.mrb[0].mxu1 }
 0x3ff   :  { %v608_v56 = vadd.f32 %v10668_v55, %v9404_v54  ;;  %v599_v57 = vpop.f32.mrb[1].mxu1  ;;  %v10968_v55 = vld [vmem:[%s13306_s4 + $0x50] ss:$12 sps:$4 sm:$0xff]  }
 0x400   :  { %v600_v58 = vadd.f32 %v9404_v54, %v599_v57  ;;  %v10669_v59 = vpop.f32.mrb[2].mxu1  ;;  %v10973_v57 = vld [vmem:[%s13306_s4 + $0x68] ss:$12 sps:$4 sm:$0xff]  }
 0x401   :  { %v611_v60 = vadd.f32 %v10669_v59, %v9404_v54  ;;  %v602_v61 = vpop.f32.mrb[3].mxu1  ;;  %v616_v63 = vmax.f32 %v608_v56, 0.0  ;;  %v10972_v56 = vld [vmem:[%s13306_s4 + $0x128] ss:$12 sps:$4 sm:$0xff]   ;;  %v10978_v59 = vld [vmem:[%s13306_s4 + $0x80] ss:$12 sps:$4 sm:$0xff]  }
 0x402   :  { %v603_v62 = vadd.f32 %v9404_v54, %v602_v61  ;;  %v614_v1 = vmax.f32 %v600_v58, 0.0  ;;  %v10967_v54 = vld [vmem:[%s13306_s4 + $0x110] ss:$12 sps:$4 sm:$0xff]   ;;  %v10977_v58 = vld [vmem:[%s13306_s4 + $0x140] ss:$12 sps:$4 sm:$0xff]  }
 0x403   :  { %v617_v0 = vmax.f32 %v611_v60, 0.0  ;;  %v703_v60 = vlaneseq }
 0x404   :  { %v615_v3 = vmax.f32 %v603_v62, 0.0 }
 0x405   :  { %v619_v4 = vpack.c.bf16 %v617_v0, %v616_v63  ;;  %v12430_v61 = vshrl.u32 %v703_v60, 7  ;;  %v701_v63 = vld [vmem:[#allocation7] sm:$0x3]  ;;  %v10930_v60 = vld [vmem:[%s13306_s4 + $0x1c] ss:$12 sps:$4 sm:$0xff]  }
 0x406   :  { %v618_v5 = vpack.c.bf16 %v615_v3, %v614_v1 }
 0x407   :  { %v622_v6 = vunpack.c.l.bf16 %v619_v4  ;;  %v623_v7 = vunpack.c.h.bf16 %v619_v4  ;;  %v12433_v62 = vsub.s32 0, %v12430_v61  ;;  %v12436_v0 = vsub.s32 1, %v12430_v61 }
 0x408   :  { %v620_v8 = vunpack.c.l.bf16 %v618_v5  ;;  %v621_v9 = vunpack.c.h.bf16 %v618_v5 }
 0x409   :  { %v626_v12 = vmul.f32 %v622_v6, %v12384_v33  ;;  %v627_v13 = vmul.f32 %v623_v7, %v12382_v31  ;;  %v706_v1 = vrot.slane %v701_v63, %v12433_v62  ;;  %v710_v3 = vrot.slane %v701_v63, %v12436_v0  ;;  %v10928_v63 = vld [vmem:[%s13306_s4 + $0x18] ss:$12 sps:$4 sm:$0xff]  }
 0x40a   :  { %v624_v10 = vmul.f32 %v620_v8, %v12380_v29  ;;  %v625_v11 = vmul.f32 %v621_v9, %v12386_v34 }
 0x40b   :  { %v629_v15 = vpack.c.bf16 %v627_v13, %v626_v12 }
 0x40c   :  { %v628_v14 = vpack.c.bf16 %v625_v11, %v624_v10 }
 0x40e   :  { %10670 = vmatprep.subr.bf16.mxu0 %v628_v14 }
 0x40f   :  { %10671 = vmatpush3.bf16.msra.mxu0 %v628_v14 }
 0x410   :  { %10672 = vmatprep.subr.bf16.mxu0 %v629_v15 }
 0x413   :  { %10673 = vmatpush3.bf16.msra.mxu0 %v629_v15 }
 0x414   :  { %793 = vmatprep.subr.bf16.mxu0 %v10903_v16 }
 0x416   :  { %10675 = vmatmul.mubr.msk.bf16.vlgmr.msra.gmra.mrb[4].mxu0 %vm384_vm0, %v12393_v41 }
 0x417   :  { %794 = vmatpush1.bf16.msra.mxu0 %v10901_v17  ;;  %825 = vmatprep.mubr.bf16.mxu0 %v12070_v36 }
 0x418   :  { %795 = vmatprep.subr.bf16.mxu0 %v10906_v18 }
 0x41b   :  { %796 = vmatpush1.bf16.msra.mxu0 %v10904_v19 }
 0x41c   :  { %797 = vmatprep.subr.bf16.mxu0 %v10909_v20 }
 0x41f   :  { %798 = vmatpush1.bf16.msra.mxu0 %v10907_v21 }
 0x420   :  { %799 = vmatprep.subr.bf16.mxu0 %v10912_v22 }
 0x423   :  { %800 = vmatpush1.bf16.msra.mxu0 %v10910_v23 }
 0x424   :  { %801 = vmatprep.subr.bf16.mxu0 %v10915_v24 }
 0x427   :  { %802 = vmatpush1.bf16.msra.mxu0 %v10913_v25 }
 0x428   :  { %803 = vmatprep.subr.bf16.mxu0 %v10918_v26 }
 0x42b   :  { %804 = vmatpush1.bf16.msra.mxu0 %v10916_v27 }
 0x42c   :  { %805 = vmatprep.subr.bf16.mxu0 %v10921_v28 }
 0x42f   :  { %806 = vmatpush1.bf16.msra.mxu0 %v10919_v30 }
 0x430   :  { %807 = vmatprep.subr.bf16.mxu0 %v10924_v32 }
 0x433   :  { %808 = vmatpush1.bf16.msra.mxu0 %v10922_v35 }
 0x434   :  { %10403 = vmatprep.subr.bf16.mxu0 %v10952_v48 }
 0x4e9   :  { %v10676_v37 = vpop.f32.mrb[4].mxu0 }
 0x4ea   :  { %v664_v38 = vpop.f32.mrb[5].mxu0  ;;  %v681_v40 = vmul.f32 %v10676_v37, %v12384_v33 }
 0x4eb   :  { %v10677_v39 = vpop.f32.mrb[6].mxu0  ;;  %v679_v44 = vmul.f32 %v664_v38, %v12380_v29 }
 0x4ec   :  { %v682_v42 = vmul.f32 %v10677_v39, %v12382_v31  ;;  %v667_v43 = vpop.f32.mrb[7].mxu0 }
 0x4ed   :  { %v680_v45 = vmul.f32 %v667_v43, %v12386_v34 }
 0x4ee   :  { %v684_v46 = vpack.c.bf16 %v682_v42, %v681_v40 }
 0x4ef   :  { %v683_v47 = vpack.c.bf16 %v680_v45, %v679_v44 }
 0x4f1   :  { %826 = vmatmul.mubr.bf16.vlgmr.msra.gmra.mrb[8].mxu0 %v683_v47 }
 0x4f2   :  { %835 = vmatprep.mubr.bf16.mxu0 %v12070_v36  ;;  %10404 = vmatpush3.bf16.msra.mxu0 %v10953_v49 }
 0x4f3   :  { %10405 = vmatprep.subr.bf16.mxu0 %v10957_v50 }
 0x4f6   :  { %10406 = vmatpush3.bf16.msra.mxu0 %v10958_v51 }
 0x4f7   :  { %10407 = vmatprep.subr.bf16.mxu0 %v10962_v52 }
 0x4f9   :  { %836 = vmatmul.mubr.bf16.gmra.mrb[12].mxu0 %v684_v46 }
 0x4fa   :  { %10408 = vmatpush3.bf16.msra.mxu0 %v10963_v53 }
 0x4fb   :  { %10409 = vmatprep.subr.bf16.mxu0 %v10967_v54 }
 0x4fe   :  { %10410 = vmatpush3.bf16.msra.mxu0 %v10968_v55 }
 0x4ff   :  { %10411 = vmatprep.subr.bf16.mxu0 %v10972_v56 }
 0x502   :  { %10412 = vmatpush3.bf16.msra.mxu0 %v10973_v57  ;;  %v10927_v57 = vld [vmem:[%s13306_s4 + $0x4] ss:$12 sps:$4 sm:$0xff]  }
 0x503   :  { %10413 = vmatprep.subr.bf16.mxu0 %v10977_v58 }
 0x506   :  { %10414 = vmatpush3.bf16.msra.mxu0 %v10978_v59  ;;  %v10925_v59 = vld [vmem:[%s13306_s4] ss:$12 sps:$4 sm:$0xff]  }
 0x5c4   :  { %v827_v4 = vpop.f32.mrb[8].mxu0 }
 0x5c5   :  { %v828_v5 = vadd.f32 %v827_v4, %v706_v1  ;;  %v829_v6 = vpop.f32.mrb[9].mxu0  ;;  %v10936_v4 = vld [vmem:[%s13306_s4 + $0x4c] ss:$12 sps:$4 sm:$0xff]  }
 0x5c6   :  { %v830_v7 = vadd.f32 %v829_v6, %v710_v3  ;;  %v831_v8 = vpop.f32.mrb[10].mxu0  ;;  %v10937_v6 = vld [vmem:[%s13306_s4 + $0x60] ss:$12 sps:$4 sm:$0xff]  }
 0x5c7   :  { %v832_v9 = vadd.f32 %v831_v8, %v706_v1  ;;  %v833_v10 = vpop.f32.mrb[11].mxu0  ;;  %v846_v12 = vmax.f32 %v828_v5, 0.0  ;;  %v10939_v5 = vld [vmem:[%s13306_s4 + $0x64] ss:$12 sps:$4 sm:$0xff]  }
 0x5c8   :  { %v834_v11 = vadd.f32 %v833_v10, %v710_v3  ;;  %v847_v14 = vmax.f32 %v830_v7, 0.0  ;;  %v10942_v7 = vld [vmem:[%s13306_s4 + $0x7c] ss:$12 sps:$4 sm:$0xff]   ;;  %v10940_v8 = vld [vmem:[%s13306_s4 + $0x78] ss:$12 sps:$4 sm:$0xff]  }
 0x5c9   :  { %v848_v13 = vmax.f32 %v832_v9, 0.0  ;;  %v10945_v9 = vld [vmem:[%s13306_s4 + $0x94] ss:$12 sps:$4 sm:$0xff]   ;;  %v10948_v10 = vld [vmem:[%s13306_s4 + $0xac] ss:$12 sps:$4 sm:$0xff]  }
 0x5ca   :  { %v849_v15 = vmax.f32 %v834_v11, 0.0  ;;  %v10946_v11 = vld [vmem:[%s13306_s4 + $0xa8] ss:$12 sps:$4 sm:$0xff]  }
 0x5cb   :  { %v854_v16 = vpack.c.bf16 %v848_v13, %v846_v12  ;;  %v10951_v12 = vld [vmem:[%s13306_s4 + $0xc4] ss:$12 sps:$4 sm:$0xff]   ;;  %v10949_v13 = vld [vmem:[%s13306_s4 + $0xc0] ss:$12 sps:$4 sm:$0xff]  }
 0x5cc   :  { %v855_v17 = vpack.c.bf16 %v849_v15, %v847_v14  ;;  %v837_v18 = vpop.f32.mrb[12].mxu0  ;;  %v10956_v14 = vld [vmem:[%s13306_s4 + $0xdc] ss:$12 sps:$4 sm:$0xff]   ;;  %v10954_v15 = vld [vmem:[%s13306_s4 + $0xd8] ss:$12 sps:$4 sm:$0xff]  }
 0x5cd   :  { %v858_v19 = vunpack.c.l.bf16 %v854_v16  ;;  %v860_v20 = vunpack.c.h.bf16 %v854_v16  ;;  %v838_v21 = vadd.f32 %v837_v18, %v706_v1  ;;  %v839_v22 = vpop.f32.mrb[13].mxu0  ;;  %v10961_v16 = vld [vmem:[%s13306_s4 + $0xf4] ss:$12 sps:$4 sm:$0xff]   ;;  %v10966_v18 = vld [vmem:[%s13306_s4 + $0x10c] ss:$12 sps:$4 sm:$0xff]  }
 0x5ce   :  { %v859_v23 = vunpack.c.l.bf16 %v855_v17  ;;  %v861_v24 = vunpack.c.h.bf16 %v855_v17  ;;  %v840_v25 = vadd.f32 %v839_v22, %v710_v3  ;;  %v841_v26 = vpop.f32.mrb[14].mxu0  ;;  %v10959_v17 = vld [vmem:[%s13306_s4 + $0xf0] ss:$12 sps:$4 sm:$0xff]  }
 0x5cf   :  { %v866_v27 = vmul.f32 %v858_v19, %v12380_v29  ;;  %v868_v28 = vmul.f32 %v860_v20, %v12386_v34  ;;  %v842_v30 = vadd.f32 %v841_v26, %v706_v1  ;;  %v843_v32 = vpop.f32.mrb[15].mxu0  ;;  %v850_v39 = vmax.f32 %v838_v21, 0.0  ;;  %v10933_v1 = vld [vmem:[%s13306_s4 + $0x34] ss:$12 sps:$4 sm:$0xff]   ;;  %v10971_v20 = vld [vmem:[%s13306_s4 + $0x124] ss:$12 sps:$4 sm:$0xff]  }
 0x5d0   :  { %v844_v35 = vadd.f32 %v843_v32, %v710_v3  ;;  %v867_v37 = vmul.f32 %v859_v23, %v12380_v29  ;;  %v869_v38 = vmul.f32 %v861_v24, %v12386_v34  ;;  %v851_v42 = vmax.f32 %v840_v25, 0.0  ;;  %v10931_v3 = vld [vmem:[%s13306_s4 + $0x30] ss:$12 sps:$4 sm:$0xff]   ;;  %v10964_v19 = vld [vmem:[%s13306_s4 + $0x108] ss:$12 sps:$4 sm:$0xff]  }
 0x5d1   :  { %v852_v40 = vmax.f32 %v842_v30, 0.0  ;;  %v874_v46 = vpack.c.bf16 %v868_v28, %v866_v27  ;;  %v10969_v21 = vld [vmem:[%s13306_s4 + $0x120] ss:$12 sps:$4 sm:$0xff]   ;;  %v10976_v22 = vld [vmem:[%s13306_s4 + $0x13c] ss:$12 sps:$4 sm:$0xff]  }
 0x5d2   :  { %v853_v43 = vmax.f32 %v844_v35, 0.0  ;;  %v875_v44 = vpack.c.bf16 %v869_v38, %v867_v37  ;;  %v10974_v23 = vld [vmem:[%s13306_s4 + $0x138] ss:$12 sps:$4 sm:$0xff]   ;;  %v10981_v24 = vld [vmem:[%s13306_s4 + $0x154] ss:$12 sps:$4 sm:$0xff]   ;;  %v12491_v38 = vadd.s32 8, %v12430_v61 }
 0x5d3   :  { %v856_v45 = vpack.c.bf16 %v852_v40, %v850_v39  ;;  %v10982_v25 = vld [vmem:[%s13306_s4 + $0x158] ss:$12 sps:$4 sm:$0xff]   ;;  %v10979_v26 = vld [vmem:[%s13306_s4 + $0x150] ss:$12 sps:$4 sm:$0xff]   ;;  %v10984_v32 = vld [vmem:[%s13306_s4 + $0x168] ss:$12 sps:$4 sm:$0xff]  }
 0x5d4   :  { %v857_v47 = vpack.c.bf16 %v853_v43, %v851_v42  ;;  %878 = vmatprep.subr.bf16.mxu1 %v875_v44  ;;  %v10983_v27 = vld [vmem:[%s13306_s4 + $0x98] ss:$12 sps:$4 sm:$0xff]   ;;  %10415 = vmatprep.subr.bf16.mxu0 %v10982_v25  ;;  %v10987_v30 = vld [vmem:[%s13306_s4 + $0x170] ss:$12 sps:$4 sm:$0xff]   ;;  %v9481_v37 = vld [vmem:[%s13307_s23] ss:$0 sm:$0xff] }
 0x5d5   :  { %v862_v48 = vunpack.c.l.bf16 %v856_v45  ;;  %v864_v49 = vunpack.c.h.bf16 %v856_v45  ;;  %879 = vmatpush1.bf16.msra.mxu1 %v874_v46  ;;  %10416 = vmatpush3.bf16.msra.mxu0 %v10983_v27  ;;  %v10986_v28 = vld [vmem:[%s13306_s4 + $0x16c] ss:$12 sps:$4 sm:$0xff]   ;;  %v10988_v35 = vld [vmem:[%s13306_s4 + $0xb0] ss:$12 sps:$4 sm:$0xff]   ;;  %vm1408_vm5 = vcmp.eq.s32.totalorder %v9481_v37, %v12430_v61  ;;  %vm1409_vm6 = vcmp.eq.s32.totalorder %v9481_v37, %v12491_v38 }
 0x5d6   :  { %v863_v50 = vunpack.c.l.bf16 %v857_v47  ;;  %v865_v51 = vunpack.c.h.bf16 %v857_v47  ;;  %10417 = vmatprep.subr.bf16.mxu0 %v10987_v30  ;;  %v12071_v39 = vmov 0.0   ;;  %v1574_v27 = vld [vmem:[%s13308_s27 + $0x1c8] sm:$0xff] }
 0x5d7   :  { %v870_v52 = vmul.f32 %v862_v48, %v12384_v33  ;;  %v872_v53 = vmul.f32 %v864_v49, %v12382_v31  ;;  %v12496_v40 = vsel %vm1408_vm5, 1.0, %v12071_v39  ;;  %v12499_v42 = vsel %vm1409_vm6, 1.0, %v12071_v39  ;;  %v1586_v37 = vld [vmem:[%s13308_s27 + $0x228] sm:$0xff] }
 0x5d8   :  { %v871_v54 = vmul.f32 %v863_v50, %v12384_v33  ;;  %v873_v55 = vmul.f32 %v865_v51, %v12382_v31  ;;  %v1414_v43 = vsel %vm384_vm0, %v12496_v40, 0.0  ;;  %v1417_v44 = vsel %vm384_vm0, %v12499_v42, 0.0 }
 0x5d9   :  { %v876_v58 = vpack.c.bf16 %v872_v53, %v870_v52  ;;  %10418 = vmatpush3.bf16.msra.mxu0 %v10988_v35  ;;  %1415 = vadd.xlane.f32.xlu0 %v1414_v43  ;;  %v1582_v35 = vld [vmem:[%s13308_s27 + $0x208] sm:$0xff] }
 0x5da   :  { %v877_v56 = vpack.c.bf16 %v873_v55, %v871_v54  ;;  %1418 = vadd.xlane.f32.xlu1 %v1417_v44  ;;  %v9553_v43 = vcombine.high %v1582_v35, %v1586_v37  ;;  %v9552_v44 = vcombine.low %v1582_v35, %v1586_v37 }
 0x5dc   :  { %880 = vmatprep.subr.bf16.mxu1 %v877_v56 }
 0x5dd   :  { %881 = vmatpush1.bf16.msra.mxu1 %v876_v58 }
 0x5de   :  { %1280 = vmatprep.subr.bf16.mxu1 %v10927_v57 }
 0x5e0   :  { %9431 = vmatmul.mubr.msk.bf16.vlgmr.msra.gmra.mrb[4].mxu1 %vm384_vm0, %v12362_v2  ;;  %v10934_v2 = vld [vmem:[%s13306_s4 + $0x48] ss:$12 sps:$4 sm:$0xff]  }
 0x5e1   :  { %920 = vmatprep.mubr.bf16.mxu1 %v12070_v36  ;;  %1281 = vmatpush1.bf16.msra.mxu1 %v10925_v59 }
 0x5e2   :  { %1282 = vmatprep.subr.bf16.mxu1 %v10930_v60 }
 0x5e5   :  { %1283 = vmatpush1.bf16.msra.mxu1 %v10928_v63 }
 0x5e6   :  { %1284 = vmatprep.subr.bf16.mxu1 %v10933_v1 }
 0x5e8   :  { %9432 = vmatmul.mubr.msk.bf16.gmra.mrb[8].mxu1 %vm384_vm0, %v12393_v41  ;;  %v10943_v41 = vld [vmem:[%s13306_s4 + $0x90] ss:$12 sps:$4 sm:$0xff]  }
 0x5e9   :  { %1285 = vmatpush1.bf16.msra.mxu1 %v10931_v3  ;;  %v1518_v3 = vld [vmem:[%s13308_s27 + $0x8] sm:$0xff] }
 0x5ea   :  { %1286 = vmatprep.subr.bf16.mxu1 %v10936_v4  ;;  %v1522_v4 = vld [vmem:[%s13308_s27 + $0x28] sm:$0xff] }
 0x5ed   :  { %1287 = vmatpush1.bf16.msra.mxu1 %v10934_v2  ;;  %v9488_v2 = vcombine.low %v1518_v3, %v1522_v4 }
 0x5ee   :  { %1288 = vmatprep.subr.bf16.mxu1 %v10939_v5  ;;  %v9489_v5 = vcombine.high %v1518_v3, %v1522_v4  ;;  %v1630_v3 = vld [vmem:[%s13308_s27 + $0x388] sm:$0xff] }
 0x5ef   :  { %v1634_v4 = vld [vmem:[%s13308_s27 + $0x3a8] sm:$0xff] }
 0x5f1   :  { %1289 = vmatpush1.bf16.msra.mxu1 %v10937_v6  ;;  %v1526_v6 = vld [vmem:[%s13308_s27 + $0x48] sm:$0xff] }
 0x5f2   :  { %1290 = vmatprep.subr.bf16.mxu1 %v10942_v7 }
 0x5f5   :  { %1291 = vmatpush1.bf16.msra.mxu1 %v10940_v8  ;;  %v1534_v8 = vld [vmem:[%s13308_s27 + $0x88] sm:$0xff] }
 0x5f6   :  { %1292 = vmatprep.subr.bf16.mxu1 %v10945_v9  ;;  %v1538_v9 = vld [vmem:[%s13308_s27 + $0xa8] sm:$0xff] }
 0x5f9   :  { %1293 = vmatpush1.bf16.msra.mxu1 %v10943_v41  ;;  %v9505_v41 = vcombine.high %v1534_v8, %v1538_v9 }
 0x5fa   :  { %1294 = vmatprep.subr.bf16.mxu1 %v10948_v10  ;;  %v9504_v10 = vcombine.low %v1534_v8, %v1538_v9 }
 0x5fd   :  { %1295 = vmatpush1.bf16.msra.mxu1 %v10946_v11  ;;  %v1542_v11 = vld [vmem:[%s13308_s27 + $0xc8] sm:$0xff] }
 0x5fe   :  { %1296 = vmatprep.subr.bf16.mxu1 %v10951_v12  ;;  %v1546_v12 = vld [vmem:[%s13308_s27 + $0xe8] sm:$0xff] }
 0x601   :  { %1297 = vmatpush1.bf16.msra.mxu1 %v10949_v13  ;;  %v9513_v13 = vcombine.high %v1542_v11, %v1546_v12 }
 0x602   :  { %1298 = vmatprep.subr.bf16.mxu1 %v10956_v14  ;;  %v9512_v14 = vcombine.low %v1542_v11, %v1546_v12 }
 0x605   :  { %1299 = vmatpush1.bf16.msra.mxu1 %v10954_v15  ;;  %v1550_v15 = vld [vmem:[%s13308_s27 + $0x108] sm:$0xff] }
 0x606   :  { %1300 = vmatprep.subr.bf16.mxu1 %v10961_v16  ;;  %v1554_v16 = vld [vmem:[%s13308_s27 + $0x128] sm:$0xff] }
 0x609   :  { %1301 = vmatpush1.bf16.msra.mxu1 %v10959_v17  ;;  %v9521_v17 = vcombine.high %v1550_v15, %v1554_v16 }
 0x60a   :  { %1302 = vmatprep.subr.bf16.mxu1 %v10966_v18  ;;  %v9520_v18 = vcombine.low %v1550_v15, %v1554_v16 }
 0x60d   :  { %1303 = vmatpush1.bf16.msra.mxu1 %v10964_v19  ;;  %v1558_v19 = vld [vmem:[%s13308_s27 + $0x148] sm:$0xff] }
 0x60e   :  { %1304 = vmatprep.subr.bf16.mxu1 %v10971_v20  ;;  %v1562_v20 = vld [vmem:[%s13308_s27 + $0x168] sm:$0xff] }
 0x611   :  { %1305 = vmatpush1.bf16.msra.mxu1 %v10969_v21  ;;  %v9529_v21 = vcombine.high %v1558_v19, %v1562_v20 }
 0x612   :  { %1306 = vmatprep.subr.bf16.mxu1 %v10976_v22  ;;  %v9528_v22 = vcombine.low %v1558_v19, %v1562_v20 }
 0x615   :  { %1307 = vmatpush1.bf16.msra.mxu1 %v10974_v23  ;;  %v1566_v23 = vld [vmem:[%s13308_s27 + $0x188] sm:$0xff] }
 0x616   :  { %1308 = vmatprep.subr.bf16.mxu1 %v10981_v24  ;;  %v1570_v24 = vld [vmem:[%s13308_s27 + $0x1a8] sm:$0xff] }
 0x617   :  { %v9537_v25 = vcombine.high %v1566_v23, %v1570_v24 }
 0x619   :  { %1309 = vmatpush1.bf16.msra.mxu1 %v10979_v26  ;;  %v9536_v26 = vcombine.low %v1566_v23, %v1570_v24 }
 0x61a   :  { %1310 = vmatprep.subr.bf16.mxu1 %v10986_v28  ;;  %v1578_v28 = vld [vmem:[%s13308_s27 + $0x1e8] sm:$0xff] }
 0x61b   :  { %v9545_v30 = vcombine.high %v1574_v27, %v1578_v28 }
 0x61d   :  { %1311 = vmatpush1.bf16.msra.mxu1 %v10984_v32  ;;  %v9544_v32 = vcombine.low %v1574_v27, %v1578_v28 }
 0x61e   :  { %2797 = vmatprep.subr.bf16.mxu1 %v9489_v5  ;;  %v9600_v5 = vcombine.low %v1630_v3, %v1634_v4 }
 0x6b3   :  { %v912_v45 = vpop.f32.mrb[4].mxu1 }
 0x6b4   :  { %v914_v46 = vpop.f32.mrb[5].mxu1  ;;  %v931_v48 = vmul.f32 %v912_v45, %v12380_v29  ;;  %v1590_v45 = vld [vmem:[%s13308_s27 + $0x248] sm:$0xff] }
 0x6b5   :  { %v916_v47 = vpop.f32.mrb[6].mxu1  ;;  %v932_v51 = vmul.f32 %v914_v46, %v12380_v29  ;;  %v1594_v46 = vld [vmem:[%s13308_s27 + $0x268] sm:$0xff] }
 0x6b6   :  { %v933_v49 = vmul.f32 %v916_v47, %v12386_v34  ;;  %v918_v50 = vpop.f32.mrb[7].mxu1  ;;  %v9561_v47 = vcombine.high %v1590_v45, %v1594_v46 }
 0x6b7   :  { %v934_v52 = vmul.f32 %v918_v50, %v12386_v34  ;;  %v1602_v50 = vld [vmem:[%s13308_s27 + $0x2a8] sm:$0xff] }
 0x6b8   :  { %v939_v53 = vpack.c.bf16 %v933_v49, %v931_v48  ;;  %v9560_v48 = vcombine.low %v1590_v45, %v1594_v46  ;;  %v1598_v49 = vld [vmem:[%s13308_s27 + $0x288] sm:$0xff] }
 0x6b9   :  { %v940_v54 = vpack.c.bf16 %v934_v52, %v932_v51  ;;  %v9569_v51 = vcombine.high %v1598_v49, %v1602_v50  ;;  %v9568_v52 = vcombine.low %v1598_v49, %v1602_v50 }
 0x6bb   :  { %v922_v55 = vpop.f32.mrb[8].mxu1  ;;  %1312 = vmatprep.mubr.bf16.mxu1 %v940_v54  ;;  %1365 = vmatprep.mubr.bf16.mxu0 %v940_v54  ;;  %v1610_v54 = vld [vmem:[%s13308_s27 + $0x2e8] sm:$0xff] }
 0x6bc   :  { %v924_v56 = vpop.f32.mrb[9].mxu1  ;;  %1313 = vmatmul.mubr.bf16.vlgmr.msra.gmra.mrb[12].mxu1 %v939_v53  ;;  %1366 = vmatmul.mubr.bf16.vlgmr.msra.gmra.mrb[16].mxu0 %v939_v53  ;;  %v935_v58 = vmul.f32 %v922_v55, %v12384_v33  ;;  %v1606_v53 = vld [vmem:[%s13308_s27 + $0x2c8] sm:$0xff] }
 0x6bd   :  { %v926_v57 = vpop.f32.mrb[10].mxu1  ;;  %v936_v34 = vmul.f32 %v924_v56, %v12384_v33  ;;  %v1530_v33 = vld [vmem:[%s13308_s27 + $0x68] sm:$0xff]  ;;  %2798 = vmatpush1.bf16.msra.mxu1 %v9488_v2  ;;  %v9577_v55 = vcombine.high %v1606_v53, %v1610_v54  ;;  %v9576_v56 = vcombine.low %v1606_v53, %v1610_v54  ;;  %v9601_v2 = vcombine.high %v1630_v3, %v1634_v4 }
 0x6be   :  { %v937_v59 = vmul.f32 %v926_v57, %v12382_v31  ;;  %v928_v29 = vpop.f32.mrb[11].mxu1  ;;  %v9497_v7 = vcombine.high %v1526_v6, %v1530_v33  ;;  %v1614_v57 = vld [vmem:[%s13308_s27 + $0x308] sm:$0xff] }
 0x6bf   :  { %v938_v60 = vmul.f32 %v928_v29, %v12382_v31  ;;  %v9496_v31 = vcombine.low %v1526_v6, %v1530_v33  ;;  %v1419_v6 = vpop.xlane.xlu1 %1418  ;;  %v1007_v33 = vld [vmem:[%s13309_s26] sm:$0x7] }
 0x6c0   :  { %v941_v63 = vpack.c.bf16 %v937_v59, %v935_v58  ;;  %2799 = vmatprep.subr.bf16.mxu1 %v9497_v7  ;;  %v1618_v58 = vld [vmem:[%s13308_s27 + $0x328] sm:$0xff]  ;;  %v1416_v7 = vpop.xlane.xlu0 %1415  ;;  %v1421_v8 = vmax.f32 %v1419_v6, 1.0  ;;  %v1012_v9 = vrot.slane %v1007_v33, %v12433_v62 }
 0x6c1   :  { %v942_v1 = vpack.c.bf16 %v938_v60, %v936_v34  ;;  %2800 = vmatpush1.bf16.msra.mxu1 %v9496_v31  ;;  %v9585_v59 = vcombine.high %v1614_v57, %v1618_v58  ;;  %v9584_v29 = vcombine.low %v1614_v57, %v1618_v58  ;;  %v1622_v34 = vld [vmem:[%s13308_s27 + $0x348] sm:$0xff]  ;;  %v12546_v31 = vsub.s32 2, %v12430_v61 }
 0x6c2   :  { %2801 = vmatprep.subr.bf16.mxu1 %v9505_v41  ;;  %v1626_v60 = vld [vmem:[%s13308_s27 + $0x368] sm:$0xff]  ;;  %v1420_v41 = vmax.f32 %v1416_v7, 1.0  ;;  %11555 = vrcp.f32 %v1421_v8 }
 0x6c3   :  { %1322 = vmatprep.mubr.bf16.mxu1 %v942_v1  ;;  %1373 = vmatprep.mubr.bf16.mxu0 %v942_v1  ;;  %v9592_v1 = vcombine.low %v1622_v34, %v1626_v60 }
 0x6c4   :  { %1323 = vmatmul.mubr.bf16.gmra.mrb[16].mxu1 %v941_v63  ;;  %1374 = vmatmul.mubr.bf16.gmra.mrb[20].mxu0 %v941_v63  ;;  %v9593_v63 = vcombine.high %v1622_v34, %v1626_v60  ;;  %11557 = vrcp.f32 %v1420_v41 }
 0x6c5   :  { %1462 = vmatprep.mubr.bf16.mxu0 %v12070_v36  ;;  %2802 = vmatpush1.bf16.msra.mxu1 %v9504_v10  ;;  %v1016_v10 = vrot.slane %v1007_v33, %v12436_v0 }
 0x6c6   :  { %2803 = vmatprep.subr.bf16.mxu1 %v9513_v13  ;;  %v1020_v13 = vrot.slane %v1007_v33, %v12546_v31 }
 0x6c9   :  { %2804 = vmatpush1.bf16.msra.mxu1 %v9512_v14 }
 0x6ca   :  { %2805 = vmatprep.subr.bf16.mxu1 %v9521_v17 }
 0x6cd   :  { %2806 = vmatpush1.bf16.msra.mxu1 %v9520_v18 }
 0x6ce   :  { %2807 = vmatprep.subr.bf16.mxu1 %v9529_v21 }
 0x6d1   :  { %2808 = vmatpush1.bf16.msra.mxu1 %v9528_v22 }
 0x6d2   :  { %2809 = vmatprep.subr.bf16.mxu1 %v9537_v25 }
 0x6d5   :  { %2810 = vmatpush1.bf16.msra.mxu1 %v9536_v26 }
 0x6d6   :  { %2811 = vmatprep.subr.bf16.mxu1 %v9545_v30 }
 0x6d9   :  { %2812 = vmatpush1.bf16.msra.mxu1 %v9544_v32 }
 0x6da   :  { %2813 = vmatprep.subr.bf16.mxu1 %v9553_v43 }
 0x6dd   :  { %2814 = vmatpush1.bf16.msra.mxu1 %v9552_v44 }
 0x6de   :  { %2815 = vmatprep.subr.bf16.mxu1 %v9561_v47 }
 0x6e1   :  { %2816 = vmatpush1.bf16.msra.mxu1 %v9560_v48 }
 0x6e2   :  { %2817 = vmatprep.subr.bf16.mxu1 %v9569_v51  ;;  %v11556_v51 = vpop.eup %11555 }
 0x6e3   :  { %v11558_v57 = vpop.eup %11557 }
 0x6e5   :  { %2818 = vmatpush1.bf16.msra.mxu1 %v9568_v52 }
 0x6e6   :  { %2819 = vmatprep.subr.bf16.mxu1 %v9577_v55 }
 0x6e9   :  { %2820 = vmatpush1.bf16.msra.mxu1 %v9576_v56 }
 0x6ea   :  { %2821 = vmatprep.subr.bf16.mxu1 %v9585_v59 }
 0x6ed   :  { %2822 = vmatpush1.bf16.msra.mxu1 %v9584_v29 }
 0x6ee   :  { %2823 = vmatprep.subr.bf16.mxu1 %v9593_v63 }
 0x6f1   :  { %2824 = vmatpush1.bf16.msra.mxu1 %v9592_v1  ;;  %v1425_v1 = vmul.f32 %v11556_v51, %v12499_v42  ;;  %v1517_v42 = vld [vmem:[%s13308_s27] sm:$0xff] }
 0x6f2   :  { %2825 = vmatprep.subr.bf16.mxu1 %v9601_v2  ;;  %v1423_v2 = vmul.f32 %v11558_v57, %v12496_v40  ;;  %v1581_v51 = vld [vmem:[%s13308_s27 + $0x200] sm:$0xff] }
 0x6f5   :  { %2826 = vmatpush1.bf16.msra.mxu1 %v9600_v5 }
 0x78f   :  { %v1314_v11 = vpop.f32.mrb[12].mxu1  ;;  %v10419_v12 = vpop.f32.mrb[16].mxu0 }
 0x790   :  { %v1315_v14 = vadd.f32 %v1314_v11, %v1012_v9  ;;  %v1316_v15 = vpop.f32.mrb[13].mxu1  ;;  %v10420_v16 = vpop.f32.mrb[17].mxu0  ;;  %v1426_v11 = vpack.c.bf16 %v1425_v1, %v1423_v2  ;;  %v1609_v1 = vld [vmem:[%s13308_s27 + $0x2e0] sm:$0xff] }
 0x791   :  { %v1317_v17 = vadd.f32 %v1316_v15, %v1016_v10  ;;  %v10421_v18 = vadd.f32 %v10420_v16, %v10419_v12  ;;  %v1318_v19 = vpop.f32.mrb[14].mxu1  ;;  %v10422_v20 = vpop.f32.mrb[18].mxu0  ;;  %v1521_v12 = vld [vmem:[%s13308_s27 + $0x20] sm:$0xff] }
 0x792   :  { %v1319_v21 = vadd.f32 %v1318_v19, %v1012_v9  ;;  %v1320_v22 = vpop.f32.mrb[15].mxu1  ;;  %v10423_v23 = vpop.f32.mrb[19].mxu0  ;;  %v1382_v27 = vmax.f32 %v1315_v14, 0.0  ;;  %v9487_v40 = vcombine.high %v1517_v42, %v1521_v12  ;;  %v1529_v14 = vld [vmem:[%s13308_s27 + $0x60] sm:$0xff]  ;;  %v9486_v15 = vcombine.low %v1517_v42, %v1521_v12 }
 0x793   :  { %v1368_v24 = vadd.f32 %v10421_v18, %v1020_v13  ;;  %v1321_v25 = vadd.f32 %v1320_v22, %v1016_v10  ;;  %v10424_v26 = vadd.f32 %v10423_v23, %v10422_v20  ;;  %v1383_v30 = vmax.f32 %v1317_v17, 0.0  ;;  %v1533_v17 = vld [vmem:[%s13308_s27 + $0x80] sm:$0xff] }
 0x794   :  { %v1385_v28 = vmax.f32 %v1319_v21, 0.0  ;;  %v1537_v18 = vld [vmem:[%s13308_s27 + $0xa0] sm:$0xff] }
 0x795   :  { %v1386_v32 = vmax.f32 %v1321_v25, 0.0  ;;  %v1371_v35 = vadd.f32 %v10424_v26, %v1020_v13  ;;  %v1384_v43 = vmax.f32 %v1368_v24, 0.0  ;;  %v9503_v20 = vcombine.high %v1533_v17, %v1537_v18  ;;  %v1541_v21 = vld [vmem:[%s13308_s27 + $0xc0] sm:$0xff] }
 0x796   :  { %v1394_v37 = vpack.c.bf16 %v1385_v28, %v1382_v27  ;;  %v1545_v22 = vld [vmem:[%s13308_s27 + $0xe0] sm:$0xff]  ;;  %v9502_v23 = vcombine.low %v1533_v17, %v1537_v18  ;;  %v1642_v17 = vld [vmem:[%s13308_s27 + $0x3e8] sm:$0xff] }
 0x797   :  { %v1395_v44 = vpack.c.bf16 %v1386_v32, %v1383_v30  ;;  %v1387_v45 = vmax.f32 %v1371_v35, 0.0  ;;  %v1324_v46 = vpop.f32.mrb[16].mxu1  ;;  %v10425_v47 = vpop.f32.mrb[20].mxu0  ;;  %v9511_v24 = vcombine.high %v1541_v21, %v1545_v22  ;;  %v1549_v25 = vld [vmem:[%s13308_s27 + $0x100] sm:$0xff]  ;;  %v9510_v27 = vcombine.low %v1541_v21, %v1545_v22 }
 0x798   :  { %v1325_v48 = vadd.f32 %v1324_v46, %v1012_v9  ;;  %v1326_v49 = vpop.f32.mrb[17].mxu1  ;;  %v10426_v50 = vpop.f32.mrb[21].mxu0  ;;  %v1553_v26 = vld [vmem:[%s13308_s27 + $0x120] sm:$0xff] }
 0x799   :  { %v1396_v52 = vpack.c.bf16 %v1387_v45, %v1384_v43  ;;  %v1327_v53 = vadd.f32 %v1326_v49, %v1016_v10  ;;  %v10427_v54 = vadd.f32 %v10426_v50, %v10425_v47  ;;  %v1328_v55 = vpop.f32.mrb[18].mxu1  ;;  %v10428_v56 = vpop.f32.mrb[22].mxu0  ;;  %1430 = vmatprep.subr.bf16.mxu0 %v1395_v44  ;;  %v9519_v28 = vcombine.high %v1549_v25, %v1553_v26  ;;  %v1557_v30 = vld [vmem:[%s13308_s27 + $0x140] sm:$0xff] }
 0x79a   :  { %v1329_v58 = vadd.f32 %v1328_v55, %v1012_v9  ;;  %v1330_v59 = vpop.f32.mrb[19].mxu1  ;;  %v10429_v29 = vpop.f32.mrb[23].mxu0  ;;  %1431 = vmatpush1.bf16.msra.mxu0 %v1394_v37  ;;  %v1388_v3 = vmax.f32 %v1325_v48, 0.0  ;;  %v1561_v32 = vld [vmem:[%s13308_s27 + $0x160] sm:$0xff]  ;;  %v9518_v35 = vcombine.low %v1549_v25, %v1553_v26  ;;  %v1650_v25 = vld [vmem:[%s13308_s27 + $0x428] sm:$0xff] }
 0x79b   :  { %v1376_v34 = vadd.f32 %v10427_v54, %v1020_v13  ;;  %v1331_v60 = vadd.f32 %v1330_v59, %v1016_v10  ;;  %v10430_v63 = vadd.f32 %v10429_v29, %v10428_v56  ;;  %v1389_v5 = vmax.f32 %v1327_v53, 0.0  ;;  %v1565_v43 = vld [vmem:[%s13308_s27 + $0x180] sm:$0xff] }
 0x79c   :  { %v1391_v4 = vmax.f32 %v1329_v58, 0.0  ;;  %v9527_v37 = vcombine.high %v1557_v30, %v1561_v32  ;;  %v1569_v44 = vld [vmem:[%s13308_s27 + $0x1a0] sm:$0xff]  ;;  %v9526_v45 = vcombine.low %v1557_v30, %v1561_v32 }
 0x79d   :  { %v1392_v6 = vmax.f32 %v1331_v60, 0.0  ;;  %v1379_v33 = vadd.f32 %v10430_v63, %v1020_v13  ;;  %v1390_v8 = vmax.f32 %v1376_v34, 0.0  ;;  %v1525_v13 = vld [vmem:[%s13308_s27 + $0x40] sm:$0xff]  ;;  %v9535_v46 = vcombine.high %v1565_v43, %v1569_v44 }
 0x79e   :  { %v1397_v7 = vpack.c.bf16 %v1391_v4, %v1388_v3  ;;  %v9495_v16 = vcombine.high %v1525_v13, %v1529_v14  ;;  %v9494_v19 = vcombine.low %v1525_v13, %v1529_v14  ;;  %v1573_v47 = vld [vmem:[%s13308_s27 + $0x1c0] sm:$0xff]  ;;  %v9534_v49 = vcombine.low %v1565_v43, %v1569_v44  ;;  %v1654_v44 = vld [vmem:[%s13308_s27 + $0x448] sm:$0xff] }
 0x79f   :  { %v1398_v9 = vpack.c.bf16 %v1392_v6, %v1389_v5  ;;  %v1393_v41 = vmax.f32 %v1379_v33, 0.0  ;;  %v1577_v48 = vld [vmem:[%s13308_s27 + $0x1e0] sm:$0xff] }
 0x7a0   :  { %v9543_v50 = vcombine.high %v1573_v47, %v1577_v48  ;;  %v9542_v53 = vcombine.low %v1573_v47, %v1577_v48  ;;  %v1589_v55 = vld [vmem:[%s13308_s27 + $0x240] sm:$0xff] }
 0x7a1   :  { %v1399_v10 = vpack.c.bf16 %v1393_v41, %v1390_v8  ;;  %1432 = vmatprep.subr.bf16.mxu0 %v1398_v9  ;;  %v1593_v56 = vld [vmem:[%s13308_s27 + $0x260] sm:$0xff] }
 0x7a2   :  { %1433 = vmatpush1.bf16.msra.mxu0 %v1397_v7  ;;  %v9559_v58 = vcombine.high %v1589_v55, %v1593_v56  ;;  %v1597_v59 = vld [vmem:[%s13308_s27 + $0x280] sm:$0xff]  ;;  %v9558_v34 = vcombine.low %v1589_v55, %v1593_v56 }
 0x7a3   :  { %10678 = vmatprep.subr.bf16.mxu0 %v12071_v39  ;;  %v1601_v29 = vld [vmem:[%s13308_s27 + $0x2a0] sm:$0xff] }
 0x7a4   :  { %v9567_v60 = vcombine.high %v1597_v59, %v1601_v29  ;;  %v1605_v63 = vld [vmem:[%s13308_s27 + $0x2c0] sm:$0xff]  ;;  %v9566_v3 = vcombine.low %v1597_v59, %v1601_v29  ;;  %v3765_v59 = vld [vmem:[%s13310_s25 + $0x8] sm:$0xff]  }
 0x7a5   :  { %9484 = vmatmul.mubr.msk.bf16.vlgmr.msra.gmra.mrb[24].mxu0 %vm384_vm0, %v1426_v11  ;;  %v9575_v4 = vcombine.high %v1605_v63, %v1609_v1  ;;  %v1613_v2 = vld [vmem:[%s13308_s27 + $0x300] sm:$0xff]  ;;  %v9574_v6 = vcombine.low %v1605_v63, %v1609_v1 }
 0x7a6   :  { %10679 = vmatpush3.bf16.msra.mxu0 %v1396_v52  ;;  %10682 = vmatprep.mubr.msk.bf16.mxu0 %vm12072_vm7, %v12071_v39  ;;  %v1585_v52 = vld [vmem:[%s13308_s27 + $0x220] sm:$0xff] }
 0x7a7   :  { %10680 = vmatprep.subr.bf16.mxu0 %v12071_v39  ;;  %v9551_v54 = vcombine.high %v1581_v51, %v1585_v52  ;;  %v9550_v57 = vcombine.low %v1581_v51, %v1585_v52  ;;  %v1617_v5 = vld [vmem:[%s13308_s27 + $0x320] sm:$0xff] }
 0x7a8   :  { %v9583_v33 = vcombine.high %v1613_v2, %v1617_v5  ;;  %v1621_v7 = vld [vmem:[%s13308_s27 + $0x340] sm:$0xff]  ;;  %v9582_v9 = vcombine.low %v1613_v2, %v1617_v5  ;;  %v1670_v5 = vld [vmem:[%s13308_s27 + $0x4c8] sm:$0xff] }
 0x7a9   :  { %v1625_v8 = vld [vmem:[%s13308_s27 + $0x360] sm:$0xff] }
 0x7aa   :  { %10681 = vmatpush3.bf16.msra.mxu0 %v1399_v10  ;;  %v9591_v41 = vcombine.high %v1621_v7, %v1625_v8  ;;  %v1633_v10 = vld [vmem:[%s13308_s27 + $0x3a0] sm:$0xff]  ;;  %v9590_v42 = vcombine.low %v1621_v7, %v1625_v8 }
 0x7ab   :  { %2711 = vmatprep.subr.bf16.mxu0 %v9487_v40  ;;  %v1637_v13 = vld [vmem:[%s13308_s27 + $0x3c0] sm:$0xff] }
 0x7ac   :  { %v1641_v14 = vld [vmem:[%s13308_s27 + $0x3e0] sm:$0xff] }
 0x7ad   :  { %10683 = vmatmul.mubr.msk.bf16.vlgmr.msra.gmra.mrb[28].mxu0 %vm384_vm0, %v1426_v11  ;;  %v1629_v11 = vld [vmem:[%s13308_s27 + $0x380] sm:$0xff]  ;;  %v9606_v18 = vcombine.low %v1637_v13, %v1641_v14 }
 0x7ae   :  { %2712 = vmatpush1.bf16.msra.mxu0 %v9486_v15  ;;  %v9599_v12 = vcombine.high %v1629_v11, %v1633_v10  ;;  %v9598_v40 = vcombine.low %v1629_v11, %v1633_v10  ;;  %v1638_v15 = vld [vmem:[%s13308_s27 + $0x3c8] sm:$0xff]  ;;  %v1645_v21 = vld [vmem:[%s13308_s27 + $0x400] sm:$0xff]  ;;  %v3768_v11 = vunpack.c.l.bf16 %v3765_v59 }
 0x7af   :  { %2713 = vmatprep.subr.bf16.mxu0 %v9495_v16  ;;  %v9607_v16 = vcombine.high %v1637_v13, %v1641_v14  ;;  %v1649_v22 = vld [vmem:[%s13308_s27 + $0x420] sm:$0xff] }
 0x7b0   :  { %v9614_v26 = vcombine.low %v1645_v21, %v1649_v22  ;;  %v1657_v43 = vld [vmem:[%s13308_s27 + $0x460] sm:$0xff] }
 0x7b1   :  { %v1661_v51 = vld [vmem:[%s13308_s27 + $0x480] sm:$0xff] }
 0x7b2   :  { %2714 = vmatpush1.bf16.msra.mxu0 %v9494_v19  ;;  %v9608_v19 = vcombine.low %v1638_v15, %v1642_v17  ;;  %v1665_v52 = vld [vmem:[%s13308_s27 + $0x4a0] sm:$0xff] }
 0x7b3   :  { %2715 = vmatprep.subr.bf16.mxu0 %v9503_v20  ;;  %v9609_v20 = vcombine.high %v1638_v15, %v1642_v17  ;;  %v1669_v63 = vld [vmem:[%s13308_s27 + $0x4c0] sm:$0xff]  ;;  %v9630_v10 = vcombine.low %v1661_v51, %v1665_v52  ;;  %v1678_v15 = vld [vmem:[%s13308_s27 + $0x508] sm:$0xff] }
 0x7b4   :  { %v1673_v2 = vld [vmem:[%s13308_s27 + $0x4e0] sm:$0xff] }
 0x7b5   :  { %2827 = vmatprep.subr.bf16.mxu1 %v9609_v20  ;;  %v1677_v13 = vld [vmem:[%s13308_s27 + $0x500] sm:$0xff] }
 0x7b6   :  { %2716 = vmatpush1.bf16.msra.mxu0 %v9502_v23  ;;  %v1646_v23 = vld [vmem:[%s13308_s27 + $0x408] sm:$0xff]  ;;  %2828 = vmatpush1.bf16.msra.mxu1 %v9608_v19  ;;  %v1681_v14 = vld [vmem:[%s13308_s27 + $0x520] sm:$0xff]  ;;  %v9638_v19 = vcombine.low %v1669_v63, %v1673_v2 }
 0x7b7   :  { %2717 = vmatprep.subr.bf16.mxu0 %v9511_v24  ;;  %v9615_v24 = vcombine.high %v1645_v21, %v1649_v22  ;;  %v9647_v21 = vcombine.high %v1677_v13, %v1681_v14 }
 0x7ba   :  { %2718 = vmatpush1.bf16.msra.mxu0 %v9510_v27  ;;  %v9616_v27 = vcombine.low %v1646_v23, %v1650_v25 }
 0x7bb   :  { %2719 = vmatprep.subr.bf16.mxu0 %v9519_v28  ;;  %v9617_v28 = vcombine.high %v1646_v23, %v1650_v25  ;;  %v1685_v23 = vld [vmem:[%s13308_s27 + $0x540] sm:$0xff]  ;;  %v1686_v25 = vld [vmem:[%s13308_s27 + $0x548] sm:$0xff] }
 0x7bd   :  { %2840 = vmatprep.subr.bf16.mxu1 %v9617_v28 }
 0x7be   :  { %2720 = vmatpush1.bf16.msra.mxu0 %v9518_v35  ;;  %v1653_v35 = vld [vmem:[%s13308_s27 + $0x440] sm:$0xff] }
 0x7bf   :  { %2721 = vmatprep.subr.bf16.mxu0 %v9527_v37  ;;  %v9622_v56 = vcombine.low %v1653_v35, %v1657_v43 }
 0x7c2   :  { %2722 = vmatpush1.bf16.msra.mxu0 %v9526_v45  ;;  %v1658_v45 = vld [vmem:[%s13308_s27 + $0x468] sm:$0xff] }
 0x7c3   :  { %2723 = vmatprep.subr.bf16.mxu0 %v9535_v46 }
 0x7c6   :  { %2724 = vmatpush1.bf16.msra.mxu0 %v9534_v49  ;;  %v9623_v49 = vcombine.high %v1653_v35, %v1657_v43  ;;  %v1693_v35 = vld [vmem:[%s13308_s27 + $0x580] sm:$0xff]  ;;  %v1694_v43 = vld [vmem:[%s13308_s27 + $0x588] sm:$0xff] }
 0x7c7   :  { %2725 = vmatprep.subr.bf16.mxu0 %v9543_v50  ;;  %v9625_v50 = vcombine.high %v1654_v44, %v1658_v45 }
 0x7ca   :  { %2726 = vmatpush1.bf16.msra.mxu0 %v9542_v53  ;;  %v1662_v53 = vld [vmem:[%s13308_s27 + $0x488] sm:$0xff] }
 0x7cb   :  { %2727 = vmatprep.subr.bf16.mxu0 %v9551_v54  ;;  %v1666_v54 = vld [vmem:[%s13308_s27 + $0x4a8] sm:$0xff] }
 0x7ce   :  { %2728 = vmatpush1.bf16.msra.mxu0 %v9550_v57  ;;  %v9624_v57 = vcombine.low %v1654_v44, %v1658_v45  ;;  %v1698_v44 = vld [vmem:[%s13308_s27 + $0x5a8] sm:$0xff] }
 0x7cf   :  { %2729 = vmatprep.subr.bf16.mxu0 %v9559_v58  ;;  %v3763_v58 = vld [vmem:[%s13310_s25] sm:$0xff]  }
 0x7d0   :  { %v3767_v1 = vunpack.c.h.bf16 %v3763_v58 }
 0x7d2   :  { %2730 = vmatpush1.bf16.msra.mxu0 %v9558_v34  ;;  %v9631_v34 = vcombine.high %v1661_v51, %v1665_v52  ;;  %v1701_v51 = vld [vmem:[%s13308_s27 + $0x5c0] sm:$0xff] }
 0x7d3   :  { %2731 = vmatprep.subr.bf16.mxu0 %v9567_v60  ;;  %v9633_v60 = vcombine.high %v1662_v53, %v1666_v54  ;;  %v1705_v52 = vld [vmem:[%s13308_s27 + $0x5e0] sm:$0xff] }
 0x7d6   :  { %2732 = vmatpush1.bf16.msra.mxu0 %v9566_v3  ;;  %v3766_v3 = vunpack.c.l.bf16 %v3763_v58 }
 0x7d7   :  { %2733 = vmatprep.subr.bf16.mxu0 %v9575_v4 }
 0x7da   :  { %2734 = vmatpush1.bf16.msra.mxu0 %v9574_v6  ;;  %v1674_v6 = vld [vmem:[%s13308_s27 + $0x4e8] sm:$0xff] }
 0x7db   :  { %2735 = vmatprep.subr.bf16.mxu0 %v9583_v33  ;;  %v3769_v33 = vunpack.c.h.bf16 %v3765_v59  ;;  %v9640_v20 = vcombine.low %v1670_v5, %v1674_v6  ;;  %v1519_v59 = vld [vmem:[%s13308_s27 + $0x10] sm:$0xff] }
 0x7dd   :  { %v3779_v17 = vsel %vm384_vm0, %v3769_v33, 0.0  ;;  %v1532_v33 = vld [vmem:[%s13308_s27 + $0x78] sm:$0xff] }
 0x7de   :  { %2736 = vmatpush1.bf16.msra.mxu0 %v9582_v9  ;;  %v3773_v9 = vsel %vm384_vm0, %v3767_v1, 0.0 }
 0x7df   :  { %2737 = vmatprep.subr.bf16.mxu0 %v9591_v41  ;;  %v3770_v41 = vsel %vm384_vm0, %v3766_v3, 0.0  ;;  %3774 = vadd.xlane.f32.xlu1 %v3773_v9 }
 0x7e0   :  { %3771 = vadd.xlane.f32.xlu0 %v3770_v41 }
 0x7e2   :  { %2738 = vmatpush1.bf16.msra.mxu0 %v9590_v42  ;;  %v9632_v42 = vcombine.low %v1662_v53, %v1666_v54  ;;  %v1702_v53 = vld [vmem:[%s13308_s27 + $0x5c8] sm:$0xff] }
 0x7e3   :  { %2739 = vmatprep.subr.bf16.mxu0 %v9599_v12  ;;  %v9639_v12 = vcombine.high %v1669_v63, %v1673_v2  ;;  %3780 = vadd.xlane.f32.xlu1 %v3779_v17  ;;  %v1706_v54 = vld [vmem:[%s13308_s27 + $0x5e8] sm:$0xff]  ;;  %v9670_v63 = vcombine.low %v1701_v51, %v1705_v52  ;;  %v1527_v2 = vld [vmem:[%s13308_s27 + $0x50] sm:$0xff] }
 0x7e4   :  { %v9673_v58 = vcombine.high %v1702_v53, %v1706_v54  ;;  %v9672_v1 = vcombine.low %v1702_v53, %v1706_v54  ;;  %v1543_v17 = vld [vmem:[%s13308_s27 + $0xd0] sm:$0xff]  ;;  %v1568_v54 = vld [vmem:[%s13308_s27 + $0x198] sm:$0xff] }
 0x7e5   :  { %v1571_v53 = vld [vmem:[%s13308_s27 + $0x1b0] sm:$0xff] }
 0x7e6   :  { %2740 = vmatpush1.bf16.msra.mxu0 %v9598_v40  ;;  %v9641_v40 = vcombine.high %v1670_v5, %v1674_v6  ;;  %v1531_v5 = vld [vmem:[%s13308_s27 + $0x70] sm:$0xff]  ;;  %v1528_v6 = vld [vmem:[%s13308_s27 + $0x58] sm:$0xff] }
 0x7e7   :  { %2741 = vmatprep.subr.bf16.mxu0 %v9607_v16  ;;  %v1682_v16 = vld [vmem:[%s13308_s27 + $0x528] sm:$0xff]  ;;  %v9499_v41 = vcombine.high %v1527_v2, %v1531_v5 }
 0x7e8   :  { %v9649_v22 = vcombine.high %v1678_v15, %v1682_v16  ;;  %v9648_v28 = vcombine.low %v1678_v15, %v1682_v16 }
 0x7ea   :  { %2742 = vmatpush1.bf16.msra.mxu0 %v9606_v18  ;;  %v3776_v18 = vsel %vm384_vm0, %v3768_v11, 0.0  ;;  %v9501_v11 = vcombine.high %v1528_v6, %v1532_v33 }
 0x7eb   :  { %2754 = vmatprep.subr.bf16.mxu0 %v9615_v24  ;;  %v1689_v24 = vld [vmem:[%s13308_s27 + $0x560] sm:$0xff]  ;;  %3777 = vadd.xlane.f32.xlu0 %v3776_v18  ;;  %v1547_v18 = vld [vmem:[%s13308_s27 + $0xf0] sm:$0xff] }
 0x7ec   :  { %v9654_v45 = vcombine.low %v1685_v23, %v1689_v24 }
 0x878   :  { %v1464_v30 = vpop.f32.mrb[24].mxu0 }
 0x879   :  { %v1466_v32 = vpop.f32.mrb[25].mxu0 }
 0x87a   :  { %v1468_v37 = vpop.f32.mrb[26].mxu0 }
 0x87b   :  { %v12600_v46 = vpack.c.bf16 %v1468_v37, %v1464_v30  ;;  %v1470_v47 = vpop.f32.mrb[27].mxu0  ;;  %v9655_v30 = vcombine.high %v1685_v23, %v1689_v24  ;;  %v1697_v37 = vld [vmem:[%s13308_s27 + $0x5a0] sm:$0xff]  ;;  %v1551_v24 = vld [vmem:[%s13308_s27 + $0x110] sm:$0xff] }
 0x87c   :  { %v12602_v48 = vpack.c.bf16 %v1470_v47, %v1466_v32 }
 0x87e   :  { %2743 = vmatprep.mubr.bf16.mxu0 %v12602_v48  ;;  %2829 = vmatprep.mubr.bf16.mxu1 %v12602_v48 }
 0x87f   :  { %2744 = vmatmul.mubr.bf16.vlgmr.msra.gmra.mrb[32].mxu0 %v12600_v46  ;;  %2830 = vmatmul.mubr.bf16.vlgmr.msra.gmra.mrb[20].mxu1 %v12600_v46 }
 0x880   :  { %2755 = vmatpush1.bf16.msra.mxu0 %v9614_v26  ;;  %2841 = vmatpush1.bf16.msra.mxu1 %v9616_v27  ;;  %v1507_v55 = vpop.f32.mrb[28].mxu0  ;;  %v1690_v26 = vld [vmem:[%s13308_s27 + $0x568] sm:$0xff]  ;;  %v9646_v27 = vcombine.low %v1677_v13, %v1681_v14  ;;  %v9498_v13 = vcombine.low %v1527_v2, %v1531_v5  ;;  %v9500_v14 = vcombine.low %v1528_v6, %v1532_v33  ;;  %v1583_v5 = vld [vmem:[%s13308_s27 + $0x210] sm:$0xff]  ;;  %v1584_v33 = vld [vmem:[%s13308_s27 + $0x218] sm:$0xff] }
 0x881   :  { %v10684_v29 = vpop.f32.mrb[29].mxu0  ;;  %2756 = vmatprep.subr.bf16.mxu0 %v9623_v49  ;;  %2842 = vmatprep.subr.bf16.mxu1 %v9625_v50  ;;  %v9657_v32 = vcombine.high %v1686_v25, %v1690_v26  ;;  %v9656_v47 = vcombine.low %v1686_v25, %v1690_v26  ;;  %v9663_v49 = vcombine.high %v1693_v35, %v1697_v37  ;;  %v1555_v25 = vld [vmem:[%s13308_s27 + $0x130] sm:$0xff]  ;;  %v1552_v26 = vld [vmem:[%s13308_s27 + $0x118] sm:$0xff] }
 0x882   :  { %v1510_v4 = vpop.f32.mrb[30].mxu0  ;;  %2786 = vmatprep.mubr.bf16.mxu0 %v12070_v36  ;;  %2872 = vmatprep.mubr.bf16.mxu1 %v12070_v36  ;;  %v9665_v50 = vcombine.high %v1694_v43, %v1698_v44  ;;  %v1523_v29 = vld [vmem:[%s13308_s27 + $0x30] sm:$0xff] }
 0x883   :  { %v12620_v7 = vpack.c.bf16 %v1510_v4, %v1507_v55  ;;  %v10685_v8 = vpop.f32.mrb[31].mxu0  ;;  %v9662_v55 = vcombine.low %v1693_v35, %v1697_v37  ;;  %v9491_v3 = vcombine.high %v1519_v59, %v1523_v29  ;;  %v1559_v37 = vld [vmem:[%s13308_s27 + $0x150] sm:$0xff] }
 0x884   :  { %2757 = vmatpush1.bf16.msra.mxu0 %v9622_v56  ;;  %2843 = vmatpush1.bf16.msra.mxu1 %v9624_v57  ;;  %v9664_v56 = vcombine.low %v1694_v43, %v1698_v44  ;;  %v9671_v57 = vcombine.high %v1701_v51, %v1705_v52  ;;  %v9490_v8 = vcombine.low %v1519_v59, %v1523_v29  ;;  %v1563_v43 = vld [vmem:[%s13308_s27 + $0x170] sm:$0xff]  ;;  %v1560_v44 = vld [vmem:[%s13308_s27 + $0x158] sm:$0xff] }
 0x885   :  { %2758 = vmatprep.subr.bf16.mxu0 %v9631_v34  ;;  %2844 = vmatprep.subr.bf16.mxu1 %v9633_v60  ;;  %v1520_v34 = vld [vmem:[%s13308_s27 + $0x18] sm:$0xff]  ;;  %v1567_v52 = vld [vmem:[%s13308_s27 + $0x190] sm:$0xff] }
 0x886   :  { %v1524_v60 = vld [vmem:[%s13308_s27 + $0x38] sm:$0xff]  ;;  %v1575_v29 = vld [vmem:[%s13308_s27 + $0x1d0] sm:$0xff] }
 0x887   :  { %v9493_v4 = vcombine.high %v1520_v34, %v1524_v60  ;;  %v9492_v9 = vcombine.low %v1520_v34, %v1524_v60  ;;  %v1579_v34 = vld [vmem:[%s13308_s27 + $0x1f0] sm:$0xff]  ;;  %v1576_v60 = vld [vmem:[%s13308_s27 + $0x1d8] sm:$0xff] }
 0x888   :  { %2759 = vmatpush1.bf16.msra.mxu0 %v9630_v10  ;;  %2845 = vmatpush1.bf16.msra.mxu1 %v9632_v42  ;;  %v1535_v10 = vld [vmem:[%s13308_s27 + $0x90] sm:$0xff] }
 0x889   :  { %2760 = vmatprep.subr.bf16.mxu0 %v9639_v12  ;;  %2846 = vmatprep.subr.bf16.mxu1 %v9641_v40  ;;  %v1539_v42 = vld [vmem:[%s13308_s27 + $0xb0] sm:$0xff]  ;;  %v1536_v12 = vld [vmem:[%s13308_s27 + $0x98] sm:$0xff] }
 0x88a   :  { %v1540_v40 = vld [vmem:[%s13308_s27 + $0xb8] sm:$0xff]  ;;  %v9507_v15 = vcombine.high %v1535_v10, %v1539_v42  ;;  %v1587_v6 = vld [vmem:[%s13308_s27 + $0x230] sm:$0xff] }
 0x88b   :  { %v9509_v16 = vcombine.high %v1536_v12, %v1540_v40 }
 0x88c   :  { %2761 = vmatpush1.bf16.msra.mxu0 %v9638_v19  ;;  %2847 = vmatpush1.bf16.msra.mxu1 %v9640_v20  ;;  %v1544_v19 = vld [vmem:[%s13308_s27 + $0xd8] sm:$0xff] }
 0x88d   :  { %2762 = vmatprep.subr.bf16.mxu0 %v9647_v21  ;;  %2848 = vmatprep.subr.bf16.mxu1 %v9649_v22  ;;  %v1548_v20 = vld [vmem:[%s13308_s27 + $0xf8] sm:$0xff]  ;;  %v9506_v21 = vcombine.low %v1535_v10, %v1539_v42  ;;  %v9508_v22 = vcombine.low %v1536_v12, %v1540_v40  ;;  %v1591_v42 = vld [vmem:[%s13308_s27 + $0x250] sm:$0xff] }
 0x88e   :  { %v9517_v23 = vcombine.high %v1544_v19, %v1548_v20  ;;  %v1595_v12 = vld [vmem:[%s13308_s27 + $0x270] sm:$0xff]  ;;  %v1592_v40 = vld [vmem:[%s13308_s27 + $0x258] sm:$0xff] }
 0x890   :  { %2763 = vmatpush1.bf16.msra.mxu0 %v9646_v27  ;;  %2849 = vmatpush1.bf16.msra.mxu1 %v9648_v28  ;;  %v1556_v27 = vld [vmem:[%s13308_s27 + $0x138] sm:$0xff]  ;;  %v9514_v28 = vcombine.low %v1543_v17, %v1547_v18 }
 0x891   :  { %2764 = vmatprep.subr.bf16.mxu0 %v9655_v30  ;;  %2850 = vmatprep.subr.bf16.mxu1 %v9657_v32  ;;  %v9516_v30 = vcombine.low %v1544_v19, %v1548_v20  ;;  %v9523_v32 = vcombine.high %v1551_v24, %v1555_v25  ;;  %v9525_v35 = vcombine.high %v1552_v26, %v1556_v27  ;;  %v1603_v19 = vld [vmem:[%s13308_s27 + $0x2b0] sm:$0xff]  ;;  %v1600_v20 = vld [vmem:[%s13308_s27 + $0x298] sm:$0xff] }
 0x894   :  { %2765 = vmatpush1.bf16.msra.mxu0 %v9654_v45  ;;  %2851 = vmatpush1.bf16.msra.mxu1 %v9656_v47  ;;  %v1564_v45 = vld [vmem:[%s13308_s27 + $0x178] sm:$0xff]  ;;  %v9522_v47 = vcombine.low %v1551_v24, %v1555_v25  ;;  %v1607_v25 = vld [vmem:[%s13308_s27 + $0x2d0] sm:$0xff] }
 0x895   :  { %2766 = vmatprep.subr.bf16.mxu0 %v9663_v49  ;;  %2852 = vmatprep.subr.bf16.mxu1 %v9665_v50  ;;  %v9524_v49 = vcombine.low %v1552_v26, %v1556_v27  ;;  %v9531_v50 = vcombine.high %v1559_v37, %v1563_v43  ;;  %v9533_v51 = vcombine.high %v1560_v44, %v1564_v45  ;;  %v1611_v26 = vld [vmem:[%s13308_s27 + $0x2f0] sm:$0xff]  ;;  %v1608_v27 = vld [vmem:[%s13308_s27 + $0x2d8] sm:$0xff] }
 0x898   :  { %2767 = vmatpush1.bf16.msra.mxu0 %v9662_v55  ;;  %2853 = vmatpush1.bf16.msra.mxu1 %v9664_v56  ;;  %v1572_v55 = vld [vmem:[%s13308_s27 + $0x1b8] sm:$0xff]  ;;  %v9530_v56 = vcombine.low %v1559_v37, %v1563_v43  ;;  %v1615_v43 = vld [vmem:[%s13308_s27 + $0x310] sm:$0xff] }
 0x899   :  { %2768 = vmatprep.subr.bf16.mxu0 %v9671_v57  ;;  %2854 = vmatprep.subr.bf16.mxu1 %v9673_v58  ;;  %v9532_v57 = vcombine.low %v1560_v44, %v1564_v45  ;;  %v9539_v58 = vcombine.high %v1567_v52, %v1571_v53  ;;  %v9541_v59 = vcombine.high %v1568_v54, %v1572_v55  ;;  %v1619_v44 = vld [vmem:[%s13308_s27 + $0x330] sm:$0xff]  ;;  %v1616_v45 = vld [vmem:[%s13308_s27 + $0x318] sm:$0xff] }
 0x89c   :  { %2769 = vmatpush1.bf16.msra.mxu0 %v9670_v63  ;;  %2855 = vmatpush1.bf16.msra.mxu1 %v9672_v1  ;;  %v1580_v63 = vld [vmem:[%s13308_s27 + $0x1f8] sm:$0xff]  ;;  %v9538_v1 = vcombine.low %v1567_v52, %v1571_v53  ;;  %v1623_v53 = vld [vmem:[%s13308_s27 + $0x350] sm:$0xff] }
 0x89d   :  { %2883 = vmatprep.subr.bf16.mxu0 %v9491_v3  ;;  %2969 = vmatprep.subr.bf16.mxu1 %v9493_v4  ;;  %v9540_v3 = vcombine.low %v1568_v54, %v1572_v55  ;;  %v9547_v4 = vcombine.high %v1575_v29, %v1579_v34  ;;  %v9549_v2 = vcombine.high %v1576_v60, %v1580_v63  ;;  %v1627_v54 = vld [vmem:[%s13308_s27 + $0x370] sm:$0xff]  ;;  %v1624_v55 = vld [vmem:[%s13308_s27 + $0x358] sm:$0xff] }
 0x89f   :  { %2787 = vmatmul.mubr.bf16.vlgmr.msra.gmra.mrb[32].mxu0 %v12620_v7  ;;  %2873 = vmatmul.mubr.bf16.vlgmr.msra.gmra.mrb[20].mxu1 %v12620_v7 }
 0x8a0   :  { %2884 = vmatpush1.bf16.msra.mxu0 %v9490_v8  ;;  %2915 = vmatprep.mubr.bf16.mxu0 %v12602_v48  ;;  %v1588_v8 = vld [vmem:[%s13308_s27 + $0x238] sm:$0xff] }
 0x8a1   :  { %2970 = vmatpush1.bf16.msra.mxu1 %v9492_v9  ;;  %3001 = vmatprep.mubr.bf16.mxu1 %v12602_v48  ;;  %v9515_v48 = vcombine.high %v1543_v17, %v1547_v18  ;;  %v9546_v9 = vcombine.low %v1575_v29, %v1579_v34  ;;  %v9557_v10 = vcombine.high %v1584_v33, %v1588_v8  ;;  %v1599_v18 = vld [vmem:[%s13308_s27 + $0x290] sm:$0xff] }
 0x8a2   :  { %2885 = vmatprep.subr.bf16.mxu0 %v9499_v41  ;;  %2971 = vmatprep.subr.bf16.mxu1 %v9501_v11  ;;  %v9548_v41 = vcombine.low %v1576_v60, %v1580_v63  ;;  %v9555_v11 = vcombine.high %v1583_v5, %v1587_v6  ;;  %v1631_v34 = vld [vmem:[%s13308_s27 + $0x390] sm:$0xff]  ;;  %v1632_v63 = vld [vmem:[%s13308_s27 + $0x398] sm:$0xff] }
 0x8a3   :  { %v1635_v60 = vld [vmem:[%s13308_s27 + $0x3b0] sm:$0xff] }
 0x8a4   :  { %2886 = vmatpush1.bf16.msra.mxu0 %v9498_v13  ;;  %v1596_v13 = vld [vmem:[%s13308_s27 + $0x278] sm:$0xff] }
 0x8a5   :  { %2972 = vmatpush1.bf16.msra.mxu1 %v9500_v14  ;;  %2887 = vmatprep.subr.bf16.mxu0 %v9507_v15  ;;  %v9554_v14 = vcombine.low %v1583_v5, %v1587_v6  ;;  %v9556_v15 = vcombine.low %v1584_v33, %v1588_v8  ;;  %v9565_v17 = vcombine.high %v1592_v40, %v1596_v13  ;;  %v1639_v6 = vld [vmem:[%s13308_s27 + $0x3d0] sm:$0xff]  ;;  %v1640_v8 = vld [vmem:[%s13308_s27 + $0x3d8] sm:$0xff] }
 0x8a6   :  { %2973 = vmatprep.subr.bf16.mxu1 %v9509_v16  ;;  %v9563_v16 = vcombine.high %v1591_v42, %v1595_v12  ;;  %v1643_v33 = vld [vmem:[%s13308_s27 + $0x3f0] sm:$0xff] }
 0x8a8   :  { %2888 = vmatpush1.bf16.msra.mxu0 %v9506_v21  ;;  %v1604_v21 = vld [vmem:[%s13308_s27 + $0x2b8] sm:$0xff] }
 0x8a9   :  { %2974 = vmatpush1.bf16.msra.mxu1 %v9508_v22  ;;  %2889 = vmatprep.subr.bf16.mxu0 %v9515_v48  ;;  %v9562_v22 = vcombine.low %v1591_v42, %v1595_v12  ;;  %v9564_v48 = vcombine.low %v1592_v40, %v1596_v13  ;;  %v9573_v24 = vcombine.high %v1600_v20, %v1604_v21  ;;  %v1647_v12 = vld [vmem:[%s13308_s27 + $0x410] sm:$0xff]  ;;  %v1648_v13 = vld [vmem:[%s13308_s27 + $0x418] sm:$0xff] }
 0x8aa   :  { %2975 = vmatprep.subr.bf16.mxu1 %v9517_v23  ;;  %v9571_v23 = vcombine.high %v1599_v18, %v1603_v19  ;;  %v1651_v40 = vld [vmem:[%s13308_s27 + $0x430] sm:$0xff] }
 0x8ac   :  { %2890 = vmatpush1.bf16.msra.mxu0 %v9514_v28  ;;  %v1612_v28 = vld [vmem:[%s13308_s27 + $0x2f8] sm:$0xff] }
 0x8ad   :  { %2976 = vmatpush1.bf16.msra.mxu1 %v9516_v30  ;;  %2891 = vmatprep.subr.bf16.mxu0 %v9523_v32  ;;  %v9570_v30 = vcombine.low %v1599_v18, %v1603_v19  ;;  %v9572_v32 = vcombine.low %v1600_v20, %v1604_v21  ;;  %v9581_v37 = vcombine.high %v1608_v27, %v1612_v28  ;;  %v1655_v19 = vld [vmem:[%s13308_s27 + $0x450] sm:$0xff]  ;;  %v1656_v21 = vld [vmem:[%s13308_s27 + $0x458] sm:$0xff] }
 0x8ae   :  { %2977 = vmatprep.subr.bf16.mxu1 %v9525_v35  ;;  %v9579_v35 = vcombine.high %v1607_v25, %v1611_v26  ;;  %v1659_v20 = vld [vmem:[%s13308_s27 + $0x470] sm:$0xff] }
 0x8b0   :  { %2892 = vmatpush1.bf16.msra.mxu0 %v9522_v47  ;;  %v1620_v47 = vld [vmem:[%s13308_s27 + $0x338] sm:$0xff] }
 0x8b1   :  { %2978 = vmatpush1.bf16.msra.mxu1 %v9524_v49  ;;  %2893 = vmatprep.subr.bf16.mxu0 %v9531_v50  ;;  %v9578_v49 = vcombine.low %v1607_v25, %v1611_v26  ;;  %v9580_v50 = vcombine.low %v1608_v27, %v1612_v28  ;;  %v9589_v52 = vcombine.high %v1616_v45, %v1620_v47  ;;  %v1663_v26 = vld [vmem:[%s13308_s27 + $0x490] sm:$0xff]  ;;  %v1664_v28 = vld [vmem:[%s13308_s27 + $0x498] sm:$0xff] }
 0x8b2   :  { %2979 = vmatprep.subr.bf16.mxu1 %v9533_v51  ;;  %v9587_v51 = vcombine.high %v1615_v43, %v1619_v44  ;;  %v1667_v27 = vld [vmem:[%s13308_s27 + $0x4b0] sm:$0xff] }
 0x8b4   :  { %2894 = vmatpush1.bf16.msra.mxu0 %v9530_v56  ;;  %v1628_v56 = vld [vmem:[%s13308_s27 + $0x378] sm:$0xff] }
 0x8b5   :  { %2980 = vmatpush1.bf16.msra.mxu1 %v9532_v57  ;;  %2895 = vmatprep.subr.bf16.mxu0 %v9539_v58  ;;  %v9586_v57 = vcombine.low %v1615_v43, %v1619_v44  ;;  %v9588_v58 = vcombine.low %v1616_v45, %v1620_v47  ;;  %v9597_v29 = vcombine.high %v1624_v55, %v1628_v56  ;;  %v1671_v44 = vld [vmem:[%s13308_s27 + $0x4d0] sm:$0xff]  ;;  %v1672_v47 = vld [vmem:[%s13308_s27 + $0x4d8] sm:$0xff] }
 0x8b6   :  { %2981 = vmatprep.subr.bf16.mxu1 %v9541_v59  ;;  %v9595_v59 = vcombine.high %v1623_v53, %v1627_v54  ;;  %v1675_v45 = vld [vmem:[%s13308_s27 + $0x4f0] sm:$0xff] }
 0x8b8   :  { %2896 = vmatpush1.bf16.msra.mxu0 %v9538_v1  ;;  %v1636_v1 = vld [vmem:[%s13308_s27 + $0x3b8] sm:$0xff] }
 0x8b9   :  { %2982 = vmatpush1.bf16.msra.mxu1 %v9540_v3  ;;  %2897 = vmatprep.subr.bf16.mxu0 %v9547_v4  ;;  %v9594_v3 = vcombine.low %v1623_v53, %v1627_v54  ;;  %v9596_v4 = vcombine.low %v1624_v55, %v1628_v56  ;;  %v9605_v5 = vcombine.high %v1632_v63, %v1636_v1  ;;  %v1679_v53 = vld [vmem:[%s13308_s27 + $0x510] sm:$0xff]  ;;  %v1680_v55 = vld [vmem:[%s13308_s27 + $0x518] sm:$0xff] }
 0x8ba   :  { %2983 = vmatprep.subr.bf16.mxu1 %v9549_v2  ;;  %v9603_v2 = vcombine.high %v1631_v34, %v1635_v60  ;;  %v1683_v54 = vld [vmem:[%s13308_s27 + $0x530] sm:$0xff]  ;;  %v1684_v56 = vld [vmem:[%s13308_s27 + $0x538] sm:$0xff] }
 0x8bc   :  { %2898 = vmatpush1.bf16.msra.mxu0 %v9546_v9  ;;  %v1644_v9 = vld [vmem:[%s13308_s27 + $0x3f8] sm:$0xff] }
 0x8bd   :  { %2984 = vmatpush1.bf16.msra.mxu1 %v9548_v41  ;;  %2899 = vmatprep.subr.bf16.mxu0 %v9555_v11  ;;  %v9602_v41 = vcombine.low %v1631_v34, %v1635_v60  ;;  %v9604_v11 = vcombine.low %v1632_v63, %v1636_v1  ;;  %v9613_v42 = vcombine.high %v1640_v8, %v1644_v9  ;;  %v1687_v34 = vld [vmem:[%s13308_s27 + $0x550] sm:$0xff]  ;;  %v1688_v63 = vld [vmem:[%s13308_s27 + $0x558] sm:$0xff] }
 0x8be   :  { %2985 = vmatprep.subr.bf16.mxu1 %v9557_v10  ;;  %v9611_v10 = vcombine.high %v1639_v6, %v1643_v33  ;;  %v1691_v60 = vld [vmem:[%s13308_s27 + $0x570] sm:$0xff]  ;;  %v1692_v1 = vld [vmem:[%s13308_s27 + $0x578] sm:$0xff] }
 0x8c0   :  { %2900 = vmatpush1.bf16.msra.mxu0 %v9554_v14  ;;  %v1652_v14 = vld [vmem:[%s13308_s27 + $0x438] sm:$0xff] }
 0x8c1   :  { %2986 = vmatpush1.bf16.msra.mxu1 %v9556_v15  ;;  %2901 = vmatprep.subr.bf16.mxu0 %v9563_v16  ;;  %v9610_v15 = vcombine.low %v1639_v6, %v1643_v33  ;;  %v9612_v16 = vcombine.low %v1640_v8, %v1644_v9  ;;  %v9621_v18 = vcombine.high %v1648_v13, %v1652_v14  ;;  %v1695_v6 = vld [vmem:[%s13308_s27 + $0x590] sm:$0xff]  ;;  %v1696_v8 = vld [vmem:[%s13308_s27 + $0x598] sm:$0xff] }
 0x8c2   :  { %2987 = vmatprep.subr.bf16.mxu1 %v9565_v17  ;;  %v9619_v17 = vcombine.high %v1647_v12, %v1651_v40  ;;  %v1699_v33 = vld [vmem:[%s13308_s27 + $0x5b0] sm:$0xff]  ;;  %v1700_v9 = vld [vmem:[%s13308_s27 + $0x5b8] sm:$0xff] }
 0x8c4   :  { %2902 = vmatpush1.bf16.msra.mxu0 %v9562_v22  ;;  %v1660_v22 = vld [vmem:[%s13308_s27 + $0x478] sm:$0xff] }
 0x8c5   :  { %2988 = vmatpush1.bf16.msra.mxu1 %v9564_v48  ;;  %2903 = vmatprep.subr.bf16.mxu0 %v9571_v23  ;;  %v9618_v48 = vcombine.low %v1647_v12, %v1651_v40  ;;  %v9620_v23 = vcombine.low %v1648_v13, %v1652_v14  ;;  %v9629_v25 = vcombine.high %v1656_v21, %v1660_v22  ;;  %v1703_v12 = vld [vmem:[%s13308_s27 + $0x5d0] sm:$0xff]  ;;  %v1704_v13 = vld [vmem:[%s13308_s27 + $0x5d8] sm:$0xff] }
 0x8c6   :  { %2989 = vmatprep.subr.bf16.mxu1 %v9573_v24  ;;  %v9627_v24 = vcombine.high %v1655_v19, %v1659_v20  ;;  %v1707_v40 = vld [vmem:[%s13308_s27 + $0x5f0] sm:$0xff]  ;;  %v1708_v14 = vld [vmem:[%s13308_s27 + $0x5f8] sm:$0xff] }
 0x8c8   :  { %2904 = vmatpush1.bf16.msra.mxu0 %v9570_v30  ;;  %v1668_v30 = vld [vmem:[%s13308_s27 + $0x4b8] sm:$0xff] }
 0x8c9   :  { %2990 = vmatpush1.bf16.msra.mxu1 %v9572_v32  ;;  %2905 = vmatprep.subr.bf16.mxu0 %v9579_v35  ;;  %v9626_v32 = vcombine.low %v1655_v19, %v1659_v20  ;;  %v9628_v35 = vcombine.low %v1656_v21, %v1660_v22  ;;  %v9637_v43 = vcombine.high %v1664_v28, %v1668_v30  ;;  %v10991_v21 = vld [vmem:[%s13311_s9 + $0x40] sm:$0xff]  }
 0x8ca   :  { %2991 = vmatprep.subr.bf16.mxu1 %v9581_v37  ;;  %v9635_v37 = vcombine.high %v1663_v26, %v1667_v27  ;;  %v9674_v19 = vcombine.low %v1703_v12, %v1707_v40  ;;  %v9676_v20 = vcombine.low %v1704_v13, %v1708_v14  ;;  %v10992_v22 = vld [vmem:[%s13311_s9 + $0xc0] sm:$0xff]  }
 0x8cc   :  { %2906 = vmatpush1.bf16.msra.mxu0 %v9578_v49  ;;  %v1676_v49 = vld [vmem:[%s13308_s27 + $0x4f8] sm:$0xff] }
 0x8cd   :  { %2992 = vmatpush1.bf16.msra.mxu1 %v9580_v50  ;;  %2907 = vmatprep.subr.bf16.mxu0 %v9587_v51  ;;  %v9636_v50 = vcombine.low %v1664_v28, %v1668_v30  ;;  %v9643_v51 = vcombine.high %v1671_v44, %v1675_v45  ;;  %v10999_v28 = vld [vmem:[%s13311_s9 + $0x50] sm:$0xff]  }
 0x8ce   :  { %2993 = vmatprep.subr.bf16.mxu1 %v9589_v52  ;;  %v9645_v52 = vcombine.high %v1672_v47, %v1676_v49  ;;  %v11000_v30 = vld [vmem:[%s13311_s9 + $0xd0] sm:$0xff]  }
 0x8d0   :  { %2908 = vmatpush1.bf16.msra.mxu0 %v9586_v57  ;;  %v9642_v57 = vcombine.low %v1671_v44, %v1675_v45  ;;  %v11006_v44 = vld [vmem:[%s13311_s9 + $0x98] sm:$0xff]   ;;  %v11007_v45 = vld [vmem:[%s13311_s9 + $0x60] sm:$0xff]  }
 0x8d1   :  { %2994 = vmatpush1.bf16.msra.mxu1 %v9588_v58  ;;  %2909 = vmatprep.subr.bf16.mxu0 %v9595_v59  ;;  %v9644_v58 = vcombine.low %v1672_v47, %v1676_v49  ;;  %v9651_v59 = vcombine.high %v1679_v53, %v1683_v54  ;;  %v11008_v47 = vld [vmem:[%s13311_s9 + $0xe0] sm:$0xff]  }
 0x8d2   :  { %2995 = vmatprep.subr.bf16.mxu1 %v9597_v29  ;;  %v9653_v29 = vcombine.high %v1680_v55, %v1684_v56  ;;  %v11009_v49 = vld [vmem:[%s13311_s9 + $0x20] sm:$0xff]  }
 0x8d4   :  { %2910 = vmatpush1.bf16.msra.mxu0 %v9594_v3  ;;  %v9650_v3 = vcombine.low %v1679_v53, %v1683_v54  ;;  %v11014_v53 = vld [vmem:[%s13311_s9 + $0xa8] sm:$0xff]   ;;  %v11015_v54 = vld [vmem:[%s13311_s9 + $0x70] sm:$0xff]  }
 0x8d5   :  { %2996 = vmatpush1.bf16.msra.mxu1 %v9596_v4  ;;  %2911 = vmatprep.subr.bf16.mxu0 %v9603_v2  ;;  %v9652_v4 = vcombine.low %v1680_v55, %v1684_v56  ;;  %v9659_v2 = vcombine.high %v1687_v34, %v1691_v60  ;;  %v11016_v55 = vld [vmem:[%s13311_s9 + $0xf0] sm:$0xff]  }
 0x8d6   :  { %2997 = vmatprep.subr.bf16.mxu1 %v9605_v5  ;;  %v9661_v5 = vcombine.high %v1688_v63, %v1692_v1  ;;  %v11017_v56 = vld [vmem:[%s13311_s9 + $0x30] sm:$0xff]  }
 0x8d8   :  { %2912 = vmatpush1.bf16.msra.mxu0 %v9602_v41  ;;  %v9658_v41 = vcombine.low %v1687_v34, %v1691_v60  ;;  %v11022_v34 = vld [vmem:[%s13311_s9 + $0xb8] sm:$0xff]   ;;  %v11023_v60 = vld [vmem:[%s13311_s9 + $0x140] sm:$0xff]  }
 0x8d9   :  { %2998 = vmatpush1.bf16.msra.mxu1 %v9604_v11  ;;  %2913 = vmatprep.subr.bf16.mxu0 %v9611_v10  ;;  %v9660_v11 = vcombine.low %v1688_v63, %v1692_v1  ;;  %v9667_v10 = vcombine.high %v1695_v6, %v1699_v33  ;;  %v11026_v63 = vld [vmem:[%s13311_s9 + $0x1c0] sm:$0xff]  }
 0x8da   :  { %2999 = vmatprep.subr.bf16.mxu1 %v9613_v42  ;;  %v9669_v42 = vcombine.high %v1696_v8, %v1700_v9  ;;  %v12783_v1 = vld [vmem:[%s13312_s21] sm:$0xff] }
 0x8dc   :  { %2914 = vmatpush1.bf16.msra.mxu0 %v9610_v15  ;;  %v9666_v15 = vcombine.low %v1695_v6, %v1699_v33 }
 0x8dd   :  { %3000 = vmatpush1.bf16.msra.mxu1 %v9612_v16  ;;  %2926 = vmatprep.subr.bf16.mxu0 %v9619_v17  ;;  %v9668_v16 = vcombine.low %v1696_v8, %v1700_v9  ;;  %v9675_v17 = vcombine.high %v1703_v12, %v1707_v40 }
 0x8de   :  { %3012 = vmatprep.subr.bf16.mxu1 %v9621_v18  ;;  %v9677_v18 = vcombine.high %v1704_v13, %v1708_v14 }
 0x8df   :  { %2916 = vmatmul.mubr.bf16.vlgmr.msra.gmra.mrb[36].mxu0 %v12600_v46 }
 0x8e0   :  { %3002 = vmatmul.mubr.bf16.vlgmr.msra.gmra.mrb[24].mxu1 %v12600_v46  ;;  %2927 = vmatpush1.bf16.msra.mxu0 %v9618_v48  ;;  %v9634_v46 = vcombine.low %v1663_v26, %v1667_v27  ;;  %v10993_v48 = vld [vmem:[%s13311_s9] sm:$0xff]   ;;  %v10997_v26 = vld [vmem:[%s13311_s9 + $0x8] sm:$0xff]  }
 0x8e1   :  { %3013 = vmatpush1.bf16.msra.mxu1 %v9620_v23  ;;  %2928 = vmatprep.subr.bf16.mxu0 %v9627_v24  ;;  %v10994_v23 = vld [vmem:[%s13311_s9 + $0x80] sm:$0xff]   ;;  %v10995_v24 = vld [vmem:[%s13311_s9 + $0x48] sm:$0xff]  }
 0x8e2   :  { %3014 = vmatprep.subr.bf16.mxu1 %v9629_v25  ;;  %2958 = vmatprep.mubr.bf16.mxu0 %v12070_v36  ;;  %v10996_v25 = vld [vmem:[%s13311_s9 + $0xc8] sm:$0xff]  }
 0x8e3   :  { %3044 = vmatprep.mubr.bf16.mxu1 %v12070_v36  ;;  %v10998_v27 = vld [vmem:[%s13311_s9 + $0x88] sm:$0xff]  }
 0x8e4   :  { %2929 = vmatpush1.bf16.msra.mxu0 %v9626_v32  ;;  %v11001_v32 = vld [vmem:[%s13311_s9 + $0x10] sm:$0xff]  }
 0x8e5   :  { %3015 = vmatpush1.bf16.msra.mxu1 %v9628_v35  ;;  %2930 = vmatprep.subr.bf16.mxu0 %v9635_v37  ;;  %v11002_v35 = vld [vmem:[%s13311_s9 + $0x90] sm:$0xff]   ;;  %v11004_v37 = vld [vmem:[%s13311_s9 + $0xd8] sm:$0xff]  }
 0x8e6   :  { %3016 = vmatprep.subr.bf16.mxu1 %v9637_v43  ;;  %v11005_v43 = vld [vmem:[%s13311_s9 + $0x18] sm:$0xff]  }
 0x8e8   :  { %2931 = vmatpush1.bf16.msra.mxu0 %v9634_v46  ;;  %v11010_v46 = vld [vmem:[%s13311_s9 + $0xa0] sm:$0xff]  }
 0x8e9   :  { %3017 = vmatpush1.bf16.msra.mxu1 %v9636_v50  ;;  %2932 = vmatprep.subr.bf16.mxu0 %v9643_v51  ;;  %v11011_v50 = vld [vmem:[%s13311_s9 + $0x68] sm:$0xff]  }
 0x8ea   :  { %3018 = vmatprep.subr.bf16.mxu1 %v9645_v52  ;;  %v11012_v51 = vld [vmem:[%s13311_s9 + $0xe8] sm:$0xff]  }
 0x8eb   :  { %v11013_v52 = vld [vmem:[%s13311_s9 + $0x28] sm:$0xff]  }
 0x8ec   :  { %2933 = vmatpush1.bf16.msra.mxu0 %v9642_v57  ;;  %v11018_v57 = vld [vmem:[%s13311_s9 + $0xb0] sm:$0xff]  }
 0x8ed   :  { %3019 = vmatpush1.bf16.msra.mxu1 %v9644_v58  ;;  %2934 = vmatprep.subr.bf16.mxu0 %v9651_v59  ;;  %v11019_v58 = vld [vmem:[%s13311_s9 + $0x78] sm:$0xff]  }
 0x8ee   :  { %3020 = vmatprep.subr.bf16.mxu1 %v9653_v29  ;;  %v11020_v59 = vld [vmem:[%s13311_s9 + $0xf8] sm:$0xff]  }
 0x8ef   :  { %v11021_v29 = vld [vmem:[%s13311_s9 + $0x38] sm:$0xff]  }
 0x8f0   :  { %2935 = vmatpush1.bf16.msra.mxu0 %v9650_v3  ;;  %v12786_v3 = vsub.s32 3, %v12430_v61 }
 0x8f1   :  { %3021 = vmatpush1.bf16.msra.mxu1 %v9652_v4  ;;  %2936 = vmatprep.subr.bf16.mxu0 %v9659_v2  ;;  %v1714_v4 = vrot.slane %v12783_v1, %v12433_v62  ;;  %v1722_v2 = vrot.slane %v12783_v1, %v12546_v31 }
 0x8f2   :  { %3022 = vmatprep.subr.bf16.mxu1 %v9661_v5  ;;  %v1718_v5 = vrot.slane %v12783_v1, %v12436_v0  ;;  %v1726_v6 = vrot.slane %v12783_v1, %v12786_v3 }
 0x8f4   :  { %2937 = vmatpush1.bf16.msra.mxu0 %v9658_v41 }
 0x8f5   :  { %3023 = vmatpush1.bf16.msra.mxu1 %v9660_v11  ;;  %2938 = vmatprep.subr.bf16.mxu0 %v9667_v10 }
 0x8f6   :  { %3024 = vmatprep.subr.bf16.mxu1 %v9669_v42 }
 0x8f8   :  { %2939 = vmatpush1.bf16.msra.mxu0 %v9666_v15 }
 0x8f9   :  { %3025 = vmatpush1.bf16.msra.mxu1 %v9668_v16  ;;  %2940 = vmatprep.subr.bf16.mxu0 %v9675_v17 }
 0x8fa   :  { %3026 = vmatprep.subr.bf16.mxu1 %v9677_v18 }
 0x8fc   :  { %2941 = vmatpush1.bf16.msra.mxu0 %v9674_v19 }
 0x8fd   :  { %3027 = vmatpush1.bf16.msra.mxu1 %v9676_v20  ;;  %10434 = vmatprep.subr.bf16.mxu0 %v10991_v21 }
 0x8fe   :  { %10456 = vmatprep.subr.bf16.mxu1 %v10992_v22 }
 0x8ff   :  { %2959 = vmatmul.mubr.bf16.vlgmr.msra.gmra.mrb[36].mxu0 %v12620_v7 }
 0x900   :  { %3045 = vmatmul.mubr.bf16.vlgmr.msra.gmra.mrb[24].mxu1 %v12620_v7  ;;  %10435 = vmatpush3.bf16.msra.mxu0 %v10993_v48  ;;  %v11003_v7 = vld [vmem:[%s13311_s9 + $0x58] sm:$0xff]  }
 0x901   :  { %10457 = vmatpush3.bf16.msra.mxu1 %v10994_v23  ;;  %10436 = vmatprep.subr.bf16.mxu0 %v10995_v24 }
 0x902   :  { %10458 = vmatprep.subr.bf16.mxu1 %v10996_v25 }
 0x904   :  { %10437 = vmatpush3.bf16.msra.mxu0 %v10997_v26 }
 0x905   :  { %10459 = vmatpush3.bf16.msra.mxu1 %v10998_v27  ;;  %10438 = vmatprep.subr.bf16.mxu0 %v10999_v28 }
 0x906   :  { %10460 = vmatprep.subr.bf16.mxu1 %v11000_v30 }
 0x908   :  { %10439 = vmatpush3.bf16.msra.mxu0 %v11001_v32 }
 0x909   :  { %10461 = vmatpush3.bf16.msra.mxu1 %v11002_v35  ;;  %10440 = vmatprep.subr.bf16.mxu0 %v11003_v7  ;;  %v11024_v35 = vld [vmem:[%s13311_s9 + $0x100] sm:$0xff]  }
 0x90a   :  { %10462 = vmatprep.subr.bf16.mxu1 %v11004_v37  ;;  %v11028_v7 = vld [vmem:[%s13311_s9 + $0x180] sm:$0xff]   ;;  %v11025_v37 = vld [vmem:[%s13311_s9 + $0x148] sm:$0xff]  }
 0x90c   :  { %10441 = vmatpush3.bf16.msra.mxu0 %v11005_v43  ;;  %v11030_v43 = vld [vmem:[%s13311_s9 + $0x1c8] sm:$0xff]  }
 0x90d   :  { %10463 = vmatpush3.bf16.msra.mxu1 %v11006_v44  ;;  %10442 = vmatprep.subr.bf16.mxu0 %v11007_v45  ;;  %v11027_v44 = vld [vmem:[%s13311_s9 + $0x108] sm:$0xff]  }
 0x90e   :  { %10464 = vmatprep.subr.bf16.mxu1 %v11008_v47  ;;  %v11032_v45 = vld [vmem:[%s13311_s9 + $0x188] sm:$0xff]   ;;  %v11029_v47 = vld [vmem:[%s13311_s9 + $0x150] sm:$0xff]  }
 0x910   :  { %10443 = vmatpush3.bf16.msra.mxu0 %v11009_v49  ;;  %v11034_v49 = vld [vmem:[%s13311_s9 + $0x1d0] sm:$0xff]  }
 0x911   :  { %10465 = vmatpush3.bf16.msra.mxu1 %v11010_v46  ;;  %10444 = vmatprep.subr.bf16.mxu0 %v11011_v50  ;;  %v3775_v46 = vpop.xlane.xlu1 %3774  ;;  %v3772_v50 = vpop.xlane.xlu0 %3771 }
 0x912   :  { %10466 = vmatprep.subr.bf16.mxu1 %v11012_v51  ;;  %v11031_v51 = vld [vmem:[%s13311_s9 + $0x110] sm:$0xff]   ;;  %11559 = vrsqrt.f32 %v3775_v46  ;;  %vm3783_vm8 = vcmp.gt.f32.partialorder %v3775_v46, 0.0  ;;  %vm3782_vm9 = vcmp.gt.f32.partialorder %v3772_v50, 0.0 }
 0x913   :  { %11561 = vrsqrt.f32 %v3772_v50 }
 0x914   :  { %10445 = vmatpush3.bf16.msra.mxu0 %v11013_v52  ;;  %v11036_v52 = vld [vmem:[%s13311_s9 + $0x190] sm:$0xff]  }
 0x915   :  { %10467 = vmatpush3.bf16.msra.mxu1 %v11014_v53  ;;  %10446 = vmatprep.subr.bf16.mxu0 %v11015_v54  ;;  %v11033_v53 = vld [vmem:[%s13311_s9 + $0x158] sm:$0xff]  }
 0x916   :  { %10468 = vmatprep.subr.bf16.mxu1 %v11016_v55  ;;  %v11038_v54 = vld [vmem:[%s13311_s9 + $0x1d8] sm:$0xff]  }
 0x917   :  { %v11035_v55 = vld [vmem:[%s13311_s9 + $0x118] sm:$0xff]  }
 0x918   :  { %10447 = vmatpush3.bf16.msra.mxu0 %v11017_v56  ;;  %v11040_v56 = vld [vmem:[%s13311_s9 + $0x198] sm:$0xff]  }
 0x919   :  { %10469 = vmatpush3.bf16.msra.mxu1 %v11018_v57  ;;  %10448 = vmatprep.subr.bf16.mxu0 %v11019_v58  ;;  %v11037_v57 = vld [vmem:[%s13311_s9 + $0x160] sm:$0xff]  }
 0x91a   :  { %10470 = vmatprep.subr.bf16.mxu1 %v11020_v59  ;;  %v11042_v58 = vld [vmem:[%s13311_s9 + $0x1e0] sm:$0xff]  }
 0x91b   :  { %v11039_v59 = vld [vmem:[%s13311_s9 + $0x120] sm:$0xff]  }
 0x91c   :  { %10449 = vmatpush3.bf16.msra.mxu0 %v11021_v29  ;;  %v11044_v29 = vld [vmem:[%s13311_s9 + $0x1a0] sm:$0xff]  }
 0x91d   :  { %10471 = vmatpush3.bf16.msra.mxu1 %v11022_v34  ;;  %10478 = vmatprep.subr.bf16.mxu0 %v11023_v60  ;;  %v11041_v34 = vld [vmem:[%s13311_s9 + $0x168] sm:$0xff]  }
 0x91e   :  { %10500 = vmatprep.subr.bf16.mxu1 %v11026_v63  ;;  %v11046_v60 = vld [vmem:[%s13311_s9 + $0x1e8] sm:$0xff]   ;;  %v11560_v63 = vpop.eup %11559 }
 0x972   :  { %v2788_v33 = vpop.f32.mrb[32].mxu0  ;;  %v2874_v8 = vpop.f32.mrb[20].mxu1 }
 0x973   :  { %v10750_v9 = vadd.f32 %v2788_v33, %v1714_v4  ;;  %v10754_v41 = vadd.f32 %v2874_v8, %v1722_v2  ;;  %v2790_v11 = vpop.f32.mrb[33].mxu0  ;;  %v2876_v10 = vpop.f32.mrb[21].mxu1  ;;  %v11045_v33 = vld [vmem:[%s13311_s9 + $0x170] sm:$0xff]  }
 0x974   :  { %v10751_v42 = vadd.f32 %v2790_v11, %v1718_v5  ;;  %v10755_v12 = vadd.f32 %v2876_v10, %v1726_v6  ;;  %v2792_v40 = vpop.f32.mrb[34].mxu0  ;;  %v2878_v13 = vpop.f32.mrb[22].mxu1  ;;  %v11050_v8 = vld [vmem:[%s13311_s9 + $0x1f0] sm:$0xff]   ;;  %v12821_v11 = vsel %vm3783_vm8, %v11560_v63, 0.0 }
 0x975   :  { %v10752_v14 = vadd.f32 %v2792_v40, %v1714_v4  ;;  %v10756_v15 = vadd.f32 %v2878_v13, %v1722_v2  ;;  %v2794_v16 = vpop.f32.mrb[35].mxu0  ;;  %v2880_v17 = vpop.f32.mrb[23].mxu1  ;;  %v3055_v20 = vmax.f32 %v10750_v9, 0.0  ;;  %v3057_v21 = vmax.f32 %v10754_v41, 0.0  ;;  %v10376_v4 = vld [vmem:[%s13313_s1] sm:$0xff]   ;;  %v11049_v40 = vld [vmem:[%s13311_s9 + $0x178] sm:$0xff]  }
 0x976   :  { %v10753_v18 = vadd.f32 %v2794_v16, %v1718_v5  ;;  %v10757_v19 = vadd.f32 %v2880_v17, %v1726_v6  ;;  %v3056_v23 = vmax.f32 %v10751_v42, 0.0  ;;  %v3058_v24 = vmax.f32 %v10755_v12, 0.0  ;;  %v11562_v2 = vpop.eup %11561  ;;  %v11043_v5 = vld [vmem:[%s13311_s9 + $0x128] sm:$0xff]   ;;  %v11047_v42 = vld [vmem:[%s13311_s9 + $0x130] sm:$0xff]   ;;  %v11051_v16 = vld [vmem:[%s13311_s9 + $0x138] sm:$0xff]  }
 0x977   :  { %v3063_v22 = vmax.f32 %v10752_v14, 0.0  ;;  %v3065_v48 = vmax.f32 %v10756_v15, 0.0  ;;  %v11048_v6 = vld [vmem:[%s13311_s9 + $0x1a8] sm:$0xff]   ;;  %v10377_v9 = vunpack.c.l.bf16 %v10376_v4  ;;  %v10378_v41 = vunpack.c.h.bf16 %v10376_v4  ;;  %v11052_v12 = vld [vmem:[%s13311_s9 + $0x1b0] sm:$0xff]   ;;  %v11053_v15 = vld [vmem:[%s13311_s9 + $0x1f8] sm:$0xff]  }
 0x978   :  { %v3064_v25 = vmax.f32 %v10753_v18, 0.0  ;;  %v3066_v26 = vmax.f32 %v10757_v19, 0.0  ;;  %v12823_v10 = vsel %vm3782_vm9, %v11562_v2, 0.0  ;;  %v11054_v17 = vld [vmem:[%s13311_s9 + $0x1b8] sm:$0xff]   ;;  %v3778_v19 = vpop.xlane.xlu0 %3777 }
 0x979   :  { %v3071_v27 = vpack.c.bf16 %v3063_v22, %v3055_v20  ;;  %v3073_v28 = vpack.c.bf16 %v3065_v48, %v3057_v21  ;;  %v3802_v13 = vmul.f32 %v10377_v9, %v12823_v10  ;;  %v3803_v14 = vmul.f32 %v10378_v41, %v12821_v11  ;;  %v3781_v20 = vpop.xlane.xlu1 %3780 }
 0x97a   :  { %v3072_v30 = vpack.c.bf16 %v3064_v25, %v3056_v23  ;;  %v3074_v32 = vpack.c.bf16 %v3066_v26, %v3058_v24  ;;  %11563 = vrsqrt.f32 %v3778_v19  ;;  %v12837_v21 = vsub.s32 4, %v12430_v61 }
 0x97b   :  { %v12833_v18 = vpack.c.bf16 %v3803_v14, %v3802_v13  ;;  %11565 = vrsqrt.f32 %v3781_v20  ;;  %v12840_v22 = vsub.s32 6, %v12430_v61  ;;  %v12843_v48 = vsub.s32 5, %v12430_v61 }
 0x97c   :  { %3630 = vmatprep.mubr.bf16.mxu0 %v3072_v30  ;;  %3671 = vmatprep.mubr.bf16.mxu1 %v3074_v32  ;;  %v12846_v23 = vsub.s32 7, %v12430_v61  ;;  %v1730_v24 = vrot.slane %v12783_v1, %v12837_v21  ;;  %vm3784_vm10 = vcmp.gt.f32.partialorder %v3778_v19, 0.0  ;;  %vm3785_vm11 = vcmp.gt.f32.partialorder %v3781_v20, 0.0  ;;  %v11058_v19 = vld [vmem:[#allocation10 + $0x18] sm:$0xff]   ;;  %v11060_v20 = vld [vmem:[#allocation10 + $0x28] sm:$0xff]  }
 0x97d   :  { %3631 = vmatmul.mubr.bf16.vlgmr.msra.gmra.mrb[40].mxu0 %v3071_v27  ;;  %3672 = vmatmul.mubr.bf16.vlgmr.msra.gmra.mrb[28].mxu1 %v3073_v28  ;;  %v1738_v25 = vrot.slane %v12783_v1, %v12840_v22  ;;  %v1734_v26 = vrot.slane %v12783_v1, %v12843_v48  ;;  %v10384_v27 = vld [vmem:[%s13313_s1 + $0x8] sm:$0xff]  }
 0x97e   :  { %10479 = vmatpush3.bf16.msra.mxu0 %v11024_v35  ;;  %10501 = vmatpush3.bf16.msra.mxu1 %v11028_v7  ;;  %v1742_v30 = vrot.slane %v12783_v1, %v12846_v23 }
 0x97f   :  { %10480 = vmatprep.subr.bf16.mxu0 %v11025_v37  ;;  %10502 = vmatprep.subr.bf16.mxu1 %v11030_v43 }
 0x982   :  { %10481 = vmatpush3.bf16.msra.mxu0 %v11027_v44  ;;  %10503 = vmatpush3.bf16.msra.mxu1 %v11032_v45  ;;  %v10381_v44 = vunpack.c.l.bf16 %v10384_v27 }
 0x983   :  { %10482 = vmatprep.subr.bf16.mxu0 %v11029_v47  ;;  %10504 = vmatprep.subr.bf16.mxu1 %v11034_v49 }
 0x984   :  { %v11564_v28 = vpop.eup %11563 }
 0x985   :  { %v11566_v35 = vpop.eup %11565  ;;  %v12857_v45 = vsel %vm3784_vm10, %v11564_v28, 0.0  ;;  %v9678_v28 = vld [vmem:[#allocation8] ss:$0 sm:$0xff] }
 0x986   :  { %10483 = vmatpush3.bf16.msra.mxu0 %v11031_v51  ;;  %10505 = vmatpush3.bf16.msra.mxu1 %v11036_v52 }
 0x987   :  { %10484 = vmatprep.subr.bf16.mxu0 %v11033_v53  ;;  %10506 = vmatprep.subr.bf16.mxu1 %v11038_v54 }
 0x98a   :  { %10485 = vmatpush3.bf16.msra.mxu0 %v11035_v55  ;;  %10507 = vmatpush3.bf16.msra.mxu1 %v11040_v56  ;;  %v10382_v55 = vunpack.c.h.bf16 %v10384_v27  ;;  %v12859_v56 = vsel %vm3785_vm11, %v11566_v35, 0.0 }
 0x98b   :  { %10486 = vmatprep.subr.bf16.mxu0 %v11037_v57  ;;  %10508 = vmatprep.subr.bf16.mxu1 %v11042_v58 }
 0x98c   :  { %v3805_v41 = vmul.f32 %v10382_v55, %v12859_v56 }
 0x98e   :  { %10487 = vmatpush3.bf16.msra.mxu0 %v11039_v59  ;;  %10509 = vmatpush3.bf16.msra.mxu1 %v11044_v29 }
 0x98f   :  { %10488 = vmatprep.subr.bf16.mxu0 %v11041_v34  ;;  %10510 = vmatprep.subr.bf16.mxu1 %v11046_v60  ;;  %v3804_v60 = vmul.f32 %v10381_v44, %v12857_v45 }
 0x991   :  { %v3807_v14 = vpack.c.bf16 %v3805_v41, %v3804_v60 }
 0x992   :  { %10489 = vmatpush3.bf16.msra.mxu0 %v11043_v5  ;;  %10511 = vmatpush3.bf16.msra.mxu1 %v11048_v6  ;;  %v11055_v6 = vld [vmem:[#allocation10] sm:$0xff]  }
 0x993   :  { %10490 = vmatprep.subr.bf16.mxu0 %v11045_v33  ;;  %10512 = vmatprep.subr.bf16.mxu1 %v11050_v8 }
 0x996   :  { %10491 = vmatpush3.bf16.msra.mxu0 %v11047_v42  ;;  %10513 = vmatpush3.bf16.msra.mxu1 %v11052_v12 }
 0x997   :  { %10492 = vmatprep.subr.bf16.mxu0 %v11049_v40  ;;  %10514 = vmatprep.subr.bf16.mxu1 %v11053_v15  ;;  %v12864_v40 = vld [vmem:[%s13310_s25] sm:$0xff]   ;;  %v11056_v15 = vld [vmem:[#allocation10 + $0x8] sm:$0xff]  }
 0x99a   :  { %10493 = vmatpush3.bf16.msra.mxu0 %v11051_v16  ;;  %10515 = vmatpush3.bf16.msra.mxu1 %v11054_v17  ;;  %v12870_v16 = vld [vmem:[%s13310_s25 + $0x8] sm:$0xff]   ;;  %v11057_v17 = vld [vmem:[#allocation10 + $0x10] sm:$0xff]  }
 0x99b   :  { %10686 = vmatprep.subr.bf16.mxu0 %v12833_v18  ;;  %10694 = vmatprep.subr.bf16.mxu1 %v11055_v6 }
 0x9d2   :  { %v2960_v32 = vpop.f32.mrb[36].mxu0 }
 0x9d3   :  { %v10758_v7 = vadd.f32 %v2960_v32, %v1730_v24  ;;  %v3046_v37 = vpop.f32.mrb[24].mxu1  ;;  %v2962_v43 = vpop.f32.mrb[37].mxu0 }
 0x9d4   :  { %v10762_v47 = vadd.f32 %v3046_v37, %v1738_v25  ;;  %v10759_v49 = vadd.f32 %v2962_v43, %v1734_v26  ;;  %v3048_v46 = vpop.f32.mrb[25].mxu1  ;;  %v2964_v50 = vpop.f32.mrb[38].mxu0 }
 0x9d5   :  { %v10763_v51 = vadd.f32 %v3048_v46, %v1742_v30  ;;  %v10760_v52 = vadd.f32 %v2964_v50, %v1730_v24  ;;  %v3050_v53 = vpop.f32.mrb[26].mxu1  ;;  %v2966_v54 = vpop.f32.mrb[39].mxu0  ;;  %v3059_v59 = vmax.f32 %v10758_v7, 0.0  ;;  %v11061_v24 = vld [vmem:[#allocation10 + $0x30] sm:$0xff]  }
 0x9d6   :  { %v10764_v1 = vadd.f32 %v3050_v53, %v1738_v25  ;;  %v10761_v57 = vadd.f32 %v2966_v54, %v1734_v26  ;;  %v3052_v58 = vpop.f32.mrb[27].mxu1  ;;  %v3061_v63 = vmax.f32 %v10762_v47, 0.0  ;;  %v3060_v4 = vmax.f32 %v10759_v49, 0.0  ;;  %v11062_v25 = vld [vmem:[#allocation10 + $0x38] sm:$0xff]  }
 0x9d7   :  { %v3067_v29 = vmax.f32 %v10760_v52, 0.0  ;;  %v10765_v34 = vadd.f32 %v3052_v58, %v1742_v30  ;;  %v3062_v33 = vmax.f32 %v10763_v51, 0.0 }
 0x9d8   :  { %v3069_v2 = vmax.f32 %v10764_v1, 0.0  ;;  %v3068_v5 = vmax.f32 %v10761_v57, 0.0 }
 0x9d9   :  { %v3075_v8 = vpack.c.bf16 %v3067_v29, %v3059_v59  ;;  %v3070_v9 = vmax.f32 %v10765_v34, 0.0 }
 0x9da   :  { %v3077_v42 = vpack.c.bf16 %v3069_v2, %v3061_v63  ;;  %v3076_v12 = vpack.c.bf16 %v3068_v5, %v3060_v4 }
 0x9db   :  { %v3078_v13 = vpack.c.bf16 %v3070_v9, %v3062_v33 }
 0x9dc   :  { %3712 = vmatprep.mubr.bf16.mxu0 %v3076_v12 }
 0x9dd   :  { %3753 = vmatprep.mubr.bf16.mxu1 %v3078_v13  ;;  %3713 = vmatmul.mubr.bf16.vlgmr.msra.gmra.mrb[44].mxu0 %v3075_v8 }
 0x9de   :  { %3754 = vmatmul.mubr.bf16.vlgmr.msra.gmra.mrb[32].mxu1 %v3077_v42  ;;  %10687 = vmatpush3.bf16.msra.mxu0 %v12833_v18  ;;  %v11059_v18 = vld [vmem:[#allocation10 + $0x20] sm:$0xff]  }
 0x9df   :  { %10688 = vmatprep.subr.bf16.mxu0 %v3807_v14  ;;  %10690 = vmatprep.mubr.msk.bf16.mxu0 %vm384_vm0, %v12864_v40 }
 0x9e0   :  { %10695 = vmatpush3.bf16.msra.mxu1 %v11055_v6 }
 0x9e1   :  { %10696 = vmatprep.subr.bf16.mxu1 %v11056_v15 }
 0x9e2   :  { %10689 = vmatpush3.bf16.msra.mxu0 %v3807_v14 }
 0x9e4   :  { %10697 = vmatpush3.bf16.msra.mxu1 %v11056_v15 }
 0x9e5   :  { %10691 = vmatmul.mubr.msk.bf16.vlgmr.msra.gmra.mrb[48].mxu0 %vm384_vm0, %v12870_v16  ;;  %10698 = vmatprep.subr.bf16.mxu1 %v11057_v17 }
 0x9e6   :  { %10718 = vmatprep.mubr.msk.bf16.mxu0 %vm384_vm0, %v12864_v40 }
 0x9e8   :  { %10699 = vmatpush3.bf16.msra.mxu1 %v11057_v17 }
 0x9e9   :  { %10700 = vmatprep.subr.bf16.mxu1 %v11058_v19 }
 0x9ec   :  { %10701 = vmatpush3.bf16.msra.mxu1 %v11058_v19 }
 0x9ed   :  { %10702 = vmatprep.subr.bf16.mxu1 %v11059_v18 }
 0x9f0   :  { %10703 = vmatpush3.bf16.msra.mxu1 %v11059_v18 }
 0x9f1   :  { %10704 = vmatprep.subr.bf16.mxu1 %v11060_v20 }
 0x9f4   :  { %10705 = vmatpush3.bf16.msra.mxu1 %v11060_v20 }
 0x9f5   :  { %10706 = vmatprep.subr.bf16.mxu1 %v11061_v24 }
 0x9f8   :  { %10707 = vmatpush3.bf16.msra.mxu1 %v11061_v24  ;;  %v9747_v24 = vld [vmem:[#allocation11] ss:$0 sm:$0xff] }
 0x9f9   :  { %10708 = vmatprep.subr.bf16.mxu1 %v11062_v25 }
 0x9fc   :  { %10709 = vmatpush3.bf16.msra.mxu1 %v11062_v25 }
 0xa50   :  { %v10450_v26 = vpop.f32.mrb[40].mxu0  ;;  %v10472_v27 = vpop.f32.mrb[28].mxu1 }
 0xa51   :  { %v10451_v30 = vpop.f32.mrb[41].mxu0  ;;  %v10473_v32 = vpop.f32.mrb[29].mxu1 }
 0xa52   :  { %v10452_v35 = vadd.f32 %v10451_v30, %v10450_v26  ;;  %v10474_v7 = vadd.f32 %v10473_v32, %v10472_v27  ;;  %v10453_v37 = vpop.f32.mrb[42].mxu0  ;;  %v10475_v43 = vpop.f32.mrb[30].mxu1 }
 0xa53   :  { %v10454_v44 = vpop.f32.mrb[43].mxu0  ;;  %v10476_v47 = vpop.f32.mrb[31].mxu1 }
 0xa54   :  { %v3633_v49 = vadd.f32 %v10452_v35, %v9678_v28  ;;  %v10455_v46 = vadd.f32 %v10454_v44, %v10453_v37  ;;  %v10477_v50 = vadd.f32 %v10476_v47, %v10475_v43 }
 0xa56   :  { %v3674_v51 = vadd.f32 %v10474_v7, %v3633_v49  ;;  %v3636_v52 = vadd.f32 %v10455_v46, %v9678_v28 }
 0xa58   :  { %v3677_v53 = vadd.f32 %v10477_v50, %v3636_v52 }
 0xab0   :  { %v10494_v54 = vpop.f32.mrb[44].mxu0 }
 0xab1   :  { %v10516_v55 = vpop.f32.mrb[32].mxu1  ;;  %v10495_v1 = vpop.f32.mrb[45].mxu0 }
 0xab2   :  { %v10496_v57 = vadd.f32 %v10495_v1, %v10494_v54  ;;  %v10517_v58 = vpop.f32.mrb[33].mxu1  ;;  %v10497_v59 = vpop.f32.mrb[46].mxu0 }
 0xab3   :  { %v10518_v29 = vadd.f32 %v10517_v58, %v10516_v55  ;;  %v10519_v34 = vpop.f32.mrb[34].mxu1  ;;  %v10498_v60 = vpop.f32.mrb[47].mxu0 }
 0xab4   :  { %v3715_v63 = vadd.f32 %v10496_v57, %v3674_v51  ;;  %v10499_v4 = vadd.f32 %v10498_v60, %v10497_v59  ;;  %v10520_v2 = vpop.f32.mrb[35].mxu1  ;;  %v11065_v60 = vld [vmem:[#allocation13 + $0x10] sm:$0xff]  }
 0xab5   :  { %v10521_v5 = vadd.f32 %v10520_v2, %v10519_v34  ;;  %v11064_v34 = vld [vmem:[#allocation13 + $0x8] sm:$0xff]  }
 0xab6   :  { %v3756_v6 = vadd.f32 %v10518_v29, %v3715_v63  ;;  %v3718_v33 = vadd.f32 %v10499_v4, %v3677_v53  ;;  %v11063_v29 = vld [vmem:[#allocation13] sm:$0xff]   ;;  %v11066_v63 = vld [vmem:[#allocation13 + $0x18] sm:$0xff]   ;;  %v11068_v2 = vld [vmem:[#allocation13 + $0x28] sm:$0xff]  }
 0xab7   :  { %v11067_v4 = vld [vmem:[#allocation13 + $0x20] sm:$0xff]  }
 0xab8   :  { %v3759_v8 = vadd.f32 %v10521_v5, %v3718_v33  ;;  %v10692_v9 = vpop.f32.mrb[48].mxu0  ;;  %v11069_v5 = vld [vmem:[#allocation13 + $0x30] sm:$0xff]  }
 0xab9   :  { %v3858_v41 = vpop.f32.mrb[49].mxu0  ;;  %v3875_v13 = vmul.f32 %v10692_v9, %v12857_v45 }
 0xaba   :  { %v12876_v42 = vpack.c.bf16 %v3759_v8, %v3756_v6  ;;  %v10693_v12 = vpop.f32.mrb[50].mxu0  ;;  %v3873_v17 = vmul.f32 %v3858_v41, %v12823_v10  ;;  %v11070_v6 = vld [vmem:[#allocation13 + $0x38] sm:$0xff]  }
 0xabb   :  { %v3876_v14 = vmul.f32 %v10693_v12, %v12859_v56  ;;  %v3861_v15 = vpop.f32.mrb[51].mxu0 }
 0xabc   :  { %v3874_v19 = vmul.f32 %v3861_v15, %v12821_v11 }
 0xabd   :  { %v3878_v18 = vpack.c.bf16 %v3876_v14, %v3875_v13 }
 0xabe   :  { %v3877_v20 = vpack.c.bf16 %v3874_v19, %v3873_v17 }
 0xac0   :  { %10710 = vmatprep.mubr.bf16.mxu1 %v3877_v20  ;;  %v11073_v20 = vld [vmem:[#allocation16 + $0x4] ss:$8 sps:$4 sm:$0xff]  }
 0xac1   :  { %10711 = vmatmul.mubr.bf16.vlgmr.msra.gmra.mrb[36].mxu1 %v3878_v18  ;;  %v11071_v18 = vld [vmem:[#allocation16] ss:$8 sps:$4 sm:$0xff]   ;;  %4369 = vmatprep.subr.bf16.mxu1 %v11073_v20 }
 0xac2   :  { %4401 = vmatprep.mubr.bf16.mxu1 %v12070_v36  ;;  %4370 = vmatpush1.bf16.msra.mxu1 %v11071_v18 }
 0xb94   :  { %v10712_v25 = vpop.f32.mrb[36].mxu1 }
 0xb95   :  { %v3993_v26 = vadd.f32 %v10712_v25, %v9747_v24  ;;  %v3984_v27 = vpop.f32.mrb[37].mxu1  ;;  %v11074_v25 = vld [vmem:[#allocation16 + $0x10] ss:$8 sps:$4 sm:$0xff]  }
 0xb96   :  { %v3985_v28 = vadd.f32 %v9747_v24, %v3984_v27  ;;  %v10713_v30 = vpop.f32.mrb[38].mxu1  ;;  %v11077_v27 = vld [vmem:[#allocation16 + $0x20] ss:$8 sps:$4 sm:$0xff]  }
 0xb97   :  { %v3996_v32 = vadd.f32 %v10713_v30, %v9747_v24  ;;  %v3987_v35 = vpop.f32.mrb[39].mxu1  ;;  %v4001_v37 = vmax.f32 %v3993_v26, 0.0  ;;  %v11079_v26 = vld [vmem:[#allocation16 + $0x24] ss:$8 sps:$4 sm:$0xff]   ;;  %v11080_v30 = vld [vmem:[#allocation16 + $0x30] ss:$8 sps:$4 sm:$0xff]  }
 0xb98   :  { %v3988_v7 = vadd.f32 %v9747_v24, %v3987_v35  ;;  %v3999_v44 = vmax.f32 %v3985_v28, 0.0  ;;  %v11076_v24 = vld [vmem:[#allocation16 + $0x14] ss:$8 sps:$4 sm:$0xff]   ;;  %v11083_v35 = vld [vmem:[#allocation16 + $0x40] ss:$8 sps:$4 sm:$0xff]  }
 0xb99   :  { %v4002_v43 = vmax.f32 %v3996_v32, 0.0  ;;  %4371 = vmatprep.subr.bf16.mxu1 %v11076_v24  ;;  %v11082_v28 = vld [vmem:[#allocation16 + $0x34] ss:$8 sps:$4 sm:$0xff]   ;;  %v11085_v32 = vld [vmem:[#allocation16 + $0x44] ss:$8 sps:$4 sm:$0xff]  }
 0xb9a   :  { %v4000_v47 = vmax.f32 %v3988_v7, 0.0  ;;  %4372 = vmatpush1.bf16.msra.mxu1 %v11074_v25  ;;  %v11086_v7 = vld [vmem:[#allocation16 + $0x50] ss:$8 sps:$4 sm:$0xff]  }
 0xb9b   :  { %v4004_v49 = vpack.c.bf16 %v4002_v43, %v4001_v37  ;;  %4373 = vmatprep.subr.bf16.mxu1 %v11079_v26  ;;  %v9758_v37 = vld [vmem:[#allocation14] ss:$0 sm:$0xff] }
 0xb9c   :  { %v4003_v46 = vpack.c.bf16 %v4000_v47, %v3999_v44 }
 0xb9d   :  { %v4007_v50 = vunpack.c.l.bf16 %v4004_v49  ;;  %v4008_v51 = vunpack.c.h.bf16 %v4004_v49 }
 0xb9e   :  { %v4005_v52 = vunpack.c.l.bf16 %v4003_v46  ;;  %v4006_v53 = vunpack.c.h.bf16 %v4003_v46  ;;  %4374 = vmatpush1.bf16.msra.mxu1 %v11077_v27 }
 0xb9f   :  { %v4011_v1 = vmul.f32 %v4007_v50, %v12857_v45  ;;  %v4012_v57 = vmul.f32 %v4008_v51, %v12859_v56  ;;  %4375 = vmatprep.subr.bf16.mxu1 %v11082_v28  ;;  %v4507_v28 = vld [vmem:[#allocation19 + $0x8] sm:$0xff] }
 0xba0   :  { %v4009_v54 = vmul.f32 %v4005_v52, %v12823_v10  ;;  %v4010_v55 = vmul.f32 %v4006_v53, %v12821_v11 }
 0xba1   :  { %v4014_v59 = vpack.c.bf16 %v4012_v57, %v4011_v1 }
 0xba2   :  { %v4013_v58 = vpack.c.bf16 %v4010_v55, %v4009_v54  ;;  %4376 = vmatpush1.bf16.msra.mxu1 %v11080_v30  ;;  %v4511_v30 = vld [vmem:[#allocation19 + $0x28] sm:$0xff] }
 0xba3   :  { %4377 = vmatprep.subr.bf16.mxu1 %v11085_v32  ;;  %v9791_v32 = vcombine.low %v4507_v28, %v4511_v30 }
 0xba4   :  { %10714 = vmatprep.subr.bf16.mxu0 %v4013_v58 }
 0xba5   :  { %10715 = vmatpush3.bf16.msra.mxu0 %v4013_v58 }
 0xba6   :  { %10716 = vmatprep.subr.bf16.mxu0 %v4014_v59  ;;  %4378 = vmatpush1.bf16.msra.mxu1 %v11083_v35  ;;  %v9792_v35 = vcombine.high %v4507_v28, %v4511_v30  ;;  %v4611_v28 = vld [vmem:[#allocation19 + $0x348] sm:$0xff] }
 0xba7   :  { %v4615_v30 = vld [vmem:[#allocation19 + $0x368] sm:$0xff] }
 0xba9   :  { %10717 = vmatpush3.bf16.msra.mxu0 %v4014_v59 }
 0xbaa   :  { %10722 = vmatprep.subr.bf16.mxu0 %v11063_v29 }
 0xbac   :  { %10719 = vmatmul.mubr.msk.bf16.vlgmr.msra.gmra.mrb[52].mxu0 %vm384_vm0, %v12870_v16 }
 0xbad   :  { %10723 = vmatpush3.bf16.msra.mxu0 %v11063_v29 }
 0xbae   :  { %10724 = vmatprep.subr.bf16.mxu0 %v11064_v34 }
 0xbb1   :  { %10725 = vmatpush3.bf16.msra.mxu0 %v11064_v34 }
 0xbb2   :  { %10726 = vmatprep.subr.bf16.mxu0 %v11065_v60 }
 0xbb5   :  { %10727 = vmatpush3.bf16.msra.mxu0 %v11065_v60 }
 0xbb6   :  { %10728 = vmatprep.subr.bf16.mxu0 %v11066_v63 }
 0xbb9   :  { %10729 = vmatpush3.bf16.msra.mxu0 %v11066_v63 }
 0xbba   :  { %10730 = vmatprep.subr.bf16.mxu0 %v11067_v4 }
 0xbbd   :  { %10731 = vmatpush3.bf16.msra.mxu0 %v11067_v4 }
 0xbbe   :  { %10732 = vmatprep.subr.bf16.mxu0 %v11068_v2 }
 0xbc1   :  { %10733 = vmatpush3.bf16.msra.mxu0 %v11068_v2 }
 0xbc2   :  { %10734 = vmatprep.subr.bf16.mxu0 %v11069_v5 }
 0xbc5   :  { %10735 = vmatpush3.bf16.msra.mxu0 %v11069_v5 }
 0xbc6   :  { %10736 = vmatprep.subr.bf16.mxu0 %v11070_v6 }
 0xbc9   :  { %10737 = vmatpush3.bf16.msra.mxu0 %v11070_v6 }
 0xc7f   :  { %v10720_v33 = vpop.f32.mrb[52].mxu0 }
 0xc80   :  { %v4049_v8 = vpop.f32.mrb[53].mxu0  ;;  %v4066_v41 = vmul.f32 %v10720_v33, %v12857_v45 }
 0xc81   :  { %v10721_v9 = vpop.f32.mrb[54].mxu0  ;;  %v4064_v14 = vmul.f32 %v4049_v8, %v12823_v10  ;;  %v11091_v8 = vld [vmem:[#allocation16 + $0x64] ss:$8 sps:$4 sm:$0xff]  }
 0xc82   :  { %v4067_v12 = vmul.f32 %v10721_v9, %v12859_v56  ;;  %v4052_v13 = vpop.f32.mrb[55].mxu0  ;;  %v11089_v9 = vld [vmem:[#allocation16 + $0x60] ss:$8 sps:$4 sm:$0xff]  }
 0xc83   :  { %v4065_v15 = vmul.f32 %v4052_v13, %v12821_v11  ;;  %v9785_v13 = vld [vmem:[%s13314_s28] ss:$0 sm:$0xff] }
 0xc84   :  { %v4069_v17 = vpack.c.bf16 %v4067_v12, %v4066_v41  ;;  %v11094_v41 = vld [vmem:[#allocation16 + $0x74] ss:$8 sps:$4 sm:$0xff]   ;;  %v11092_v12 = vld [vmem:[#allocation16 + $0x70] ss:$8 sps:$4 sm:$0xff]   ;;  %vm4440_vm12 = vcmp.eq.s32.totalorder %v9785_v13, %v12491_v38  ;;  %vm4439_vm13 = vcmp.eq.s32.totalorder %v9785_v13, %v12430_v61 }
 0xc85   :  { %v4068_v19 = vpack.c.bf16 %v4065_v15, %v4064_v14  ;;  %v12906_v14 = vsel %vm4440_vm12, 1.0, %v12071_v39 }
 0xc86   :  { %v4448_v15 = vsel %vm384_vm0, %v12906_v14, 0.0 }
 0xc87   :  { %10738 = vmatprep.mubr.bf16.mxu0 %v4068_v19  ;;  %4449 = vadd.xlane.f32.xlu1 %v4448_v15  ;;  %v4587_v15 = vld [vmem:[#allocation19 + $0x288] sm:$0xff] }
 0xc88   :  { %10739 = vmatmul.mubr.bf16.vlgmr.msra.gmra.mrb[56].mxu0 %v4069_v17 }
 0xc89   :  { %10746 = vmatprep.mubr.msk.bf16.mxu0 %vm384_vm0, %v12864_v40  ;;  %v11088_v40 = vld [vmem:[#allocation16 + $0x54] ss:$8 sps:$4 sm:$0xff]  }
 0xc8a   :  { %4379 = vmatprep.subr.bf16.mxu1 %v11088_v40  ;;  %v4515_v40 = vld [vmem:[#allocation19 + $0x48] sm:$0xff] }
 0xc8b   :  { %4380 = vmatpush1.bf16.msra.mxu1 %v11086_v7  ;;  %v4519_v7 = vld [vmem:[#allocation19 + $0x68] sm:$0xff] }
 0xc8c   :  { %4381 = vmatprep.subr.bf16.mxu1 %v11091_v8 }
 0xc8f   :  { %4382 = vmatpush1.bf16.msra.mxu1 %v11089_v9  ;;  %v4579_v9 = vld [vmem:[#allocation19 + $0x248] sm:$0xff] }
 0xc90   :  { %4383 = vmatprep.subr.bf16.mxu1 %v11094_v41  ;;  %v4583_v41 = vld [vmem:[#allocation19 + $0x268] sm:$0xff] }
 0xc91   :  { %v9863_v13 = vcombine.low %v4579_v9, %v4583_v41 }
 0xc93   :  { %4384 = vmatpush1.bf16.msra.mxu1 %v11092_v12  ;;  %v9864_v12 = vcombine.high %v4579_v9, %v4583_v41 }
 0xc94   :  { %5359 = vmatprep.subr.bf16.mxu1 %v9792_v35  ;;  %v9895_v35 = vcombine.low %v4611_v28, %v4615_v30 }
 0xd5b   :  { %v10740_v43 = vpop.f32.mrb[56].mxu0 }
 0xd5c   :  { %v4184_v44 = vadd.f32 %v10740_v43, %v9758_v37  ;;  %v4175_v47 = vpop.f32.mrb[57].mxu0 }
 0xd5d   :  { %v4176_v49 = vadd.f32 %v9758_v37, %v4175_v47  ;;  %v10741_v46 = vpop.f32.mrb[58].mxu0  ;;  %v4535_v47 = vld [vmem:[#allocation19 + $0xe8] sm:$0xff] }
 0xd5e   :  { %v4187_v50 = vadd.f32 %v10741_v46, %v9758_v37  ;;  %v4178_v51 = vpop.f32.mrb[59].mxu0  ;;  %v4192_v53 = vmax.f32 %v4184_v44, 0.0  ;;  %v4531_v44 = vld [vmem:[#allocation19 + $0xc8] sm:$0xff] }
 0xd5f   :  { %v4179_v52 = vadd.f32 %v9758_v37, %v4178_v51  ;;  %v4190_v55 = vmax.f32 %v4176_v49, 0.0  ;;  %v4527_v37 = vld [vmem:[#allocation19 + $0xa8] sm:$0xff]  ;;  %v9816_v49 = vcombine.high %v4531_v44, %v4535_v47  ;;  %v9815_v46 = vcombine.low %v4531_v44, %v4535_v47 }
 0xd60   :  { %v4193_v54 = vmax.f32 %v4187_v50, 0.0  ;;  %v4539_v50 = vld [vmem:[#allocation19 + $0x108] sm:$0xff] }
 0xd61   :  { %v4191_v1 = vmax.f32 %v4179_v52, 0.0  ;;  %v4543_v51 = vld [vmem:[#allocation19 + $0x128] sm:$0xff] }
 0xd62   :  { %v4195_v57 = vpack.c.bf16 %v4193_v54, %v4192_v53  ;;  %v9824_v52 = vcombine.high %v4539_v50, %v4543_v51  ;;  %v9823_v53 = vcombine.low %v4539_v50, %v4543_v51  ;;  %v4547_v54 = vld [vmem:[#allocation19 + $0x148] sm:$0xff] }
 0xd63   :  { %v4194_v58 = vpack.c.bf16 %v4191_v1, %v4190_v55  ;;  %v4551_v55 = vld [vmem:[#allocation19 + $0x168] sm:$0xff] }
 0xd64   :  { %v4198_v59 = vunpack.c.l.bf16 %v4195_v57  ;;  %v4199_v29 = vunpack.c.h.bf16 %v4195_v57  ;;  %v9832_v1 = vcombine.high %v4547_v54, %v4551_v55  ;;  %v9831_v57 = vcombine.low %v4547_v54, %v4551_v55 }
 0xd65   :  { %v4196_v34 = vunpack.c.l.bf16 %v4194_v58  ;;  %v4197_v60 = vunpack.c.h.bf16 %v4194_v58  ;;  %v4555_v58 = vld [vmem:[#allocation19 + $0x188] sm:$0xff] }
 0xd66   :  { %v4202_v2 = vmul.f32 %v4198_v59, %v12857_v45  ;;  %v4203_v5 = vmul.f32 %v4199_v29, %v12859_v56  ;;  %v4559_v59 = vld [vmem:[#allocation19 + $0x1a8] sm:$0xff] }
 0xd67   :  { %v4200_v63 = vmul.f32 %v4196_v34, %v12823_v10  ;;  %v4201_v4 = vmul.f32 %v4197_v60, %v12821_v11  ;;  %v9840_v29 = vcombine.high %v4555_v58, %v4559_v59  ;;  %v9839_v34 = vcombine.low %v4555_v58, %v4559_v59  ;;  %v4563_v60 = vld [vmem:[#allocation19 + $0x1c8] sm:$0xff] }
 0xd68   :  { %v4205_v33 = vpack.c.bf16 %v4203_v5, %v4202_v2  ;;  %v4571_v5 = vld [vmem:[#allocation19 + $0x208] sm:$0xff] }
 0xd69   :  { %v4204_v6 = vpack.c.bf16 %v4201_v4, %v4200_v63  ;;  %v4567_v63 = vld [vmem:[#allocation19 + $0x1e8] sm:$0xff] }
 0xd6a   :  { %v9848_v4 = vcombine.high %v4563_v60, %v4567_v63  ;;  %v9847_v2 = vcombine.low %v4563_v60, %v4567_v63 }
 0xd6b   :  { %10742 = vmatprep.subr.bf16.mxu0 %v4204_v6 }
 0xd6c   :  { %10743 = vmatpush3.bf16.msra.mxu0 %v4204_v6  ;;  %v4575_v6 = vld [vmem:[#allocation19 + $0x228] sm:$0xff] }
 0xd6d   :  { %10744 = vmatprep.subr.bf16.mxu0 %v4205_v33  ;;  %v9855_v8 = vcombine.low %v4571_v5, %v4575_v6 }
 0xd70   :  { %10745 = vmatpush3.bf16.msra.mxu0 %v4205_v33  ;;  %v9856_v33 = vcombine.high %v4571_v5, %v4575_v6 }
 0xd73   :  { %10747 = vmatmul.mubr.msk.bf16.vlgmr.msra.gmra.mrb[60].mxu0 %vm384_vm0, %v12870_v16  ;;  %v12909_v16 = vsel %vm4439_vm13, 1.0, %v12071_v39 }
 0xd74   :  { %4493 = vmatprep.mubr.bf16.mxu0 %v12070_v36  ;;  %v4445_v17 = vsel %vm384_vm0, %v12909_v16, 0.0 }
 0xd75   :  { %4446 = vadd.xlane.f32.xlu0 %v4445_v17  ;;  %v4591_v17 = vld [vmem:[#allocation19 + $0x2a8] sm:$0xff] }
 0xe46   :  { %v10748_v19 = vpop.f32.mrb[60].mxu0 }
 0xe47   :  { %v4240_v18 = vpop.f32.mrb[61].mxu0  ;;  %v4257_v38 = vmul.f32 %v10748_v19, %v12857_v45  ;;  %v9800_v45 = vcombine.high %v4515_v40, %v4519_v7  ;;  %v9872_v19 = vcombine.high %v4587_v15, %v4591_v17 }
 0xe48   :  { %v10749_v20 = vpop.f32.mrb[62].mxu0  ;;  %v4255_v25 = vmul.f32 %v4240_v18, %v12823_v10  ;;  %v4523_v10 = vld [vmem:[#allocation19 + $0x88] sm:$0xff]  ;;  %v9871_v18 = vcombine.low %v4587_v15, %v4591_v17  ;;  %v4506_v17 = vld [vmem:[#allocation19] sm:$0xff] }
 0xe49   :  { %v4258_v61 = vmul.f32 %v10749_v20, %v12859_v56  ;;  %v4243_v24 = vpop.f32.mrb[63].mxu0  ;;  %v9799_v56 = vcombine.low %v4515_v40, %v4519_v7  ;;  %v9807_v43 = vcombine.low %v4523_v10, %v4527_v37  ;;  %v4595_v20 = vld [vmem:[#allocation19 + $0x2c8] sm:$0xff] }
 0xe4a   :  { %v4256_v39 = vmul.f32 %v4243_v24, %v12821_v11  ;;  %v9808_v11 = vcombine.high %v4523_v10, %v4527_v37  ;;  %v4619_v40 = vld [vmem:[#allocation19 + $0x388] sm:$0xff]  ;;  %v4450_v10 = vpop.xlane.xlu1 %4449  ;;  %v4277_v37 = vld [vmem:[#allocation17] sm:$0x3] }
 0xe4b   :  { %v4260_v26 = vpack.c.bf16 %v4258_v61, %v4257_v38  ;;  %v4599_v38 = vld [vmem:[#allocation19 + $0x2e8] sm:$0xff]  ;;  %v4282_v44 = vrot.slane %v4277_v37, %v12433_v62 }
 0xe4c   :  { %v4259_v27 = vpack.c.bf16 %v4256_v39, %v4255_v25  ;;  %v9880_v61 = vcombine.high %v4595_v20, %v4599_v38  ;;  %v9879_v24 = vcombine.low %v4595_v20, %v4599_v38  ;;  %v4603_v25 = vld [vmem:[#allocation19 + $0x308] sm:$0xff] }
 0xe4d   :  { %v4607_v39 = vld [vmem:[#allocation19 + $0x328] sm:$0xff] }
 0xe4e   :  { %4402 = vmatmul.mubr.bf16.vlgmr.msra.gmra.mrb[40].mxu1 %v4259_v27  ;;  %v9887_v27 = vcombine.low %v4603_v25, %v4607_v39  ;;  %v4623_v7 = vld [vmem:[#allocation19 + $0x3a8] sm:$0xff] }
 0xe4f   :  { %4411 = vmatprep.mubr.bf16.mxu1 %v12070_v36  ;;  %5360 = vmatpush1.bf16.msra.mxu1 %v9791_v32  ;;  %v9896_v32 = vcombine.high %v4611_v28, %v4615_v30 }
 0xe50   :  { %5361 = vmatprep.subr.bf16.mxu1 %v9800_v45  ;;  %v9904_v45 = vcombine.high %v4619_v40, %v4623_v7 }
 0xe53   :  { %5362 = vmatpush1.bf16.msra.mxu1 %v9799_v56  ;;  %v9903_v56 = vcombine.low %v4619_v40, %v4623_v7  ;;  %v4526_v40 = vld [vmem:[#allocation19 + $0xa0] sm:$0xff] }
 0xe54   :  { %5363 = vmatprep.subr.bf16.mxu1 %v9808_v11  ;;  %v4447_v11 = vpop.xlane.xlu0 %4446  ;;  %v4530_v7 = vld [vmem:[#allocation19 + $0xc0] sm:$0xff] }
 0xe55   :  { %v4451_v47 = vmax.f32 %v4447_v11, 1.0  ;;  %v4542_v11 = vld [vmem:[#allocation19 + $0x120] sm:$0xff] }
 0xe56   :  { %4412 = vmatmul.mubr.bf16.gmra.mrb[44].mxu1 %v4260_v26  ;;  %v9888_v26 = vcombine.high %v4603_v25, %v4607_v39 }
 0xe57   :  { %5364 = vmatpush1.bf16.msra.mxu1 %v9807_v43  ;;  %v4452_v43 = vmax.f32 %v4450_v10, 1.0 }
 0xe58   :  { %5365 = vmatprep.subr.bf16.mxu1 %v9816_v49  ;;  %v4286_v49 = vrot.slane %v4277_v37, %v12436_v0  ;;  %v4538_v37 = vld [vmem:[#allocation19 + $0x100] sm:$0xff] }
 0xe59   :  { %11567 = vrcp.f32 %v4452_v43 }
 0xe5a   :  { %11569 = vrcp.f32 %v4451_v47  ;;  %v4546_v47 = vld [vmem:[#allocation19 + $0x140] sm:$0xff] }
 0xe5b   :  { %5366 = vmatpush1.bf16.msra.mxu1 %v9815_v46 }
 0xe5c   :  { %5367 = vmatprep.subr.bf16.mxu1 %v9824_v52 }
 0xe5f   :  { %5368 = vmatpush1.bf16.msra.mxu1 %v9823_v53 }
 0xe60   :  { %5369 = vmatprep.subr.bf16.mxu1 %v9832_v1 }
 0xe63   :  { %5370 = vmatpush1.bf16.msra.mxu1 %v9831_v57  ;;  %v11568_v5 = vpop.eup %11567 }
 0xe64   :  { %5371 = vmatprep.subr.bf16.mxu1 %v9840_v29 }
 0xe67   :  { %5372 = vmatpush1.bf16.msra.mxu1 %v9839_v34 }
 0xe68   :  { %5373 = vmatprep.subr.bf16.mxu1 %v9848_v4 }
 0xe6b   :  { %5374 = vmatpush1.bf16.msra.mxu1 %v9847_v2 }
 0xe6c   :  { %5375 = vmatprep.subr.bf16.mxu1 %v9856_v33 }
 0xe6f   :  { %5376 = vmatpush1.bf16.msra.mxu1 %v9855_v8  ;;  %v11570_v8 = vpop.eup %11569 }
 0xe70   :  { %5377 = vmatprep.subr.bf16.mxu1 %v9864_v12  ;;  %v4454_v20 = vmul.f32 %v11570_v8, %v12909_v16 }
 0xe73   :  { %5378 = vmatpush1.bf16.msra.mxu1 %v9863_v13 }
 0xe74   :  { %5379 = vmatprep.subr.bf16.mxu1 %v9872_v19  ;;  %v4510_v19 = vld [vmem:[#allocation19 + $0x20] sm:$0xff] }
 0xe75   :  { %v9790_v39 = vcombine.high %v4506_v17, %v4510_v19  ;;  %v9789_v30 = vcombine.low %v4506_v17, %v4510_v19  ;;  %v4602_v17 = vld [vmem:[#allocation19 + $0x300] sm:$0xff] }
 0xe76   :  { %v4606_v19 = vld [vmem:[#allocation19 + $0x320] sm:$0xff] }
 0xe77   :  { %5380 = vmatpush1.bf16.msra.mxu1 %v9871_v18  ;;  %v4456_v18 = vmul.f32 %v11568_v5, %v12906_v14 }
 0xe78   :  { %5381 = vmatprep.subr.bf16.mxu1 %v9880_v61 }
 0xe79   :  { %v4457_v28 = vpack.c.bf16 %v4456_v18, %v4454_v20  ;;  %v9886_v20 = vcombine.high %v4602_v17, %v4606_v19 }
 0xe7b   :  { %5382 = vmatpush1.bf16.msra.mxu1 %v9879_v24 }
 0xe7c   :  { %5383 = vmatprep.subr.bf16.mxu1 %v9888_v26  ;;  %v4514_v26 = vld [vmem:[#allocation19 + $0x40] sm:$0xff] }
 0xe7f   :  { %5384 = vmatpush1.bf16.msra.mxu1 %v9887_v27  ;;  %v4518_v27 = vld [vmem:[#allocation19 + $0x60] sm:$0xff] }
 0xe80   :  { %5385 = vmatprep.subr.bf16.mxu1 %v9896_v32  ;;  %v9798_v32 = vcombine.high %v4514_v26, %v4518_v27  ;;  %v9797_v14 = vcombine.low %v4514_v26, %v4518_v27  ;;  %v4622_v26 = vld [vmem:[#allocation19 + $0x3a0] sm:$0xff] }
 0xe83   :  { %5386 = vmatpush1.bf16.msra.mxu1 %v9895_v35  ;;  %v4522_v35 = vld [vmem:[#allocation19 + $0x80] sm:$0xff] }
 0xe84   :  { %5387 = vmatprep.subr.bf16.mxu1 %v9904_v45  ;;  %v9806_v16 = vcombine.high %v4522_v35, %v4526_v40  ;;  %v4534_v45 = vld [vmem:[#allocation19 + $0xe0] sm:$0xff] }
 0xe85   :  { %v9814_v10 = vcombine.high %v4530_v7, %v4534_v45  ;;  %v9813_v43 = vcombine.low %v4530_v7, %v4534_v45 }
 0xe87   :  { %5388 = vmatpush1.bf16.msra.mxu1 %v9903_v56  ;;  %v9805_v56 = vcombine.low %v4522_v35, %v4526_v40  ;;  %v4630_v35 = vld [vmem:[#allocation19 + $0x3e0] sm:$0xff]  ;;  %v4627_v40 = vld [vmem:[#allocation19 + $0x3c8] sm:$0xff] }
 0xf21   :  { %v4403_v46 = vpop.f32.mrb[40].mxu1 }
 0xf22   :  { %v4404_v50 = vadd.f32 %v4403_v46, %v4282_v44  ;;  %v4405_v51 = vpop.f32.mrb[41].mxu1  ;;  %v9821_v46 = vcombine.low %v4538_v37, %v4542_v11 }
 0xf23   :  { %v4406_v52 = vadd.f32 %v4405_v51, %v4286_v49  ;;  %v4407_v53 = vpop.f32.mrb[42].mxu1  ;;  %v4554_v51 = vld [vmem:[#allocation19 + $0x180] sm:$0xff] }
 0xf24   :  { %v4408_v54 = vadd.f32 %v4407_v53, %v4282_v44  ;;  %v4409_v55 = vpop.f32.mrb[43].mxu1  ;;  %v4422_v57 = vmax.f32 %v4404_v50, 0.0 }
 0xf25   :  { %v4410_v1 = vadd.f32 %v4409_v55, %v4286_v49  ;;  %v4423_v59 = vmax.f32 %v4406_v52, 0.0  ;;  %v4558_v52 = vld [vmem:[#allocation19 + $0x1a0] sm:$0xff] }
 0xf26   :  { %v4424_v58 = vmax.f32 %v4408_v54, 0.0  ;;  %v9838_v54 = vcombine.high %v4554_v51, %v4558_v52  ;;  %v4562_v55 = vld [vmem:[#allocation19 + $0x1c0] sm:$0xff] }
 0xf27   :  { %v4425_v29 = vmax.f32 %v4410_v1, 0.0  ;;  %v4566_v1 = vld [vmem:[#allocation19 + $0x1e0] sm:$0xff] }
 0xf28   :  { %v4430_v34 = vpack.c.bf16 %v4424_v58, %v4422_v57  ;;  %v9837_v57 = vcombine.low %v4554_v51, %v4558_v52  ;;  %v9846_v58 = vcombine.high %v4562_v55, %v4566_v1 }
 0xf29   :  { %v4431_v60 = vpack.c.bf16 %v4425_v29, %v4423_v59  ;;  %v4413_v63 = vpop.f32.mrb[44].mxu1  ;;  %v4570_v59 = vld [vmem:[#allocation19 + $0x200] sm:$0xff] }
 0xf2a   :  { %v4414_v4 = vadd.f32 %v4413_v63, %v4282_v44  ;;  %v4415_v2 = vpop.f32.mrb[45].mxu1  ;;  %v4574_v29 = vld [vmem:[#allocation19 + $0x220] sm:$0xff] }
 0xf2b   :  { %v4416_v6 = vadd.f32 %v4415_v2, %v4286_v49  ;;  %v4417_v33 = vpop.f32.mrb[46].mxu1  ;;  %4461 = vmatprep.subr.bf16.mxu0 %v4431_v60  ;;  %v9854_v60 = vcombine.high %v4570_v59, %v4574_v29  ;;  %v4578_v63 = vld [vmem:[#allocation19 + $0x240] sm:$0xff]  ;;  %v9853_v2 = vcombine.low %v4570_v59, %v4574_v29  ;;  %v4524_v29 = vld [vmem:[#allocation19 + $0x90] sm:$0xff] }
 0xf2c   :  { %v4418_v9 = vadd.f32 %v4417_v33, %v4282_v44  ;;  %v4419_v41 = vpop.f32.mrb[47].mxu1  ;;  %4462 = vmatpush1.bf16.msra.mxu0 %v4430_v34  ;;  %v4426_v13 = vmax.f32 %v4414_v4, 0.0  ;;  %v9822_v44 = vcombine.high %v4538_v37, %v4542_v11  ;;  %v9845_v34 = vcombine.low %v4562_v55, %v4566_v1  ;;  %v4582_v4 = vld [vmem:[#allocation19 + $0x260] sm:$0xff]  ;;  %v4512_v37 = vld [vmem:[#allocation19 + $0x30] sm:$0xff]  ;;  %v4509_v11 = vld [vmem:[#allocation19 + $0x18] sm:$0xff] }
 0xf2d   :  { %v4420_v12 = vadd.f32 %v4419_v41, %v4286_v49  ;;  %v4427_v38 = vmax.f32 %v4416_v6, 0.0  ;;  %v4550_v49 = vld [vmem:[#allocation19 + $0x160] sm:$0xff]  ;;  %v9862_v5 = vcombine.high %v4578_v63, %v4582_v4  ;;  %v9861_v8 = vcombine.low %v4578_v63, %v4582_v4  ;;  %v4520_v1 = vld [vmem:[#allocation19 + $0x70] sm:$0xff]  ;;  %v4525_v4 = vld [vmem:[#allocation19 + $0x98] sm:$0xff] }
 0xf2e   :  { %v4428_v15 = vmax.f32 %v4418_v9, 0.0  ;;  %v9830_v50 = vcombine.high %v4546_v47, %v4550_v49  ;;  %v9829_v53 = vcombine.low %v4546_v47, %v4550_v49  ;;  %v4586_v6 = vld [vmem:[#allocation19 + $0x280] sm:$0xff]  ;;  %v4528_v63 = vld [vmem:[#allocation19 + $0xb0] sm:$0xff] }
 0xf2f   :  { %v4429_v61 = vmax.f32 %v4420_v12, 0.0  ;;  %v4590_v33 = vld [vmem:[#allocation19 + $0x2a0] sm:$0xff] }
 0xf30   :  { %v4432_v24 = vpack.c.bf16 %v4428_v15, %v4426_v13  ;;  %v9870_v9 = vcombine.high %v4586_v6, %v4590_v33  ;;  %v4594_v41 = vld [vmem:[#allocation19 + $0x2c0] sm:$0xff]  ;;  %v9869_v13 = vcombine.low %v4586_v6, %v4590_v33  ;;  %v9810_v33 = vcombine.high %v4524_v29, %v4528_v63 }
 0xf31   :  { %v4433_v25 = vpack.c.bf16 %v4429_v61, %v4427_v38  ;;  %v4598_v12 = vld [vmem:[#allocation19 + $0x2e0] sm:$0xff] }
 0xf32   :  { %v9878_v15 = vcombine.high %v4594_v41, %v4598_v12  ;;  %v9877_v18 = vcombine.low %v4594_v41, %v4598_v12  ;;  %v4610_v38 = vld [vmem:[#allocation19 + $0x340] sm:$0xff]  ;;  %v4536_v41 = vld [vmem:[#allocation19 + $0xf0] sm:$0xff]  ;;  %v4533_v12 = vld [vmem:[#allocation19 + $0xd8] sm:$0xff] }
 0xf33   :  { %4463 = vmatprep.subr.bf16.mxu0 %v4433_v25  ;;  %v4614_v61 = vld [vmem:[#allocation19 + $0x360] sm:$0xff] }
 0xf34   :  { %4464 = vmatpush1.bf16.msra.mxu0 %v4432_v24  ;;  %v9885_v24 = vcombine.low %v4602_v17, %v4606_v19  ;;  %v9894_v25 = vcombine.high %v4610_v38, %v4614_v61  ;;  %v9893_v27 = vcombine.low %v4610_v38, %v4614_v61  ;;  %v4544_v38 = vld [vmem:[#allocation19 + $0x130] sm:$0xff]  ;;  %v4541_v61 = vld [vmem:[#allocation19 + $0x118] sm:$0xff] }
 0xf35   :  { %5316 = vmatprep.subr.bf16.mxu0 %v9790_v39  ;;  %v4618_v39 = vld [vmem:[#allocation19 + $0x380] sm:$0xff] }
 0xf37   :  { %9788 = vmatmul.mubr.msk.bf16.vlgmr.msra.gmra.mrb[64].mxu0 %vm384_vm0, %v4457_v28  ;;  %v9902_v28 = vcombine.high %v4618_v39, %v4622_v26 }
 0xf38   :  { %5317 = vmatpush1.bf16.msra.mxu0 %v9789_v30  ;;  %v9901_v30 = vcombine.low %v4618_v39, %v4622_v26 }
 0xf39   :  { %5318 = vmatprep.subr.bf16.mxu0 %v9798_v32  ;;  %v4626_v32 = vld [vmem:[#allocation19 + $0x3c0] sm:$0xff] }
 0xf3a   :  { %v9909_v7 = vcombine.low %v4626_v32, %v4630_v35 }
 0xf3c   :  { %5319 = vmatpush1.bf16.msra.mxu0 %v9797_v14  ;;  %v9910_v14 = vcombine.high %v4626_v32, %v4630_v35  ;;  %v4549_v32 = vld [vmem:[#allocation19 + $0x158] sm:$0xff] }
 0xf3d   :  { %5320 = vmatprep.subr.bf16.mxu0 %v9806_v16  ;;  %v4631_v16 = vld [vmem:[#allocation19 + $0x3e8] sm:$0xff]  ;;  %v4553_v35 = vld [vmem:[#allocation19 + $0x178] sm:$0xff] }
 0xf3e   :  { %v9911_v45 = vcombine.low %v4627_v40, %v4631_v16 }
 0xf40   :  { %5321 = vmatpush1.bf16.msra.mxu0 %v9805_v56  ;;  %v9912_v56 = vcombine.high %v4627_v40, %v4631_v16 }
 0xf41   :  { %5322 = vmatprep.subr.bf16.mxu0 %v9814_v10  ;;  %v4508_v10 = vld [vmem:[#allocation19 + $0x10] sm:$0xff] }
 0xf42   :  { %5389 = vmatprep.subr.bf16.mxu1 %v9912_v56  ;;  %v9793_v47 = vcombine.low %v4508_v10, %v4512_v37  ;;  %v4560_v56 = vld [vmem:[#allocation19 + $0x1b0] sm:$0xff] }
 0xf43   :  { %5390 = vmatpush1.bf16.msra.mxu1 %v9911_v45  ;;  %v4556_v45 = vld [vmem:[#allocation19 + $0x190] sm:$0xff] }
 0xf44   :  { %5323 = vmatpush1.bf16.msra.mxu0 %v9813_v43  ;;  %v9794_v43 = vcombine.high %v4508_v10, %v4512_v37  ;;  %v4557_v10 = vld [vmem:[#allocation19 + $0x198] sm:$0xff] }
 0xf45   :  { %5324 = vmatprep.subr.bf16.mxu0 %v9822_v44  ;;  %v4513_v44 = vld [vmem:[#allocation19 + $0x38] sm:$0xff] }
 0xf46   :  { %v9795_v49 = vcombine.low %v4509_v11, %v4513_v44  ;;  %v4561_v37 = vld [vmem:[#allocation19 + $0x1b8] sm:$0xff] }
 0xf48   :  { %5325 = vmatpush1.bf16.msra.mxu0 %v9821_v46  ;;  %v9796_v46 = vcombine.high %v4509_v11, %v4513_v44  ;;  %v9842_v44 = vcombine.high %v4556_v45, %v4560_v56 }
 0xf49   :  { %5326 = vmatprep.subr.bf16.mxu0 %v9830_v50 }
 0xf4a   :  { %5445 = vmatprep.subr.bf16.mxu1 %v9796_v46  ;;  %v4568_v46 = vld [vmem:[#allocation19 + $0x1f0] sm:$0xff] }
 0xf4c   :  { %5327 = vmatpush1.bf16.msra.mxu0 %v9829_v53  ;;  %v4516_v53 = vld [vmem:[#allocation19 + $0x50] sm:$0xff] }
 0xf4d   :  { %5328 = vmatprep.subr.bf16.mxu0 %v9838_v54 }
 0xf50   :  { %5329 = vmatpush1.bf16.msra.mxu0 %v9837_v57  ;;  %v4517_v57 = vld [vmem:[#allocation19 + $0x58] sm:$0xff] }
 0xf51   :  { %5330 = vmatprep.subr.bf16.mxu0 %v9846_v58  ;;  %v4521_v58 = vld [vmem:[#allocation19 + $0x78] sm:$0xff] }
 0xf52   :  { %v9803_v6 = vcombine.low %v4517_v57, %v4521_v58 }
 0xf54   :  { %5331 = vmatpush1.bf16.msra.mxu0 %v9845_v34  ;;  %v9802_v34 = vcombine.high %v4516_v53, %v4520_v1 }
 0xf55   :  { %5332 = vmatprep.subr.bf16.mxu0 %v9854_v60  ;;  %v9804_v60 = vcombine.high %v4517_v57, %v4521_v58  ;;  %v4572_v57 = vld [vmem:[#allocation19 + $0x210] sm:$0xff] }
 0xf56   :  { %v4576_v58 = vld [vmem:[#allocation19 + $0x230] sm:$0xff] }
 0xf58   :  { %5333 = vmatpush1.bf16.msra.mxu0 %v9853_v2  ;;  %v4529_v2 = vld [vmem:[#allocation19 + $0xb8] sm:$0xff] }
 0xf59   :  { %5334 = vmatprep.subr.bf16.mxu0 %v9862_v5  ;;  %v9801_v5 = vcombine.low %v4516_v53, %v4520_v1  ;;  %v9811_v17 = vcombine.low %v4525_v4, %v4529_v2  ;;  %v9843_v53 = vcombine.low %v4557_v10, %v4561_v37 }
 0xf5c   :  { %5335 = vmatpush1.bf16.msra.mxu0 %v9861_v8  ;;  %v9812_v8 = vcombine.high %v4525_v4, %v4529_v2  ;;  %v4580_v2 = vld [vmem:[#allocation19 + $0x250] sm:$0xff] }
 0xf5d   :  { %5336 = vmatprep.subr.bf16.mxu0 %v9870_v9  ;;  %v4532_v9 = vld [vmem:[#allocation19 + $0xd0] sm:$0xff] }
 0xf5e   :  { %v9818_v19 = vcombine.high %v4532_v9, %v4536_v41 }
 0xf60   :  { %5337 = vmatpush1.bf16.msra.mxu0 %v9869_v13  ;;  %v4537_v13 = vld [vmem:[#allocation19 + $0xf8] sm:$0xff] }
 0xf61   :  { %5338 = vmatprep.subr.bf16.mxu0 %v9878_v15  ;;  %v9809_v15 = vcombine.low %v4524_v29, %v4528_v63  ;;  %v9819_v39 = vcombine.low %v4533_v12, %v4537_v13  ;;  %v4577_v29 = vld [vmem:[#allocation19 + $0x238] sm:$0xff]  ;;  %v9858_v63 = vcombine.high %v4572_v57, %v4576_v58 }
 0xf64   :  { %5339 = vmatpush1.bf16.msra.mxu0 %v9877_v18  ;;  %v9820_v18 = vcombine.high %v4533_v12, %v4537_v13  ;;  %v4588_v13 = vld [vmem:[#allocation19 + $0x290] sm:$0xff] }
 0xf65   :  { %5340 = vmatprep.subr.bf16.mxu0 %v9886_v20  ;;  %v4540_v20 = vld [vmem:[#allocation19 + $0x110] sm:$0xff] }
 0xf66   :  { %v9826_v26 = vcombine.high %v4540_v20, %v4544_v38  ;;  %v9825_v40 = vcombine.low %v4540_v20, %v4544_v38 }
 0xf68   :  { %5341 = vmatpush1.bf16.msra.mxu0 %v9885_v24  ;;  %v4545_v24 = vld [vmem:[#allocation19 + $0x138] sm:$0xff] }
 0xf69   :  { %5342 = vmatprep.subr.bf16.mxu0 %v9894_v25  ;;  %v9817_v25 = vcombine.low %v4532_v9, %v4536_v41 }
 0xf6c   :  { %5343 = vmatpush1.bf16.msra.mxu0 %v9893_v27  ;;  %v9828_v27 = vcombine.high %v4541_v61, %v4545_v24 }
 0xf6d   :  { %5344 = vmatprep.subr.bf16.mxu0 %v9902_v28  ;;  %v4548_v28 = vld [vmem:[#allocation19 + $0x150] sm:$0xff] }
 0xf70   :  { %5345 = vmatpush1.bf16.msra.mxu0 %v9901_v30  ;;  %v4552_v30 = vld [vmem:[#allocation19 + $0x170] sm:$0xff] }
 0xf71   :  { %5346 = vmatprep.subr.bf16.mxu0 %v9910_v14  ;;  %v9827_v14 = vcombine.low %v4541_v61, %v4545_v24  ;;  %v9834_v16 = vcombine.high %v4548_v28, %v4552_v30  ;;  %v9833_v11 = vcombine.low %v4548_v28, %v4552_v30  ;;  %v4596_v24 = vld [vmem:[#allocation19 + $0x2d0] sm:$0xff] }
 0xf74   :  { %5347 = vmatpush1.bf16.msra.mxu0 %v9909_v7  ;;  %v9836_v7 = vcombine.high %v4549_v32, %v4553_v35 }
 0xf75   :  { %5402 = vmatprep.subr.bf16.mxu0 %v9794_v43  ;;  %v9835_v43 = vcombine.low %v4549_v32, %v4553_v35  ;;  %v4604_v35 = vld [vmem:[#allocation19 + $0x310] sm:$0xff] }
0x100a   :  { %v4495_v50 = vpop.f32.mrb[64].mxu0 }
0x100b   :  { %v4497_v51 = vpop.f32.mrb[65].mxu0 }
0x100c   :  { %v4499_v52 = vpop.f32.mrb[66].mxu0 }
0x100d   :  { %v12925_v54 = vpack.c.bf16 %v4499_v52, %v4495_v50  ;;  %v4501_v55 = vpop.f32.mrb[67].mxu0  ;;  %v4565_v50 = vld [vmem:[#allocation19 + $0x1d8] sm:$0xff]  ;;  %v9841_v52 = vcombine.low %v4556_v45, %v4560_v56 }
0x100e   :  { %v4505_v59 = vpack.c.bf16 %v4501_v55, %v4497_v51  ;;  %v4569_v51 = vld [vmem:[#allocation19 + $0x1f8] sm:$0xff] }
0x100f   :  { %v9852_v1 = vcombine.high %v4565_v50, %v4569_v51 }
0x1010   :  { %5348 = vmatprep.mubr.bf16.mxu0 %v4505_v59  ;;  %5391 = vmatprep.mubr.bf16.mxu1 %v4505_v59 }
0x1011   :  { %5349 = vmatmul.mubr.bf16.vlgmr.msra.gmra.mrb[68].mxu0 %v12925_v54  ;;  %5392 = vmatmul.mubr.bf16.vlgmr.msra.gmra.mrb[48].mxu1 %v12925_v54 }
0x1012   :  { %5403 = vmatpush1.bf16.msra.mxu0 %v9793_v47  ;;  %5446 = vmatpush1.bf16.msra.mxu1 %v9795_v49  ;;  %v9844_v47 = vcombine.high %v4557_v10, %v4561_v37  ;;  %v4564_v49 = vld [vmem:[#allocation19 + $0x1d0] sm:$0xff] }
0x1013   :  { %5434 = vmatprep.mubr.bf16.mxu0 %v4505_v59  ;;  %5477 = vmatprep.mubr.bf16.mxu1 %v4505_v59  ;;  %v9850_v55 = vcombine.high %v4564_v49, %v4568_v46  ;;  %v4573_v59 = vld [vmem:[#allocation19 + $0x218] sm:$0xff]  ;;  %v4612_v37 = vld [vmem:[#allocation19 + $0x350] sm:$0xff] }
0x1014   :  { %5404 = vmatprep.subr.bf16.mxu0 %v9802_v34  ;;  %5447 = vmatprep.subr.bf16.mxu1 %v9804_v60  ;;  %v9849_v34 = vcombine.low %v4564_v49, %v4568_v46  ;;  %v9851_v60 = vcombine.low %v4565_v50, %v4569_v51  ;;  %v9860_v4 = vcombine.high %v4573_v59, %v4577_v29  ;;  %v4620_v51 = vld [vmem:[#allocation19 + $0x390] sm:$0xff] }
0x1015   :  { %v9859_v9 = vcombine.low %v4573_v59, %v4577_v29  ;;  %v4628_v29 = vld [vmem:[#allocation19 + $0x3d0] sm:$0xff] }
0x1016   :  { %5405 = vmatpush1.bf16.msra.mxu0 %v9801_v5  ;;  %5448 = vmatpush1.bf16.msra.mxu1 %v9803_v6  ;;  %v4584_v5 = vld [vmem:[#allocation19 + $0x270] sm:$0xff]  ;;  %v4581_v6 = vld [vmem:[#allocation19 + $0x258] sm:$0xff] }
0x1017   :  { %5406 = vmatprep.subr.bf16.mxu0 %v9810_v33  ;;  %5449 = vmatprep.subr.bf16.mxu1 %v9812_v8  ;;  %v4585_v33 = vld [vmem:[#allocation19 + $0x278] sm:$0xff]  ;;  %v9857_v8 = vcombine.low %v4572_v57, %v4576_v58  ;;  %v9866_v41 = vcombine.high %v4580_v2, %v4584_v5 }
0x1018   :  { %v9868_v12 = vcombine.high %v4581_v6, %v4585_v33  ;;  %v9867_v20 = vcombine.low %v4581_v6, %v4585_v33 }
0x101a   :  { %5407 = vmatpush1.bf16.msra.mxu0 %v9809_v15  ;;  %5450 = vmatpush1.bf16.msra.mxu1 %v9811_v17  ;;  %v4592_v15 = vld [vmem:[#allocation19 + $0x2b0] sm:$0xff]  ;;  %v4589_v17 = vld [vmem:[#allocation19 + $0x298] sm:$0xff] }
0x101b   :  { %5408 = vmatprep.subr.bf16.mxu0 %v9818_v19  ;;  %5451 = vmatprep.subr.bf16.mxu1 %v9820_v18  ;;  %v4593_v19 = vld [vmem:[#allocation19 + $0x2b8] sm:$0xff]  ;;  %v9865_v18 = vcombine.low %v4580_v2, %v4584_v5  ;;  %v9874_v38 = vcombine.high %v4588_v13, %v4592_v15 }
0x101c   :  { %v9876_v61 = vcombine.high %v4589_v17, %v4593_v19  ;;  %v9875_v28 = vcombine.low %v4589_v17, %v4593_v19  ;;  %v11100_v17 = vld [vmem:[#allocation22 + $0xc8] sm:$0xff]  }
0x101d   :  { %v11101_v19 = vld [vmem:[#allocation22 + $0x8] sm:$0xff]  }
0x101e   :  { %5409 = vmatpush1.bf16.msra.mxu0 %v9817_v25  ;;  %5452 = vmatpush1.bf16.msra.mxu1 %v9819_v39  ;;  %v4600_v25 = vld [vmem:[#allocation19 + $0x2f0] sm:$0xff]  ;;  %v4597_v39 = vld [vmem:[#allocation19 + $0x2d8] sm:$0xff] }
0x101f   :  { %5410 = vmatprep.subr.bf16.mxu0 %v9826_v26  ;;  %5453 = vmatprep.subr.bf16.mxu1 %v9828_v27  ;;  %v4601_v26 = vld [vmem:[#allocation19 + $0x2f8] sm:$0xff]  ;;  %v9873_v27 = vcombine.low %v4588_v13, %v4592_v15  ;;  %v9882_v30 = vcombine.high %v4596_v24, %v4600_v25  ;;  %v11098_v13 = vld [vmem:[#allocation22 + $0x80] sm:$0xff]   ;;  %v11099_v15 = vld [vmem:[#allocation22 + $0x48] sm:$0xff]  }
0x1020   :  { %v9884_v32 = vcombine.high %v4597_v39, %v4601_v26  ;;  %v9883_v45 = vcombine.low %v4597_v39, %v4601_v26  ;;  %v11108_v39 = vld [vmem:[#allocation22 + $0xd8] sm:$0xff]  }
0x1021   :  { %v11109_v26 = vld [vmem:[#allocation22 + $0x18] sm:$0xff]  }
0x1022   :  { %5411 = vmatpush1.bf16.msra.mxu0 %v9825_v40  ;;  %5454 = vmatpush1.bf16.msra.mxu1 %v9827_v14  ;;  %v4608_v40 = vld [vmem:[#allocation19 + $0x330] sm:$0xff]  ;;  %v4605_v14 = vld [vmem:[#allocation19 + $0x318] sm:$0xff] }
0x1023   :  { %5412 = vmatprep.subr.bf16.mxu0 %v9834_v16  ;;  %5455 = vmatprep.subr.bf16.mxu1 %v9836_v7  ;;  %v4609_v16 = vld [vmem:[#allocation19 + $0x338] sm:$0xff]  ;;  %v9881_v7 = vcombine.low %v4596_v24, %v4600_v25  ;;  %v9890_v56 = vcombine.high %v4604_v35, %v4608_v40  ;;  %v11107_v25 = vld [vmem:[#allocation22 + $0x58] sm:$0xff]  }
0x1024   :  { %v9892_v10 = vcombine.high %v4605_v14, %v4609_v16  ;;  %v9891_v49 = vcombine.low %v4605_v14, %v4609_v16  ;;  %v11106_v24 = vld [vmem:[#allocation22 + $0x90] sm:$0xff]   ;;  %v11117_v14 = vld [vmem:[#allocation22 + $0x28] sm:$0xff]  }
0x1025   :  { %v11118_v16 = vld [vmem:[#allocation22 + $0xa8] sm:$0xff]  }
0x1026   :  { %5413 = vmatpush1.bf16.msra.mxu0 %v9833_v11  ;;  %5456 = vmatpush1.bf16.msra.mxu1 %v9835_v43  ;;  %v4616_v11 = vld [vmem:[#allocation19 + $0x370] sm:$0xff]  ;;  %v4613_v43 = vld [vmem:[#allocation19 + $0x358] sm:$0xff] }
0x1027   :  { %5414 = vmatprep.subr.bf16.mxu0 %v9842_v44  ;;  %5457 = vmatprep.subr.bf16.mxu1 %v9844_v47  ;;  %v4617_v44 = vld [vmem:[#allocation19 + $0x378] sm:$0xff]  ;;  %v9889_v47 = vcombine.low %v4604_v35, %v4608_v40  ;;  %v9898_v46 = vcombine.high %v4612_v37, %v4616_v11  ;;  %v11115_v35 = vld [vmem:[#allocation22 + $0x68] sm:$0xff]  }
0x1028   :  { %v9900_v50 = vcombine.high %v4613_v43, %v4617_v44  ;;  %v9899_v57 = vcombine.low %v4613_v43, %v4617_v44  ;;  %v11116_v40 = vld [vmem:[#allocation22 + $0xe8] sm:$0xff]   ;;  %v11125_v43 = vld [vmem:[#allocation22 + $0x38] sm:$0xff]  }
0x1029   :  { %v11126_v44 = vld [vmem:[#allocation22 + $0xb8] sm:$0xff]  }
0x102a   :  { %5415 = vmatpush1.bf16.msra.mxu0 %v9841_v52  ;;  %5458 = vmatpush1.bf16.msra.mxu1 %v9843_v53  ;;  %v4624_v52 = vld [vmem:[#allocation19 + $0x3b0] sm:$0xff]  ;;  %v4621_v53 = vld [vmem:[#allocation19 + $0x398] sm:$0xff] }
0x102b   :  { %5416 = vmatprep.subr.bf16.mxu0 %v9850_v55  ;;  %5459 = vmatprep.subr.bf16.mxu1 %v9852_v1  ;;  %v4625_v55 = vld [vmem:[#allocation19 + $0x3b8] sm:$0xff]  ;;  %v9897_v1 = vcombine.low %v4612_v37, %v4616_v11  ;;  %v9906_v58 = vcombine.high %v4620_v51, %v4624_v52  ;;  %v11123_v37 = vld [vmem:[#allocation22 + $0x78] sm:$0xff]  }
0x102c   :  { %v9908_v59 = vcombine.high %v4621_v53, %v4625_v55  ;;  %v9907_v2 = vcombine.low %v4621_v53, %v4625_v55  ;;  %v11124_v11 = vld [vmem:[#allocation22 + $0xf8] sm:$0xff]  }
0x102e   :  { %5417 = vmatpush1.bf16.msra.mxu0 %v9849_v34  ;;  %5460 = vmatpush1.bf16.msra.mxu1 %v9851_v60  ;;  %v4632_v34 = vld [vmem:[#allocation19 + $0x3f0] sm:$0xff]  ;;  %v4629_v60 = vld [vmem:[#allocation19 + $0x3d8] sm:$0xff] }
0x102f   :  { %5418 = vmatprep.subr.bf16.mxu0 %v9858_v63  ;;  %5461 = vmatprep.subr.bf16.mxu1 %v9860_v4  ;;  %v4633_v63 = vld [vmem:[#allocation19 + $0x3f8] sm:$0xff]  ;;  %v9905_v4 = vcombine.low %v4620_v51, %v4624_v52  ;;  %v9914_v5 = vcombine.high %v4628_v29, %v4632_v34  ;;  %v9913_v33 = vcombine.low %v4628_v29, %v4632_v34 }
0x1030   :  { %v9916_v6 = vcombine.high %v4629_v60, %v4633_v63 }
0x1032   :  { %5419 = vmatpush1.bf16.msra.mxu0 %v9857_v8  ;;  %5462 = vmatpush1.bf16.msra.mxu1 %v9859_v9  ;;  %v9915_v8 = vcombine.low %v4629_v60, %v4633_v63  ;;  %v11095_v9 = vld [vmem:[#allocation22 + $0x40] sm:$0xff]  }
0x1033   :  { %5420 = vmatprep.subr.bf16.mxu0 %v9866_v41  ;;  %5463 = vmatprep.subr.bf16.mxu1 %v9868_v12  ;;  %v11096_v41 = vld [vmem:[#allocation22 + $0xc0] sm:$0xff]  }
0x1034   :  { %v11097_v12 = vld [vmem:[#allocation22] sm:$0xff]  }
0x1036   :  { %5421 = vmatpush1.bf16.msra.mxu0 %v9865_v18  ;;  %5464 = vmatpush1.bf16.msra.mxu1 %v9867_v20  ;;  %v11102_v18 = vld [vmem:[#allocation22 + $0x88] sm:$0xff]   ;;  %v11103_v20 = vld [vmem:[#allocation22 + $0x50] sm:$0xff]  }
0x1037   :  { %5422 = vmatprep.subr.bf16.mxu0 %v9874_v38  ;;  %5465 = vmatprep.subr.bf16.mxu1 %v9876_v61  ;;  %v11104_v38 = vld [vmem:[#allocation22 + $0xd0] sm:$0xff]  }
0x1038   :  { %v11105_v61 = vld [vmem:[#allocation22 + $0x10] sm:$0xff]  }
0x103a   :  { %5423 = vmatpush1.bf16.msra.mxu0 %v9873_v27  ;;  %5466 = vmatpush1.bf16.msra.mxu1 %v9875_v28  ;;  %v11111_v27 = vld [vmem:[#allocation22 + $0x60] sm:$0xff]  }
0x103b   :  { %5424 = vmatprep.subr.bf16.mxu0 %v9882_v30  ;;  %5467 = vmatprep.subr.bf16.mxu1 %v9884_v32  ;;  %v11112_v28 = vld [vmem:[#allocation22 + $0xe0] sm:$0xff]  }
0x103c   :  { %v11113_v30 = vld [vmem:[#allocation22 + $0x20] sm:$0xff]  }
0x103d   :  { %v11114_v32 = vld [vmem:[#allocation22 + $0xa0] sm:$0xff]  }
0x103e   :  { %5425 = vmatpush1.bf16.msra.mxu0 %v9881_v7  ;;  %5468 = vmatpush1.bf16.msra.mxu1 %v9883_v45  ;;  %v11119_v7 = vld [vmem:[#allocation22 + $0x70] sm:$0xff]  }
0x103f   :  { %5426 = vmatprep.subr.bf16.mxu0 %v9890_v56  ;;  %5469 = vmatprep.subr.bf16.mxu1 %v9892_v10  ;;  %v11120_v45 = vld [vmem:[#allocation22 + $0xf0] sm:$0xff]  }
0x1040   :  { %v11121_v56 = vld [vmem:[#allocation22 + $0x30] sm:$0xff]  }
0x1041   :  { %v11122_v10 = vld [vmem:[#allocation22 + $0xb0] sm:$0xff]  }
0x1042   :  { %5427 = vmatpush1.bf16.msra.mxu0 %v9889_v47  ;;  %5470 = vmatpush1.bf16.msra.mxu1 %v9891_v49  ;;  %v11127_v47 = vld [vmem:[#allocation22 + $0x140] sm:$0xff]  }
0x1043   :  { %5428 = vmatprep.subr.bf16.mxu0 %v9898_v46  ;;  %5471 = vmatprep.subr.bf16.mxu1 %v9900_v50  ;;  %v11128_v49 = vld [vmem:[#allocation22 + $0x1c0] sm:$0xff]   ;;  %v12931_v46 = vld [vmem:[#allocation20] sm:$0xff] }
0x1044   :  { %v4639_v50 = vrot.slane %v12931_v46, %v12433_v62  ;;  %v4647_v51 = vrot.slane %v12931_v46, %v12546_v31  ;;  %v4643_v52 = vrot.slane %v12931_v46, %v12436_v0  ;;  %v4651_v53 = vrot.slane %v12931_v46, %v12786_v3 }
0x1046   :  { %5429 = vmatpush1.bf16.msra.mxu0 %v9897_v1  ;;  %5472 = vmatpush1.bf16.msra.mxu1 %v9899_v57 }
0x1047   :  { %5430 = vmatprep.subr.bf16.mxu0 %v9906_v58  ;;  %5473 = vmatprep.subr.bf16.mxu1 %v9908_v59 }
0x104a   :  { %5431 = vmatpush1.bf16.msra.mxu0 %v9905_v4  ;;  %5474 = vmatpush1.bf16.msra.mxu1 %v9907_v2 }
0x104b   :  { %5432 = vmatprep.subr.bf16.mxu0 %v9914_v5  ;;  %5475 = vmatprep.subr.bf16.mxu1 %v9916_v6 }
0x104e   :  { %5433 = vmatpush1.bf16.msra.mxu0 %v9913_v33  ;;  %5476 = vmatpush1.bf16.msra.mxu1 %v9915_v8 }
0x104f   :  { %10554 = vmatprep.subr.bf16.mxu0 %v11095_v9  ;;  %10576 = vmatprep.subr.bf16.mxu1 %v11096_v41 }
0x1051   :  { %5435 = vmatmul.mubr.bf16.vlgmr.msra.gmra.mrb[72].mxu0 %v12925_v54  ;;  %5478 = vmatmul.mubr.bf16.vlgmr.msra.gmra.mrb[52].mxu1 %v12925_v54  ;;  %v11110_v54 = vld [vmem:[#allocation22 + $0x98] sm:$0xff]  }
0x1052   :  { %10555 = vmatpush3.bf16.msra.mxu0 %v11097_v12  ;;  %10577 = vmatpush3.bf16.msra.mxu1 %v11098_v13 }
0x1053   :  { %10556 = vmatprep.subr.bf16.mxu0 %v11099_v15  ;;  %10578 = vmatprep.subr.bf16.mxu1 %v11100_v17 }
0x1056   :  { %10557 = vmatpush3.bf16.msra.mxu0 %v11101_v19  ;;  %10579 = vmatpush3.bf16.msra.mxu1 %v11102_v18 }
0x1057   :  { %10558 = vmatprep.subr.bf16.mxu0 %v11103_v20  ;;  %10580 = vmatprep.subr.bf16.mxu1 %v11104_v38 }
0x105a   :  { %10559 = vmatpush3.bf16.msra.mxu0 %v11105_v61  ;;  %10581 = vmatpush3.bf16.msra.mxu1 %v11106_v24 }
0x105b   :  { %10560 = vmatprep.subr.bf16.mxu0 %v11107_v25  ;;  %10582 = vmatprep.subr.bf16.mxu1 %v11108_v39  ;;  %v11129_v39 = vld [vmem:[#allocation22 + $0x100] sm:$0xff]  }
0x105e   :  { %10561 = vmatpush3.bf16.msra.mxu0 %v11109_v26  ;;  %10583 = vmatpush3.bf16.msra.mxu1 %v11110_v54  ;;  %v11130_v26 = vld [vmem:[#allocation22 + $0x180] sm:$0xff]   ;;  %v11131_v54 = vld [vmem:[#allocation22 + $0x148] sm:$0xff]  }
0x105f   :  { %10562 = vmatprep.subr.bf16.mxu0 %v11111_v27  ;;  %10584 = vmatprep.subr.bf16.mxu1 %v11112_v28  ;;  %v11132_v27 = vld [vmem:[#allocation22 + $0x1c8] sm:$0xff]  }
0x1060   :  { %v11133_v28 = vld [vmem:[#allocation22 + $0x108] sm:$0xff]  }
0x1062   :  { %10563 = vmatpush3.bf16.msra.mxu0 %v11113_v30  ;;  %10585 = vmatpush3.bf16.msra.mxu1 %v11114_v32  ;;  %v11134_v30 = vld [vmem:[#allocation22 + $0x188] sm:$0xff]   ;;  %v11135_v32 = vld [vmem:[#allocation22 + $0x150] sm:$0xff]  }
0x1063   :  { %10564 = vmatprep.subr.bf16.mxu0 %v11115_v35  ;;  %10586 = vmatprep.subr.bf16.mxu1 %v11116_v40  ;;  %v11136_v35 = vld [vmem:[#allocation22 + $0x1d0] sm:$0xff]  }
0x1064   :  { %v11137_v40 = vld [vmem:[#allocation22 + $0x110] sm:$0xff]  }
0x1066   :  { %10565 = vmatpush3.bf16.msra.mxu0 %v11117_v14  ;;  %10587 = vmatpush3.bf16.msra.mxu1 %v11118_v16  ;;  %v11138_v14 = vld [vmem:[#allocation22 + $0x190] sm:$0xff]   ;;  %v11139_v16 = vld [vmem:[#allocation22 + $0x158] sm:$0xff]  }
0x1067   :  { %10566 = vmatprep.subr.bf16.mxu0 %v11119_v7  ;;  %10588 = vmatprep.subr.bf16.mxu1 %v11120_v45  ;;  %v11140_v7 = vld [vmem:[#allocation22 + $0x1d8] sm:$0xff]  }
0x1068   :  { %v11141_v45 = vld [vmem:[#allocation22 + $0x118] sm:$0xff]  }
0x106a   :  { %10567 = vmatpush3.bf16.msra.mxu0 %v11121_v56  ;;  %10589 = vmatpush3.bf16.msra.mxu1 %v11122_v10  ;;  %v11142_v56 = vld [vmem:[#allocation22 + $0x198] sm:$0xff]   ;;  %v11143_v10 = vld [vmem:[#allocation22 + $0x160] sm:$0xff]  }
0x106b   :  { %10568 = vmatprep.subr.bf16.mxu0 %v11123_v37  ;;  %10590 = vmatprep.subr.bf16.mxu1 %v11124_v11  ;;  %v11144_v37 = vld [vmem:[#allocation22 + $0x1e0] sm:$0xff]  }
0x106c   :  { %v11145_v11 = vld [vmem:[#allocation22 + $0x120] sm:$0xff]  }
0x106e   :  { %10569 = vmatpush3.bf16.msra.mxu0 %v11125_v43  ;;  %10591 = vmatpush3.bf16.msra.mxu1 %v11126_v44  ;;  %v11146_v43 = vld [vmem:[#allocation22 + $0x1a0] sm:$0xff]   ;;  %v11147_v44 = vld [vmem:[#allocation22 + $0x168] sm:$0xff]  }
0x106f   :  { %10598 = vmatprep.subr.bf16.mxu0 %v11127_v47  ;;  %10620 = vmatprep.subr.bf16.mxu1 %v11128_v49  ;;  %v11148_v47 = vld [vmem:[#allocation22 + $0x1e8] sm:$0xff]  }
0x1070   :  { %v11149_v49 = vld [vmem:[#allocation22 + $0x128] sm:$0xff]  }
0x10e4   :  { %v5350_v55 = vpop.f32.mrb[68].mxu0  ;;  %v5393_v1 = vpop.f32.mrb[48].mxu1 }
0x10e5   :  { %v5351_v57 = vadd.f32 %v5350_v55, %v4639_v50  ;;  %v5394_v58 = vadd.f32 %v5393_v1, %v4647_v51  ;;  %v5352_v59 = vpop.f32.mrb[69].mxu0  ;;  %v5395_v29 = vpop.f32.mrb[49].mxu1  ;;  %v11154_v55 = vld [vmem:[#allocation22 + $0x1b0] sm:$0xff]   ;;  %v11155_v1 = vld [vmem:[#allocation22 + $0x178] sm:$0xff]  }
0x10e6   :  { %v5353_v34 = vadd.f32 %v5352_v59, %v4643_v52  ;;  %v5396_v60 = vadd.f32 %v5395_v29, %v4651_v53  ;;  %v5354_v63 = vpop.f32.mrb[70].mxu0  ;;  %v5397_v4 = vpop.f32.mrb[50].mxu1  ;;  %v11158_v59 = vld [vmem:[#allocation22 + $0x1b8] sm:$0xff]   ;;  %v4655_v29 = vrot.slane %v12931_v46, %v12837_v21 }
0x10e7   :  { %v5355_v2 = vadd.f32 %v5354_v63, %v4639_v50  ;;  %v5398_v5 = vadd.f32 %v5397_v4, %v4647_v51  ;;  %v5356_v6 = vpop.f32.mrb[71].mxu0  ;;  %v5399_v33 = vpop.f32.mrb[51].mxu1  ;;  %v5488_v41 = vmax.f32 %v5351_v57, 0.0  ;;  %v5490_v12 = vmax.f32 %v5394_v58, 0.0  ;;  %v11150_v50 = vld [vmem:[#allocation22 + $0x1a8] sm:$0xff]   ;;  %v11151_v51 = vld [vmem:[#allocation22 + $0x170] sm:$0xff]  }
0x10e8   :  { %v5357_v8 = vadd.f32 %v5356_v6, %v4643_v52  ;;  %v5400_v9 = vadd.f32 %v5399_v33, %v4651_v53  ;;  %v5489_v17 = vmax.f32 %v5353_v34, 0.0  ;;  %v5491_v19 = vmax.f32 %v5396_v60, 0.0  ;;  %v11152_v52 = vld [vmem:[#allocation22 + $0x1f0] sm:$0xff]   ;;  %v11156_v57 = vld [vmem:[#allocation22 + $0x1f8] sm:$0xff]  }
0x10e9   :  { %v5496_v13 = vmax.f32 %v5355_v2, 0.0  ;;  %v5498_v15 = vmax.f32 %v5398_v5, 0.0  ;;  %v11153_v53 = vld [vmem:[#allocation22 + $0x130] sm:$0xff]   ;;  %v11157_v58 = vld [vmem:[#allocation22 + $0x138] sm:$0xff]   ;;  %v4663_v34 = vrot.slane %v12931_v46, %v12840_v22  ;;  %v4659_v60 = vrot.slane %v12931_v46, %v12843_v48 }
0x10ea   :  { %v5497_v18 = vmax.f32 %v5357_v8, 0.0  ;;  %v5499_v20 = vmax.f32 %v5400_v9, 0.0  ;;  %v4667_v63 = vrot.slane %v12931_v46, %v12846_v23 }
0x10eb   :  { %v5504_v38 = vpack.c.bf16 %v5496_v13, %v5488_v41  ;;  %v5506_v61 = vpack.c.bf16 %v5498_v15, %v5490_v12 }
0x10ec   :  { %v5505_v24 = vpack.c.bf16 %v5497_v18, %v5489_v17  ;;  %v5507_v25 = vpack.c.bf16 %v5499_v20, %v5491_v19 }
0x10ee   :  { %6063 = vmatprep.mubr.bf16.mxu0 %v5505_v24  ;;  %6104 = vmatprep.mubr.bf16.mxu1 %v5507_v25 }
0x10ef   :  { %6064 = vmatmul.mubr.bf16.vlgmr.msra.gmra.mrb[76].mxu0 %v5504_v38  ;;  %6105 = vmatmul.mubr.bf16.vlgmr.msra.gmra.mrb[56].mxu1 %v5506_v61 }
0x10f0   :  { %10599 = vmatpush3.bf16.msra.mxu0 %v11129_v39  ;;  %10621 = vmatpush3.bf16.msra.mxu1 %v11130_v26 }
0x10f1   :  { %10600 = vmatprep.subr.bf16.mxu0 %v11131_v54  ;;  %10622 = vmatprep.subr.bf16.mxu1 %v11132_v27 }
0x10f4   :  { %10601 = vmatpush3.bf16.msra.mxu0 %v11133_v28  ;;  %10623 = vmatpush3.bf16.msra.mxu1 %v11134_v30 }
0x10f5   :  { %10602 = vmatprep.subr.bf16.mxu0 %v11135_v32  ;;  %10624 = vmatprep.subr.bf16.mxu1 %v11136_v35 }
0x10f8   :  { %10603 = vmatpush3.bf16.msra.mxu0 %v11137_v40  ;;  %10625 = vmatpush3.bf16.msra.mxu1 %v11138_v14  ;;  %v6261_v40 = vld [vmem:[#allocation26] sm:$0xff] }
0x10f9   :  { %10604 = vmatprep.subr.bf16.mxu0 %v11139_v16  ;;  %10626 = vmatprep.subr.bf16.mxu1 %v11140_v7  ;;  %v6265_v14 = vld [vmem:[#allocation26 + $0x20] sm:$0xff]  ;;  %v6262_v16 = vld [vmem:[#allocation26 + $0x8] sm:$0xff] }
0x10fa   :  { %v9982_v7 = vcombine.low %v6261_v40, %v6265_v14 }
0x10fc   :  { %10605 = vmatpush3.bf16.msra.mxu0 %v11141_v45  ;;  %10627 = vmatpush3.bf16.msra.mxu1 %v11142_v56  ;;  %v9983_v45 = vcombine.high %v6261_v40, %v6265_v14  ;;  %v6266_v56 = vld [vmem:[#allocation26 + $0x28] sm:$0xff] }
0x10fd   :  { %10606 = vmatprep.subr.bf16.mxu0 %v11143_v10  ;;  %10628 = vmatprep.subr.bf16.mxu1 %v11144_v37  ;;  %v6269_v10 = vld [vmem:[#allocation26 + $0x40] sm:$0xff] }
0x10fe   :  { %v6273_v37 = vld [vmem:[#allocation26 + $0x60] sm:$0xff] }
0x1100   :  { %10607 = vmatpush3.bf16.msra.mxu0 %v11145_v11  ;;  %10629 = vmatpush3.bf16.msra.mxu1 %v11146_v43  ;;  %v9984_v11 = vcombine.low %v6262_v16, %v6266_v56  ;;  %v9985_v43 = vcombine.high %v6262_v16, %v6266_v56  ;;  %v6317_v16 = vld [vmem:[#allocation26 + $0x1c0] sm:$0xff] }
0x1101   :  { %10608 = vmatprep.subr.bf16.mxu0 %v11147_v44  ;;  %10630 = vmatprep.subr.bf16.mxu1 %v11148_v47  ;;  %v9991_v44 = vcombine.high %v6269_v10, %v6273_v37  ;;  %v6270_v47 = vld [vmem:[#allocation26 + $0x48] sm:$0xff] }
0x1104   :  { %10609 = vmatpush3.bf16.msra.mxu0 %v11149_v49  ;;  %10631 = vmatpush3.bf16.msra.mxu1 %v11150_v50  ;;  %v6274_v49 = vld [vmem:[#allocation26 + $0x68] sm:$0xff]  ;;  %v6277_v50 = vld [vmem:[#allocation26 + $0x80] sm:$0xff] }
0x1105   :  { %10610 = vmatprep.subr.bf16.mxu0 %v11151_v51  ;;  %10632 = vmatprep.subr.bf16.mxu1 %v11152_v52  ;;  %v9993_v51 = vcombine.high %v6270_v47, %v6274_v49  ;;  %v6281_v52 = vld [vmem:[#allocation26 + $0xa0] sm:$0xff] }
0x1108   :  { %10611 = vmatpush3.bf16.msra.mxu0 %v11153_v53  ;;  %10633 = vmatpush3.bf16.msra.mxu1 %v11154_v55  ;;  %v6278_v53 = vld [vmem:[#allocation26 + $0x88] sm:$0xff] }
0x1109   :  { %10612 = vmatprep.subr.bf16.mxu0 %v11155_v1  ;;  %10634 = vmatprep.subr.bf16.mxu1 %v11156_v57  ;;  %v6282_v55 = vld [vmem:[#allocation26 + $0xa8] sm:$0xff]  ;;  %v9990_v1 = vcombine.low %v6269_v10, %v6273_v37  ;;  %v9992_v57 = vcombine.low %v6270_v47, %v6274_v49  ;;  %v6267_v47 = vld [vmem:[#allocation26 + $0x30] sm:$0xff]  ;;  %v6264_v49 = vld [vmem:[#allocation26 + $0x18] sm:$0xff] }
0x110a   :  { %v6322_v10 = vld [vmem:[#allocation26 + $0x1e8] sm:$0xff] }
0x110c   :  { %10613 = vmatpush3.bf16.msra.mxu0 %v11157_v58  ;;  %10635 = vmatpush3.bf16.msra.mxu1 %v11158_v59  ;;  %v9999_v58 = vcombine.high %v6277_v50, %v6281_v52  ;;  %v10001_v59 = vcombine.high %v6278_v53, %v6282_v55 }
0x110d   :  { %6645 = vmatprep.subr.bf16.mxu0 %v9983_v45  ;;  %6688 = vmatprep.subr.bf16.mxu1 %v9985_v43  ;;  %v6318_v45 = vld [vmem:[#allocation26 + $0x1c8] sm:$0xff] }
0x110e   :  { %v10041_v43 = vcombine.high %v6318_v45, %v6322_v10 }
0x1124   :  { %v5436_v4 = vpop.f32.mrb[72].mxu0  ;;  %v5479_v2 = vpop.f32.mrb[52].mxu1 }
0x1125   :  { %v5437_v5 = vadd.f32 %v5436_v4, %v4655_v29  ;;  %v5480_v6 = vadd.f32 %v5479_v2, %v4663_v34  ;;  %v5438_v33 = vpop.f32.mrb[73].mxu0  ;;  %v5481_v8 = vpop.f32.mrb[53].mxu1  ;;  %v9998_v4 = vcombine.low %v6277_v50, %v6281_v52  ;;  %v10000_v2 = vcombine.low %v6278_v53, %v6282_v55 }
0x1126   :  { %v5439_v9 = vadd.f32 %v5438_v33, %v4659_v60  ;;  %v5482_v41 = vadd.f32 %v5481_v8, %v4667_v63  ;;  %v5440_v12 = vpop.f32.mrb[74].mxu0  ;;  %v5483_v13 = vpop.f32.mrb[54].mxu1  ;;  %v6293_v33 = vld [vmem:[#allocation26 + $0x100] sm:$0xff] }
0x1127   :  { %v5441_v15 = vadd.f32 %v5440_v12, %v4655_v29  ;;  %v5484_v17 = vadd.f32 %v5483_v13, %v4663_v34  ;;  %v5442_v19 = vpop.f32.mrb[75].mxu0  ;;  %v5485_v18 = vpop.f32.mrb[55].mxu1  ;;  %v5492_v61 = vmax.f32 %v5437_v5, 0.0  ;;  %v5494_v24 = vmax.f32 %v5480_v6, 0.0  ;;  %v6285_v29 = vld [vmem:[#allocation26 + $0xc0] sm:$0xff] }
0x1128   :  { %v5443_v20 = vadd.f32 %v5442_v19, %v4659_v60  ;;  %v5486_v38 = vadd.f32 %v5485_v18, %v4667_v63  ;;  %v5493_v39 = vmax.f32 %v5439_v9, 0.0  ;;  %v5495_v26 = vmax.f32 %v5482_v41, 0.0  ;;  %v6289_v34 = vld [vmem:[#allocation26 + $0xe0] sm:$0xff]  ;;  %v6286_v60 = vld [vmem:[#allocation26 + $0xc8] sm:$0xff] }
0x1129   :  { %v5500_v25 = vmax.f32 %v5441_v15, 0.0  ;;  %v5502_v46 = vmax.f32 %v5484_v17, 0.0  ;;  %v6290_v63 = vld [vmem:[#allocation26 + $0xe8] sm:$0xff]  ;;  %v10007_v5 = vcombine.high %v6285_v29, %v6289_v34  ;;  %v6297_v8 = vld [vmem:[#allocation26 + $0x120] sm:$0xff]  ;;  %v10006_v12 = vcombine.low %v6285_v29, %v6289_v34 }
0x112a   :  { %v5501_v54 = vmax.f32 %v5443_v20, 0.0  ;;  %v5503_v27 = vmax.f32 %v5486_v38, 0.0  ;;  %v10009_v6 = vcombine.high %v6286_v60, %v6290_v63  ;;  %v6294_v9 = vld [vmem:[#allocation26 + $0x108] sm:$0xff]  ;;  %v10008_v13 = vcombine.low %v6286_v60, %v6290_v63  ;;  %v6301_v19 = vld [vmem:[#allocation26 + $0x140] sm:$0xff] }
0x112b   :  { %v5508_v28 = vpack.c.bf16 %v5500_v25, %v5492_v61  ;;  %v5510_v30 = vpack.c.bf16 %v5502_v46, %v5494_v24  ;;  %v6298_v41 = vld [vmem:[#allocation26 + $0x128] sm:$0xff]  ;;  %v10015_v15 = vcombine.high %v6293_v33, %v6297_v8  ;;  %v6305_v18 = vld [vmem:[#allocation26 + $0x160] sm:$0xff]  ;;  %v10014_v61 = vcombine.low %v6293_v33, %v6297_v8 }
0x112c   :  { %v5509_v32 = vpack.c.bf16 %v5501_v54, %v5493_v39  ;;  %v5511_v35 = vpack.c.bf16 %v5503_v27, %v5495_v26  ;;  %v10017_v17 = vcombine.high %v6294_v9, %v6298_v41  ;;  %v6302_v20 = vld [vmem:[#allocation26 + $0x148] sm:$0xff]  ;;  %v10016_v24 = vcombine.low %v6294_v9, %v6298_v41  ;;  %v6309_v54 = vld [vmem:[#allocation26 + $0x180] sm:$0xff] }
0x112d   :  { %v6306_v38 = vld [vmem:[#allocation26 + $0x168] sm:$0xff]  ;;  %v10023_v25 = vcombine.high %v6301_v19, %v6305_v18  ;;  %v10022_v39 = vcombine.low %v6301_v19, %v6305_v18  ;;  %v6313_v27 = vld [vmem:[#allocation26 + $0x1a0] sm:$0xff] }
0x112e   :  { %6145 = vmatprep.mubr.bf16.mxu0 %v5509_v32  ;;  %6186 = vmatprep.mubr.bf16.mxu1 %v5511_v35  ;;  %v10025_v46 = vcombine.high %v6302_v20, %v6306_v38  ;;  %v10024_v26 = vcombine.low %v6302_v20, %v6306_v38  ;;  %v6314_v32 = vld [vmem:[#allocation26 + $0x1a8] sm:$0xff]  ;;  %v10030_v35 = vcombine.low %v6309_v54, %v6313_v27 }
0x112f   :  { %6146 = vmatmul.mubr.bf16.vlgmr.msra.gmra.mrb[80].mxu0 %v5508_v28  ;;  %6187 = vmatmul.mubr.bf16.vlgmr.msra.gmra.mrb[60].mxu1 %v5510_v30  ;;  %v6310_v28 = vld [vmem:[#allocation26 + $0x188] sm:$0xff]  ;;  %v10031_v30 = vcombine.high %v6309_v54, %v6313_v27 }
0x1130   :  { %6677 = vmatprep.mubr.bf16.mxu0 %v12070_v36  ;;  %6720 = vmatprep.mubr.bf16.mxu1 %v12070_v36  ;;  %v10032_v40 = vcombine.low %v6310_v28, %v6314_v32  ;;  %v10033_v14 = vcombine.high %v6310_v28, %v6314_v32  ;;  %v6271_v28 = vld [vmem:[#allocation26 + $0x50] sm:$0xff]  ;;  %v6272_v32 = vld [vmem:[#allocation26 + $0x58] sm:$0xff] }
0x1131   :  { %6646 = vmatpush1.bf16.msra.mxu0 %v9982_v7  ;;  %6689 = vmatpush1.bf16.msra.mxu1 %v9984_v11  ;;  %v6321_v7 = vld [vmem:[#allocation26 + $0x1e0] sm:$0xff]  ;;  %v10040_v11 = vcombine.low %v6318_v45, %v6322_v10  ;;  %v6279_v45 = vld [vmem:[#allocation26 + $0x90] sm:$0xff]  ;;  %v6280_v10 = vld [vmem:[#allocation26 + $0x98] sm:$0xff] }
0x1132   :  { %6647 = vmatprep.subr.bf16.mxu0 %v9991_v44  ;;  %6690 = vmatprep.subr.bf16.mxu1 %v9993_v51  ;;  %v10039_v56 = vcombine.high %v6317_v16, %v6321_v7  ;;  %v10038_v37 = vcombine.low %v6317_v16, %v6321_v7  ;;  %v6263_v44 = vld [vmem:[#allocation26 + $0x10] sm:$0xff]  ;;  %v6268_v51 = vld [vmem:[#allocation26 + $0x38] sm:$0xff] }
0x1133   :  { %v9987_v50 = vcombine.high %v6263_v44, %v6267_v47  ;;  %v9986_v52 = vcombine.low %v6263_v44, %v6267_v47  ;;  %v9988_v53 = vcombine.low %v6264_v49, %v6268_v51  ;;  %v9989_v55 = vcombine.high %v6264_v49, %v6268_v51  ;;  %v6287_v49 = vld [vmem:[#allocation26 + $0xd0] sm:$0xff]  ;;  %v6288_v51 = vld [vmem:[#allocation26 + $0xd8] sm:$0xff] }
0x1135   :  { %6648 = vmatpush1.bf16.msra.mxu0 %v9990_v1  ;;  %6691 = vmatpush1.bf16.msra.mxu1 %v9992_v57 }
0x1136   :  { %6649 = vmatprep.subr.bf16.mxu0 %v9999_v58  ;;  %6692 = vmatprep.subr.bf16.mxu1 %v10001_v59  ;;  %v9917_v58 = vld [vmem:[#allocation23] ss:$0 sm:$0xff] }
0x1139   :  { %6650 = vmatpush1.bf16.msra.mxu0 %v9998_v4  ;;  %6693 = vmatpush1.bf16.msra.mxu1 %v10000_v2 }
0x113a   :  { %6651 = vmatprep.subr.bf16.mxu0 %v10007_v5  ;;  %6694 = vmatprep.subr.bf16.mxu1 %v10009_v6 }
0x113d   :  { %6652 = vmatpush1.bf16.msra.mxu0 %v10006_v12  ;;  %6695 = vmatpush1.bf16.msra.mxu1 %v10008_v13 }
0x113e   :  { %6653 = vmatprep.subr.bf16.mxu0 %v10015_v15  ;;  %6696 = vmatprep.subr.bf16.mxu1 %v10017_v17 }
0x1141   :  { %6654 = vmatpush1.bf16.msra.mxu0 %v10014_v61  ;;  %6697 = vmatpush1.bf16.msra.mxu1 %v10016_v24 }
0x1142   :  { %6655 = vmatprep.subr.bf16.mxu0 %v10023_v25  ;;  %6698 = vmatprep.subr.bf16.mxu1 %v10025_v46 }
0x1145   :  { %6656 = vmatpush1.bf16.msra.mxu0 %v10022_v39  ;;  %6699 = vmatpush1.bf16.msra.mxu1 %v10024_v26 }
0x1146   :  { %6657 = vmatprep.subr.bf16.mxu0 %v10031_v30  ;;  %6700 = vmatprep.subr.bf16.mxu1 %v10033_v14  ;;  %v6275_v30 = vld [vmem:[#allocation26 + $0x70] sm:$0xff] }
0x1147   :  { %v9995_v16 = vcombine.high %v6271_v28, %v6275_v30 }
0x1149   :  { %6658 = vmatpush1.bf16.msra.mxu0 %v10030_v35  ;;  %6701 = vmatpush1.bf16.msra.mxu1 %v10032_v40  ;;  %v6276_v35 = vld [vmem:[#allocation26 + $0x78] sm:$0xff] }
0x114a   :  { %6659 = vmatprep.subr.bf16.mxu0 %v10039_v56  ;;  %6702 = vmatprep.subr.bf16.mxu1 %v10041_v43  ;;  %v9997_v7 = vcombine.high %v6272_v32, %v6276_v35  ;;  %v6283_v56 = vld [vmem:[#allocation26 + $0xb0] sm:$0xff]  ;;  %v9996_v43 = vcombine.low %v6272_v32, %v6276_v35  ;;  %v6196_v32 = vld [vmem:[#allocation25] sm:$0xff] }
0x114b   :  { %v10003_v44 = vcombine.high %v6279_v45, %v6283_v56  ;;  %v6200_v35 = vld [vmem:[#allocation25 + $0x20] sm:$0xff] }
0x114d   :  { %6660 = vmatpush1.bf16.msra.mxu0 %v10038_v37  ;;  %6703 = vmatpush1.bf16.msra.mxu1 %v10040_v11  ;;  %v6284_v37 = vld [vmem:[#allocation26 + $0xb8] sm:$0xff]  ;;  %v9994_v11 = vcombine.low %v6271_v28, %v6275_v30 }
0x114e   :  { %6731 = vmatprep.subr.bf16.mxu0 %v9987_v50  ;;  %6774 = vmatprep.subr.bf16.mxu1 %v9989_v55  ;;  %v10005_v47 = vcombine.high %v6280_v10, %v6284_v37  ;;  %v6291_v50 = vld [vmem:[#allocation26 + $0xf0] sm:$0xff]  ;;  %v6292_v55 = vld [vmem:[#allocation26 + $0xf8] sm:$0xff] }
0x11c2   :  { %v10570_v1 = vpop.f32.mrb[76].mxu0  ;;  %v10592_v57 = vpop.f32.mrb[56].mxu1 }
0x11c3   :  { %v10571_v59 = vpop.f32.mrb[77].mxu0  ;;  %v10593_v29 = vpop.f32.mrb[57].mxu1 }
0x11c4   :  { %v10572_v34 = vadd.f32 %v10571_v59, %v10570_v1  ;;  %v10594_v60 = vadd.f32 %v10593_v29, %v10592_v57  ;;  %v10573_v63 = vpop.f32.mrb[78].mxu0  ;;  %v10595_v4 = vpop.f32.mrb[58].mxu1  ;;  %v10002_v1 = vcombine.low %v6279_v45, %v6283_v56  ;;  %v10004_v57 = vcombine.low %v6280_v10, %v6284_v37  ;;  %v6299_v59 = vld [vmem:[#allocation26 + $0x130] sm:$0xff]  ;;  %v6296_v29 = vld [vmem:[#allocation26 + $0x118] sm:$0xff]  ;;  %v6204_v37 = vld [vmem:[#allocation25 + $0x40] sm:$0xff] }
0x11c5   :  { %v10574_v2 = vpop.f32.mrb[79].mxu0  ;;  %v10596_v5 = vpop.f32.mrb[59].mxu1  ;;  %v10047_v56 = vcombine.high %v6196_v32, %v6200_v35 }
0x11c6   :  { %v6066_v6 = vadd.f32 %v10572_v34, %v9917_v58  ;;  %v10575_v33 = vadd.f32 %v10574_v2, %v10573_v63  ;;  %v10597_v8 = vadd.f32 %v10596_v5, %v10595_v4  ;;  %v6300_v34 = vld [vmem:[#allocation26 + $0x138] sm:$0xff]  ;;  %v10012_v63 = vcombine.low %v6288_v51, %v6292_v55  ;;  %v6303_v5 = vld [vmem:[#allocation26 + $0x150] sm:$0xff] }
0x11c7   :  { %v10021_v2 = vcombine.high %v6296_v29, %v6300_v34 }
0x11c8   :  { %v6107_v9 = vadd.f32 %v10594_v60, %v6066_v6  ;;  %v6069_v41 = vadd.f32 %v10575_v33, %v9917_v58  ;;  %v6295_v58 = vld [vmem:[#allocation26 + $0x110] sm:$0xff]  ;;  %v10010_v60 = vcombine.low %v6287_v49, %v6291_v50  ;;  %v6304_v33 = vld [vmem:[#allocation26 + $0x158] sm:$0xff] }
0x11c9   :  { %v10019_v4 = vcombine.high %v6295_v58, %v6299_v59  ;;  %v6307_v6 = vld [vmem:[#allocation26 + $0x170] sm:$0xff] }
0x11ca   :  { %v6110_v12 = vadd.f32 %v10597_v8, %v6069_v41  ;;  %v6308_v8 = vld [vmem:[#allocation26 + $0x178] sm:$0xff]  ;;  %v10020_v41 = vcombine.low %v6296_v29, %v6300_v34  ;;  %v6220_v34 = vld [vmem:[#allocation25 + $0xc0] sm:$0xff] }
0x1202   :  { %v10614_v13 = vpop.f32.mrb[80].mxu0  ;;  %v10636_v15 = vpop.f32.mrb[60].mxu1 }
0x1203   :  { %v10615_v17 = vpop.f32.mrb[81].mxu0  ;;  %v10637_v19 = vpop.f32.mrb[61].mxu1 }
0x1204   :  { %v10616_v18 = vadd.f32 %v10615_v17, %v10614_v13  ;;  %v10638_v20 = vadd.f32 %v10637_v19, %v10636_v15  ;;  %v10617_v38 = vpop.f32.mrb[82].mxu0  ;;  %v10639_v61 = vpop.f32.mrb[62].mxu1  ;;  %v10029_v13 = vcombine.high %v6304_v33, %v6308_v8  ;;  %v6311_v15 = vld [vmem:[#allocation26 + $0x190] sm:$0xff]  ;;  %v6312_v19 = vld [vmem:[#allocation26 + $0x198] sm:$0xff] }
0x1205   :  { %v10618_v24 = vpop.f32.mrb[83].mxu0  ;;  %v10640_v25 = vpop.f32.mrb[63].mxu1  ;;  %v6315_v17 = vld [vmem:[#allocation26 + $0x1b0] sm:$0xff] }
0x1206   :  { %v6148_v46 = vadd.f32 %v10616_v18, %v6107_v9  ;;  %v10619_v39 = vadd.f32 %v10618_v24, %v10617_v38  ;;  %v10641_v26 = vadd.f32 %v10640_v25, %v10639_v61  ;;  %v10018_v9 = vcombine.low %v6295_v58, %v6299_v59  ;;  %v6316_v18 = vld [vmem:[#allocation26 + $0x1b8] sm:$0xff]  ;;  %v6319_v25 = vld [vmem:[#allocation26 + $0x1d0] sm:$0xff] }
0x1207   :  { %v10028_v38 = vcombine.low %v6304_v33, %v6308_v8  ;;  %v10035_v61 = vcombine.high %v6311_v15, %v6315_v17  ;;  %v10037_v24 = vcombine.high %v6312_v19, %v6316_v18  ;;  %v6228_v33 = vld [vmem:[#allocation25 + $0x100] sm:$0xff] }
0x1208   :  { %v6189_v54 = vadd.f32 %v10638_v20, %v6148_v46  ;;  %v6151_v27 = vadd.f32 %v10619_v39, %v6110_v12  ;;  %v10027_v12 = vcombine.high %v6303_v5, %v6307_v6  ;;  %v10026_v20 = vcombine.low %v6303_v5, %v6307_v6  ;;  %v6323_v46 = vld [vmem:[#allocation26 + $0x1f0] sm:$0xff]  ;;  %v6320_v39 = vld [vmem:[#allocation26 + $0x1d8] sm:$0xff]  ;;  %v6232_v8 = vld [vmem:[#allocation25 + $0x120] sm:$0xff] }
0x1209   :  { %v10043_v28 = vcombine.high %v6319_v25, %v6323_v46 }
0x120a   :  { %v6192_v40 = vadd.f32 %v10641_v26, %v6151_v27  ;;  %v6324_v26 = vld [vmem:[#allocation26 + $0x1f8] sm:$0xff]  ;;  %v10036_v27 = vcombine.low %v6312_v19, %v6316_v18  ;;  %v6236_v19 = vld [vmem:[#allocation25 + $0x140] sm:$0xff] }
0x120b   :  { %v10045_v30 = vcombine.high %v6320_v39, %v6324_v26  ;;  %v10044_v45 = vcombine.low %v6320_v39, %v6324_v26  ;;  %v6240_v18 = vld [vmem:[#allocation25 + $0x160] sm:$0xff] }
0x120c   :  { %v12951_v14 = vpack.c.bf16 %v6192_v40, %v6189_v54  ;;  %v10034_v54 = vcombine.low %v6311_v15, %v6315_v17  ;;  %v6197_v40 = vld [vmem:[#allocation25 + $0x8] sm:$0xff]  ;;  %v10079_v15 = vcombine.high %v6228_v33, %v6232_v8  ;;  %v6244_v39 = vld [vmem:[#allocation25 + $0x180] sm:$0xff] }
0x120d   :  { %v6248_v26 = vld [vmem:[#allocation25 + $0x1a0] sm:$0xff] }
0x120e   :  { %6678 = vmatmul.mubr.bf16.vlgmr.msra.gmra.mrb[84].mxu0 %v12951_v14  ;;  %6721 = vmatmul.mubr.bf16.vlgmr.msra.gmra.mrb[64].mxu1 %v12951_v14 }
0x120f   :  { %6732 = vmatpush1.bf16.msra.mxu0 %v9986_v52  ;;  %6775 = vmatpush1.bf16.msra.mxu1 %v9988_v53  ;;  %v10011_v52 = vcombine.high %v6287_v49, %v6291_v50  ;;  %v10013_v53 = vcombine.high %v6288_v51, %v6292_v55  ;;  %v6212_v55 = vld [vmem:[#allocation25 + $0x80] sm:$0xff] }
0x1210   :  { %6733 = vmatprep.subr.bf16.mxu0 %v9995_v16  ;;  %6776 = vmatprep.subr.bf16.mxu1 %v9997_v7  ;;  %v6201_v16 = vld [vmem:[#allocation25 + $0x28] sm:$0xff]  ;;  %v10042_v7 = vcombine.low %v6319_v25, %v6323_v46  ;;  %v10087_v25 = vcombine.high %v6236_v19, %v6240_v18 }
0x1211   :  { %6763 = vmatprep.mubr.bf16.mxu0 %v12070_v36  ;;  %6806 = vmatprep.mubr.bf16.mxu1 %v12070_v36  ;;  %v10049_v10 = vcombine.high %v6197_v40, %v6201_v16  ;;  %v10048_v49 = vcombine.low %v6197_v40, %v6201_v16  ;;  %v6252_v40 = vld [vmem:[#allocation25 + $0x1c0] sm:$0xff] }
0x1212   :  { %v6256_v16 = vld [vmem:[#allocation25 + $0x1e0] sm:$0xff] }
0x1213   :  { %6734 = vmatpush1.bf16.msra.mxu0 %v9994_v11  ;;  %6777 = vmatpush1.bf16.msra.mxu1 %v9996_v43  ;;  %v6208_v11 = vld [vmem:[#allocation25 + $0x60] sm:$0xff]  ;;  %v6205_v43 = vld [vmem:[#allocation25 + $0x48] sm:$0xff] }
0x1214   :  { %6735 = vmatprep.subr.bf16.mxu0 %v10003_v44  ;;  %6778 = vmatprep.subr.bf16.mxu1 %v10005_v47  ;;  %v6209_v44 = vld [vmem:[#allocation25 + $0x68] sm:$0xff]  ;;  %v10046_v47 = vcombine.low %v6196_v32, %v6200_v35  ;;  %v10055_v50 = vcombine.high %v6204_v37, %v6208_v11  ;;  %v10095_v32 = vcombine.high %v6244_v39, %v6248_v26 }
0x1215   :  { %v10057_v51 = vcombine.high %v6205_v43, %v6209_v44  ;;  %v10056_v58 = vcombine.low %v6205_v43, %v6209_v44  ;;  %v6198_v43 = vld [vmem:[#allocation25 + $0x10] sm:$0xff] }
0x1216   :  { %v6202_v44 = vld [vmem:[#allocation25 + $0x30] sm:$0xff] }
0x1217   :  { %6736 = vmatpush1.bf16.msra.mxu0 %v10002_v1  ;;  %6779 = vmatpush1.bf16.msra.mxu1 %v10004_v57  ;;  %v6216_v1 = vld [vmem:[#allocation25 + $0xa0] sm:$0xff]  ;;  %v6213_v57 = vld [vmem:[#allocation25 + $0x88] sm:$0xff] }
0x1218   :  { %6737 = vmatprep.subr.bf16.mxu0 %v10011_v52  ;;  %6780 = vmatprep.subr.bf16.mxu1 %v10013_v53  ;;  %v6217_v52 = vld [vmem:[#allocation25 + $0xa8] sm:$0xff]  ;;  %v10054_v53 = vcombine.low %v6204_v37, %v6208_v11  ;;  %v10063_v59 = vcombine.high %v6212_v55, %v6216_v1  ;;  %v10103_v37 = vcombine.high %v6252_v40, %v6256_v16 }
0x1219   :  { %v10065_v29 = vcombine.high %v6213_v57, %v6217_v52 }
0x121b   :  { %6738 = vmatpush1.bf16.msra.mxu0 %v10010_v60  ;;  %6781 = vmatpush1.bf16.msra.mxu1 %v10012_v63  ;;  %v6224_v60 = vld [vmem:[#allocation25 + $0xe0] sm:$0xff]  ;;  %v6221_v63 = vld [vmem:[#allocation25 + $0xc8] sm:$0xff] }
0x121c   :  { %6739 = vmatprep.subr.bf16.mxu0 %v10019_v4  ;;  %6782 = vmatprep.subr.bf16.mxu1 %v10021_v2  ;;  %v6225_v4 = vld [vmem:[#allocation25 + $0xe8] sm:$0xff]  ;;  %v10062_v2 = vcombine.low %v6212_v55, %v6216_v1  ;;  %v10071_v5 = vcombine.high %v6220_v34, %v6224_v60  ;;  %v10051_v55 = vcombine.high %v6198_v43, %v6202_v44 }
0x121d   :  { %v10073_v6 = vcombine.high %v6221_v63, %v6225_v4 }
0x121f   :  { %6740 = vmatpush1.bf16.msra.mxu0 %v10018_v9  ;;  %6783 = vmatpush1.bf16.msra.mxu1 %v10020_v41  ;;  %v6229_v9 = vld [vmem:[#allocation25 + $0x108] sm:$0xff] }
0x1220   :  { %6741 = vmatprep.subr.bf16.mxu0 %v10027_v12  ;;  %6784 = vmatprep.subr.bf16.mxu1 %v10029_v13  ;;  %v6233_v41 = vld [vmem:[#allocation25 + $0x128] sm:$0xff]  ;;  %v10070_v12 = vcombine.low %v6220_v34, %v6224_v60  ;;  %v10072_v13 = vcombine.low %v6221_v63, %v6225_v4  ;;  %v6214_v63 = vld [vmem:[#allocation25 + $0x90] sm:$0xff] }
0x1221   :  { %v10081_v17 = vcombine.high %v6229_v9, %v6233_v41  ;;  %v6218_v4 = vld [vmem:[#allocation25 + $0xb0] sm:$0xff] }
0x1223   :  { %6742 = vmatpush1.bf16.msra.mxu0 %v10026_v20  ;;  %6785 = vmatpush1.bf16.msra.mxu1 %v10028_v38  ;;  %v6237_v20 = vld [vmem:[#allocation25 + $0x148] sm:$0xff] }
0x1224   :  { %6743 = vmatprep.subr.bf16.mxu0 %v10035_v61  ;;  %6786 = vmatprep.subr.bf16.mxu1 %v10037_v24  ;;  %v6241_v38 = vld [vmem:[#allocation25 + $0x168] sm:$0xff]  ;;  %v10078_v61 = vcombine.low %v6228_v33, %v6232_v8  ;;  %v10080_v24 = vcombine.low %v6229_v9, %v6233_v41  ;;  %v10067_v33 = vcombine.high %v6214_v63, %v6218_v4  ;;  %v6222_v9 = vld [vmem:[#allocation25 + $0xd0] sm:$0xff] }
0x1225   :  { %v10089_v46 = vcombine.high %v6237_v20, %v6241_v38  ;;  %v6226_v41 = vld [vmem:[#allocation25 + $0xf0] sm:$0xff] }
0x1227   :  { %6744 = vmatpush1.bf16.msra.mxu0 %v10034_v54  ;;  %6787 = vmatpush1.bf16.msra.mxu1 %v10036_v27  ;;  %v6245_v54 = vld [vmem:[#allocation25 + $0x188] sm:$0xff] }
0x1228   :  { %6745 = vmatprep.subr.bf16.mxu0 %v10043_v28  ;;  %6788 = vmatprep.subr.bf16.mxu1 %v10045_v30  ;;  %v6249_v27 = vld [vmem:[#allocation25 + $0x1a8] sm:$0xff]  ;;  %v10086_v28 = vcombine.low %v6236_v19, %v6240_v18  ;;  %v10088_v30 = vcombine.low %v6237_v20, %v6241_v38  ;;  %v10075_v19 = vcombine.high %v6222_v9, %v6226_v41  ;;  %v6230_v20 = vld [vmem:[#allocation25 + $0x110] sm:$0xff] }
0x1229   :  { %v10097_v35 = vcombine.high %v6245_v54, %v6249_v27  ;;  %v6234_v38 = vld [vmem:[#allocation25 + $0x130] sm:$0xff] }
0x122b   :  { %6746 = vmatpush1.bf16.msra.mxu0 %v10042_v7  ;;  %6789 = vmatpush1.bf16.msra.mxu1 %v10044_v45  ;;  %v6253_v7 = vld [vmem:[#allocation25 + $0x1c8] sm:$0xff] }
0x122c   :  { %7137 = vmatprep.subr.bf16.mxu0 %v10047_v56  ;;  %7180 = vmatprep.subr.bf16.mxu1 %v10049_v10  ;;  %v6257_v45 = vld [vmem:[#allocation25 + $0x1e8] sm:$0xff]  ;;  %v10094_v56 = vcombine.low %v6244_v39, %v6248_v26  ;;  %v10096_v10 = vcombine.low %v6245_v54, %v6249_v27  ;;  %v10083_v39 = vcombine.high %v6230_v20, %v6234_v38  ;;  %v6238_v26 = vld [vmem:[#allocation25 + $0x150] sm:$0xff]  ;;  %v6239_v27 = vld [vmem:[#allocation25 + $0x158] sm:$0xff] }
0x122d   :  { %v10105_v11 = vcombine.high %v6253_v7, %v6257_v45  ;;  %v6242_v54 = vld [vmem:[#allocation25 + $0x170] sm:$0xff] }
0x122e   :  { %6764 = vmatmul.mubr.bf16.vlgmr.msra.gmra.mrb[88].mxu0 %v12951_v14  ;;  %6807 = vmatmul.mubr.bf16.vlgmr.msra.gmra.mrb[68].mxu1 %v12951_v14  ;;  %v10064_v14 = vcombine.low %v6213_v57, %v6217_v52  ;;  %v6206_v57 = vld [vmem:[#allocation25 + $0x50] sm:$0xff] }
0x122f   :  { %7138 = vmatpush1.bf16.msra.mxu0 %v10046_v47  ;;  %7181 = vmatpush1.bf16.msra.mxu1 %v10048_v49  ;;  %v6199_v47 = vld [vmem:[#allocation25 + $0x18] sm:$0xff]  ;;  %v6210_v52 = vld [vmem:[#allocation25 + $0x70] sm:$0xff] }
0x1230   :  { %7139 = vmatprep.subr.bf16.mxu0 %v10055_v50  ;;  %7182 = vmatprep.subr.bf16.mxu1 %v10057_v51  ;;  %v6203_v49 = vld [vmem:[#allocation25 + $0x38] sm:$0xff]  ;;  %v10102_v50 = vcombine.low %v6252_v40, %v6256_v16  ;;  %v10104_v51 = vcombine.low %v6253_v7, %v6257_v45  ;;  %v10059_v34 = vcombine.high %v6206_v57, %v6210_v52  ;;  %v6246_v16 = vld [vmem:[#allocation25 + $0x190] sm:$0xff] }
0x1231   :  { %7169 = vmatprep.mubr.bf16.mxu0 %v12070_v36  ;;  %7212 = vmatprep.mubr.bf16.mxu1 %v12070_v36  ;;  %v10053_v1 = vcombine.high %v6199_v47, %v6203_v49  ;;  %v6250_v7 = vld [vmem:[#allocation25 + $0x1b0] sm:$0xff]  ;;  %v6247_v45 = vld [vmem:[#allocation25 + $0x198] sm:$0xff] }
0x1233   :  { %7140 = vmatpush1.bf16.msra.mxu0 %v10054_v53  ;;  %7183 = vmatpush1.bf16.msra.mxu1 %v10056_v58  ;;  %v6207_v53 = vld [vmem:[#allocation25 + $0x58] sm:$0xff] }
0x1234   :  { %7141 = vmatprep.subr.bf16.mxu0 %v10063_v59  ;;  %7184 = vmatprep.subr.bf16.mxu1 %v10065_v29  ;;  %v6211_v58 = vld [vmem:[#allocation25 + $0x78] sm:$0xff]  ;;  %v10050_v59 = vcombine.low %v6198_v43, %v6202_v44  ;;  %v10052_v29 = vcombine.low %v6199_v47, %v6203_v49  ;;  %v6254_v44 = vld [vmem:[#allocation25 + $0x1d0] sm:$0xff] }
0x1235   :  { %v10061_v60 = vcombine.high %v6207_v53, %v6211_v58  ;;  %v6258_v47 = vld [vmem:[#allocation25 + $0x1f0] sm:$0xff]  ;;  %v6255_v49 = vld [vmem:[#allocation25 + $0x1d8] sm:$0xff] }
0x1237   :  { %7142 = vmatpush1.bf16.msra.mxu0 %v10062_v2  ;;  %7185 = vmatpush1.bf16.msra.mxu1 %v10064_v14  ;;  %v6215_v2 = vld [vmem:[#allocation25 + $0x98] sm:$0xff] }
0x1238   :  { %7143 = vmatprep.subr.bf16.mxu0 %v10071_v5  ;;  %7186 = vmatprep.subr.bf16.mxu1 %v10073_v6  ;;  %v6219_v14 = vld [vmem:[#allocation25 + $0xb8] sm:$0xff]  ;;  %v10058_v5 = vcombine.low %v6206_v57, %v6210_v52  ;;  %v10060_v6 = vcombine.low %v6207_v53, %v6211_v58  ;;  %v10106_v52 = vcombine.low %v6254_v44, %v6258_v47 }
0x1239   :  { %v10069_v8 = vcombine.high %v6215_v2, %v6219_v14  ;;  %v11161_v58 = vld [vmem:[%s13315_s8 + $0x4] ss:$16 sps:$4 sm:$0xff]  }
0x123b   :  { %7144 = vmatpush1.bf16.msra.mxu0 %v10070_v12  ;;  %7187 = vmatpush1.bf16.msra.mxu1 %v10072_v13  ;;  %v6223_v12 = vld [vmem:[#allocation25 + $0xd8] sm:$0xff] }
0x123c   :  { %7145 = vmatprep.subr.bf16.mxu0 %v10079_v15  ;;  %7188 = vmatprep.subr.bf16.mxu1 %v10081_v17  ;;  %v6227_v13 = vld [vmem:[#allocation25 + $0xf8] sm:$0xff]  ;;  %v10066_v15 = vcombine.low %v6214_v63, %v6218_v4  ;;  %v10068_v17 = vcombine.low %v6215_v2, %v6219_v14  ;;  %v11168_v2 = vld [vmem:[%s13315_s8 + $0x28] ss:$16 sps:$4 sm:$0xff]  }
0x123d   :  { %v10077_v18 = vcombine.high %v6223_v12, %v6227_v13  ;;  %v11170_v63 = vld [vmem:[%s13315_s8 + $0x2c] ss:$16 sps:$4 sm:$0xff]   ;;  %v11165_v4 = vld [vmem:[%s13315_s8 + $0x20] ss:$16 sps:$4 sm:$0xff]   ;;  %v11173_v14 = vld [vmem:[%s13315_s8 + $0x44] ss:$16 sps:$4 sm:$0xff]  }
0x123f   :  { %7146 = vmatpush1.bf16.msra.mxu0 %v10078_v61  ;;  %7189 = vmatpush1.bf16.msra.mxu1 %v10080_v24  ;;  %v6231_v61 = vld [vmem:[#allocation25 + $0x118] sm:$0xff] }
0x1240   :  { %7147 = vmatprep.subr.bf16.mxu0 %v10087_v25  ;;  %7190 = vmatprep.subr.bf16.mxu1 %v10089_v46  ;;  %v6235_v24 = vld [vmem:[#allocation25 + $0x138] sm:$0xff]  ;;  %v10074_v25 = vcombine.low %v6222_v9, %v6226_v41  ;;  %v10076_v46 = vcombine.low %v6223_v12, %v6227_v13  ;;  %v11180_v41 = vld [vmem:[%s13315_s8 + $0x68] ss:$16 sps:$4 sm:$0xff]  }
0x1241   :  { %v11177_v9 = vld [vmem:[%s13315_s8 + $0x60] ss:$16 sps:$4 sm:$0xff]   ;;  %v11185_v12 = vld [vmem:[%s13315_s8 + $0x84] ss:$16 sps:$4 sm:$0xff]   ;;  %v11188_v13 = vld [vmem:[%s13315_s8 + $0x8c] ss:$16 sps:$4 sm:$0xff]  }
0x1243   :  { %7148 = vmatpush1.bf16.msra.mxu0 %v10086_v28  ;;  %7191 = vmatpush1.bf16.msra.mxu1 %v10088_v30  ;;  %v6243_v28 = vld [vmem:[#allocation25 + $0x178] sm:$0xff]  ;;  %v10082_v30 = vcombine.low %v6230_v20, %v6234_v38  ;;  %v11192_v38 = vld [vmem:[%s13315_s8 + $0xa8] ss:$16 sps:$4 sm:$0xff]  }
0x1244   :  { %7149 = vmatprep.subr.bf16.mxu0 %v10095_v32  ;;  %7192 = vmatprep.subr.bf16.mxu1 %v10097_v35  ;;  %v10084_v32 = vcombine.low %v6231_v61, %v6235_v24  ;;  %v10091_v35 = vcombine.high %v6238_v26, %v6242_v54  ;;  %v10093_v40 = vcombine.high %v6239_v27, %v6243_v28  ;;  %v11189_v20 = vld [vmem:[%s13315_s8 + $0xa0] ss:$16 sps:$4 sm:$0xff]  }
0x1247   :  { %7150 = vmatpush1.bf16.msra.mxu0 %v10094_v56  ;;  %7193 = vmatpush1.bf16.msra.mxu1 %v10096_v10  ;;  %v6251_v56 = vld [vmem:[#allocation25 + $0x1b8] sm:$0xff]  ;;  %v10090_v10 = vcombine.low %v6238_v26, %v6242_v54  ;;  %v11204_v54 = vld [vmem:[%s13315_s8 + $0xe8] ss:$16 sps:$4 sm:$0xff]  }
0x1248   :  { %7151 = vmatprep.subr.bf16.mxu0 %v10103_v37  ;;  %7194 = vmatprep.subr.bf16.mxu1 %v10105_v11  ;;  %v10092_v37 = vcombine.low %v6239_v27, %v6243_v28  ;;  %v10099_v11 = vcombine.high %v6246_v16, %v6250_v7  ;;  %v10101_v43 = vcombine.high %v6247_v45, %v6251_v56  ;;  %v11201_v26 = vld [vmem:[%s13315_s8 + $0xe0] ss:$16 sps:$4 sm:$0xff]   ;;  %v11209_v27 = vld [vmem:[%s13315_s8 + $0x104] ss:$16 sps:$4 sm:$0xff]   ;;  %v11212_v28 = vld [vmem:[%s13315_s8 + $0x10c] ss:$16 sps:$4 sm:$0xff]  }
0x124b   :  { %7152 = vmatpush1.bf16.msra.mxu0 %v10102_v50  ;;  %7195 = vmatpush1.bf16.msra.mxu1 %v10104_v51  ;;  %v6259_v50 = vld [vmem:[#allocation25 + $0x1f8] sm:$0xff]  ;;  %v10098_v51 = vcombine.low %v6246_v16, %v6250_v7  ;;  %v11216_v7 = vld [vmem:[%s13315_s8 + $0x128] ss:$16 sps:$4 sm:$0xff]  }
0x124c   :  { %7223 = vmatprep.subr.bf16.mxu0 %v10051_v55  ;;  %7266 = vmatprep.subr.bf16.mxu1 %v10053_v1  ;;  %v10100_v55 = vcombine.low %v6247_v45, %v6251_v56  ;;  %v10107_v1 = vcombine.high %v6254_v44, %v6258_v47  ;;  %v10109_v57 = vcombine.high %v6255_v49, %v6259_v50  ;;  %v11213_v16 = vld [vmem:[%s13315_s8 + $0x120] ss:$16 sps:$4 sm:$0xff]   ;;  %v11221_v45 = vld [vmem:[%s13315_s8 + $0x144] ss:$16 sps:$4 sm:$0xff]   ;;  %v11224_v56 = vld [vmem:[%s13315_s8 + $0x14c] ss:$16 sps:$4 sm:$0xff]  }
0x124d   :  { %v10108_v53 = vcombine.low %v6255_v49, %v6259_v50  ;;  %v11225_v44 = vld [vmem:[%s13315_s8 + $0x160] ss:$16 sps:$4 sm:$0xff]   ;;  %v11228_v47 = vld [vmem:[%s13315_s8 + $0x168] ss:$16 sps:$4 sm:$0xff]   ;;  %v11233_v49 = vld [vmem:[%s13315_s8 + $0x184] ss:$16 sps:$4 sm:$0xff]  }
0x124e   :  { %7170 = vmatmul.mubr.bf16.vlgmr.msra.gmra.mrb[84].mxu0 %v12876_v42  ;;  %7213 = vmatmul.mubr.bf16.vlgmr.msra.gmra.mrb[64].mxu1 %v12876_v42  ;;  %v11236_v50 = vld [vmem:[%s13315_s8 + $0x18c] ss:$16 sps:$4 sm:$0xff]  }
0x124f   :  { %7224 = vmatpush1.bf16.msra.mxu0 %v10050_v59  ;;  %7267 = vmatpush1.bf16.msra.mxu1 %v10052_v29  ;;  %v11164_v59 = vld [vmem:[%s13315_s8 + $0xc] ss:$16 sps:$4 sm:$0xff]   ;;  %v11159_v29 = vld [vmem:[%s13315_s8] ss:$16 sps:$4 sm:$0xff]  }
0x1250   :  { %7225 = vmatprep.subr.bf16.mxu0 %v10059_v34  ;;  %7268 = vmatprep.subr.bf16.mxu1 %v10061_v60  ;;  %v11162_v34 = vld [vmem:[%s13315_s8 + $0x8] ss:$16 sps:$4 sm:$0xff]   ;;  %v11167_v60 = vld [vmem:[%s13315_s8 + $0x24] ss:$16 sps:$4 sm:$0xff]  }
0x1251   :  { %7255 = vmatprep.mubr.bf16.mxu0 %v12070_v36  ;;  %7298 = vmatprep.mubr.bf16.mxu1 %v12070_v36  ;;  %v10085_v36 = vcombine.high %v6231_v61, %v6235_v24  ;;  %v11197_v61 = vld [vmem:[%s13315_s8 + $0xc4] ss:$16 sps:$4 sm:$0xff]   ;;  %v11200_v24 = vld [vmem:[%s13315_s8 + $0xcc] ss:$16 sps:$4 sm:$0xff]  }
0x1253   :  { %7226 = vmatpush1.bf16.msra.mxu0 %v10058_v5  ;;  %7269 = vmatpush1.bf16.msra.mxu1 %v10060_v6  ;;  %v11176_v5 = vld [vmem:[%s13315_s8 + $0x4c] ss:$16 sps:$4 sm:$0xff]   ;;  %v11171_v6 = vld [vmem:[%s13315_s8 + $0x40] ss:$16 sps:$4 sm:$0xff]  }
0x1254   :  { %7227 = vmatprep.subr.bf16.mxu0 %v10067_v33  ;;  %7270 = vmatprep.subr.bf16.mxu1 %v10069_v8  ;;  %v11174_v33 = vld [vmem:[%s13315_s8 + $0x48] ss:$16 sps:$4 sm:$0xff]   ;;  %v11182_v8 = vld [vmem:[%s13315_s8 + $0x6c] ss:$16 sps:$4 sm:$0xff]  }
0x1257   :  { %7228 = vmatpush1.bf16.msra.mxu0 %v10066_v15  ;;  %7271 = vmatpush1.bf16.msra.mxu1 %v10068_v17  ;;  %v11183_v15 = vld [vmem:[%s13315_s8 + $0x80] ss:$16 sps:$4 sm:$0xff]   ;;  %v11186_v17 = vld [vmem:[%s13315_s8 + $0x88] ss:$16 sps:$4 sm:$0xff]  }
0x1258   :  { %7229 = vmatprep.subr.bf16.mxu0 %v10075_v19  ;;  %7272 = vmatprep.subr.bf16.mxu1 %v10077_v18  ;;  %v11191_v19 = vld [vmem:[%s13315_s8 + $0xa4] ss:$16 sps:$4 sm:$0xff]   ;;  %v11194_v18 = vld [vmem:[%s13315_s8 + $0xac] ss:$16 sps:$4 sm:$0xff]  }
0x125b   :  { %7230 = vmatpush1.bf16.msra.mxu0 %v10074_v25  ;;  %7273 = vmatpush1.bf16.msra.mxu1 %v10076_v46  ;;  %v11195_v25 = vld [vmem:[%s13315_s8 + $0xc0] ss:$16 sps:$4 sm:$0xff]   ;;  %v11198_v46 = vld [vmem:[%s13315_s8 + $0xc8] ss:$16 sps:$4 sm:$0xff]  }
0x125c   :  { %7231 = vmatprep.subr.bf16.mxu0 %v10083_v39  ;;  %7274 = vmatprep.subr.bf16.mxu1 %v10085_v36  ;;  %v11203_v39 = vld [vmem:[%s13315_s8 + $0xe4] ss:$16 sps:$4 sm:$0xff]   ;;  %v11206_v36 = vld [vmem:[%s13315_s8 + $0xec] ss:$16 sps:$4 sm:$0xff]  }
0x125f   :  { %7232 = vmatpush1.bf16.msra.mxu0 %v10082_v30  ;;  %7275 = vmatpush1.bf16.msra.mxu1 %v10084_v32  ;;  %v11207_v30 = vld [vmem:[%s13315_s8 + $0x100] ss:$16 sps:$4 sm:$0xff]   ;;  %v11210_v32 = vld [vmem:[%s13315_s8 + $0x108] ss:$16 sps:$4 sm:$0xff]  }
0x1260   :  { %7233 = vmatprep.subr.bf16.mxu0 %v10091_v35  ;;  %7276 = vmatprep.subr.bf16.mxu1 %v10093_v40  ;;  %v11215_v35 = vld [vmem:[%s13315_s8 + $0x124] ss:$16 sps:$4 sm:$0xff]   ;;  %v11218_v40 = vld [vmem:[%s13315_s8 + $0x12c] ss:$16 sps:$4 sm:$0xff]  }
0x1263   :  { %7234 = vmatpush1.bf16.msra.mxu0 %v10090_v10  ;;  %7277 = vmatpush1.bf16.msra.mxu1 %v10092_v37  ;;  %v11219_v10 = vld [vmem:[%s13315_s8 + $0x140] ss:$16 sps:$4 sm:$0xff]   ;;  %v11222_v37 = vld [vmem:[%s13315_s8 + $0x148] ss:$16 sps:$4 sm:$0xff]  }
0x1264   :  { %7235 = vmatprep.subr.bf16.mxu0 %v10099_v11  ;;  %7278 = vmatprep.subr.bf16.mxu1 %v10101_v43  ;;  %v11227_v11 = vld [vmem:[%s13315_s8 + $0x164] ss:$16 sps:$4 sm:$0xff]   ;;  %v11230_v43 = vld [vmem:[%s13315_s8 + $0x16c] ss:$16 sps:$4 sm:$0xff]  }
0x1267   :  { %7236 = vmatpush1.bf16.msra.mxu0 %v10098_v51  ;;  %7279 = vmatpush1.bf16.msra.mxu1 %v10100_v55  ;;  %v11231_v51 = vld [vmem:[%s13315_s8 + $0x180] ss:$16 sps:$4 sm:$0xff]   ;;  %v11234_v55 = vld [vmem:[%s13315_s8 + $0x188] ss:$16 sps:$4 sm:$0xff]  }
0x1268   :  { %7237 = vmatprep.subr.bf16.mxu0 %v10107_v1  ;;  %7280 = vmatprep.subr.bf16.mxu1 %v10109_v57  ;;  %v11239_v1 = vld [vmem:[%s13315_s8 + $0x1a4] ss:$16 sps:$4 sm:$0xff]   ;;  %v11242_v57 = vld [vmem:[%s13315_s8 + $0x1ac] ss:$16 sps:$4 sm:$0xff]  }
0x126b   :  { %7238 = vmatpush1.bf16.msra.mxu0 %v10106_v52  ;;  %7281 = vmatpush1.bf16.msra.mxu1 %v10108_v53  ;;  %v11237_v52 = vld [vmem:[%s13315_s8 + $0x1a0] ss:$16 sps:$4 sm:$0xff]   ;;  %v11240_v53 = vld [vmem:[%s13315_s8 + $0x1a8] ss:$16 sps:$4 sm:$0xff]  }
0x126c   :  { %8949 = vmatprep.subr.bf16.mxu0 %v11161_v58  ;;  %9121 = vmatprep.subr.bf16.mxu1 %v11164_v59  ;;  %v11245_v58 = vld [vmem:[%s13315_s8 + $0x1c4] ss:$16 sps:$4 sm:$0xff]   ;;  %v11248_v59 = vld [vmem:[%s13315_s8 + $0x1cc] ss:$16 sps:$4 sm:$0xff]  }
0x126e   :  { %7256 = vmatmul.mubr.bf16.vlgmr.msra.gmra.mrb[88].mxu0 %v12876_v42  ;;  %7299 = vmatmul.mubr.bf16.vlgmr.msra.gmra.mrb[68].mxu1 %v12876_v42  ;;  %v11179_v42 = vld [vmem:[%s13315_s8 + $0x64] ss:$16 sps:$4 sm:$0xff]  }
0x126f   :  { %8950 = vmatpush1.bf16.msra.mxu0 %v11159_v29  ;;  %9122 = vmatpush1.bf16.msra.mxu1 %v11162_v34  ;;  %v11243_v29 = vld [vmem:[%s13315_s8 + $0x1c0] ss:$16 sps:$4 sm:$0xff]   ;;  %v11246_v34 = vld [vmem:[%s13315_s8 + $0x1c8] ss:$16 sps:$4 sm:$0xff]  }
0x1270   :  { %8951 = vmatprep.subr.bf16.mxu0 %v11167_v60  ;;  %9123 = vmatprep.subr.bf16.mxu1 %v11170_v63  ;;  %v11251_v60 = vld [vmem:[%s13315_s8 + $0x1e4] ss:$16 sps:$4 sm:$0xff]   ;;  %v11254_v63 = vld [vmem:[%s13315_s8 + $0x1ec] ss:$16 sps:$4 sm:$0xff]  }
0x1273   :  { %8952 = vmatpush1.bf16.msra.mxu0 %v11165_v4  ;;  %9124 = vmatpush1.bf16.msra.mxu1 %v11168_v2  ;;  %v11249_v4 = vld [vmem:[%s13315_s8 + $0x1e0] ss:$16 sps:$4 sm:$0xff]   ;;  %v11252_v2 = vld [vmem:[%s13315_s8 + $0x1e8] ss:$16 sps:$4 sm:$0xff]  }
0x1274   :  { %8953 = vmatprep.subr.bf16.mxu0 %v11173_v14  ;;  %9125 = vmatprep.subr.bf16.mxu1 %v11176_v5  ;;  %v11257_v14 = vld [vmem:[%s13315_s8 + $0x204] ss:$16 sps:$4 sm:$0xff]   ;;  %v11260_v5 = vld [vmem:[%s13315_s8 + $0x20c] ss:$16 sps:$4 sm:$0xff]  }
0x1277   :  { %8954 = vmatpush1.bf16.msra.mxu0 %v11171_v6  ;;  %9126 = vmatpush1.bf16.msra.mxu1 %v11174_v33  ;;  %v13033_v6 = vld [vmem:[#allocation28] sm:$0xff] }
0x1278   :  { %8955 = vmatprep.subr.bf16.mxu0 %v11179_v42  ;;  %9127 = vmatprep.subr.bf16.mxu1 %v11182_v8  ;;  %v7314_v33 = vrot.slane %v13033_v6, %v12433_v62  ;;  %v7322_v42 = vrot.slane %v13033_v6, %v12546_v31  ;;  %v7318_v8 = vrot.slane %v13033_v6, %v12436_v0 }
0x127b   :  { %8956 = vmatpush1.bf16.msra.mxu0 %v11177_v9  ;;  %9128 = vmatpush1.bf16.msra.mxu1 %v11180_v41  ;;  %v7326_v9 = vrot.slane %v13033_v6, %v12786_v3 }
0x127c   :  { %8957 = vmatprep.subr.bf16.mxu0 %v11185_v12  ;;  %9129 = vmatprep.subr.bf16.mxu1 %v11188_v13 }
0x127f   :  { %8958 = vmatpush1.bf16.msra.mxu0 %v11183_v15  ;;  %9130 = vmatpush1.bf16.msra.mxu1 %v11186_v17 }
0x1280   :  { %8959 = vmatprep.subr.bf16.mxu0 %v11191_v19  ;;  %9131 = vmatprep.subr.bf16.mxu1 %v11194_v18 }
0x1283   :  { %8960 = vmatpush1.bf16.msra.mxu0 %v11189_v20  ;;  %9132 = vmatpush1.bf16.msra.mxu1 %v11192_v38 }
0x1284   :  { %8961 = vmatprep.subr.bf16.mxu0 %v11197_v61  ;;  %9133 = vmatprep.subr.bf16.mxu1 %v11200_v24 }
0x1287   :  { %8962 = vmatpush1.bf16.msra.mxu0 %v11195_v25  ;;  %9134 = vmatpush1.bf16.msra.mxu1 %v11198_v46 }
0x1288   :  { %8963 = vmatprep.subr.bf16.mxu0 %v11203_v39  ;;  %9135 = vmatprep.subr.bf16.mxu1 %v11206_v36 }
0x128b   :  { %8964 = vmatpush1.bf16.msra.mxu0 %v11201_v26  ;;  %9136 = vmatpush1.bf16.msra.mxu1 %v11204_v54 }
0x128c   :  { %8965 = vmatprep.subr.bf16.mxu0 %v11209_v27  ;;  %9137 = vmatprep.subr.bf16.mxu1 %v11212_v28 }
0x128f   :  { %8966 = vmatpush1.bf16.msra.mxu0 %v11207_v30  ;;  %9138 = vmatpush1.bf16.msra.mxu1 %v11210_v32 }
0x1290   :  { %8967 = vmatprep.subr.bf16.mxu0 %v11215_v35  ;;  %9139 = vmatprep.subr.bf16.mxu1 %v11218_v40 }
0x1293   :  { %8968 = vmatpush1.bf16.msra.mxu0 %v11213_v16  ;;  %9140 = vmatpush1.bf16.msra.mxu1 %v11216_v7 }
0x1294   :  { %8969 = vmatprep.subr.bf16.mxu0 %v11221_v45  ;;  %9141 = vmatprep.subr.bf16.mxu1 %v11224_v56 }
0x1297   :  { %8970 = vmatpush1.bf16.msra.mxu0 %v11219_v10  ;;  %9142 = vmatpush1.bf16.msra.mxu1 %v11222_v37  ;;  %v11255_v37 = vld [vmem:[%s13315_s8 + $0x200] ss:$16 sps:$4 sm:$0xff]  }
0x1298   :  { %8971 = vmatprep.subr.bf16.mxu0 %v11227_v11  ;;  %9143 = vmatprep.subr.bf16.mxu1 %v11230_v43  ;;  %v11258_v11 = vld [vmem:[%s13315_s8 + $0x208] ss:$16 sps:$4 sm:$0xff]   ;;  %v11263_v43 = vld [vmem:[%s13315_s8 + $0x224] ss:$16 sps:$4 sm:$0xff]  }
0x129b   :  { %8972 = vmatpush1.bf16.msra.mxu0 %v11225_v44  ;;  %9144 = vmatpush1.bf16.msra.mxu1 %v11228_v47  ;;  %v11266_v44 = vld [vmem:[%s13315_s8 + $0x22c] ss:$16 sps:$4 sm:$0xff]   ;;  %v11261_v47 = vld [vmem:[%s13315_s8 + $0x220] ss:$16 sps:$4 sm:$0xff]  }
0x129c   :  { %8973 = vmatprep.subr.bf16.mxu0 %v11233_v49  ;;  %9145 = vmatprep.subr.bf16.mxu1 %v11236_v50  ;;  %v11264_v49 = vld [vmem:[%s13315_s8 + $0x228] ss:$16 sps:$4 sm:$0xff]   ;;  %v11269_v50 = vld [vmem:[%s13315_s8 + $0x244] ss:$16 sps:$4 sm:$0xff]  }
0x129f   :  { %8974 = vmatpush1.bf16.msra.mxu0 %v11231_v51  ;;  %9146 = vmatpush1.bf16.msra.mxu1 %v11234_v55  ;;  %v11272_v51 = vld [vmem:[%s13315_s8 + $0x24c] ss:$16 sps:$4 sm:$0xff]   ;;  %v11267_v55 = vld [vmem:[%s13315_s8 + $0x240] ss:$16 sps:$4 sm:$0xff]  }
0x12a0   :  { %8975 = vmatprep.subr.bf16.mxu0 %v11239_v1  ;;  %9147 = vmatprep.subr.bf16.mxu1 %v11242_v57  ;;  %v11270_v1 = vld [vmem:[%s13315_s8 + $0x248] ss:$16 sps:$4 sm:$0xff]   ;;  %v11275_v57 = vld [vmem:[%s13315_s8 + $0x264] ss:$16 sps:$4 sm:$0xff]  }
0x12a3   :  { %8976 = vmatpush1.bf16.msra.mxu0 %v11237_v52  ;;  %9148 = vmatpush1.bf16.msra.mxu1 %v11240_v53  ;;  %v11278_v52 = vld [vmem:[%s13315_s8 + $0x26c] ss:$16 sps:$4 sm:$0xff]   ;;  %v11273_v53 = vld [vmem:[%s13315_s8 + $0x260] ss:$16 sps:$4 sm:$0xff]  }
0x12a4   :  { %8977 = vmatprep.subr.bf16.mxu0 %v11245_v58  ;;  %9149 = vmatprep.subr.bf16.mxu1 %v11248_v59  ;;  %v11276_v58 = vld [vmem:[%s13315_s8 + $0x268] ss:$16 sps:$4 sm:$0xff]   ;;  %v11281_v59 = vld [vmem:[%s13315_s8 + $0x284] ss:$16 sps:$4 sm:$0xff]  }
0x12a7   :  { %8978 = vmatpush1.bf16.msra.mxu0 %v11243_v29  ;;  %9150 = vmatpush1.bf16.msra.mxu1 %v11246_v34  ;;  %v11284_v29 = vld [vmem:[%s13315_s8 + $0x28c] ss:$16 sps:$4 sm:$0xff]   ;;  %v11279_v34 = vld [vmem:[%s13315_s8 + $0x280] ss:$16 sps:$4 sm:$0xff]  }
0x12a8   :  { %8979 = vmatprep.subr.bf16.mxu0 %v11251_v60  ;;  %9151 = vmatprep.subr.bf16.mxu1 %v11254_v63  ;;  %v11282_v60 = vld [vmem:[%s13315_s8 + $0x288] ss:$16 sps:$4 sm:$0xff]   ;;  %v11287_v63 = vld [vmem:[%s13315_s8 + $0x2a4] ss:$16 sps:$4 sm:$0xff]  }
0x12ab   :  { %8980 = vmatpush1.bf16.msra.mxu0 %v11249_v4  ;;  %9152 = vmatpush1.bf16.msra.mxu1 %v11252_v2  ;;  %v11290_v4 = vld [vmem:[%s13315_s8 + $0x2ac] ss:$16 sps:$4 sm:$0xff]   ;;  %v11285_v2 = vld [vmem:[%s13315_s8 + $0x2a0] ss:$16 sps:$4 sm:$0xff]  }
0x12ac   :  { %8992 = vmatprep.subr.bf16.mxu0 %v11257_v14  ;;  %9164 = vmatprep.subr.bf16.mxu1 %v11260_v5  ;;  %v11288_v14 = vld [vmem:[%s13315_s8 + $0x2a8] ss:$16 sps:$4 sm:$0xff]   ;;  %v7330_v5 = vrot.slane %v13033_v6, %v12837_v21 }
0x1321   :  { %v7171_v41 = vpop.f32.mrb[84].mxu0  ;;  %v7214_v12 = vpop.f32.mrb[64].mxu1 }
0x1322   :  { %v7351_v13 = vadd.f32 %v7314_v33, %v7171_v41  ;;  %v7353_v15 = vadd.f32 %v7322_v42, %v7214_v12  ;;  %v7173_v17 = vpop.f32.mrb[85].mxu0  ;;  %v7216_v19 = vpop.f32.mrb[65].mxu1  ;;  %v7342_v41 = vrot.slane %v13033_v6, %v12846_v23 }
0x1323   :  { %v7352_v18 = vadd.f32 %v7318_v8, %v7173_v17  ;;  %v7354_v20 = vadd.f32 %v7326_v9, %v7216_v19  ;;  %v7175_v38 = vpop.f32.mrb[86].mxu0  ;;  %v7218_v61 = vpop.f32.mrb[66].mxu1  ;;  %v11294_v17 = vld [vmem:[%s13315_s8 + $0x2c8] ss:$16 sps:$4 sm:$0xff]  }
0x1324   :  { %v7359_v24 = vadd.f32 %v7314_v33, %v7175_v38  ;;  %v7361_v25 = vadd.f32 %v7322_v42, %v7218_v61  ;;  %v7177_v46 = vpop.f32.mrb[87].mxu0  ;;  %v7220_v39 = vpop.f32.mrb[67].mxu1  ;;  %v7367_v54 = vmax.f32 %v7351_v13, 0.0  ;;  %v7369_v27 = vmax.f32 %v7353_v15, 0.0  ;;  %v11293_v42 = vld [vmem:[%s13315_s8 + $0x2c4] ss:$16 sps:$4 sm:$0xff]  }
0x1325   :  { %v7360_v36 = vadd.f32 %v7318_v8, %v7177_v46  ;;  %v7362_v26 = vadd.f32 %v7326_v9, %v7220_v39  ;;  %v7368_v32 = vmax.f32 %v7352_v18, 0.0  ;;  %v7370_v35 = vmax.f32 %v7354_v20, 0.0  ;;  %v11296_v8 = vld [vmem:[%s13315_s8 + $0x2cc] ss:$16 sps:$4 sm:$0xff]   ;;  %v11291_v15 = vld [vmem:[%s13315_s8 + $0x2c0] ss:$16 sps:$4 sm:$0xff]  }
0x1326   :  { %v7375_v28 = vmax.f32 %v7359_v24, 0.0  ;;  %v7377_v30 = vmax.f32 %v7361_v25, 0.0  ;;  %v7338_v33 = vrot.slane %v13033_v6, %v12840_v22  ;;  %v7334_v9 = vrot.slane %v13033_v6, %v12843_v48  ;;  %v11299_v20 = vld [vmem:[%s13315_s8 + $0x2e4] ss:$16 sps:$4 sm:$0xff]   ;;  %v11302_v48 = vld [vmem:[%s13315_s8 + $0x2ec] ss:$16 sps:$4 sm:$0xff]  }
0x1327   :  { %v7376_v40 = vmax.f32 %v7360_v36, 0.0  ;;  %v7378_v16 = vmax.f32 %v7362_v26, 0.0 }
0x1328   :  { %v7383_v7 = vpack.c.bf16 %v7375_v28, %v7367_v54  ;;  %v13043_v45 = vpack.c.bf16 %v7377_v30, %v7369_v27  ;;  %v11297_v54 = vld [vmem:[%s13315_s8 + $0x2e0] ss:$16 sps:$4 sm:$0xff]   ;;  %v11300_v27 = vld [vmem:[%s13315_s8 + $0x2e8] ss:$16 sps:$4 sm:$0xff]   ;;  %v11305_v28 = vld [vmem:[%s13315_s8 + $0x304] ss:$16 sps:$4 sm:$0xff]  }
0x1329   :  { %v7384_v56 = vpack.c.bf16 %v7376_v40, %v7368_v32  ;;  %v7386_v10 = vpack.c.bf16 %v7378_v16, %v7370_v35  ;;  %v11308_v16 = vld [vmem:[%s13315_s8 + $0x30c] ss:$16 sps:$4 sm:$0xff]  }
0x132b   :  { %8981 = vmatprep.mubr.bf16.mxu0 %v7384_v56  ;;  %9153 = vmatprep.mubr.bf16.mxu1 %v7384_v56 }
0x132c   :  { %8982 = vmatmul.mubr.bf16.vlgmr.msra.gmra.mrb[92].mxu0 %v7383_v7  ;;  %9154 = vmatmul.mubr.bf16.vlgmr.msra.gmra.mrb[72].mxu1 %v7383_v7 }
0x132d   :  { %8993 = vmatpush1.bf16.msra.mxu0 %v11255_v37  ;;  %9165 = vmatpush1.bf16.msra.mxu1 %v11258_v11 }
0x132e   :  { %9024 = vmatprep.mubr.bf16.mxu0 %v7386_v10  ;;  %9196 = vmatprep.mubr.bf16.mxu1 %v7386_v10 }
0x132f   :  { %8994 = vmatprep.subr.bf16.mxu0 %v11263_v43  ;;  %9166 = vmatprep.subr.bf16.mxu1 %v11266_v44 }
0x1331   :  { %8995 = vmatpush1.bf16.msra.mxu0 %v11261_v47  ;;  %9167 = vmatpush1.bf16.msra.mxu1 %v11264_v49  ;;  %v11303_v49 = vld [vmem:[%s13315_s8 + $0x300] ss:$16 sps:$4 sm:$0xff]  }
0x1332   :  { %8996 = vmatprep.subr.bf16.mxu0 %v11269_v50  ;;  %9168 = vmatprep.subr.bf16.mxu1 %v11272_v51  ;;  %v11306_v50 = vld [vmem:[%s13315_s8 + $0x308] ss:$16 sps:$4 sm:$0xff]   ;;  %v11311_v51 = vld [vmem:[%s13315_s8 + $0x324] ss:$16 sps:$4 sm:$0xff]  }
0x1335   :  { %8997 = vmatpush1.bf16.msra.mxu0 %v11267_v55  ;;  %9169 = vmatpush1.bf16.msra.mxu1 %v11270_v1  ;;  %v11314_v55 = vld [vmem:[%s13315_s8 + $0x32c] ss:$16 sps:$4 sm:$0xff]   ;;  %v11309_v1 = vld [vmem:[%s13315_s8 + $0x320] ss:$16 sps:$4 sm:$0xff]  }
0x1336   :  { %8998 = vmatprep.subr.bf16.mxu0 %v11275_v57  ;;  %9170 = vmatprep.subr.bf16.mxu1 %v11278_v52  ;;  %v11312_v57 = vld [vmem:[%s13315_s8 + $0x328] ss:$16 sps:$4 sm:$0xff]   ;;  %v11317_v52 = vld [vmem:[%s13315_s8 + $0x344] ss:$16 sps:$4 sm:$0xff]  }
0x1339   :  { %8999 = vmatpush1.bf16.msra.mxu0 %v11273_v53  ;;  %9171 = vmatpush1.bf16.msra.mxu1 %v11276_v58  ;;  %v11320_v53 = vld [vmem:[%s13315_s8 + $0x34c] ss:$16 sps:$4 sm:$0xff]   ;;  %v11315_v58 = vld [vmem:[%s13315_s8 + $0x340] ss:$16 sps:$4 sm:$0xff]  }
0x133a   :  { %9000 = vmatprep.subr.bf16.mxu0 %v11281_v59  ;;  %9172 = vmatprep.subr.bf16.mxu1 %v11284_v29  ;;  %v11318_v59 = vld [vmem:[%s13315_s8 + $0x348] ss:$16 sps:$4 sm:$0xff]   ;;  %v11323_v29 = vld [vmem:[%s13315_s8 + $0x364] ss:$16 sps:$4 sm:$0xff]  }
0x133d   :  { %9001 = vmatpush1.bf16.msra.mxu0 %v11279_v34  ;;  %9173 = vmatpush1.bf16.msra.mxu1 %v11282_v60  ;;  %v11326_v34 = vld [vmem:[%s13315_s8 + $0x36c] ss:$16 sps:$4 sm:$0xff]   ;;  %v11321_v60 = vld [vmem:[%s13315_s8 + $0x360] ss:$16 sps:$4 sm:$0xff]  }
0x133e   :  { %9002 = vmatprep.subr.bf16.mxu0 %v11287_v63  ;;  %9174 = vmatprep.subr.bf16.mxu1 %v11290_v4  ;;  %v11324_v63 = vld [vmem:[%s13315_s8 + $0x368] ss:$16 sps:$4 sm:$0xff]   ;;  %v11329_v4 = vld [vmem:[%s13315_s8 + $0x384] ss:$16 sps:$4 sm:$0xff]  }
0x1341   :  { %9003 = vmatpush1.bf16.msra.mxu0 %v11285_v2  ;;  %9175 = vmatpush1.bf16.msra.mxu1 %v11288_v14  ;;  %v7257_v12 = vpop.f32.mrb[88].mxu0  ;;  %v7300_v13 = vpop.f32.mrb[68].mxu1  ;;  %v11332_v2 = vld [vmem:[%s13315_s8 + $0x38c] ss:$16 sps:$4 sm:$0xff]   ;;  %v11327_v14 = vld [vmem:[%s13315_s8 + $0x380] ss:$16 sps:$4 sm:$0xff]  }
0x1342   :  { %v7355_v21 = vadd.f32 %v7330_v5, %v7257_v12  ;;  %v7357_v19 = vadd.f32 %v7338_v33, %v7300_v13  ;;  %v7259_v18 = vpop.f32.mrb[89].mxu0  ;;  %v7302_v22 = vpop.f32.mrb[69].mxu1  ;;  %9004 = vmatprep.subr.bf16.mxu0 %v11293_v42  ;;  %9176 = vmatprep.subr.bf16.mxu1 %v11296_v8  ;;  %v11338_v42 = vld [vmem:[%s13315_s8 + $0x3ac] ss:$16 sps:$4 sm:$0xff]   ;;  %v11333_v8 = vld [vmem:[%s13315_s8 + $0x3a0] ss:$16 sps:$4 sm:$0xff]  }
0x1343   :  { %v7356_v38 = vadd.f32 %v7334_v9, %v7259_v18  ;;  %v7358_v61 = vadd.f32 %v7342_v41, %v7302_v22  ;;  %v7261_v23 = vpop.f32.mrb[90].mxu0  ;;  %v7304_v6 = vpop.f32.mrb[70].mxu1  ;;  %v11344_v12 = vld [vmem:[%s13315_s8 + $0x3cc] ss:$16 sps:$4 sm:$0xff]   ;;  %v11339_v13 = vld [vmem:[%s13315_s8 + $0x3c0] ss:$16 sps:$4 sm:$0xff]  }
0x1344   :  { %v7363_v24 = vadd.f32 %v7330_v5, %v7261_v23  ;;  %v7365_v25 = vadd.f32 %v7338_v33, %v7304_v6  ;;  %v7263_v46 = vpop.f32.mrb[91].mxu0  ;;  %v7306_v39 = vpop.f32.mrb[71].mxu1  ;;  %v7371_v30 = vmax.f32 %v7355_v21, 0.0  ;;  %v7373_v32 = vmax.f32 %v7357_v19, 0.0  ;;  %v11330_v5 = vld [vmem:[%s13315_s8 + $0x388] ss:$16 sps:$4 sm:$0xff]  }
0x1345   :  { %v7364_v36 = vadd.f32 %v7334_v9, %v7263_v46  ;;  %v7366_v26 = vadd.f32 %v7342_v41, %v7306_v39  ;;  %9005 = vmatpush1.bf16.msra.mxu0 %v11291_v15  ;;  %9177 = vmatpush1.bf16.msra.mxu1 %v11294_v17  ;;  %v7372_v7 = vmax.f32 %v7356_v38, 0.0  ;;  %v7374_v56 = vmax.f32 %v7358_v61, 0.0  ;;  %v11335_v33 = vld [vmem:[%s13315_s8 + $0x3a4] ss:$16 sps:$4 sm:$0xff]   ;;  %v11336_v9 = vld [vmem:[%s13315_s8 + $0x3a8] ss:$16 sps:$4 sm:$0xff]  }
0x1346   :  { %v7379_v35 = vmax.f32 %v7363_v24, 0.0  ;;  %v7381_v40 = vmax.f32 %v7365_v25, 0.0  ;;  %9006 = vmatprep.subr.bf16.mxu0 %v11299_v20  ;;  %9178 = vmatprep.subr.bf16.mxu1 %v11302_v48  ;;  %v11341_v41 = vld [vmem:[%s13315_s8 + $0x3c4] ss:$16 sps:$4 sm:$0xff]   ;;  %v11342_v15 = vld [vmem:[%s13315_s8 + $0x3c8] ss:$16 sps:$4 sm:$0xff]  }
0x1347   :  { %v7380_v10 = vmax.f32 %v7364_v36, 0.0  ;;  %v7382_v37 = vmax.f32 %v7366_v26, 0.0  ;;  %v11347_v17 = vld [vmem:[%s13315_s8 + $0x3e4] ss:$16 sps:$4 sm:$0xff]   ;;  %v11350_v21 = vld [vmem:[%s13315_s8 + $0x3ec] ss:$16 sps:$4 sm:$0xff]  }
0x1348   :  { %v13085_v11 = vpack.c.bf16 %v7379_v35, %v7371_v30  ;;  %v13087_v43 = vpack.c.bf16 %v7381_v40, %v7373_v32  ;;  %v11345_v19 = vld [vmem:[%s13315_s8 + $0x3e0] ss:$16 sps:$4 sm:$0xff]   ;;  %v11348_v18 = vld [vmem:[%s13315_s8 + $0x3e8] ss:$16 sps:$4 sm:$0xff]   ;;  %v11353_v22 = vld [vmem:[%s13315_s8 + $0x404] ss:$16 sps:$4 sm:$0xff]  }
0x1349   :  { %v13089_v44 = vpack.c.bf16 %v7380_v10, %v7372_v7  ;;  %v13091_v47 = vpack.c.bf16 %v7382_v37, %v7374_v56  ;;  %9007 = vmatpush1.bf16.msra.mxu0 %v11297_v54  ;;  %9179 = vmatpush1.bf16.msra.mxu1 %v11300_v27  ;;  %v11356_v20 = vld [vmem:[%s13315_s8 + $0x40c] ss:$16 sps:$4 sm:$0xff]   ;;  %v11351_v48 = vld [vmem:[%s13315_s8 + $0x400] ss:$16 sps:$4 sm:$0xff]   ;;  %v11354_v38 = vld [vmem:[%s13315_s8 + $0x408] ss:$16 sps:$4 sm:$0xff]  }
0x134a   :  { %9008 = vmatprep.subr.bf16.mxu0 %v11305_v28  ;;  %9180 = vmatprep.subr.bf16.mxu1 %v11308_v16  ;;  %v11359_v61 = vld [vmem:[%s13315_s8 + $0x424] ss:$16 sps:$4 sm:$0xff]   ;;  %v11362_v23 = vld [vmem:[%s13315_s8 + $0x42c] ss:$16 sps:$4 sm:$0xff]   ;;  %v11357_v6 = vld [vmem:[%s13315_s8 + $0x420] ss:$16 sps:$4 sm:$0xff]  }
0x134b   :  { %v11360_v24 = vld [vmem:[%s13315_s8 + $0x428] ss:$16 sps:$4 sm:$0xff]   ;;  %v11365_v25 = vld [vmem:[%s13315_s8 + $0x444] ss:$16 sps:$4 sm:$0xff]   ;;  %v11368_v46 = vld [vmem:[%s13315_s8 + $0x44c] ss:$16 sps:$4 sm:$0xff]  }
0x134c   :  { %v11366_v39 = vld [vmem:[%s13315_s8 + $0x448] ss:$16 sps:$4 sm:$0xff]   ;;  %v11371_v36 = vld [vmem:[%s13315_s8 + $0x464] ss:$16 sps:$4 sm:$0xff]   ;;  %v11374_v26 = vld [vmem:[%s13315_s8 + $0x46c] ss:$16 sps:$4 sm:$0xff]  }
0x134d   :  { %9009 = vmatpush1.bf16.msra.mxu0 %v11303_v49  ;;  %9181 = vmatpush1.bf16.msra.mxu1 %v11306_v50  ;;  %v11369_v54 = vld [vmem:[%s13315_s8 + $0x460] ss:$16 sps:$4 sm:$0xff]   ;;  %v11372_v27 = vld [vmem:[%s13315_s8 + $0x468] ss:$16 sps:$4 sm:$0xff]   ;;  %v11377_v28 = vld [vmem:[%s13315_s8 + $0x484] ss:$16 sps:$4 sm:$0xff]  }
0x134e   :  { %9010 = vmatprep.subr.bf16.mxu0 %v11311_v51  ;;  %9182 = vmatprep.subr.bf16.mxu1 %v11314_v55  ;;  %v11380_v30 = vld [vmem:[%s13315_s8 + $0x48c] ss:$16 sps:$4 sm:$0xff]   ;;  %v11375_v32 = vld [vmem:[%s13315_s8 + $0x480] ss:$16 sps:$4 sm:$0xff]   ;;  %v11378_v35 = vld [vmem:[%s13315_s8 + $0x488] ss:$16 sps:$4 sm:$0xff]  }
0x134f   :  { %v11383_v40 = vld [vmem:[%s13315_s8 + $0x4a4] ss:$16 sps:$4 sm:$0xff]   ;;  %v11386_v16 = vld [vmem:[%s13315_s8 + $0x4ac] ss:$16 sps:$4 sm:$0xff]   ;;  %v11381_v7 = vld [vmem:[%s13315_s8 + $0x4a0] ss:$16 sps:$4 sm:$0xff]  }
0x1350   :  { %v11384_v56 = vld [vmem:[%s13315_s8 + $0x4a8] ss:$16 sps:$4 sm:$0xff]   ;;  %v11389_v10 = vld [vmem:[%s13315_s8 + $0x4c4] ss:$16 sps:$4 sm:$0xff]   ;;  %v11392_v37 = vld [vmem:[%s13315_s8 + $0x4cc] ss:$16 sps:$4 sm:$0xff]  }
0x1351   :  { %9011 = vmatpush1.bf16.msra.mxu0 %v11309_v1  ;;  %9183 = vmatpush1.bf16.msra.mxu1 %v11312_v57  ;;  %v11390_v49 = vld [vmem:[%s13315_s8 + $0x4c8] ss:$16 sps:$4 sm:$0xff]   ;;  %v11395_v50 = vld [vmem:[%s13315_s8 + $0x4e4] ss:$16 sps:$4 sm:$0xff]   ;;  %v11398_v51 = vld [vmem:[%s13315_s8 + $0x4ec] ss:$16 sps:$4 sm:$0xff]  }
0x1352   :  { %9012 = vmatprep.subr.bf16.mxu0 %v11317_v52  ;;  %9184 = vmatprep.subr.bf16.mxu1 %v11320_v53  ;;  %v11393_v55 = vld [vmem:[%s13315_s8 + $0x4e0] ss:$16 sps:$4 sm:$0xff]   ;;  %v11396_v1 = vld [vmem:[%s13315_s8 + $0x4e8] ss:$16 sps:$4 sm:$0xff]   ;;  %v11401_v57 = vld [vmem:[%s13315_s8 + $0x504] ss:$16 sps:$4 sm:$0xff]  }
0x1353   :  { %v11404_v52 = vld [vmem:[%s13315_s8 + $0x50c] ss:$16 sps:$4 sm:$0xff]   ;;  %v11399_v53 = vld [vmem:[%s13315_s8 + $0x500] ss:$16 sps:$4 sm:$0xff]  }
0x1355   :  { %9013 = vmatpush1.bf16.msra.mxu0 %v11315_v58  ;;  %9185 = vmatpush1.bf16.msra.mxu1 %v11318_v59  ;;  %v11402_v58 = vld [vmem:[%s13315_s8 + $0x508] ss:$16 sps:$4 sm:$0xff]   ;;  %v11407_v59 = vld [vmem:[%s13315_s8 + $0x524] ss:$16 sps:$4 sm:$0xff]  }
0x1356   :  { %9014 = vmatprep.subr.bf16.mxu0 %v11323_v29  ;;  %9186 = vmatprep.subr.bf16.mxu1 %v11326_v34  ;;  %v11410_v29 = vld [vmem:[%s13315_s8 + $0x52c] ss:$16 sps:$4 sm:$0xff]   ;;  %v11405_v34 = vld [vmem:[%s13315_s8 + $0x520] ss:$16 sps:$4 sm:$0xff]  }
0x1359   :  { %9015 = vmatpush1.bf16.msra.mxu0 %v11321_v60  ;;  %9187 = vmatpush1.bf16.msra.mxu1 %v11324_v63  ;;  %v11408_v60 = vld [vmem:[%s13315_s8 + $0x528] ss:$16 sps:$4 sm:$0xff]   ;;  %v11413_v63 = vld [vmem:[%s13315_s8 + $0x544] ss:$16 sps:$4 sm:$0xff]  }
0x135a   :  { %9016 = vmatprep.subr.bf16.mxu0 %v11329_v4  ;;  %9188 = vmatprep.subr.bf16.mxu1 %v11332_v2  ;;  %v11416_v4 = vld [vmem:[%s13315_s8 + $0x54c] ss:$16 sps:$4 sm:$0xff]   ;;  %v11411_v2 = vld [vmem:[%s13315_s8 + $0x540] ss:$16 sps:$4 sm:$0xff]  }
0x135d   :  { %9017 = vmatpush1.bf16.msra.mxu0 %v11327_v14  ;;  %9189 = vmatpush1.bf16.msra.mxu1 %v11330_v5  ;;  %v11414_v14 = vld [vmem:[%s13315_s8 + $0x548] ss:$16 sps:$4 sm:$0xff]   ;;  %v11419_v5 = vld [vmem:[%s13315_s8 + $0x564] ss:$16 sps:$4 sm:$0xff]  }
0x135e   :  { %9018 = vmatprep.subr.bf16.mxu0 %v11335_v33  ;;  %9190 = vmatprep.subr.bf16.mxu1 %v11338_v42  ;;  %v11422_v33 = vld [vmem:[%s13315_s8 + $0x56c] ss:$16 sps:$4 sm:$0xff]   ;;  %v11417_v42 = vld [vmem:[%s13315_s8 + $0x560] ss:$16 sps:$4 sm:$0xff]  }
0x1361   :  { %9019 = vmatpush1.bf16.msra.mxu0 %v11333_v8  ;;  %9191 = vmatpush1.bf16.msra.mxu1 %v11336_v9  ;;  %v11420_v8 = vld [vmem:[%s13315_s8 + $0x568] ss:$16 sps:$4 sm:$0xff]   ;;  %v11425_v9 = vld [vmem:[%s13315_s8 + $0x584] ss:$16 sps:$4 sm:$0xff]  }
0x1362   :  { %9020 = vmatprep.subr.bf16.mxu0 %v11341_v41  ;;  %9192 = vmatprep.subr.bf16.mxu1 %v11344_v12  ;;  %v11428_v41 = vld [vmem:[%s13315_s8 + $0x58c] ss:$16 sps:$4 sm:$0xff]   ;;  %v11423_v12 = vld [vmem:[%s13315_s8 + $0x580] ss:$16 sps:$4 sm:$0xff]  }
0x1365   :  { %9021 = vmatpush1.bf16.msra.mxu0 %v11339_v13  ;;  %9193 = vmatpush1.bf16.msra.mxu1 %v11342_v15  ;;  %v11426_v13 = vld [vmem:[%s13315_s8 + $0x588] ss:$16 sps:$4 sm:$0xff]   ;;  %v11431_v15 = vld [vmem:[%s13315_s8 + $0x5a4] ss:$16 sps:$4 sm:$0xff]  }
0x1366   :  { %9022 = vmatprep.subr.bf16.mxu0 %v11347_v17  ;;  %9194 = vmatprep.subr.bf16.mxu1 %v11350_v21  ;;  %v11434_v17 = vld [vmem:[%s13315_s8 + $0x5ac] ss:$16 sps:$4 sm:$0xff]   ;;  %v11429_v21 = vld [vmem:[%s13315_s8 + $0x5a0] ss:$16 sps:$4 sm:$0xff]  }
0x1369   :  { %9023 = vmatpush1.bf16.msra.mxu0 %v11345_v19  ;;  %9195 = vmatpush1.bf16.msra.mxu1 %v11348_v18  ;;  %v11432_v19 = vld [vmem:[%s13315_s8 + $0x5a8] ss:$16 sps:$4 sm:$0xff]   ;;  %v11437_v18 = vld [vmem:[%s13315_s8 + $0x5c4] ss:$16 sps:$4 sm:$0xff]  }
0x136a   :  { %9035 = vmatprep.subr.bf16.mxu0 %v11353_v22  ;;  %9207 = vmatprep.subr.bf16.mxu1 %v11356_v20  ;;  %v11440_v22 = vld [vmem:[%s13315_s8 + $0x5cc] ss:$16 sps:$4 sm:$0xff]   ;;  %v11435_v20 = vld [vmem:[%s13315_s8 + $0x5c0] ss:$16 sps:$4 sm:$0xff]  }
0x136c   :  { %9025 = vmatmul.mubr.bf16.vlgmr.msra.gmra.mrb[92].mxu0 %v13043_v45  ;;  %9197 = vmatmul.mubr.bf16.vlgmr.msra.gmra.mrb[72].mxu1 %v13043_v45  ;;  %v11363_v45 = vld [vmem:[%s13315_s8 + $0x440] ss:$16 sps:$4 sm:$0xff]  }
0x136d   :  { %9036 = vmatpush1.bf16.msra.mxu0 %v11351_v48  ;;  %9067 = vmatprep.mubr.bf16.mxu0 %v13089_v44  ;;  %v11438_v48 = vld [vmem:[%s13315_s8 + $0x5c8] ss:$16 sps:$4 sm:$0xff]  }
0x136e   :  { %9208 = vmatpush1.bf16.msra.mxu1 %v11354_v38  ;;  %9239 = vmatprep.mubr.bf16.mxu1 %v13089_v44  ;;  %v11387_v44 = vld [vmem:[%s13315_s8 + $0x4c0] ss:$16 sps:$4 sm:$0xff]   ;;  %v11443_v38 = vld [vmem:[%s13315_s8 + $0x5e4] ss:$16 sps:$4 sm:$0xff]  }
0x136f   :  { %9037 = vmatprep.subr.bf16.mxu0 %v11359_v61  ;;  %9209 = vmatprep.subr.bf16.mxu1 %v11362_v23  ;;  %v11446_v61 = vld [vmem:[%s13315_s8 + $0x5ec] ss:$16 sps:$4 sm:$0xff]   ;;  %v11441_v23 = vld [vmem:[%s13315_s8 + $0x5e0] ss:$16 sps:$4 sm:$0xff]  }
0x1371   :  { %9038 = vmatpush1.bf16.msra.mxu0 %v11357_v6  ;;  %v11444_v6 = vld [vmem:[%s13315_s8 + $0x5e8] ss:$16 sps:$4 sm:$0xff]  }
0x1372   :  { %9210 = vmatpush1.bf16.msra.mxu1 %v11360_v24  ;;  %9039 = vmatprep.subr.bf16.mxu0 %v11365_v25  ;;  %v11449_v24 = vld [vmem:[%s13315_s8 + $0x604] ss:$16 sps:$4 sm:$0xff]   ;;  %v11452_v25 = vld [vmem:[%s13315_s8 + $0x60c] ss:$16 sps:$4 sm:$0xff]  }
0x1373   :  { %9211 = vmatprep.subr.bf16.mxu1 %v11368_v46  ;;  %v11447_v46 = vld [vmem:[%s13315_s8 + $0x600] ss:$16 sps:$4 sm:$0xff]  }
0x1375   :  { %9040 = vmatpush1.bf16.msra.mxu0 %v11363_v45  ;;  %v11450_v45 = vld [vmem:[%s13315_s8 + $0x608] ss:$16 sps:$4 sm:$0xff]  }
0x1376   :  { %9212 = vmatpush1.bf16.msra.mxu1 %v11366_v39  ;;  %9041 = vmatprep.subr.bf16.mxu0 %v11371_v36  ;;  %v11455_v39 = vld [vmem:[%s13315_s8 + $0x624] ss:$16 sps:$4 sm:$0xff]   ;;  %v11458_v36 = vld [vmem:[%s13315_s8 + $0x62c] ss:$16 sps:$4 sm:$0xff]  }
0x1377   :  { %9213 = vmatprep.subr.bf16.mxu1 %v11374_v26  ;;  %v11453_v26 = vld [vmem:[%s13315_s8 + $0x620] ss:$16 sps:$4 sm:$0xff]  }
0x1379   :  { %9042 = vmatpush1.bf16.msra.mxu0 %v11369_v54  ;;  %v11456_v54 = vld [vmem:[%s13315_s8 + $0x628] ss:$16 sps:$4 sm:$0xff]  }
0x137a   :  { %9214 = vmatpush1.bf16.msra.mxu1 %v11372_v27  ;;  %9043 = vmatprep.subr.bf16.mxu0 %v11377_v28  ;;  %v11461_v27 = vld [vmem:[%s13315_s8 + $0x644] ss:$16 sps:$4 sm:$0xff]   ;;  %v11464_v28 = vld [vmem:[%s13315_s8 + $0x64c] ss:$16 sps:$4 sm:$0xff]  }
0x137b   :  { %9215 = vmatprep.subr.bf16.mxu1 %v11380_v30  ;;  %v11462_v30 = vld [vmem:[%s13315_s8 + $0x648] ss:$16 sps:$4 sm:$0xff]  }
0x137d   :  { %9044 = vmatpush1.bf16.msra.mxu0 %v11375_v32  ;;  %v11467_v32 = vld [vmem:[%s13315_s8 + $0x664] ss:$16 sps:$4 sm:$0xff]  }
0x137e   :  { %9216 = vmatpush1.bf16.msra.mxu1 %v11378_v35  ;;  %9045 = vmatprep.subr.bf16.mxu0 %v11383_v40  ;;  %v11470_v35 = vld [vmem:[%s13315_s8 + $0x66c] ss:$16 sps:$4 sm:$0xff]   ;;  %v11468_v40 = vld [vmem:[%s13315_s8 + $0x668] ss:$16 sps:$4 sm:$0xff]  }
0x137f   :  { %9217 = vmatprep.subr.bf16.mxu1 %v11386_v16  ;;  %v11473_v16 = vld [vmem:[%s13315_s8 + $0x684] ss:$16 sps:$4 sm:$0xff]  }
0x1381   :  { %9046 = vmatpush1.bf16.msra.mxu0 %v11381_v7  ;;  %v11476_v7 = vld [vmem:[%s13315_s8 + $0x68c] ss:$16 sps:$4 sm:$0xff]  }
0x1382   :  { %9218 = vmatpush1.bf16.msra.mxu1 %v11384_v56  ;;  %9047 = vmatprep.subr.bf16.mxu0 %v11389_v10  ;;  %v11471_v56 = vld [vmem:[%s13315_s8 + $0x680] ss:$16 sps:$4 sm:$0xff]   ;;  %v11474_v10 = vld [vmem:[%s13315_s8 + $0x688] ss:$16 sps:$4 sm:$0xff]  }
0x1383   :  { %9219 = vmatprep.subr.bf16.mxu1 %v11392_v37  ;;  %v11479_v37 = vld [vmem:[%s13315_s8 + $0x6a4] ss:$16 sps:$4 sm:$0xff]  }
0x1385   :  { %9048 = vmatpush1.bf16.msra.mxu0 %v11387_v44  ;;  %v11482_v44 = vld [vmem:[%s13315_s8 + $0x6ac] ss:$16 sps:$4 sm:$0xff]  }
0x1386   :  { %9220 = vmatpush1.bf16.msra.mxu1 %v11390_v49  ;;  %9049 = vmatprep.subr.bf16.mxu0 %v11395_v50  ;;  %v11477_v49 = vld [vmem:[%s13315_s8 + $0x6a0] ss:$16 sps:$4 sm:$0xff]   ;;  %v11480_v50 = vld [vmem:[%s13315_s8 + $0x6a8] ss:$16 sps:$4 sm:$0xff]  }
0x1387   :  { %9221 = vmatprep.subr.bf16.mxu1 %v11398_v51  ;;  %v11485_v51 = vld [vmem:[%s13315_s8 + $0x6c4] ss:$16 sps:$4 sm:$0xff]  }
0x1389   :  { %9050 = vmatpush1.bf16.msra.mxu0 %v11393_v55  ;;  %v11488_v55 = vld [vmem:[%s13315_s8 + $0x6cc] ss:$16 sps:$4 sm:$0xff]  }
0x138a   :  { %9222 = vmatpush1.bf16.msra.mxu1 %v11396_v1  ;;  %9051 = vmatprep.subr.bf16.mxu0 %v11401_v57  ;;  %v11483_v1 = vld [vmem:[%s13315_s8 + $0x6c0] ss:$16 sps:$4 sm:$0xff]   ;;  %v11486_v57 = vld [vmem:[%s13315_s8 + $0x6c8] ss:$16 sps:$4 sm:$0xff]  }
0x138b   :  { %9223 = vmatprep.subr.bf16.mxu1 %v11404_v52  ;;  %v11491_v52 = vld [vmem:[%s13315_s8 + $0x6e4] ss:$16 sps:$4 sm:$0xff]  }
0x138d   :  { %9052 = vmatpush1.bf16.msra.mxu0 %v11399_v53  ;;  %v11494_v53 = vld [vmem:[%s13315_s8 + $0x6ec] ss:$16 sps:$4 sm:$0xff]  }
0x138e   :  { %9224 = vmatpush1.bf16.msra.mxu1 %v11402_v58  ;;  %9053 = vmatprep.subr.bf16.mxu0 %v11407_v59  ;;  %v11489_v58 = vld [vmem:[%s13315_s8 + $0x6e0] ss:$16 sps:$4 sm:$0xff]   ;;  %v11492_v59 = vld [vmem:[%s13315_s8 + $0x6e8] ss:$16 sps:$4 sm:$0xff]  }
0x138f   :  { %9225 = vmatprep.subr.bf16.mxu1 %v11410_v29  ;;  %v11497_v29 = vld [vmem:[%s13315_s8 + $0x704] ss:$16 sps:$4 sm:$0xff]  }
0x1391   :  { %9054 = vmatpush1.bf16.msra.mxu0 %v11405_v34  ;;  %v11500_v34 = vld [vmem:[%s13315_s8 + $0x70c] ss:$16 sps:$4 sm:$0xff]  }
0x1392   :  { %9226 = vmatpush1.bf16.msra.mxu1 %v11408_v60  ;;  %9055 = vmatprep.subr.bf16.mxu0 %v11413_v63  ;;  %v11495_v60 = vld [vmem:[%s13315_s8 + $0x700] ss:$16 sps:$4 sm:$0xff]   ;;  %v11498_v63 = vld [vmem:[%s13315_s8 + $0x708] ss:$16 sps:$4 sm:$0xff]  }
0x1393   :  { %9227 = vmatprep.subr.bf16.mxu1 %v11416_v4  ;;  %v11503_v4 = vld [vmem:[%s13315_s8 + $0x724] ss:$16 sps:$4 sm:$0xff]  }
0x1395   :  { %9056 = vmatpush1.bf16.msra.mxu0 %v11411_v2  ;;  %v11506_v2 = vld [vmem:[%s13315_s8 + $0x72c] ss:$16 sps:$4 sm:$0xff]  }
0x1396   :  { %9228 = vmatpush1.bf16.msra.mxu1 %v11414_v14  ;;  %9057 = vmatprep.subr.bf16.mxu0 %v11419_v5  ;;  %v11501_v14 = vld [vmem:[%s13315_s8 + $0x720] ss:$16 sps:$4 sm:$0xff]   ;;  %v11504_v5 = vld [vmem:[%s13315_s8 + $0x728] ss:$16 sps:$4 sm:$0xff]  }
0x1397   :  { %9229 = vmatprep.subr.bf16.mxu1 %v11422_v33  ;;  %v11509_v33 = vld [vmem:[%s13315_s8 + $0x744] ss:$16 sps:$4 sm:$0xff]  }
0x1399   :  { %9058 = vmatpush1.bf16.msra.mxu0 %v11417_v42  ;;  %v11512_v42 = vld [vmem:[%s13315_s8 + $0x74c] ss:$16 sps:$4 sm:$0xff]  }
0x139a   :  { %9230 = vmatpush1.bf16.msra.mxu1 %v11420_v8  ;;  %9059 = vmatprep.subr.bf16.mxu0 %v11425_v9  ;;  %v11507_v8 = vld [vmem:[%s13315_s8 + $0x740] ss:$16 sps:$4 sm:$0xff]   ;;  %v11510_v9 = vld [vmem:[%s13315_s8 + $0x748] ss:$16 sps:$4 sm:$0xff]  }
0x139b   :  { %9231 = vmatprep.subr.bf16.mxu1 %v11428_v41  ;;  %v11515_v41 = vld [vmem:[%s13315_s8 + $0x764] ss:$16 sps:$4 sm:$0xff]  }
0x139d   :  { %9060 = vmatpush1.bf16.msra.mxu0 %v11423_v12  ;;  %v11518_v12 = vld [vmem:[%s13315_s8 + $0x76c] ss:$16 sps:$4 sm:$0xff]  }
0x139e   :  { %9232 = vmatpush1.bf16.msra.mxu1 %v11426_v13  ;;  %9061 = vmatprep.subr.bf16.mxu0 %v11431_v15  ;;  %v11513_v13 = vld [vmem:[%s13315_s8 + $0x760] ss:$16 sps:$4 sm:$0xff]   ;;  %v11516_v15 = vld [vmem:[%s13315_s8 + $0x768] ss:$16 sps:$4 sm:$0xff]  }
0x139f   :  { %9233 = vmatprep.subr.bf16.mxu1 %v11434_v17  ;;  %v11521_v17 = vld [vmem:[%s13315_s8 + $0x784] ss:$16 sps:$4 sm:$0xff]  }
0x13a1   :  { %9062 = vmatpush1.bf16.msra.mxu0 %v11429_v21  ;;  %v11524_v21 = vld [vmem:[%s13315_s8 + $0x78c] ss:$16 sps:$4 sm:$0xff]  }
0x13a2   :  { %9234 = vmatpush1.bf16.msra.mxu1 %v11432_v19  ;;  %9063 = vmatprep.subr.bf16.mxu0 %v11437_v18  ;;  %v11519_v19 = vld [vmem:[%s13315_s8 + $0x780] ss:$16 sps:$4 sm:$0xff]   ;;  %v11522_v18 = vld [vmem:[%s13315_s8 + $0x788] ss:$16 sps:$4 sm:$0xff]  }
0x13a3   :  { %9235 = vmatprep.subr.bf16.mxu1 %v11440_v22  ;;  %v11527_v22 = vld [vmem:[%s13315_s8 + $0x7a4] ss:$16 sps:$4 sm:$0xff]  }
0x13a5   :  { %9064 = vmatpush1.bf16.msra.mxu0 %v11435_v20  ;;  %v11530_v20 = vld [vmem:[%s13315_s8 + $0x7ac] ss:$16 sps:$4 sm:$0xff]  }
0x13a6   :  { %9236 = vmatpush1.bf16.msra.mxu1 %v11438_v48  ;;  %9065 = vmatprep.subr.bf16.mxu0 %v11443_v38  ;;  %v11525_v48 = vld [vmem:[%s13315_s8 + $0x7a0] ss:$16 sps:$4 sm:$0xff]   ;;  %v11528_v38 = vld [vmem:[%s13315_s8 + $0x7a8] ss:$16 sps:$4 sm:$0xff]  }
0x13a7   :  { %9237 = vmatprep.subr.bf16.mxu1 %v11446_v61  ;;  %v11533_v61 = vld [vmem:[%s13315_s8 + $0x7c4] ss:$16 sps:$4 sm:$0xff]  }
0x13a9   :  { %9066 = vmatpush1.bf16.msra.mxu0 %v11441_v23  ;;  %v11536_v23 = vld [vmem:[%s13315_s8 + $0x7cc] ss:$16 sps:$4 sm:$0xff]  }
0x13aa   :  { %9238 = vmatpush1.bf16.msra.mxu1 %v11444_v6  ;;  %9078 = vmatprep.subr.bf16.mxu0 %v11449_v24  ;;  %v11531_v6 = vld [vmem:[%s13315_s8 + $0x7c0] ss:$16 sps:$4 sm:$0xff]   ;;  %v11534_v24 = vld [vmem:[%s13315_s8 + $0x7c8] ss:$16 sps:$4 sm:$0xff]  }
0x13ab   :  { %9250 = vmatprep.subr.bf16.mxu1 %v11452_v25  ;;  %v11539_v25 = vld [vmem:[%s13315_s8 + $0x7e4] ss:$16 sps:$4 sm:$0xff]  }
0x13ac   :  { %9068 = vmatmul.mubr.bf16.vlgmr.msra.gmra.mrb[92].mxu0 %v13085_v11 }
0x13ad   :  { %9240 = vmatmul.mubr.bf16.vlgmr.msra.gmra.mrb[72].mxu1 %v13085_v11  ;;  %9079 = vmatpush1.bf16.msra.mxu0 %v11447_v46  ;;  %v11459_v11 = vld [vmem:[%s13315_s8 + $0x640] ss:$16 sps:$4 sm:$0xff]   ;;  %v11542_v46 = vld [vmem:[%s13315_s8 + $0x7ec] ss:$16 sps:$4 sm:$0xff]  }
0x13ae   :  { %9110 = vmatprep.mubr.bf16.mxu0 %v13091_v47  ;;  %9251 = vmatpush1.bf16.msra.mxu1 %v11450_v45  ;;  %v11537_v45 = vld [vmem:[%s13315_s8 + $0x7e0] ss:$16 sps:$4 sm:$0xff]  }
0x13af   :  { %9282 = vmatprep.mubr.bf16.mxu1 %v13091_v47  ;;  %9080 = vmatprep.subr.bf16.mxu0 %v11455_v39  ;;  %v11465_v47 = vld [vmem:[%s13315_s8 + $0x660] ss:$16 sps:$4 sm:$0xff]   ;;  %v11540_v39 = vld [vmem:[%s13315_s8 + $0x7e8] ss:$16 sps:$4 sm:$0xff]  }
0x13b0   :  { %9252 = vmatprep.subr.bf16.mxu1 %v11458_v36  ;;  %v7647_v36 = vld [vmem:[#allocation29] sm:$0xf] }
0x13b1   :  { %9081 = vmatpush1.bf16.msra.mxu0 %v11453_v26  ;;  %v7652_v26 = vrot.slane %v7647_v36, %v12433_v62 }
0x13b2   :  { %9253 = vmatpush1.bf16.msra.mxu1 %v11456_v54  ;;  %9082 = vmatprep.subr.bf16.mxu0 %v11461_v27  ;;  %v9301_v54 = vld [vmem:[#allocation31] sm:$0xf]  ;;  %v7660_v27 = vrot.slane %v7647_v36, %v12546_v31 }
0x13b3   :  { %9254 = vmatprep.subr.bf16.mxu1 %v11464_v28  ;;  %v7656_v28 = vrot.slane %v7647_v36, %v12436_v0 }
0x13b5   :  { %9083 = vmatpush1.bf16.msra.mxu0 %v11459_v11  ;;  %v7664_v11 = vrot.slane %v7647_v36, %v12786_v3 }
0x13b6   :  { %9255 = vmatpush1.bf16.msra.mxu1 %v11462_v30  ;;  %9084 = vmatprep.subr.bf16.mxu0 %v11467_v32 }
0x13b7   :  { %9256 = vmatprep.subr.bf16.mxu1 %v11470_v35  ;;  %v9307_v35 = vrot.slane %v9301_v54, %v12433_v62 }
0x13b9   :  { %9085 = vmatpush1.bf16.msra.mxu0 %v11465_v47 }
0x13ba   :  { %9257 = vmatpush1.bf16.msra.mxu1 %v11468_v40  ;;  %9086 = vmatprep.subr.bf16.mxu0 %v11473_v16 }
0x13bb   :  { %9258 = vmatprep.subr.bf16.mxu1 %v11476_v7 }
0x13bd   :  { %9087 = vmatpush1.bf16.msra.mxu0 %v11471_v56 }
0x13be   :  { %9259 = vmatpush1.bf16.msra.mxu1 %v11474_v10  ;;  %9088 = vmatprep.subr.bf16.mxu0 %v11479_v37 }
0x13bf   :  { %9260 = vmatprep.subr.bf16.mxu1 %v11482_v44  ;;  %v9315_v44 = vrot.slane %v9301_v54, %v12546_v31 }
0x13c1   :  { %9089 = vmatpush1.bf16.msra.mxu0 %v11477_v49 }
0x13c2   :  { %9261 = vmatpush1.bf16.msra.mxu1 %v11480_v50  ;;  %9090 = vmatprep.subr.bf16.mxu0 %v11485_v51 }
0x13c3   :  { %9262 = vmatprep.subr.bf16.mxu1 %v11488_v55 }
0x13c5   :  { %9091 = vmatpush1.bf16.msra.mxu0 %v11483_v1 }
0x13c6   :  { %9263 = vmatpush1.bf16.msra.mxu1 %v11486_v57  ;;  %9092 = vmatprep.subr.bf16.mxu0 %v11491_v52 }
0x13c7   :  { %9264 = vmatprep.subr.bf16.mxu1 %v11494_v53 }
0x13c9   :  { %9093 = vmatpush1.bf16.msra.mxu0 %v11489_v58 }
0x13ca   :  { %9265 = vmatpush1.bf16.msra.mxu1 %v11492_v59  ;;  %9094 = vmatprep.subr.bf16.mxu0 %v11497_v29  ;;  %v9319_v59 = vrot.slane %v9301_v54, %v12786_v3 }
0x13cb   :  { %9266 = vmatprep.subr.bf16.mxu1 %v11500_v34 }
0x13cd   :  { %9095 = vmatpush1.bf16.msra.mxu0 %v11495_v60 }
0x13ce   :  { %9267 = vmatpush1.bf16.msra.mxu1 %v11498_v63  ;;  %9096 = vmatprep.subr.bf16.mxu0 %v11503_v4 }
0x13cf   :  { %9268 = vmatprep.subr.bf16.mxu1 %v11506_v2 }
0x13d1   :  { %9097 = vmatpush1.bf16.msra.mxu0 %v11501_v14 }
0x13d2   :  { %9269 = vmatpush1.bf16.msra.mxu1 %v11504_v5  ;;  %9098 = vmatprep.subr.bf16.mxu0 %v11509_v33 }
0x13d3   :  { %9270 = vmatprep.subr.bf16.mxu1 %v11512_v42 }
0x13d5   :  { %9099 = vmatpush1.bf16.msra.mxu0 %v11507_v8 }
0x13d6   :  { %9271 = vmatpush1.bf16.msra.mxu1 %v11510_v9  ;;  %9100 = vmatprep.subr.bf16.mxu0 %v11515_v41 }
0x13d7   :  { %9272 = vmatprep.subr.bf16.mxu1 %v11518_v12 }
0x13d9   :  { %9101 = vmatpush1.bf16.msra.mxu0 %v11513_v13 }
0x13da   :  { %9273 = vmatpush1.bf16.msra.mxu1 %v11516_v15  ;;  %9102 = vmatprep.subr.bf16.mxu0 %v11521_v17  ;;  %v10366_v17 = vld [vmem:[#allocation2] ss:$0 sm:$0xff] }
0x13db   :  { %9274 = vmatprep.subr.bf16.mxu1 %v11524_v21 }
0x13dd   :  { %9103 = vmatpush1.bf16.msra.mxu0 %v11519_v19 }
0x13de   :  { %9275 = vmatpush1.bf16.msra.mxu1 %v11522_v18  ;;  %9104 = vmatprep.subr.bf16.mxu0 %v11527_v22 }
0x13df   :  { %9276 = vmatprep.subr.bf16.mxu1 %v11530_v20 }
0x13e1   :  { %9105 = vmatpush1.bf16.msra.mxu0 %v11525_v48 }
0x13e2   :  { %9277 = vmatpush1.bf16.msra.mxu1 %v11528_v38  ;;  %9106 = vmatprep.subr.bf16.mxu0 %v11533_v61 }
0x13e3   :  { %9278 = vmatprep.subr.bf16.mxu1 %v11536_v23 }
0x13e5   :  { %9107 = vmatpush1.bf16.msra.mxu0 %v11531_v6 }
0x13e6   :  { %9279 = vmatpush1.bf16.msra.mxu1 %v11534_v24  ;;  %9108 = vmatprep.subr.bf16.mxu0 %v11539_v25 }
0x13e7   :  { %9280 = vmatprep.subr.bf16.mxu1 %v11542_v46 }
0x13e9   :  { %9109 = vmatpush1.bf16.msra.mxu0 %v11537_v45 }
0x13ea   :  { %9281 = vmatpush1.bf16.msra.mxu1 %v11540_v39 }
0x13ec   :  { %9111 = vmatmul.mubr.bf16.vlgmr.msra.gmra.mrb[92].mxu0 %v13087_v43 }
0x13ed   :  { %9283 = vmatmul.mubr.bf16.vlgmr.msra.gmra.mrb[72].mxu1 %v13087_v43  ;;  %v9311_v43 = vrot.slane %v9301_v54, %v12436_v0 }
0x14bf   :  { %v9112_v30 = vpop.f32.mrb[92].mxu0 }
0x14c0   :  { %v10766_v32 = vadd.f32 %v9112_v30, %v7652_v26  ;;  %v9284_v47 = vpop.f32.mrb[72].mxu1  ;;  %v9114_v40 = vpop.f32.mrb[93].mxu0 }
0x14c1   :  { %v10770_v16 = vadd.f32 %v9284_v47, %v7660_v27  ;;  %v10767_v7 = vadd.f32 %v9114_v40, %v7656_v28  ;;  %v9286_v56 = vpop.f32.mrb[73].mxu1  ;;  %v9116_v10 = vpop.f32.mrb[94].mxu0 }
0x14c2   :  { %v9293_v37 = vmax.f32 %v10766_v32, 0.0  ;;  %v10771_v49 = vadd.f32 %v9286_v56, %v7664_v11  ;;  %v10768_v50 = vadd.f32 %v9116_v10, %v7652_v26  ;;  %v9288_v51 = vpop.f32.mrb[74].mxu1  ;;  %v9118_v55 = vpop.f32.mrb[95].mxu0 }
0x14c3   :  { %v9295_v1 = vmax.f32 %v10770_v16, 0.0  ;;  %v9294_v57 = vmax.f32 %v10767_v7, 0.0  ;;  %v10772_v52 = vadd.f32 %v9288_v51, %v7660_v27  ;;  %v10769_v53 = vadd.f32 %v9118_v55, %v7656_v28  ;;  %v9290_v62 = vpop.f32.mrb[75].mxu1 }
0x14c4   :  { %v9324_v58 = vmul.f32 %v9307_v35, %v9293_v37  ;;  %v9297_v29 = vmax.f32 %v10768_v50, 0.0  ;;  %v10773_v34 = vadd.f32 %v9290_v62, %v7664_v11  ;;  %v9296_v60 = vmax.f32 %v10771_v49, 0.0 }
0x14c5   :  { %v9325_v0 = vmul.f32 %v9311_v43, %v9294_v57  ;;  %v9299_v63 = vmax.f32 %v10772_v52, 0.0  ;;  %v9298_v4 = vmax.f32 %v10769_v53, 0.0  ;;  %v9326_v31 = vmul.f32 %v9315_v44, %v9295_v1 }
0x14c6   :  { %v9328_v2 = vmul.f32 %v9307_v35, %v9297_v29  ;;  %v9300_v33 = vmax.f32 %v10773_v34, 0.0  ;;  %v9327_v42 = vmul.f32 %v9319_v59, %v9296_v60 }
0x14c7   :  { %v9332_v14 = vadd.f32 %v9325_v0, %v9324_v58  ;;  %v9329_v5 = vmul.f32 %v9311_v43, %v9298_v4  ;;  %v9330_v8 = vmul.f32 %v9315_v44, %v9299_v63 }
0x14c8   :  { %v9331_v12 = vmul.f32 %v9319_v59, %v9300_v33 }
0x14c9   :  { %v9337_v9 = vadd.f32 %v9329_v5, %v9328_v2  ;;  %v9333_v41 = vadd.f32 %v9332_v14, %v9326_v31 }
0x14cb   :  { %v9334_v13 = vadd.f32 %v9333_v41, %v9327_v42  ;;  %v9338_v3 = vadd.f32 %v9337_v9, %v9330_v8 }
0x14cd   :  { %9335 = vadd.xlane.f32.xlu0 %v9334_v13  ;;  %v9339_v15 = vadd.f32 %v9338_v3, %v9331_v12 }
0x14cf   :  { %9340 = vadd.xlane.f32.xlu1 %v9339_v15 }
0x155a   :  { %v9336_v21 = vpop.xlane.xlu0 %9335 }
0x155b   :  { %v9348_v19 = vadd.f32 %v10366_v17, %v9336_v21 }
0x155c   :  { %v9341_v18 = vpop.xlane.xlu1 %9340 }
0x155d   :  { %9351 = vst.msk [vmem:[%s12244_s5] sm:$0xff] %vm9350_vm14, %v9348_v19  ;;  %v9349_v22 = vadd.f32 %v10366_v17, %v9341_v18 }
0x155f   :  { %9352 = vst.msk [vmem:[%s12244_s5 + $0x8] sm:$0xff] %vm9350_vm14, %v9349_v22 }
0x1560   :  { %9357 = vsyncpa [#allocation4], 1 }
0x1561   :  { %9358 = vsyncpa [#allocation6], 1 }
0x1562   :  { %9359 = vsyncpa [#allocation9], 1 }
0x1563   :  { %9360 = vsyncpa [#allocation12], 1 }
0x1564   :  { %9361 = vsyncpa [#allocation15], 1 }
0x1565   :  { %9362 = vsyncpa [#allocation18], 1 }
0x1566   :  { %9363 = vsyncpa [#allocation21], 1 }
0x1567   :  { %9364 = vsyncpa [#allocation24], 1 }
0x1568   :  { %9365 = vsyncpa [#allocation27], 1 }
0x1569   :  { %9366 = vsyncpa [#allocation30], 1 }

</bundles_post_ra>
